<compile_context>
chip_gen: v6e
topology: v6e:2x2x1
jax: 0.10.0
libtpu: 0.0.40
codegen_flags: <defaults>
</compile_context>

<pallas_src>
import jax
import jax.numpy as jnp
import numpy as np
from jax import lax
from jax.experimental import pallas as pl
from jax.experimental.pallas import tpu as pltpu

VOCAB = 2000          # nn.Embedding(2000, D) / nn.Linear(D, 2000)
VOCAB_PAD = 2048      # lane-dense padded vocab (multiple of 128)
EMB_DIM = 256         # embeddingDim (module default)
MAX_SEQ = 128         # max_seq_len (module default)
NUM_LAYERS = 3
BATCH = 2
SEQ = 8
V_CHUNK = 512         # vocab chunk for the windup matmul / store


# ---------------------------------------------------------------------------
# Fused kernel: [blocks x L] + windup Linear
# ---------------------------------------------------------------------------
def fused_model_kernel(x_ref, pos_ref, wblk_ref, bblk_ref, wout_ref, bout_ref,
                       o_ref):
    bc, S, D = x_ref.shape
    L = wblk_ref.shape[0]
    Vp = o_ref.shape[-1]

    for b in range(bc):                         # static unroll (tiny batch)
        xb = x_ref[b]                           # (S, D) f32
        for l in range(L):                      # static unroll over layers
            yb = xb + pos_ref[l]                # (S, D)
            ss = jnp.sum(yb * yb, axis=-1, keepdims=True)          # (S, 1)
            yb = yb * (1.0 / (jnp.sqrt(ss) + 1e-6))                # L2 norm + eps
            # (y @ y^T) @ y reassociated as y @ (y^T @ y): lane-dense (D, D)
            # intermediate, K=D second contraction (MXU-friendly).
            g = lax.dot_general(yb, yb, (((0,), (0,)), ((), ())),
                                preferred_element_type=jnp.float32)  # (D, D)
            yb = jnp.dot(yb, g, preferred_element_type=jnp.float32)  # (S, D)
            zb = jnp.dot(yb, wblk_ref[l],
                         preferred_element_type=jnp.float32) + bblk_ref[l]
            xb = jnp.maximum(zb, 0.0)           # ReLU
        # Windup Linear(D, VOCAB_PAD), chunked over the padded vocab so only a
        # (S, V_CHUNK) slab of logits is live at a time (caps vreg pressure,
        # interleaves MXU result pops with stores).
        for v0 in range(0, Vp, V_CHUNK):
            logits = jnp.dot(xb, wout_ref[:, v0:v0 + V_CHUNK],
                             preferred_element_type=jnp.float32)
            logits = logits + bout_ref[:, v0:v0 + V_CHUNK]
            o_ref[b, :, v0:v0 + V_CHUNK] = logits


def fused_forward(x, pos_stack, w_stack, b_stack, w_out_pad, b_out_pad,
                  *, batch_grid_steps=1):
    B, S, D = x.shape
    L = pos_stack.shape[0]
    Vp = w_out_pad.shape[1]
    steps = batch_grid_steps
    assert B % steps == 0
    bc = B // steps

    return pl.pallas_call(
        fused_model_kernel,
        out_shape=jax.ShapeDtypeStruct((B, S, Vp), jnp.float32),
        grid_spec=pltpu.PrefetchScalarGridSpec(
            num_scalar_prefetch=0,
            grid=(steps,),
            in_specs=[
                pl.BlockSpec((bc, S, D), lambda bi: (bi, 0, 0)),   # activations
                pl.BlockSpec((L, S, D), lambda bi: (0, 0, 0)),     # pos emb (first S rows)
                pl.BlockSpec((L, D, D), lambda bi: (0, 0, 0)),     # block weights
                pl.BlockSpec((L, 1, D), lambda bi: (0, 0, 0)),     # block biases
                pl.BlockSpec((D, Vp), lambda bi: (0, 0)),          # windup weight (resident)
                pl.BlockSpec((1, Vp), lambda bi: (0, 0)),          # windup bias (padded)
            ],
            out_specs=pl.BlockSpec((bc, S, Vp), lambda bi: (bi, 0, 0)),
        ),
        compiler_params=pltpu.CompilerParams(
            dimension_semantics=("arbitrary",) if steps == 1 else ("parallel",)),
    )(x, pos_stack, w_stack, b_stack, w_out_pad, b_out_pad)


# ---------------------------------------------------------------------------
# Full model
# ---------------------------------------------------------------------------
def model_forward(tokens, params, badtrans_now_depth=None):
    """Forward pass.  Returns padded (B, S, VOCAB_PAD) logits; columns
    [VOCAB:] are exactly zero (zero-padded weight/bias), slicing is left to
    the consumer to avoid an extra HBM copy per call."""
    pos, w, b = params["pos_stack"], params["w_stack"], params["b_stack"]
    if badtrans_now_depth is not None and badtrans_now_depth != pos.shape[0]:
        pos = pos[:badtrans_now_depth]
        w = w[:badtrans_now_depth]
        b = b[:badtrans_now_depth]
    # pre_embedding lookup (gather) — plain JAX glue outside the kernel.
    x = jnp.take(params["emb"], tokens, axis=0)                  # (B, S, D)
    return fused_forward(x, pos, w, b, params["w_out_pad"], params["b_out_pad"])


def reference_forward(tokens, params, badtrans_now_depth=NUM_LAYERS):
    """Pure-JAX reference mirroring the PyTorch semantics exactly
    (original (y@y^T)@y association, unpadded windup), highest precision."""
    hp = lax.Precision.HIGHEST
    x = jnp.take(params["emb"], tokens, axis=0)
    S = tokens.shape[1]
    for i in range(badtrans_now_depth):
        y = x + params["pos_stack"][i, :S][None]
        y = y / (jnp.linalg.norm(y, axis=-1, keepdims=True) + 1e-6)
        cmp = jnp.einsum("bij,bkj->bik", y, y, precision=hp)
        y = jnp.einsum("bik,bkd->bid", cmp, y, precision=hp)
        z = jnp.einsum("bid,de->bie", y, params["w_stack"][i], precision=hp)
        x = jnp.maximum(z + params["b_stack"][i][None], 0.0)
    w_out = params["w_out_pad"][:, :VOCAB]
    b_out = params["b_out_pad"][:, :VOCAB]
    return jnp.einsum("bid,dv->biv", x, w_out, precision=hp) + b_out[None]


def init_params(key):
    """Builds kernel-ready parameters ONCE: per-layer tensors pre-stacked and
    the windup weight/bias pre-padded to VOCAB_PAD lanes (no per-call
    jnp.stack / jnp.pad inside the jitted forward)."""
    ks = jax.random.split(key, NUM_LAYERS + 2)
    emb = jax.random.normal(ks[0], (VOCAB, EMB_DIM), jnp.float32) * 0.02
    pos_l, w_l, b_l = [], [], []
    for i in range(NUM_LAYERS):
        k1, k2, k3 = jax.random.split(ks[1 + i], 3)
        # torch inits positionEmbedding to zeros; small random values are used
        # here so the pos-add path is actually exercised by the test.
        pos_l.append(jax.random.normal(k1, (MAX_SEQ, EMB_DIM), jnp.float32) * 0.02)
        w_l.append(jax.random.normal(k2, (EMB_DIM, EMB_DIM), jnp.float32)
                   / np.sqrt(EMB_DIM))
        b_l.append(jax.random.normal(k3, (1, EMB_DIM), jnp.float32) * 0.01)
    kw, kb = jax.random.split(ks[-1])
    w_out = jax.random.normal(kw, (EMB_DIM, VOCAB), jnp.float32) / np.sqrt(EMB_DIM)
    b_out = jax.random.normal(kb, (1, VOCAB), jnp.float32) * 0.01
    return dict(
        emb=emb,
        pos_stack=jnp.stack(pos_l, axis=0),                            # (L, MAX_SEQ, D)
        w_stack=jnp.stack(w_l, axis=0),                                # (L, D, D)
        b_stack=jnp.stack(b_l, axis=0),                                # (L, 1, D)
        w_out_pad=jnp.pad(w_out, ((0, 0), (0, VOCAB_PAD - VOCAB))),    # (D, VP)
        b_out_pad=jnp.pad(b_out, ((0, 0), (0, VOCAB_PAD - VOCAB))),    # (1, VP)
    )


if __name__ == "__main__":
    key = jax.random.PRNGKey(0)
    kp, kt = jax.random.split(key)
    params = init_params(kp)
    tokens = jax.random.randint(kt, (BATCH, SEQ), 0, VOCAB, dtype=jnp.int32)

    fwd = jax.jit(model_forward, static_argnames=("badtrans_now_depth",))
    out = jax.block_until_ready(fwd(tokens, params))
    assert out.shape == (BATCH, SEQ, VOCAB_PAD) and out.dtype == jnp.float32

    ref = jax.block_until_ready(reference_forward(tokens, params))
    out_np = np.asarray(out)
    ref_np = np.asarray(ref)

    # Padded vocab columns must be exactly zero (zero weight / zero bias).
    np.testing.assert_array_equal(out_np[:, :, VOCAB:], 0.0)
    # Tolerance accounts for TPU default f32 matmul contraction precision and
    # the mathematically-exact y@(y^T@y) reassociation vs. the torch-order
    # reference; genuine semantic bugs produce O(1)-relative differences.
    np.testing.assert_allclose(out_np[:, :, :VOCAB], ref_np, rtol=3e-2, atol=3e-3)
    print("KERNEL_OK")
</pallas_src>

<mosaic_0001>
module attributes {stable_mosaic.version = 11 : i64} {
  func.func @fused_model_kernel(%arg0: i32, %arg1: memref<2x8x256xf32, #tpu.memory_space<vmem>>, %arg2: memref<3x8x256xf32, #tpu.memory_space<vmem>>, %arg3: memref<3x256x256xf32, #tpu.memory_space<vmem>>, %arg4: memref<3x1x256xf32, #tpu.memory_space<vmem>>, %arg5: memref<256x2048xf32, #tpu.memory_space<vmem>>, %arg6: memref<1x2048xf32, #tpu.memory_space<vmem>>, %arg7: memref<2x8x2048xf32, #tpu.memory_space<vmem>>) attributes {dimension_semantics = [#tpu.dimension_semantics<arbitrary>], iteration_bounds = array<i64: 1>, scalar_prefetch = 0 : i64, scratch_operands = 0 : i64, tpu.core_type = #tpu.core_type<tc>, window_params = [{transform_indices = @transform_0, window_bounds = array<i64: 2, 8, 256>}, {transform_indices = @transform_1, window_bounds = array<i64: 3, 8, 256>}, {pipeline_mode = #tpu.pipeline_mode<synchronous>, transform_indices = @transform_2, window_bounds = array<i64: 3, 256, 256>}, {pipeline_mode = #tpu.pipeline_mode<synchronous>, transform_indices = @transform_3, window_bounds = array<i64: 3, 1, 256>}, {pipeline_mode = #tpu.pipeline_mode<synchronous>, transform_indices = @transform_4, window_bounds = array<i64: 256, 2048>}, {pipeline_mode = #tpu.pipeline_mode<synchronous>, transform_indices = @transform_5, window_bounds = array<i64: 1, 2048>}, {transform_indices = @transform_6, window_bounds = array<i64: 2, 8, 2048>}]} {
    %c0 = arith.constant 0 : index
    %c0_0 = arith.constant 0 : index
    %c0_1 = arith.constant 0 : index
    %0 = vector.load %arg1[%c0, %c0_0, %c0_1] : memref<2x8x256xf32, #tpu.memory_space<vmem>>, vector<1x8x256xf32>
    %1 = vector.shape_cast %0 : vector<1x8x256xf32> to vector<8x256xf32>
    %c0_2 = arith.constant 0 : index
    %c0_3 = arith.constant 0 : index
    %c0_4 = arith.constant 0 : index
    %2 = vector.load %arg2[%c0_2, %c0_3, %c0_4] : memref<3x8x256xf32, #tpu.memory_space<vmem>>, vector<1x8x256xf32>
    %3 = vector.shape_cast %2 : vector<1x8x256xf32> to vector<8x256xf32>
    %4 = arith.addf %1, %3 : vector<8x256xf32>
    %5 = arith.mulf %4, %4 : vector<8x256xf32>
    %cst = arith.constant dense<0.000000e+00> : vector<8xf32>
    %6 = vector.multi_reduction <add>, %5, %cst [1] : vector<8x256xf32> to vector<8xf32>
    %7 = vector.shape_cast %6 : vector<8xf32> to vector<8x1xf32>
    %8 = math.sqrt %7 : vector<8x1xf32>
    %cst_5 = arith.constant 9.99999997E-7 : f32
    %9 = vector.broadcast %cst_5 : f32 to vector<8x1xf32>
    %10 = arith.addf %8, %9 : vector<8x1xf32>
    %cst_6 = arith.constant 1.000000e+00 : f32
    %11 = vector.broadcast %cst_6 : f32 to vector<8x1xf32>
    %12 = arith.divf %11, %10 : vector<8x1xf32>
    %13 = vector.broadcast %12 : vector<8x1xf32> to vector<8x256xf32>
    %14 = arith.mulf %4, %13 : vector<8x256xf32>
    %cst_7 = arith.constant dense<0.000000e+00> : vector<256x256xf32>
    %15 = tpu.matmul %14, %14, %cst_7 {dimension_numbers = #tpu.dot_dimension_numbers<[0], [0], [1], [1], [0, 1, 1, 1], [], []>} : vector<8x256xf32>, vector<8x256xf32>, vector<256x256xf32> -> vector<256x256xf32>
    %cst_8 = arith.constant dense<0.000000e+00> : vector<8x256xf32>
    %16 = tpu.matmul %14, %15, %cst_8 {dimension_numbers = #tpu.dot_dimension_numbers<[1], [0], [0], [1], [0, 0, 1, 1], [], []>} : vector<8x256xf32>, vector<256x256xf32>, vector<8x256xf32> -> vector<8x256xf32>
    %c0_9 = arith.constant 0 : index
    %c0_10 = arith.constant 0 : index
    %c0_11 = arith.constant 0 : index
    %17 = vector.load %arg3[%c0_9, %c0_10, %c0_11] : memref<3x256x256xf32, #tpu.memory_space<vmem>>, vector<1x256x256xf32>
    %18 = vector.shape_cast %17 : vector<1x256x256xf32> to vector<256x256xf32>
    %cst_12 = arith.constant dense<0.000000e+00> : vector<8x256xf32>
    %19 = tpu.matmul %16, %18, %cst_12 {dimension_numbers = #tpu.dot_dimension_numbers<[1], [0], [0], [1], [0, 0, 1, 1], [], []>} : vector<8x256xf32>, vector<256x256xf32>, vector<8x256xf32> -> vector<8x256xf32>
    %c0_13 = arith.constant 0 : index
    %c0_14 = arith.constant 0 : index
    %c0_15 = arith.constant 0 : index
    %20 = vector.load %arg4[%c0_13, %c0_14, %c0_15] : memref<3x1x256xf32, #tpu.memory_space<vmem>>, vector<1x1x256xf32>
    %21 = vector.shape_cast %20 : vector<1x1x256xf32> to vector<1x256xf32>
    %22 = vector.broadcast %21 : vector<1x256xf32> to vector<8x256xf32>
    %23 = arith.addf %19, %22 : vector<8x256xf32>
    %cst_16 = arith.constant 0.000000e+00 : f32
    %24 = vector.broadcast %cst_16 : f32 to vector<8x256xf32>
    %25 = arith.maximumf %23, %24 : vector<8x256xf32>
    %c1 = arith.constant 1 : index
    %c0_17 = arith.constant 0 : index
    %c0_18 = arith.constant 0 : index
    %26 = vector.load %arg2[%c1, %c0_17, %c0_18] : memref<3x8x256xf32, #tpu.memory_space<vmem>>, vector<1x8x256xf32>
    %27 = vector.shape_cast %26 : vector<1x8x256xf32> to vector<8x256xf32>
    %28 = arith.addf %25, %27 : vector<8x256xf32>
    %29 = arith.mulf %28, %28 : vector<8x256xf32>
    %cst_19 = arith.constant dense<0.000000e+00> : vector<8xf32>
    %30 = vector.multi_reduction <add>, %29, %cst_19 [1] : vector<8x256xf32> to vector<8xf32>
    %31 = vector.shape_cast %30 : vector<8xf32> to vector<8x1xf32>
    %32 = math.sqrt %31 : vector<8x1xf32>
    %cst_20 = arith.constant 9.99999997E-7 : f32
    %33 = vector.broadcast %cst_20 : f32 to vector<8x1xf32>
    %34 = arith.addf %32, %33 : vector<8x1xf32>
    %cst_21 = arith.constant 1.000000e+00 : f32
    %35 = vector.broadcast %cst_21 : f32 to vector<8x1xf32>
    %36 = arith.divf %35, %34 : vector<8x1xf32>
    %37 = vector.broadcast %36 : vector<8x1xf32> to vector<8x256xf32>
    %38 = arith.mulf %28, %37 : vector<8x256xf32>
    %cst_22 = arith.constant dense<0.000000e+00> : vector<256x256xf32>
    %39 = tpu.matmul %38, %38, %cst_22 {dimension_numbers = #tpu.dot_dimension_numbers<[0], [0], [1], [1], [0, 1, 1, 1], [], []>} : vector<8x256xf32>, vector<8x256xf32>, vector<256x256xf32> -> vector<256x256xf32>
    %cst_23 = arith.constant dense<0.000000e+00> : vector<8x256xf32>
    %40 = tpu.matmul %38, %39, %cst_23 {dimension_numbers = #tpu.dot_dimension_numbers<[1], [0], [0], [1], [0, 0, 1, 1], [], []>} : vector<8x256xf32>, vector<256x256xf32>, vector<8x256xf32> -> vector<8x256xf32>
    %c1_24 = arith.constant 1 : index
    %c0_25 = arith.constant 0 : index
    %c0_26 = arith.constant 0 : index
    %41 = vector.load %arg3[%c1_24, %c0_25, %c0_26] : memref<3x256x256xf32, #tpu.memory_space<vmem>>, vector<1x256x256xf32>
    %42 = vector.shape_cast %41 : vector<1x256x256xf32> to vector<256x256xf32>
    %cst_27 = arith.constant dense<0.000000e+00> : vector<8x256xf32>
    %43 = tpu.matmul %40, %42, %cst_27 {dimension_numbers = #tpu.dot_dimension_numbers<[1], [0], [0], [1], [0, 0, 1, 1], [], []>} : vector<8x256xf32>, vector<256x256xf32>, vector<8x256xf32> -> vector<8x256xf32>
    %c1_28 = arith.constant 1 : index
    %c0_29 = arith.constant 0 : index
    %c0_30 = arith.constant 0 : index
    %44 = vector.load %arg4[%c1_28, %c0_29, %c0_30] : memref<3x1x256xf32, #tpu.memory_space<vmem>>, vector<1x1x256xf32>
    %45 = vector.shape_cast %44 : vector<1x1x256xf32> to vector<1x256xf32>
    %46 = vector.broadcast %45 : vector<1x256xf32> to vector<8x256xf32>
    %47 = arith.addf %43, %46 : vector<8x256xf32>
    %cst_31 = arith.constant 0.000000e+00 : f32
    %48 = vector.broadcast %cst_31 : f32 to vector<8x256xf32>
    %49 = arith.maximumf %47, %48 : vector<8x256xf32>
    %c2 = arith.constant 2 : index
    %c0_32 = arith.constant 0 : index
    %c0_33 = arith.constant 0 : index
    %50 = vector.load %arg2[%c2, %c0_32, %c0_33] : memref<3x8x256xf32, #tpu.memory_space<vmem>>, vector<1x8x256xf32>
    %51 = vector.shape_cast %50 : vector<1x8x256xf32> to vector<8x256xf32>
    %52 = arith.addf %49, %51 : vector<8x256xf32>
    %53 = arith.mulf %52, %52 : vector<8x256xf32>
    %cst_34 = arith.constant dense<0.000000e+00> : vector<8xf32>
    %54 = vector.multi_reduction <add>, %53, %cst_34 [1] : vector<8x256xf32> to vector<8xf32>
    %55 = vector.shape_cast %54 : vector<8xf32> to vector<8x1xf32>
    %56 = math.sqrt %55 : vector<8x1xf32>
    %cst_35 = arith.constant 9.99999997E-7 : f32
    %57 = vector.broadcast %cst_35 : f32 to vector<8x1xf32>
    %58 = arith.addf %56, %57 : vector<8x1xf32>
    %cst_36 = arith.constant 1.000000e+00 : f32
    %59 = vector.broadcast %cst_36 : f32 to vector<8x1xf32>
    %60 = arith.divf %59, %58 : vector<8x1xf32>
    %61 = vector.broadcast %60 : vector<8x1xf32> to vector<8x256xf32>
    %62 = arith.mulf %52, %61 : vector<8x256xf32>
    %cst_37 = arith.constant dense<0.000000e+00> : vector<256x256xf32>
    %63 = tpu.matmul %62, %62, %cst_37 {dimension_numbers = #tpu.dot_dimension_numbers<[0], [0], [1], [1], [0, 1, 1, 1], [], []>} : vector<8x256xf32>, vector<8x256xf32>, vector<256x256xf32> -> vector<256x256xf32>
    %cst_38 = arith.constant dense<0.000000e+00> : vector<8x256xf32>
    %64 = tpu.matmul %62, %63, %cst_38 {dimension_numbers = #tpu.dot_dimension_numbers<[1], [0], [0], [1], [0, 0, 1, 1], [], []>} : vector<8x256xf32>, vector<256x256xf32>, vector<8x256xf32> -> vector<8x256xf32>
    %c2_39 = arith.constant 2 : index
    %c0_40 = arith.constant 0 : index
    %c0_41 = arith.constant 0 : index
    %65 = vector.load %arg3[%c2_39, %c0_40, %c0_41] : memref<3x256x256xf32, #tpu.memory_space<vmem>>, vector<1x256x256xf32>
    %66 = vector.shape_cast %65 : vector<1x256x256xf32> to vector<256x256xf32>
    %cst_42 = arith.constant dense<0.000000e+00> : vector<8x256xf32>
    %67 = tpu.matmul %64, %66, %cst_42 {dimension_numbers = #tpu.dot_dimension_numbers<[1], [0], [0], [1], [0, 0, 1, 1], [], []>} : vector<8x256xf32>, vector<256x256xf32>, vector<8x256xf32> -> vector<8x256xf32>
    %c2_43 = arith.constant 2 : index
    %c0_44 = arith.constant 0 : index
    %c0_45 = arith.constant 0 : index
    %68 = vector.load %arg4[%c2_43, %c0_44, %c0_45] : memref<3x1x256xf32, #tpu.memory_space<vmem>>, vector<1x1x256xf32>
    %69 = vector.shape_cast %68 : vector<1x1x256xf32> to vector<1x256xf32>
    %70 = vector.broadcast %69 : vector<1x256xf32> to vector<8x256xf32>
    %71 = arith.addf %67, %70 : vector<8x256xf32>
    %cst_46 = arith.constant 0.000000e+00 : f32
    %72 = vector.broadcast %cst_46 : f32 to vector<8x256xf32>
    %73 = arith.maximumf %71, %72 : vector<8x256xf32>
    %c0_47 = arith.constant 0 : index
    %c0_48 = arith.constant 0 : index
    %74 = vector.load %arg5[%c0_47, %c0_48] : memref<256x2048xf32, #tpu.memory_space<vmem>>, vector<256x512xf32>
    %cst_49 = arith.constant dense<0.000000e+00> : vector<8x512xf32>
    %75 = tpu.matmul %73, %74, %cst_49 {dimension_numbers = #tpu.dot_dimension_numbers<[1], [0], [0], [1], [0, 0, 1, 1], [], []>} : vector<8x256xf32>, vector<256x512xf32>, vector<8x512xf32> -> vector<8x512xf32>
    %c0_50 = arith.constant 0 : index
    %c0_51 = arith.constant 0 : index
    %76 = vector.load %arg6[%c0_50, %c0_51] : memref<1x2048xf32, #tpu.memory_space<vmem>>, vector<1x512xf32>
    %77 = vector.broadcast %76 : vector<1x512xf32> to vector<8x512xf32>
    %78 = arith.addf %75, %77 : vector<8x512xf32>
    %c0_52 = arith.constant 0 : index
    %c0_53 = arith.constant 0 : index
    %c0_54 = arith.constant 0 : index
    %79 = vector.load %arg7[%c0_52, %c0_53, %c0_54] : memref<2x8x2048xf32, #tpu.memory_space<vmem>>, vector<1x8x512xf32>
    %80 = vector.shape_cast %79 : vector<1x8x512xf32> to vector<8x512xf32>
    %81 = vector.shape_cast %78 : vector<8x512xf32> to vector<1x8x512xf32>
    tpu.vector_store %arg7[%c0_52, %c0_53, %c0_54], %81 {strides = array<i32>} : memref<2x8x2048xf32, #tpu.memory_space<vmem>>, vector<1x8x512xf32>,
    %c0_55 = arith.constant 0 : index
    %c512 = arith.constant 512 : index
    %82 = vector.load %arg5[%c0_55, %c512] : memref<256x2048xf32, #tpu.memory_space<vmem>>, vector<256x512xf32>
    %cst_56 = arith.constant dense<0.000000e+00> : vector<8x512xf32>
    %83 = tpu.matmul %73, %82, %cst_56 {dimension_numbers = #tpu.dot_dimension_numbers<[1], [0], [0], [1], [0, 0, 1, 1], [], []>} : vector<8x256xf32>, vector<256x512xf32>, vector<8x512xf32> -> vector<8x512xf32>
    %c0_57 = arith.constant 0 : index
    %c512_58 = arith.constant 512 : index
    %84 = vector.load %arg6[%c0_57, %c512_58] : memref<1x2048xf32, #tpu.memory_space<vmem>>, vector<1x512xf32>
    %85 = vector.broadcast %84 : vector<1x512xf32> to vector<8x512xf32>
    %86 = arith.addf %83, %85 : vector<8x512xf32>
    %c0_59 = arith.constant 0 : index
    %c0_60 = arith.constant 0 : index
    %c512_61 = arith.constant 512 : index
    %87 = vector.load %arg7[%c0_59, %c0_60, %c512_61] : memref<2x8x2048xf32, #tpu.memory_space<vmem>>, vector<1x8x512xf32>
    %88 = vector.shape_cast %87 : vector<1x8x512xf32> to vector<8x512xf32>
    %89 = vector.shape_cast %86 : vector<8x512xf32> to vector<1x8x512xf32>
    tpu.vector_store %arg7[%c0_59, %c0_60, %c512_61], %89 {strides = array<i32>} : memref<2x8x2048xf32, #tpu.memory_space<vmem>>, vector<1x8x512xf32>,
    %c0_62 = arith.constant 0 : index
    %c1024 = arith.constant 1024 : index
    %90 = vector.load %arg5[%c0_62, %c1024] : memref<256x2048xf32, #tpu.memory_space<vmem>>, vector<256x512xf32>
    %cst_63 = arith.constant dense<0.000000e+00> : vector<8x512xf32>
    %91 = tpu.matmul %73, %90, %cst_63 {dimension_numbers = #tpu.dot_dimension_numbers<[1], [0], [0], [1], [0, 0, 1, 1], [], []>} : vector<8x256xf32>, vector<256x512xf32>, vector<8x512xf32> -> vector<8x512xf32>
    %c0_64 = arith.constant 0 : index
    %c1024_65 = arith.constant 1024 : index
    %92 = vector.load %arg6[%c0_64, %c1024_65] : memref<1x2048xf32, #tpu.memory_space<vmem>>, vector<1x512xf32>
    %93 = vector.broadcast %92 : vector<1x512xf32> to vector<8x512xf32>
    %94 = arith.addf %91, %93 : vector<8x512xf32>
    %c0_66 = arith.constant 0 : index
    %c0_67 = arith.constant 0 : index
    %c1024_68 = arith.constant 1024 : index
    %95 = vector.load %arg7[%c0_66, %c0_67, %c1024_68] : memref<2x8x2048xf32, #tpu.memory_space<vmem>>, vector<1x8x512xf32>
    %96 = vector.shape_cast %95 : vector<1x8x512xf32> to vector<8x512xf32>
    %97 = vector.shape_cast %94 : vector<8x512xf32> to vector<1x8x512xf32>
    tpu.vector_store %arg7[%c0_66, %c0_67, %c1024_68], %97 {strides = array<i32>} : memref<2x8x2048xf32, #tpu.memory_space<vmem>>, vector<1x8x512xf32>,
    %c0_69 = arith.constant 0 : index
    %c1536 = arith.constant 1536 : index
    %98 = vector.load %arg5[%c0_69, %c1536] : memref<256x2048xf32, #tpu.memory_space<vmem>>, vector<256x512xf32>
    %cst_70 = arith.constant dense<0.000000e+00> : vector<8x512xf32>
    %99 = tpu.matmul %73, %98, %cst_70 {dimension_numbers = #tpu.dot_dimension_numbers<[1], [0], [0], [1], [0, 0, 1, 1], [], []>} : vector<8x256xf32>, vector<256x512xf32>, vector<8x512xf32> -> vector<8x512xf32>
    %c0_71 = arith.constant 0 : index
    %c1536_72 = arith.constant 1536 : index
    %100 = vector.load %arg6[%c0_71, %c1536_72] : memref<1x2048xf32, #tpu.memory_space<vmem>>, vector<1x512xf32>
    %101 = vector.broadcast %100 : vector<1x512xf32> to vector<8x512xf32>
    %102 = arith.addf %99, %101 : vector<8x512xf32>
    %c0_73 = arith.constant 0 : index
    %c0_74 = arith.constant 0 : index
    %c1536_75 = arith.constant 1536 : index
    %103 = vector.load %arg7[%c0_73, %c0_74, %c1536_75] : memref<2x8x2048xf32, #tpu.memory_space<vmem>>, vector<1x8x512xf32>
    %104 = vector.shape_cast %103 : vector<1x8x512xf32> to vector<8x512xf32>
    %105 = vector.shape_cast %102 : vector<8x512xf32> to vector<1x8x512xf32>
    tpu.vector_store %arg7[%c0_73, %c0_74, %c1536_75], %105 {strides = array<i32>} : memref<2x8x2048xf32, #tpu.memory_space<vmem>>, vector<1x8x512xf32>,
    %c1_76 = arith.constant 1 : index
    %c0_77 = arith.constant 0 : index
    %c0_78 = arith.constant 0 : index
    %106 = vector.load %arg1[%c1_76, %c0_77, %c0_78] : memref<2x8x256xf32, #tpu.memory_space<vmem>>, vector<1x8x256xf32>
    %107 = vector.shape_cast %106 : vector<1x8x256xf32> to vector<8x256xf32>
    %c0_79 = arith.constant 0 : index
    %c0_80 = arith.constant 0 : index
    %c0_81 = arith.constant 0 : index
    %108 = vector.load %arg2[%c0_79, %c0_80, %c0_81] : memref<3x8x256xf32, #tpu.memory_space<vmem>>, vector<1x8x256xf32>
    %109 = vector.shape_cast %108 : vector<1x8x256xf32> to vector<8x256xf32>
    %110 = arith.addf %107, %109 : vector<8x256xf32>
    %111 = arith.mulf %110, %110 : vector<8x256xf32>
    %cst_82 = arith.constant dense<0.000000e+00> : vector<8xf32>
    %112 = vector.multi_reduction <add>, %111, %cst_82 [1] : vector<8x256xf32> to vector<8xf32>
    %113 = vector.shape_cast %112 : vector<8xf32> to vector<8x1xf32>
    %114 = math.sqrt %113 : vector<8x1xf32>
    %cst_83 = arith.constant 9.99999997E-7 : f32
    %115 = vector.broadcast %cst_83 : f32 to vector<8x1xf32>
    %116 = arith.addf %114, %115 : vector<8x1xf32>
    %cst_84 = arith.constant 1.000000e+00 : f32
    %117 = vector.broadcast %cst_84 : f32 to vector<8x1xf32>
    %118 = arith.divf %117, %116 : vector<8x1xf32>
    %119 = vector.broadcast %118 : vector<8x1xf32> to vector<8x256xf32>
    %120 = arith.mulf %110, %119 : vector<8x256xf32>
    %cst_85 = arith.constant dense<0.000000e+00> : vector<256x256xf32>
    %121 = tpu.matmul %120, %120, %cst_85 {dimension_numbers = #tpu.dot_dimension_numbers<[0], [0], [1], [1], [0, 1, 1, 1], [], []>} : vector<8x256xf32>, vector<8x256xf32>, vector<256x256xf32> -> vector<256x256xf32>
    %cst_86 = arith.constant dense<0.000000e+00> : vector<8x256xf32>
    %122 = tpu.matmul %120, %121, %cst_86 {dimension_numbers = #tpu.dot_dimension_numbers<[1], [0], [0], [1], [0, 0, 1, 1], [], []>} : vector<8x256xf32>, vector<256x256xf32>, vector<8x256xf32> -> vector<8x256xf32>
    %c0_87 = arith.constant 0 : index
    %c0_88 = arith.constant 0 : index
    %c0_89 = arith.constant 0 : index
    %123 = vector.load %arg3[%c0_87, %c0_88, %c0_89] : memref<3x256x256xf32, #tpu.memory_space<vmem>>, vector<1x256x256xf32>
    %124 = vector.shape_cast %123 : vector<1x256x256xf32> to vector<256x256xf32>
    %cst_90 = arith.constant dense<0.000000e+00> : vector<8x256xf32>
    %125 = tpu.matmul %122, %124, %cst_90 {dimension_numbers = #tpu.dot_dimension_numbers<[1], [0], [0], [1], [0, 0, 1, 1], [], []>} : vector<8x256xf32>, vector<256x256xf32>, vector<8x256xf32> -> vector<8x256xf32>
    %c0_91 = arith.constant 0 : index
    %c0_92 = arith.constant 0 : index
    %c0_93 = arith.constant 0 : index
    %126 = vector.load %arg4[%c0_91, %c0_92, %c0_93] : memref<3x1x256xf32, #tpu.memory_space<vmem>>, vector<1x1x256xf32>
    %127 = vector.shape_cast %126 : vector<1x1x256xf32> to vector<1x256xf32>
    %128 = vector.broadcast %127 : vector<1x256xf32> to vector<8x256xf32>
    %129 = arith.addf %125, %128 : vector<8x256xf32>
    %cst_94 = arith.constant 0.000000e+00 : f32
    %130 = vector.broadcast %cst_94 : f32 to vector<8x256xf32>
    %131 = arith.maximumf %129, %130 : vector<8x256xf32>
    %c1_95 = arith.constant 1 : index
    %c0_96 = arith.constant 0 : index
    %c0_97 = arith.constant 0 : index
    %132 = vector.load %arg2[%c1_95, %c0_96, %c0_97] : memref<3x8x256xf32, #tpu.memory_space<vmem>>, vector<1x8x256xf32>
    %133 = vector.shape_cast %132 : vector<1x8x256xf32> to vector<8x256xf32>
    %134 = arith.addf %131, %133 : vector<8x256xf32>
    %135 = arith.mulf %134, %134 : vector<8x256xf32>
    %cst_98 = arith.constant dense<0.000000e+00> : vector<8xf32>
    %136 = vector.multi_reduction <add>, %135, %cst_98 [1] : vector<8x256xf32> to vector<8xf32>
    %137 = vector.shape_cast %136 : vector<8xf32> to vector<8x1xf32>
    %138 = math.sqrt %137 : vector<8x1xf32>
    %cst_99 = arith.constant 9.99999997E-7 : f32
    %139 = vector.broadcast %cst_99 : f32 to vector<8x1xf32>
    %140 = arith.addf %138, %139 : vector<8x1xf32>
    %cst_100 = arith.constant 1.000000e+00 : f32
    %141 = vector.broadcast %cst_100 : f32 to vector<8x1xf32>
    %142 = arith.divf %141, %140 : vector<8x1xf32>
    %143 = vector.broadcast %142 : vector<8x1xf32> to vector<8x256xf32>
    %144 = arith.mulf %134, %143 : vector<8x256xf32>
    %cst_101 = arith.constant dense<0.000000e+00> : vector<256x256xf32>
    %145 = tpu.matmul %144, %144, %cst_101 {dimension_numbers = #tpu.dot_dimension_numbers<[0], [0], [1], [1], [0, 1, 1, 1], [], []>} : vector<8x256xf32>, vector<8x256xf32>, vector<256x256xf32> -> vector<256x256xf32>
    %cst_102 = arith.constant dense<0.000000e+00> : vector<8x256xf32>
    %146 = tpu.matmul %144, %145, %cst_102 {dimension_numbers = #tpu.dot_dimension_numbers<[1], [0], [0], [1], [0, 0, 1, 1], [], []>} : vector<8x256xf32>, vector<256x256xf32>, vector<8x256xf32> -> vector<8x256xf32>
    %c1_103 = arith.constant 1 : index
    %c0_104 = arith.constant 0 : index
    %c0_105 = arith.constant 0 : index
    %147 = vector.load %arg3[%c1_103, %c0_104, %c0_105] : memref<3x256x256xf32, #tpu.memory_space<vmem>>, vector<1x256x256xf32>
    %148 = vector.shape_cast %147 : vector<1x256x256xf32> to vector<256x256xf32>
    %cst_106 = arith.constant dense<0.000000e+00> : vector<8x256xf32>
    %149 = tpu.matmul %146, %148, %cst_106 {dimension_numbers = #tpu.dot_dimension_numbers<[1], [0], [0], [1], [0, 0, 1, 1], [], []>} : vector<8x256xf32>, vector<256x256xf32>, vector<8x256xf32> -> vector<8x256xf32>
    %c1_107 = arith.constant 1 : index
    %c0_108 = arith.constant 0 : index
    %c0_109 = arith.constant 0 : index
    %150 = vector.load %arg4[%c1_107, %c0_108, %c0_109] : memref<3x1x256xf32, #tpu.memory_space<vmem>>, vector<1x1x256xf32>
    %151 = vector.shape_cast %150 : vector<1x1x256xf32> to vector<1x256xf32>
    %152 = vector.broadcast %151 : vector<1x256xf32> to vector<8x256xf32>
    %153 = arith.addf %149, %152 : vector<8x256xf32>
    %cst_110 = arith.constant 0.000000e+00 : f32
    %154 = vector.broadcast %cst_110 : f32 to vector<8x256xf32>
    %155 = arith.maximumf %153, %154 : vector<8x256xf32>
    %c2_111 = arith.constant 2 : index
    %c0_112 = arith.constant 0 : index
    %c0_113 = arith.constant 0 : index
    %156 = vector.load %arg2[%c2_111, %c0_112, %c0_113] : memref<3x8x256xf32, #tpu.memory_space<vmem>>, vector<1x8x256xf32>
    %157 = vector.shape_cast %156 : vector<1x8x256xf32> to vector<8x256xf32>
    %158 = arith.addf %155, %157 : vector<8x256xf32>
    %159 = arith.mulf %158, %158 : vector<8x256xf32>
    %cst_114 = arith.constant dense<0.000000e+00> : vector<8xf32>
    %160 = vector.multi_reduction <add>, %159, %cst_114 [1] : vector<8x256xf32> to vector<8xf32>
    %161 = vector.shape_cast %160 : vector<8xf32> to vector<8x1xf32>
    %162 = math.sqrt %161 : vector<8x1xf32>
    %cst_115 = arith.constant 9.99999997E-7 : f32
    %163 = vector.broadcast %cst_115 : f32 to vector<8x1xf32>
    %164 = arith.addf %162, %163 : vector<8x1xf32>
    %cst_116 = arith.constant 1.000000e+00 : f32
    %165 = vector.broadcast %cst_116 : f32 to vector<8x1xf32>
    %166 = arith.divf %165, %164 : vector<8x1xf32>
    %167 = vector.broadcast %166 : vector<8x1xf32> to vector<8x256xf32>
    %168 = arith.mulf %158, %167 : vector<8x256xf32>
    %cst_117 = arith.constant dense<0.000000e+00> : vector<256x256xf32>
    %169 = tpu.matmul %168, %168, %cst_117 {dimension_numbers = #tpu.dot_dimension_numbers<[0], [0], [1], [1], [0, 1, 1, 1], [], []>} : vector<8x256xf32>, vector<8x256xf32>, vector<256x256xf32> -> vector<256x256xf32>
    %cst_118 = arith.constant dense<0.000000e+00> : vector<8x256xf32>
    %170 = tpu.matmul %168, %169, %cst_118 {dimension_numbers = #tpu.dot_dimension_numbers<[1], [0], [0], [1], [0, 0, 1, 1], [], []>} : vector<8x256xf32>, vector<256x256xf32>, vector<8x256xf32> -> vector<8x256xf32>
    %c2_119 = arith.constant 2 : index
    %c0_120 = arith.constant 0 : index
    %c0_121 = arith.constant 0 : index
    %171 = vector.load %arg3[%c2_119, %c0_120, %c0_121] : memref<3x256x256xf32, #tpu.memory_space<vmem>>, vector<1x256x256xf32>
    %172 = vector.shape_cast %171 : vector<1x256x256xf32> to vector<256x256xf32>
    %cst_122 = arith.constant dense<0.000000e+00> : vector<8x256xf32>
    %173 = tpu.matmul %170, %172, %cst_122 {dimension_numbers = #tpu.dot_dimension_numbers<[1], [0], [0], [1], [0, 0, 1, 1], [], []>} : vector<8x256xf32>, vector<256x256xf32>, vector<8x256xf32> -> vector<8x256xf32>
    %c2_123 = arith.constant 2 : index
    %c0_124 = arith.constant 0 : index
    %c0_125 = arith.constant 0 : index
    %174 = vector.load %arg4[%c2_123, %c0_124, %c0_125] : memref<3x1x256xf32, #tpu.memory_space<vmem>>, vector<1x1x256xf32>
    %175 = vector.shape_cast %174 : vector<1x1x256xf32> to vector<1x256xf32>
    %176 = vector.broadcast %175 : vector<1x256xf32> to vector<8x256xf32>
    %177 = arith.addf %173, %176 : vector<8x256xf32>
    %cst_126 = arith.constant 0.000000e+00 : f32
    %178 = vector.broadcast %cst_126 : f32 to vector<8x256xf32>
    %179 = arith.maximumf %177, %178 : vector<8x256xf32>
    %c0_127 = arith.constant 0 : index
    %c0_128 = arith.constant 0 : index
    %180 = vector.load %arg5[%c0_127, %c0_128] : memref<256x2048xf32, #tpu.memory_space<vmem>>, vector<256x512xf32>
    %cst_129 = arith.constant dense<0.000000e+00> : vector<8x512xf32>
    %181 = tpu.matmul %179, %180, %cst_129 {dimension_numbers = #tpu.dot_dimension_numbers<[1], [0], [0], [1], [0, 0, 1, 1], [], []>} : vector<8x256xf32>, vector<256x512xf32>, vector<8x512xf32> -> vector<8x512xf32>
    %c0_130 = arith.constant 0 : index
    %c0_131 = arith.constant 0 : index
    %182 = vector.load %arg6[%c0_130, %c0_131] : memref<1x2048xf32, #tpu.memory_space<vmem>>, vector<1x512xf32>
    %183 = vector.broadcast %182 : vector<1x512xf32> to vector<8x512xf32>
    %184 = arith.addf %181, %183 : vector<8x512xf32>
    %c1_132 = arith.constant 1 : index
    %c0_133 = arith.constant 0 : index
    %c0_134 = arith.constant 0 : index
    %185 = vector.load %arg7[%c1_132, %c0_133, %c0_134] : memref<2x8x2048xf32, #tpu.memory_space<vmem>>, vector<1x8x512xf32>
    %186 = vector.shape_cast %185 : vector<1x8x512xf32> to vector<8x512xf32>
    %187 = vector.shape_cast %184 : vector<8x512xf32> to vector<1x8x512xf32>
    tpu.vector_store %arg7[%c1_132, %c0_133, %c0_134], %187 {strides = array<i32>} : memref<2x8x2048xf32, #tpu.memory_space<vmem>>, vector<1x8x512xf32>,
    %c0_135 = arith.constant 0 : index
    %c512_136 = arith.constant 512 : index
    %188 = vector.load %arg5[%c0_135, %c512_136] : memref<256x2048xf32, #tpu.memory_space<vmem>>, vector<256x512xf32>
    %cst_137 = arith.constant dense<0.000000e+00> : vector<8x512xf32>
    %189 = tpu.matmul %179, %188, %cst_137 {dimension_numbers = #tpu.dot_dimension_numbers<[1], [0], [0], [1], [0, 0, 1, 1], [], []>} : vector<8x256xf32>, vector<256x512xf32>, vector<8x512xf32> -> vector<8x512xf32>
    %c0_138 = arith.constant 0 : index
    %c512_139 = arith.constant 512 : index
    %190 = vector.load %arg6[%c0_138, %c512_139] : memref<1x2048xf32, #tpu.memory_space<vmem>>, vector<1x512xf32>
    %191 = vector.broadcast %190 : vector<1x512xf32> to vector<8x512xf32>
    %192 = arith.addf %189, %191 : vector<8x512xf32>
    %c1_140 = arith.constant 1 : index
    %c0_141 = arith.constant 0 : index
    %c512_142 = arith.constant 512 : index
    %193 = vector.load %arg7[%c1_140, %c0_141, %c512_142] : memref<2x8x2048xf32, #tpu.memory_space<vmem>>, vector<1x8x512xf32>
    %194 = vector.shape_cast %193 : vector<1x8x512xf32> to vector<8x512xf32>
    %195 = vector.shape_cast %192 : vector<8x512xf32> to vector<1x8x512xf32>
    tpu.vector_store %arg7[%c1_140, %c0_141, %c512_142], %195 {strides = array<i32>} : memref<2x8x2048xf32, #tpu.memory_space<vmem>>, vector<1x8x512xf32>,
    %c0_143 = arith.constant 0 : index
    %c1024_144 = arith.constant 1024 : index
    %196 = vector.load %arg5[%c0_143, %c1024_144] : memref<256x2048xf32, #tpu.memory_space<vmem>>, vector<256x512xf32>
    %cst_145 = arith.constant dense<0.000000e+00> : vector<8x512xf32>
    %197 = tpu.matmul %179, %196, %cst_145 {dimension_numbers = #tpu.dot_dimension_numbers<[1], [0], [0], [1], [0, 0, 1, 1], [], []>} : vector<8x256xf32>, vector<256x512xf32>, vector<8x512xf32> -> vector<8x512xf32>
    %c0_146 = arith.constant 0 : index
    %c1024_147 = arith.constant 1024 : index
    %198 = vector.load %arg6[%c0_146, %c1024_147] : memref<1x2048xf32, #tpu.memory_space<vmem>>, vector<1x512xf32>
    %199 = vector.broadcast %198 : vector<1x512xf32> to vector<8x512xf32>
    %200 = arith.addf %197, %199 : vector<8x512xf32>
    %c1_148 = arith.constant 1 : index
    %c0_149 = arith.constant 0 : index
    %c1024_150 = arith.constant 1024 : index
    %201 = vector.load %arg7[%c1_148, %c0_149, %c1024_150] : memref<2x8x2048xf32, #tpu.memory_space<vmem>>, vector<1x8x512xf32>
    %202 = vector.shape_cast %201 : vector<1x8x512xf32> to vector<8x512xf32>
    %203 = vector.shape_cast %200 : vector<8x512xf32> to vector<1x8x512xf32>
    tpu.vector_store %arg7[%c1_148, %c0_149, %c1024_150], %203 {strides = array<i32>} : memref<2x8x2048xf32, #tpu.memory_space<vmem>>, vector<1x8x512xf32>,
    %c0_151 = arith.constant 0 : index
    %c1536_152 = arith.constant 1536 : index
    %204 = vector.load %arg5[%c0_151, %c1536_152] : memref<256x2048xf32, #tpu.memory_space<vmem>>, vector<256x512xf32>
    %cst_153 = arith.constant dense<0.000000e+00> : vector<8x512xf32>
    %205 = tpu.matmul %179, %204, %cst_153 {dimension_numbers = #tpu.dot_dimension_numbers<[1], [0], [0], [1], [0, 0, 1, 1], [], []>} : vector<8x256xf32>, vector<256x512xf32>, vector<8x512xf32> -> vector<8x512xf32>
    %c0_154 = arith.constant 0 : index
    %c1536_155 = arith.constant 1536 : index
    %206 = vector.load %arg6[%c0_154, %c1536_155] : memref<1x2048xf32, #tpu.memory_space<vmem>>, vector<1x512xf32>
    %207 = vector.broadcast %206 : vector<1x512xf32> to vector<8x512xf32>
    %208 = arith.addf %205, %207 : vector<8x512xf32>
    %c1_156 = arith.constant 1 : index
    %c0_157 = arith.constant 0 : index
    %c1536_158 = arith.constant 1536 : index
    %209 = vector.load %arg7[%c1_156, %c0_157, %c1536_158] : memref<2x8x2048xf32, #tpu.memory_space<vmem>>, vector<1x8x512xf32>
    %210 = vector.shape_cast %209 : vector<1x8x512xf32> to vector<8x512xf32>
    %211 = vector.shape_cast %208 : vector<8x512xf32> to vector<1x8x512xf32>
    tpu.vector_store %arg7[%c1_156, %c0_157, %c1536_158], %211 {strides = array<i32>} : memref<2x8x2048xf32, #tpu.memory_space<vmem>>, vector<1x8x512xf32>,
    return
  }
  func.func @transform_0(%arg0: i32) -> (i32, i32, i32) {
    %c0_i32 = arith.constant 0 : i32
    %c0_i32_0 = arith.constant 0 : i32
    %c0_i32_1 = arith.constant 0 : i32
    return %arg0, %c0_i32, %c0_i32_0 : i32, i32, i32
  }
  func.func @transform_1(%arg0: i32) -> (i32, i32, i32) {
    %c0_i32 = arith.constant 0 : i32
    %c0_i32_0 = arith.constant 0 : i32
    %c0_i32_1 = arith.constant 0 : i32
    %c0_i32_2 = arith.constant 0 : i32
    return %c0_i32, %c0_i32_0, %c0_i32_1 : i32, i32, i32
  }
  func.func @transform_2(%arg0: i32) -> (i32, i32, i32) {
    %c0_i32 = arith.constant 0 : i32
    %c0_i32_0 = arith.constant 0 : i32
    %c0_i32_1 = arith.constant 0 : i32
    %c0_i32_2 = arith.constant 0 : i32
    return %c0_i32, %c0_i32_0, %c0_i32_1 : i32, i32, i32
  }
  func.func @transform_3(%arg0: i32) -> (i32, i32, i32) {
    %c0_i32 = arith.constant 0 : i32
    %c0_i32_0 = arith.constant 0 : i32
    %c0_i32_1 = arith.constant 0 : i32
    %c0_i32_2 = arith.constant 0 : i32
    return %c0_i32, %c0_i32_0, %c0_i32_1 : i32, i32, i32
  }
  func.func @transform_4(%arg0: i32) -> (i32, i32) {
    %c0_i32 = arith.constant 0 : i32
    %c0_i32_0 = arith.constant 0 : i32
    %c0_i32_1 = arith.constant 0 : i32
    return %c0_i32, %c0_i32_0 : i32, i32
  }
  func.func @transform_5(%arg0: i32) -> (i32, i32) {
    %c0_i32 = arith.constant 0 : i32
    %c0_i32_0 = arith.constant 0 : i32
    %c0_i32_1 = arith.constant 0 : i32
    return %c0_i32, %c0_i32_0 : i32, i32
  }
  func.func @transform_6(%arg0: i32) -> (i32, i32, i32) {
    %c0_i32 = arith.constant 0 : i32
    %c0_i32_0 = arith.constant 0 : i32
    %c0_i32_1 = arith.constant 0 : i32
    return %arg0, %c0_i32, %c0_i32_0 : i32, i32, i32
  }
}

</mosaic_0001>

<bundles_post_ra>
// kernel: model_forward.1
= control target key start
LH: loop header
LB: loop body
LE: loop exit
PB: predicated region body
PF: predicated region fallthrough
CT: control target
= control target key end

     0   :  { %11 = vsyncpa [#allocation3], 0  ;;  %s8188_s0 = inlined_call_operand.vmem [shape: f32[2,8,256], index: 0, kind: input, shape index: {}]   ;;  %s8189_s1 = inlined_call_operand.hbm [shape: f32[3,128,256], index: 1, kind: input, shape index: {}]   ;;  %s8190_s2 = inlined_call_operand.hbm [shape: f32[3,256,256], index: 2, kind: input, shape index: {}]   ;;  %s8191_s3 = inlined_call_operand.hbm [shape: f32[3,1,256], index: 3, kind: input, shape index: {}]   ;;  %s8192_s4 = inlined_call_operand.hbm [shape: f32[256,2048], index: 4, kind: input, shape index: {}]   ;;  %s8193_s5 = inlined_call_operand.hbm [shape: f32[1,2048], index: 5, kind: input, shape index: {}]   ;;  %s8194_s6 = inlined_call_operand.hbm [shape: f32[2,8,2048], index: 6, kind: output, shape index: {}]  }
   0x1   :  { %12 = vsyncpa [#allocation6], 0 }
   0x2   :  { %13 = vsyncpa [#allocation9], 0 }
   0x3   :  { %14 = vsyncpa [#allocation4], 0  ;;  %s6808_s21 = smov [#allocation5]   ;;  %s6809_s23 = smov [#allocation8]  }
   0x4   :  { %s34_s22 = sshll.u32 %s6808_s21, 4  ;;  %s58_s24 = sshll.u32 %s6809_s23, 4  ;;  %s35_s22 = int_to_ptr.vmem [resolvable:$true] %s34_s22  ;;  %s59_s24 = int_to_ptr.vmem [resolvable:$true] %s58_s24 }
   0x5   :  { %s6688_s25 = scalar_lea.vmem %s35_s22, 24576  ;;  %p6693_p1 = scmp.lt.s32.totalorder %s35_s22, %s35_s22 }
   0x6   :  { %p6689_p0 = scmp.ne.s32.totalorder %s35_s22, %s6688_s25  ;;  %p6694_p2 = scmp.lt.s32.totalorder %s6688_s25, %s6688_s25 }
   0x8   :  { %p6695_p3 = por %p6694_p2, %p6693_p1 }
   0xa   :  { %p6696_p4 = pnand %p6695_p3, %p6689_p0 }
   0xc   :  { %6699 = shalt.err (!%p6696_p4)
}
   0xd   :  { %s6810_s26 = smov 256   ;;  %s6811_s27 = smov 16  }
   0xe   :  { %40 = dma.hbm_to_vmem [thread:$0]  %s8190_s2, 24576, %s35_s22, [#allocation6], %s6810_s26, %s6810_s26, %s6811_s27  }
   0xf   :  { %s6708_s30 = scalar_lea.vmem %s59_s24, 65536  ;;  %p6713_p6 = scmp.lt.s32.totalorder %s59_s24, %s59_s24 }
  0x10   :  { %p6709_p5 = scmp.ne.s32.totalorder %s59_s24, %s6708_s30  ;;  %p6714_p7 = scmp.lt.s32.totalorder %s6708_s30, %s6708_s30 }
  0x12   :  { %p6715_p8 = por %p6714_p7, %p6713_p6 }
  0x14   :  { %p6716_p9 = pnand %p6715_p8, %p6709_p5 }
  0x16   :  { %6719 = shalt.err (!%p6716_p9)
}
  0x17   :  { %s6812_s7 = smov 2048   ;;  %s6813_s8 = smov 128  }
  0x18   :  { %64 = dma.hbm_to_vmem [thread:$0]  %s8192_s4, 65536, %s59_s24, [#allocation9], %s6812_s7, %s6812_s7, %s6813_s8  }
  0x19   :  { %s6814_s11 = smov [#allocation2]   ;;  %s6815_s2 = smov [#allocation7]  }
  0x1a   :  { %s22_s12 = sshll.u32 %s6814_s11, 4  ;;  %s46_s13 = sshll.u32 %s6815_s2, 4  ;;  %s23_s12 = int_to_ptr.vmem [resolvable:$true] %s22_s12  ;;  %s47_s13 = int_to_ptr.vmem [resolvable:$true] %s46_s13 }
  0x1b   :  { %s6728_s14 = scalar_lea.vmem %s23_s12, 768  ;;  %p6733_p11 = scmp.lt.s32.totalorder %s23_s12, %s23_s12 }
  0x1c   :  { %p6729_p10 = scmp.ne.s32.totalorder %s23_s12, %s6728_s14  ;;  %p6734_p12 = scmp.lt.s32.totalorder %s6728_s14, %s6728_s14 }
  0x1e   :  { %p6735_p13 = por %p6734_p12, %p6733_p11 }
  0x20   :  { %p6736_p0 = pnand %p6735_p13, %p6729_p10 }
  0x22   :  { %6739 = shalt.err (!%p6736_p0)
}
  0x23   :  { %s6816_s15 = smov 4096   ;;  %s6748_s4 = scalar_lea.vmem %s47_s13, 96 }
  0x24   :  { %28 = dma.hbm_to_vmem [thread:$0]  %s8189_s1, 768, %s23_s12, [#allocation3], %s6816_s15, %s6810_s26, %s6811_s27  }
  0x25   :  { %p6749_p1 = scmp.ne.s32.totalorder %s47_s13, %s6748_s4  ;;  %p6753_p2 = scmp.lt.s32.totalorder %s47_s13, %s47_s13 }
  0x26   :  { %p6754_p3 = scmp.lt.s32.totalorder %s6748_s4, %s6748_s4 }
  0x28   :  { %p6755_p4 = por %p6754_p3, %p6753_p2 }
  0x2a   :  { %p6756_p5 = pnand %p6755_p4, %p6749_p1 }
  0x2c   :  { %6759 = shalt.err (!%p6756_p5)
}
  0x2d   :  { %s6817_s18 = smov 32   ;;  %s6818_s19 = smov 2  }
  0x2e   :  { %52 = dma.hbm_to_vmem [thread:$0]  %s8191_s3, 96, %s47_s13, [#allocation6], %s6817_s18, %s6817_s18, %s6818_s19  }
  0x2f   :  { %s6819_s22 = smov [#allocation10]  }
  0x30   :  { %s71_s23 = sshll.u32 %s6819_s22, 4  ;;  %s72_s23 = int_to_ptr.vmem [resolvable:$true] %s71_s23 }
  0x31   :  { %s6768_s24 = scalar_lea.vmem %s72_s23, 256  ;;  %p6773_p7 = scmp.lt.s32.totalorder %s72_s23, %s72_s23 }
  0x32   :  { %p6769_p6 = scmp.ne.s32.totalorder %s72_s23, %s6768_s24  ;;  %p6774_p8 = scmp.lt.s32.totalorder %s6768_s24, %s6768_s24 }
  0x34   :  { %p6775_p9 = por %p6774_p8, %p6773_p7 }
  0x36   :  { %p6776_p10 = pnand %p6775_p9, %p6769_p6 }
  0x38   :  { %6779 = shalt.err (!%p6776_p10)
}
  0x39   :  { %74 = dma.hbm_to_vmem [thread:$0]  %s8193_s5, 256, %s72_s23, [#allocation9]  }
  0x3a   :  { %6800 = dma.done.wait [#allocation3], 768  }
  0x3b   :  { %6801 = vsyncadd [#allocation3], 4294966528 }
  0x3c   :  { %6802 = dma.done.wait [#allocation6], 24672  }
  0x3d   :  { %6803 = vsyncadd [#allocation6], 4294942624 }
  0x3e   :  { %6804 = dma.done.wait [#allocation9], 65792  }
  0x3f   :  { %6805 = vsyncadd [#allocation9], 4294901504  ;;  %v90_v0 = vld [vmem:[%s8188_s0] sm:$0xff]  ;;  %v91_v1 = vld [vmem:[%s8188_s0 + $0x8] sm:$0xff]  ;;  %v8195_v9 = vmov 0.0   ;;  %vm177_vm2 = vcmask 64512  }
  0x40   :  { %v92_v2 = vld [vmem:[#allocation2] sm:$0xff]  ;;  %v93_v3 = vld [vmem:[#allocation2 + $0x8] sm:$0xff]  ;;  %338 = vmatprep.mubr.f32.mxu0 %v8195_v9  ;;  %434 = vmatprep.mubr.f32.mxu1 %v8195_v9  ;;  %v631_v55 = vld [vmem:[#allocation5 + $0xe8] sm:$0xff] }
  0x41   :  { %v94_v4 = vadd.f32 %v92_v2, %v90_v0  ;;  %v95_v5 = vadd.f32 %v93_v3, %v91_v1  ;;  %v633_v53 = vld [vmem:[#allocation5 + $0xf8] sm:$0xff]  ;;  %v632_v54 = vld [vmem:[#allocation5 + $0xf0] sm:$0xff]  ;;  %v630_v57 = vld [vmem:[#allocation5 + $0xe0] sm:$0xff] }
  0x42   :  { %v629_v59 = vld [vmem:[#allocation5 + $0xd8] sm:$0xff]  ;;  %v628_v61 = vld [vmem:[#allocation5 + $0xd0] sm:$0xff]  ;;  %v627_v63 = vld [vmem:[#allocation5 + $0xc8] sm:$0xff] }
  0x43   :  { %v96_v6 = vmul.f32 %v94_v4, %v94_v4  ;;  %v97_v7 = vmul.f32 %v95_v5, %v95_v5  ;;  %v626_v1 = vld [vmem:[#allocation5 + $0xc0] sm:$0xff]  ;;  %v625_v3 = vld [vmem:[#allocation5 + $0xb8] sm:$0xff] }
  0x45   :  { %v98_v8 = vadd.f32 %v97_v7, %v96_v6  ;;  %v623_v7 = vld [vmem:[#allocation5 + $0xa8] sm:$0xff] }
  0x47   :  { %99 = vadd.xlane.f32.xlu0 %v98_v8 }
  0xd0   :  { %v100_v10 = vpop.xlane.xlu0 %99 }
  0xd1   :  { %6656 = vrsqrt.f32 %v100_v10  ;;  %vm103_vm0 = vcmp.eq.f32.partialorder %v100_v10, inf  ;;  %v106_v13 = vand.u32 2147483648, %v100_v10  ;;  %vm105_vm1 = vcmp.eq.f32.partialorder %v100_v10, 0.0 }
  0xde   :  { %v6657_v11 = vpop.eup %6656 }
  0xdf   :  { %v102_v12 = vmul.f32 %v6657_v11, %v100_v10 }
  0xe1   :  { %v104_v14 = vsel %vm103_vm0, %v100_v10, %v102_v12  ;;  %v622_v10 = vld [vmem:[#allocation5 + $0xa0] sm:$0xff]  ;;  %v621_v12 = vld [vmem:[#allocation5 + $0x98] sm:$0xff] }
  0xe2   :  { %v107_v15 = vsel %vm105_vm1, %v106_v13, %v104_v14  ;;  %v620_v14 = vld [vmem:[#allocation5 + $0x90] sm:$0xff] }
  0xe3   :  { %v108_v16 = vadd.f32 1e-06, %v107_v15 }
  0xe5   :  { %6658 = vrcp.f32 %v108_v16  ;;  %v619_v16 = vld [vmem:[#allocation5 + $0x88] sm:$0xff] }
  0xf2   :  { %v6659_v17 = vpop.eup %6658 }
  0xf3   :  { %v6886_v18 = vmul.f32 %v6659_v17, %v95_v5  ;;  %v6888_v19 = vmul.f32 %v6659_v17, %v94_v4  ;;  %v624_v5 = vld [vmem:[#allocation5 + $0xb0] sm:$0xff] }
  0xf5   :  { %145 = vxpose.xlu1.b32.start.end [1/1] (short) %v6886_v18, 128  ;;  %304 = vmatprep.subr.mxu0 %v6886_v18 }
  0xf6   :  { %6632 = vmatprep.subr.mxu1 %v6886_v18  ;;  %113 = vxpose.xlu0.b32.start.end [1/1] (short) %v6888_v19, 128 }
  0xf7   :  { %305 = vmatpush1.msra.mxu0 %v6888_v19  ;;  %6633 = vmatpush1.msra.mxu1 %v6888_v19 }
  0xf8   :  { %678 = vmatprep.subr.mxu1 %v633_v53  ;;  %v665_v53 = vld [vmem:[#allocation5 + $0x1f8] sm:$0xff] }
 0x171   :  { %v161_v20 = vpop.trf.xlu1 }
 0x172   :  { %v129_v21 = vpop.trf.xlu0  ;;  %6454 = vmatmul.mubr.msk.f32.vlgmr.msra.gmra.mxu1 %vm177_vm2, %v161_v20 }
 0x173   :  { %6438 = vmatmul.mubr.msk.f32.vlgmr.msra.gmra.mxu0 %vm177_vm2, %v129_v21  ;;  %440 = vmatprep.mubr.f32.mxu1 %v8195_v9  ;;  %v617_v21 = vld [vmem:[#allocation5 + $0x78] sm:$0xff] }
 0x174   :  { %344 = vmatprep.mubr.f32.mxu0 %v8195_v9  ;;  %679 = vmatpush1.msra.mxu1 %v632_v54 }
 0x175   :  { %v162_v22 = vpop.trf.xlu1  ;;  %680 = vmatprep.subr.mxu1 %v631_v55 }
 0x176   :  { %v130_v23 = vpop.trf.xlu0  ;;  %6455 = vmatmul.mubr.msk.f32.gmra.mxu1 %vm177_vm2, %v162_v22 }
 0x177   :  { %6439 = vmatmul.mubr.msk.f32.gmra.mxu0 %vm177_vm2, %v130_v23  ;;  %446 = vmatprep.mubr.f32.mxu1 %v8195_v9  ;;  %v616_v23 = vld [vmem:[#allocation5 + $0x70] sm:$0xff] }
 0x178   :  { %350 = vmatprep.mubr.f32.mxu0 %v8195_v9  ;;  %681 = vmatpush1.msra.mxu1 %v630_v57  ;;  %v664_v57 = vld [vmem:[#allocation5 + $0x1f0] sm:$0xff] }
 0x179   :  { %v163_v24 = vpop.trf.xlu1  ;;  %682 = vmatprep.subr.mxu1 %v629_v59  ;;  %v663_v59 = vld [vmem:[#allocation5 + $0x1e8] sm:$0xff] }
 0x17a   :  { %v131_v25 = vpop.trf.xlu0  ;;  %6456 = vmatmul.mubr.msk.f32.gmra.mxu1 %vm177_vm2, %v163_v24 }
 0x17b   :  { %6440 = vmatmul.mubr.msk.f32.gmra.mxu0 %vm177_vm2, %v131_v25  ;;  %452 = vmatprep.mubr.f32.mxu1 %v8195_v9  ;;  %v615_v25 = vld [vmem:[#allocation5 + $0x68] sm:$0xff] }
 0x17c   :  { %356 = vmatprep.mubr.f32.mxu0 %v8195_v9  ;;  %683 = vmatpush1.msra.mxu1 %v628_v61 }
 0x17d   :  { %v164_v26 = vpop.trf.xlu1  ;;  %684 = vmatprep.subr.mxu1 %v627_v63  ;;  %v662_v63 = vld [vmem:[#allocation5 + $0x1e0] sm:$0xff] }
 0x17e   :  { %v132_v27 = vpop.trf.xlu0  ;;  %6457 = vmatmul.mubr.msk.f32.gmra.mxu1 %vm177_vm2, %v164_v26 }
 0x17f   :  { %6441 = vmatmul.mubr.msk.f32.gmra.mxu0 %vm177_vm2, %v132_v27  ;;  %458 = vmatprep.mubr.f32.mxu1 %v8195_v9  ;;  %v614_v27 = vld [vmem:[#allocation5 + $0x60] sm:$0xff] }
 0x180   :  { %362 = vmatprep.mubr.f32.mxu0 %v8195_v9  ;;  %685 = vmatpush1.msra.mxu1 %v626_v1  ;;  %v661_v1 = vld [vmem:[#allocation5 + $0x1d8] sm:$0xff] }
 0x181   :  { %v165_v28 = vpop.trf.xlu1  ;;  %686 = vmatprep.subr.mxu1 %v625_v3 }
 0x182   :  { %v133_v29 = vpop.trf.xlu0  ;;  %6458 = vmatmul.mubr.msk.f32.gmra.mxu1 %vm177_vm2, %v165_v28 }
 0x183   :  { %6442 = vmatmul.mubr.msk.f32.gmra.mxu0 %vm177_vm2, %v133_v29  ;;  %464 = vmatprep.mubr.f32.mxu1 %v8195_v9  ;;  %v613_v29 = vld [vmem:[#allocation5 + $0x58] sm:$0xff] }
 0x184   :  { %368 = vmatprep.mubr.f32.mxu0 %v8195_v9  ;;  %687 = vmatpush1.msra.mxu1 %v624_v5 }
 0x185   :  { %v166_v30 = vpop.trf.xlu1  ;;  %688 = vmatprep.subr.mxu1 %v623_v7  ;;  %v660_v7 = vld [vmem:[#allocation5 + $0x1d0] sm:$0xff] }
 0x186   :  { %v134_v31 = vpop.trf.xlu0  ;;  %6459 = vmatmul.mubr.msk.f32.gmra.mxu1 %vm177_vm2, %v166_v30 }
 0x187   :  { %6443 = vmatmul.mubr.msk.f32.gmra.mxu0 %vm177_vm2, %v134_v31  ;;  %470 = vmatprep.mubr.f32.mxu1 %v8195_v9  ;;  %v612_v31 = vld [vmem:[#allocation5 + $0x50] sm:$0xff] }
 0x188   :  { %374 = vmatprep.mubr.f32.mxu0 %v8195_v9  ;;  %689 = vmatpush1.msra.mxu1 %v622_v10  ;;  %v659_v10 = vld [vmem:[#allocation5 + $0x1c8] sm:$0xff] }
 0x189   :  { %v167_v32 = vpop.trf.xlu1  ;;  %690 = vmatprep.subr.mxu1 %v621_v12 }
 0x18a   :  { %v135_v33 = vpop.trf.xlu0  ;;  %6460 = vmatmul.mubr.msk.f32.gmra.mxu1 %vm177_vm2, %v167_v32 }
 0x18b   :  { %6444 = vmatmul.mubr.msk.f32.gmra.mxu0 %vm177_vm2, %v135_v33  ;;  %476 = vmatprep.mubr.f32.mxu1 %v8195_v9  ;;  %v611_v33 = vld [vmem:[#allocation5 + $0x48] sm:$0xff] }
 0x18c   :  { %380 = vmatprep.mubr.f32.mxu0 %v8195_v9  ;;  %691 = vmatpush1.msra.mxu1 %v620_v14  ;;  %v658_v14 = vld [vmem:[#allocation5 + $0x1c0] sm:$0xff] }
 0x18d   :  { %v168_v34 = vpop.trf.xlu1  ;;  %692 = vmatprep.subr.mxu1 %v619_v16  ;;  %v657_v16 = vld [vmem:[#allocation5 + $0x1b8] sm:$0xff] }
 0x18e   :  { %v136_v35 = vpop.trf.xlu0  ;;  %6461 = vmatmul.mubr.msk.f32.gmra.mxu1 %vm177_vm2, %v168_v34 }
 0x18f   :  { %6445 = vmatmul.mubr.msk.f32.gmra.mxu0 %vm177_vm2, %v136_v35  ;;  %482 = vmatprep.mubr.f32.mxu1 %v8195_v9  ;;  %v610_v35 = vld [vmem:[#allocation5 + $0x40] sm:$0xff] }
 0x190   :  { %386 = vmatprep.mubr.f32.mxu0 %v8195_v9 }
 0x191   :  { %v169_v36 = vpop.trf.xlu1 }
 0x192   :  { %v137_v37 = vpop.trf.xlu0  ;;  %6462 = vmatmul.mubr.msk.f32.gmra.mxu1 %vm177_vm2, %v169_v36 }
 0x193   :  { %6446 = vmatmul.mubr.msk.f32.gmra.mxu0 %vm177_vm2, %v137_v37  ;;  %488 = vmatprep.mubr.f32.mxu1 %v8195_v9  ;;  %v609_v37 = vld [vmem:[#allocation5 + $0x38] sm:$0xff] }
 0x194   :  { %392 = vmatprep.mubr.f32.mxu0 %v8195_v9 }
 0x195   :  { %v170_v38 = vpop.trf.xlu1 }
 0x196   :  { %v138_v39 = vpop.trf.xlu0  ;;  %6463 = vmatmul.mubr.msk.f32.gmra.mxu1 %vm177_vm2, %v170_v38 }
 0x197   :  { %6447 = vmatmul.mubr.msk.f32.gmra.mxu0 %vm177_vm2, %v138_v39  ;;  %494 = vmatprep.mubr.f32.mxu1 %v8195_v9  ;;  %v608_v39 = vld [vmem:[#allocation5 + $0x30] sm:$0xff] }
 0x198   :  { %398 = vmatprep.mubr.f32.mxu0 %v8195_v9 }
 0x199   :  { %v171_v40 = vpop.trf.xlu1 }
 0x19a   :  { %v139_v41 = vpop.trf.xlu0  ;;  %6464 = vmatmul.mubr.msk.f32.gmra.mxu1 %vm177_vm2, %v171_v40 }
 0x19b   :  { %6448 = vmatmul.mubr.msk.f32.gmra.mxu0 %vm177_vm2, %v139_v41  ;;  %500 = vmatprep.mubr.f32.mxu1 %v8195_v9  ;;  %v607_v41 = vld [vmem:[#allocation5 + $0x28] sm:$0xff] }
 0x19c   :  { %404 = vmatprep.mubr.f32.mxu0 %v8195_v9 }
 0x19d   :  { %v172_v42 = vpop.trf.xlu1 }
 0x19e   :  { %v140_v43 = vpop.trf.xlu0  ;;  %6465 = vmatmul.mubr.msk.f32.gmra.mxu1 %vm177_vm2, %v172_v42 }
 0x19f   :  { %6449 = vmatmul.mubr.msk.f32.gmra.mxu0 %vm177_vm2, %v140_v43  ;;  %506 = vmatprep.mubr.f32.mxu1 %v8195_v9  ;;  %v606_v43 = vld [vmem:[#allocation5 + $0x20] sm:$0xff] }
 0x1a0   :  { %410 = vmatprep.mubr.f32.mxu0 %v8195_v9 }
 0x1a1   :  { %v173_v44 = vpop.trf.xlu1 }
 0x1a2   :  { %v141_v45 = vpop.trf.xlu0  ;;  %6466 = vmatmul.mubr.msk.f32.gmra.mxu1 %vm177_vm2, %v173_v44 }
 0x1a3   :  { %6450 = vmatmul.mubr.msk.f32.gmra.mxu0 %vm177_vm2, %v141_v45  ;;  %512 = vmatprep.mubr.f32.mxu1 %v8195_v9  ;;  %v605_v45 = vld [vmem:[#allocation5 + $0x18] sm:$0xff] }
 0x1a4   :  { %416 = vmatprep.mubr.f32.mxu0 %v8195_v9 }
 0x1a5   :  { %v174_v46 = vpop.trf.xlu1 }
 0x1a6   :  { %v142_v47 = vpop.trf.xlu0  ;;  %6467 = vmatmul.mubr.msk.f32.gmra.mxu1 %vm177_vm2, %v174_v46 }
 0x1a7   :  { %6451 = vmatmul.mubr.msk.f32.gmra.mxu0 %vm177_vm2, %v142_v47  ;;  %518 = vmatprep.mubr.f32.mxu1 %v8195_v9  ;;  %v604_v47 = vld [vmem:[#allocation5 + $0x10] sm:$0xff] }
 0x1a8   :  { %422 = vmatprep.mubr.f32.mxu0 %v8195_v9 }
 0x1a9   :  { %v175_v48 = vpop.trf.xlu1 }
 0x1aa   :  { %v143_v49 = vpop.trf.xlu0  ;;  %6468 = vmatmul.mubr.msk.f32.gmra.mxu1 %vm177_vm2, %v175_v48 }
 0x1ab   :  { %6452 = vmatmul.mubr.msk.f32.gmra.mxu0 %vm177_vm2, %v143_v49  ;;  %524 = vmatprep.mubr.f32.mxu1 %v8195_v9  ;;  %v603_v49 = vld [vmem:[#allocation5 + $0x8] sm:$0xff] }
 0x1ac   :  { %428 = vmatprep.mubr.f32.mxu0 %v8195_v9 }
 0x1ad   :  { %v176_v50 = vpop.trf.xlu1 }
 0x1ae   :  { %v144_v51 = vpop.trf.xlu0  ;;  %6469 = vmatmul.mubr.msk.f32.gmra.mxu1 %vm177_vm2, %v176_v50 }
 0x1af   :  { %6453 = vmatmul.mubr.msk.f32.gmra.mxu0 %vm177_vm2, %v144_v51  ;;  %v602_v51 = vld [vmem:[#allocation5] sm:$0xff] }
 0x1b0   :  { %595 = vmatprep.mubr.f32.mxu0 %v6886_v18  ;;  %v618_v18 = vld [vmem:[#allocation5 + $0x80] sm:$0xff] }
 0x1b1   :  { %693 = vmatpush1.msra.mxu1 %v618_v18 }
 0x1b2   :  { %694 = vmatprep.subr.mxu1 %v617_v21 }
 0x1b3   :  { %695 = vmatpush1.msra.mxu1 %v616_v23  ;;  %v656_v23 = vld [vmem:[#allocation5 + $0x1b0] sm:$0xff] }
 0x1b4   :  { %696 = vmatprep.subr.mxu1 %v615_v25  ;;  %v655_v25 = vld [vmem:[#allocation5 + $0x1a8] sm:$0xff] }
 0x1b5   :  { %697 = vmatpush1.msra.mxu1 %v614_v27 }
 0x1b6   :  { %698 = vmatprep.subr.mxu1 %v613_v29  ;;  %v654_v29 = vld [vmem:[#allocation5 + $0x1a0] sm:$0xff] }
 0x1b7   :  { %699 = vmatpush1.msra.mxu1 %v612_v31  ;;  %v653_v31 = vld [vmem:[#allocation5 + $0x198] sm:$0xff] }
 0x1b8   :  { %700 = vmatprep.subr.mxu1 %v611_v33 }
 0x1b9   :  { %701 = vmatpush1.msra.mxu1 %v610_v35 }
 0x1ba   :  { %702 = vmatprep.subr.mxu1 %v609_v37  ;;  %v652_v37 = vld [vmem:[#allocation5 + $0x190] sm:$0xff] }
 0x1bb   :  { %703 = vmatpush1.msra.mxu1 %v608_v39  ;;  %v651_v39 = vld [vmem:[#allocation5 + $0x188] sm:$0xff] }
 0x1bc   :  { %704 = vmatprep.subr.mxu1 %v607_v41 }
 0x1bd   :  { %705 = vmatpush1.msra.mxu1 %v606_v43  ;;  %v650_v43 = vld [vmem:[#allocation5 + $0x180] sm:$0xff] }
 0x1be   :  { %706 = vmatprep.subr.mxu1 %v605_v45  ;;  %v649_v45 = vld [vmem:[#allocation5 + $0x178] sm:$0xff] }
 0x1bf   :  { %707 = vmatpush1.msra.mxu1 %v604_v47 }
 0x1c0   :  { %708 = vmatprep.subr.mxu1 %v603_v49 }
 0x1c1   :  { %709 = vmatpush1.msra.mxu1 %v602_v51  ;;  %v648_v51 = vld [vmem:[#allocation5 + $0x170] sm:$0xff] }
 0x1c2   :  { %710 = vmatprep.subr.mxu1 %v665_v53  ;;  %v647_v53 = vld [vmem:[#allocation5 + $0x168] sm:$0xff] }
 0x1c3   :  { %711 = vmatpush2.msra.mxu1 %v664_v57 }
 0x1c4   :  { %712 = vmatprep.subr.mxu1 %v663_v59  ;;  %v646_v59 = vld [vmem:[#allocation5 + $0x160] sm:$0xff] }
 0x1c5   :  { %713 = vmatpush2.msra.mxu1 %v662_v63  ;;  %v645_v63 = vld [vmem:[#allocation5 + $0x158] sm:$0xff] }
 0x1c6   :  { %714 = vmatprep.subr.mxu1 %v661_v1 }
 0x1c7   :  { %715 = vmatpush2.msra.mxu1 %v660_v7 }
 0x1c8   :  { %716 = vmatprep.subr.mxu1 %v659_v10  ;;  %v644_v10 = vld [vmem:[#allocation5 + $0x150] sm:$0xff] }
 0x1c9   :  { %717 = vmatpush2.msra.mxu1 %v658_v14  ;;  %v643_v14 = vld [vmem:[#allocation5 + $0x148] sm:$0xff] }
 0x1ca   :  { %718 = vmatprep.subr.mxu1 %v657_v16 }
 0x1cb   :  { %719 = vmatpush2.msra.mxu1 %v656_v23  ;;  %v642_v23 = vld [vmem:[#allocation5 + $0x140] sm:$0xff] }
 0x1cc   :  { %720 = vmatprep.subr.mxu1 %v655_v25  ;;  %v641_v25 = vld [vmem:[#allocation5 + $0x138] sm:$0xff] }
 0x1cd   :  { %721 = vmatpush2.msra.mxu1 %v654_v29 }
 0x1ce   :  { %722 = vmatprep.subr.mxu1 %v653_v31 }
 0x1cf   :  { %723 = vmatpush2.msra.mxu1 %v652_v37  ;;  %v640_v37 = vld [vmem:[#allocation5 + $0x130] sm:$0xff] }
 0x1d0   :  { %724 = vmatprep.subr.mxu1 %v651_v39  ;;  %v639_v39 = vld [vmem:[#allocation5 + $0x128] sm:$0xff] }
 0x1d1   :  { %725 = vmatpush2.msra.mxu1 %v650_v43 }
 0x1d2   :  { %726 = vmatprep.subr.mxu1 %v649_v45  ;;  %v638_v45 = vld [vmem:[#allocation5 + $0x120] sm:$0xff] }
 0x1d3   :  { %727 = vmatpush2.msra.mxu1 %v648_v51 }
 0x1d4   :  { %728 = vmatprep.subr.mxu1 %v647_v53 }
 0x1d5   :  { %729 = vmatpush2.msra.mxu1 %v646_v59 }
 0x1d6   :  { %730 = vmatprep.subr.mxu1 %v645_v63 }
 0x1d7   :  { %731 = vmatpush2.msra.mxu1 %v644_v10 }
 0x1d8   :  { %732 = vmatprep.subr.mxu1 %v643_v14 }
 0x1d9   :  { %733 = vmatpush2.msra.mxu1 %v642_v23 }
 0x1da   :  { %734 = vmatprep.subr.mxu1 %v641_v25 }
 0x1db   :  { %735 = vmatpush2.msra.mxu1 %v640_v37 }
 0x1dc   :  { %736 = vmatprep.subr.mxu1 %v639_v39 }
 0x1dd   :  { %737 = vmatpush2.msra.mxu1 %v638_v45 }
 0x232   :  { %v6959_v52 = vpop.f32.mrf.mxu1 }
 0x233   :  { %v6961_v56 = vpop.f32.mrf.mxu0 }
 0x234   :  { %v6963_v58 = vpop.f32.mrf.mxu1 }
 0x235   :  { %v6965_v60 = vpop.f32.mrf.mxu0 }
 0x236   :  { %v6967_v62 = vpop.f32.mrf.mxu1 }
 0x237   :  { %v6969_v0 = vpop.f32.mrf.mxu0 }
 0x238   :  { %v6971_v2 = vpop.f32.mrf.mxu1 }
 0x239   :  { %v6973_v4 = vpop.f32.mrf.mxu0 }
 0x23a   :  { %v6975_v6 = vpop.f32.mrf.mxu1 }
 0x23b   :  { %v6977_v8 = vpop.f32.mrf.mxu0 }
 0x23c   :  { %v6979_v11 = vpop.f32.mrf.mxu1 }
 0x23d   :  { %v6981_v13 = vpop.f32.mrf.mxu0 }
 0x23e   :  { %v6983_v15 = vpop.f32.mrf.mxu1 }
 0x23f   :  { %v6985_v17 = vpop.f32.mrf.mxu0 }
 0x240   :  { %v6987_v20 = vpop.f32.mrf.mxu1 }
 0x241   :  { %v6989_v22 = vpop.f32.mrf.mxu0 }
 0x242   :  { %v6991_v24 = vpop.f32.mrf.mxu1 }
 0x243   :  { %v6993_v26 = vpop.f32.mrf.mxu0 }
 0x244   :  { %v6995_v28 = vpop.f32.mrf.mxu1 }
 0x245   :  { %v6997_v30 = vpop.f32.mrf.mxu0 }
 0x246   :  { %v6999_v32 = vpop.f32.mrf.mxu1 }
 0x247   :  { %v7001_v34 = vpop.f32.mrf.mxu0 }
 0x248   :  { %v7003_v36 = vpop.f32.mrf.mxu1 }
 0x249   :  { %v7005_v38 = vpop.f32.mrf.mxu0 }
 0x24a   :  { %v7007_v40 = vpop.f32.mrf.mxu1 }
 0x24b   :  { %v7009_v42 = vpop.f32.mrf.mxu0 }
 0x24c   :  { %v7011_v44 = vpop.f32.mrf.mxu1 }
 0x24d   :  { %v7013_v46 = vpop.f32.mrf.mxu0 }
 0x24e   :  { %v7015_v48 = vpop.f32.mrf.mxu1 }
 0x24f   :  { %v7017_v50 = vpop.f32.mrf.mxu0 }
 0x250   :  { %v7021_v55 = vpop.f32.mrf.mxu1 }
 0x251   :  { %v7019_v54 = vpop.f32.mrf.mxu0 }
 0x252   :  { %v7027_v5 = vpop.f32.mrf.mxu1 }
 0x253   :  { %v7023_v61 = vpop.f32.mrf.mxu0 }
 0x254   :  { %v7033_v21 = vpop.f32.mrf.mxu1 }
 0x255   :  { %v7025_v3 = vpop.f32.mrf.mxu0 }
 0x256   :  { %v7037_v35 = vpop.f32.mrf.mxu1 }
 0x257   :  { %v7029_v12 = vpop.f32.mrf.mxu0 }
 0x258   :  { %v7039_v49 = vpop.f32.mrf.mxu1 }
 0x259   :  { %v7031_v18 = vpop.f32.mrf.mxu0 }
 0x25a   :  { %v7041_v7 = vpop.f32.mrf.mxu1 }
 0x25b   :  { %v7035_v27 = vpop.f32.mrf.mxu0 }
 0x25c   :  { %v7043_v31 = vpop.f32.mrf.mxu1 }
 0x25d   :  { %v402_v33 = vpop.f32.mrf.mxu0 }
 0x25e   :  { %v502_v53 = vpop.f32.mrf.mxu1 }
 0x25f   :  { %v406_v41 = vpop.f32.mrf.mxu0 }
 0x260   :  { %v504_v9 = vpop.f32.mrf.mxu1 }
 0x261   :  { %v408_v47 = vpop.f32.mrf.mxu0 }
 0x262   :  { %v508_v10 = vpop.f32.mrf.mxu1 }
 0x263   :  { %v412_v57 = vpop.f32.mrf.mxu0 }
 0x264   :  { %v510_v14 = vpop.f32.mrf.mxu1 }
 0x265   :  { %v414_v1 = vpop.f32.mrf.mxu0 }
 0x266   :  { %v514_v23 = vpop.f32.mrf.mxu1 }
 0x267   :  { %v418_v16 = vpop.f32.mrf.mxu0 }
 0x268   :  { %v516_v25 = vpop.f32.mrf.mxu1 }
 0x269   :  { %v420_v29 = vpop.f32.mrf.mxu0 }
 0x26b   :  { %v424_v43 = vpop.f32.mrf.mxu0 }
 0x26d   :  { %v426_v51 = vpop.f32.mrf.mxu0 }
 0x26f   :  { %v430_v59 = vpop.f32.mrf.mxu0 }
 0x271   :  { %v432_v63 = vpop.f32.mrf.mxu0 }
 0x272   :  { %531 = vmatprep.subr.mxu0 %v432_v63 }
 0x273   :  { %532 = vmatpush1.msra.mxu0 %v430_v59 }
 0x274   :  { %533 = vmatprep.subr.mxu0 %v426_v51 }
 0x275   :  { %534 = vmatpush1.msra.mxu0 %v424_v43 }
 0x276   :  { %535 = vmatprep.subr.mxu0 %v420_v29 }
 0x277   :  { %536 = vmatpush1.msra.mxu0 %v418_v16 }
 0x278   :  { %537 = vmatprep.subr.mxu0 %v414_v1 }
 0x279   :  { %538 = vmatpush1.msra.mxu0 %v412_v57 }
 0x27a   :  { %539 = vmatprep.subr.mxu0 %v408_v47 }
 0x27b   :  { %540 = vmatpush1.msra.mxu0 %v406_v41 }
 0x27c   :  { %541 = vmatprep.subr.mxu0 %v402_v33  ;;  %v520_v33 = vpop.f32.mrf.mxu1 }
 0x27d   :  { %542 = vmatpush1.msra.mxu0 %v7035_v27 }
 0x27e   :  { %543 = vmatprep.subr.mxu0 %v7031_v18 }
 0x27f   :  { %544 = vmatpush1.msra.mxu0 %v7029_v12 }
 0x280   :  { %545 = vmatprep.subr.mxu0 %v7025_v3  ;;  %v522_v3 = vpop.f32.mrf.mxu1 }
 0x281   :  { %546 = vmatpush1.msra.mxu0 %v7023_v61 }
 0x282   :  { %547 = vmatprep.subr.mxu0 %v7019_v54 }
 0x283   :  { %548 = vmatpush1.msra.mxu0 %v7017_v50  ;;  %v526_v50 = vpop.f32.mrf.mxu1 }
 0x284   :  { %549 = vmatprep.subr.mxu0 %v7013_v46 }
 0x285   :  { %550 = vmatpush1.msra.mxu0 %v7009_v42 }
 0x286   :  { %551 = vmatprep.subr.mxu0 %v7005_v38 }
 0x287   :  { %552 = vmatpush1.msra.mxu0 %v7001_v34  ;;  %v528_v34 = vpop.f32.mrf.mxu1 }
 0x288   :  { %553 = vmatprep.subr.mxu0 %v6997_v30 }
 0x289   :  { %554 = vmatpush1.msra.mxu0 %v6993_v26 }
 0x28a   :  { %555 = vmatprep.subr.mxu0 %v6989_v22 }
 0x28b   :  { %556 = vmatpush1.msra.mxu0 %v6985_v17 }
 0x28c   :  { %557 = vmatprep.subr.mxu0 %v6981_v13 }
 0x28d   :  { %558 = vmatpush1.msra.mxu0 %v6977_v8 }
 0x28e   :  { %559 = vmatprep.subr.mxu0 %v6973_v4  ;;  %v634_v4 = vld [vmem:[#allocation5 + $0x100] sm:$0xff] }
 0x28f   :  { %560 = vmatpush1.msra.mxu0 %v6969_v0  ;;  %v635_v0 = vld [vmem:[#allocation5 + $0x108] sm:$0xff] }
 0x290   :  { %561 = vmatprep.subr.mxu0 %v6965_v60  ;;  %v636_v60 = vld [vmem:[#allocation5 + $0x110] sm:$0xff] }
 0x291   :  { %562 = vmatpush1.msra.mxu0 %v6961_v56  ;;  %v637_v56 = vld [vmem:[#allocation5 + $0x118] sm:$0xff] }
 0x292   :  { %563 = vmatprep.subr.mxu0 %v528_v34  ;;  %738 = vmatprep.subr.mxu1 %v637_v56 }
 0x293   :  { %564 = vmatpush2.msra.mxu0 %v526_v50  ;;  %739 = vmatpush2.msra.mxu1 %v636_v60 }
 0x294   :  { %565 = vmatprep.subr.mxu0 %v522_v3  ;;  %740 = vmatprep.subr.mxu1 %v635_v0 }
 0x295   :  { %566 = vmatpush2.msra.mxu0 %v520_v33  ;;  %741 = vmatpush2.msra.mxu1 %v634_v4 }
 0x296   :  { %567 = vmatprep.subr.mxu0 %v516_v25 }
 0x297   :  { %568 = vmatpush2.msra.mxu0 %v514_v23 }
 0x298   :  { %569 = vmatprep.subr.mxu0 %v510_v14 }
 0x299   :  { %570 = vmatpush2.msra.mxu0 %v508_v10 }
 0x29a   :  { %571 = vmatprep.subr.mxu0 %v504_v9  ;;  %v8212_v9 = vmov 0.0  }
 0x29b   :  { %572 = vmatpush2.msra.mxu0 %v502_v53 }
 0x29c   :  { %573 = vmatprep.subr.mxu0 %v7043_v31 }
 0x29d   :  { %574 = vmatpush2.msra.mxu0 %v7041_v7 }
 0x29e   :  { %575 = vmatprep.subr.mxu0 %v7039_v49 }
 0x29f   :  { %576 = vmatpush2.msra.mxu0 %v7037_v35 }
 0x2a0   :  { %577 = vmatprep.subr.mxu0 %v7033_v21 }
 0x2a1   :  { %578 = vmatpush2.msra.mxu0 %v7027_v5 }
 0x2a2   :  { %579 = vmatprep.subr.mxu0 %v7021_v55 }
 0x2a3   :  { %580 = vmatpush2.msra.mxu0 %v7015_v48 }
 0x2a4   :  { %581 = vmatprep.subr.mxu0 %v7011_v44 }
 0x2a5   :  { %582 = vmatpush2.msra.mxu0 %v7007_v40 }
 0x2a6   :  { %583 = vmatprep.subr.mxu0 %v7003_v36 }
 0x2a7   :  { %584 = vmatpush2.msra.mxu0 %v6999_v32 }
 0x2a8   :  { %585 = vmatprep.subr.mxu0 %v6995_v28  ;;  %v753_v28 = vld [vmem:[#allocation2 + $0x18] sm:$0xff] }
 0x2a9   :  { %586 = vmatpush2.msra.mxu0 %v6991_v24 }
 0x2aa   :  { %587 = vmatprep.subr.mxu0 %v6987_v20  ;;  %v752_v20 = vld [vmem:[#allocation2 + $0x10] sm:$0xff] }
 0x2ab   :  { %588 = vmatpush2.msra.mxu0 %v6983_v15 }
 0x2ac   :  { %589 = vmatprep.subr.mxu0 %v6979_v11 }
 0x2ad   :  { %590 = vmatpush2.msra.mxu0 %v6975_v6 }
 0x2ae   :  { %591 = vmatprep.subr.mxu0 %v6971_v2 }
 0x2af   :  { %592 = vmatpush2.msra.mxu0 %v6967_v62  ;;  %v666_v62 = vld [vmem:[#allocation7] sm:$0x3] }
 0x2b0   :  { %593 = vmatprep.subr.mxu0 %v6963_v58  ;;  %v668_v58 = vlaneseq }
 0x2b1   :  { %594 = vmatpush2.msra.mxu0 %v6959_v52 }
 0x2b2   :  { %596 = vmatmul.mubr.f32.vlgmr.msra.gmra.mxu0 %v6888_v19  ;;  %v7091_v52 = vshrl.u32 %v668_v58, 7  ;;  %v1293_v58 = vld [vmem:[#allocation5 + $0x2f8] sm:$0xff] }
 0x2b3   :  { %997 = vmatprep.mubr.f32.mxu0 %v8212_v9 }
 0x2b4   :  { %8213 = vst [vmem:[#allocation16_spill] sm:$0xff] %v7091_v52  ;;  %v7094_v19 = vsub.s32 0, %v7091_v52  ;;  %v7097_v8 = vsub.s32 1, %v7091_v52 }
 0x2b6   :  { %8214 = vst [vmem:[#allocation17_spill] sm:$0xff] %v7094_v19  ;;  %8215 = vst [vmem:[#allocation18_spill] sm:$0xff] %v7097_v8  ;;  %v671_v11 = vrot.slane %v666_v62, %v7094_v19  ;;  %v675_v13 = vrot.slane %v666_v62, %v7097_v8  ;;  %v1292_v62 = vld [vmem:[#allocation5 + $0x2f0] sm:$0xff]  ;;  %v1298_v8 = vld [vmem:[#allocation5 + $0x320] sm:$0xff] }
 0x372   :  { %v597_v6 = vpop.f32.mrf.mxu0 }
 0x374   :  { %v599_v2 = vpop.f32.mrf.mxu0 }
 0x375   :  { %742 = vmatprep.mubr.f32.mxu1 %v599_v2 }
 0x376   :  { %743 = vmatmul.mubr.f32.vlgmr.msra.gmra.mxu1 %v597_v6 }
 0x377   :  { %1093 = vmatprep.mubr.f32.mxu1 %v8212_v9 }
 0x436   :  { %v744_v15 = vpop.f32.mrf.mxu1 }
 0x437   :  { %v745_v17 = vadd.f32 %v744_v15, %v671_v11  ;;  %v1291_v11 = vld [vmem:[#allocation5 + $0x2e8] sm:$0xff]  ;;  %v1290_v15 = vld [vmem:[#allocation5 + $0x2e0] sm:$0xff] }
 0x438   :  { %v746_v22 = vpop.f32.mrf.mxu1 }
 0x439   :  { %v749_v24 = vmax.f32 %v745_v17, 0.0  ;;  %v747_v26 = vadd.f32 %v746_v22, %v675_v13 }
 0x43b   :  { %v754_v30 = vadd.f32 %v752_v20, %v749_v24  ;;  %v750_v32 = vmax.f32 %v747_v26, 0.0  ;;  %v1289_v20 = vld [vmem:[#allocation5 + $0x2d8] sm:$0xff]  ;;  %v1288_v24 = vld [vmem:[#allocation5 + $0x2d0] sm:$0xff] }
 0x43d   :  { %v755_v36 = vadd.f32 %v753_v28, %v750_v32  ;;  %v756_v38 = vmul.f32 %v754_v30, %v754_v30  ;;  %v1287_v28 = vld [vmem:[#allocation5 + $0x2c8] sm:$0xff]  ;;  %v1286_v32 = vld [vmem:[#allocation5 + $0x2c0] sm:$0xff] }
 0x43f   :  { %v757_v40 = vmul.f32 %v755_v36, %v755_v36 }
 0x441   :  { %v758_v42 = vadd.f32 %v757_v40, %v756_v38  ;;  %v1285_v38 = vld [vmem:[#allocation5 + $0x2b8] sm:$0xff] }
 0x443   :  { %759 = vadd.xlane.f32.xlu1 %v758_v42  ;;  %v1284_v42 = vld [vmem:[#allocation5 + $0x2b0] sm:$0xff] }
 0x4cc   :  { %v760_v44 = vpop.xlane.xlu1 %759 }
 0x4cd   :  { %6660 = vrsqrt.f32 %v760_v44  ;;  %vm763_vm3 = vcmp.eq.f32.partialorder %v760_v44, inf  ;;  %v766_v54 = vand.u32 2147483648, %v760_v44  ;;  %vm765_vm4 = vcmp.eq.f32.partialorder %v760_v44, 0.0 }
 0x4da   :  { %v6661_v46 = vpop.eup %6660 }
 0x4db   :  { %v762_v48 = vmul.f32 %v6661_v46, %v760_v44  ;;  %v1283_v46 = vld [vmem:[#allocation5 + $0x2a8] sm:$0xff] }
 0x4dd   :  { %v764_v55 = vsel %vm763_vm3, %v760_v44, %v762_v48 }
 0x4de   :  { %v767_v61 = vsel %vm765_vm4, %v766_v54, %v764_v55  ;;  %v1282_v54 = vld [vmem:[#allocation5 + $0x2a0] sm:$0xff] }
 0x4df   :  { %v768_v5 = vadd.f32 1e-06, %v767_v61  ;;  %v1281_v61 = vld [vmem:[#allocation5 + $0x298] sm:$0xff] }
 0x4e1   :  { %6662 = vrcp.f32 %v768_v5 }
 0x4ee   :  { %v6663_v12 = vpop.eup %6662 }
 0x4ef   :  { %v7101_v18 = vmul.f32 %v6663_v12, %v755_v36  ;;  %v7103_v21 = vmul.f32 %v6663_v12, %v754_v30  ;;  %v1280_v12 = vld [vmem:[#allocation5 + $0x290] sm:$0xff] }
 0x4f1   :  { %805 = vxpose.xlu1.b32.start.end [1/1] (short) %v7101_v18, 128  ;;  %963 = vmatprep.subr.mxu0 %v7101_v18 }
 0x4f2   :  { %6634 = vmatprep.subr.mxu1 %v7101_v18  ;;  %773 = vxpose.xlu0.b32.start.end [1/1] (short) %v7103_v21, 128 }
 0x4f3   :  { %964 = vmatpush1.msra.mxu0 %v7103_v21  ;;  %6635 = vmatpush1.msra.mxu1 %v7103_v21 }
 0x4f4   :  { %1339 = vmatprep.subr.mxu1 %v1293_v58  ;;  %v1263_v58 = vld [vmem:[#allocation5 + $0x208] sm:$0xff] }
 0x56d   :  { %v821_v27 = vpop.trf.xlu1 }
 0x56e   :  { %v789_v35 = vpop.trf.xlu0  ;;  %6486 = vmatmul.mubr.msk.f32.vlgmr.msra.gmra.mxu1 %vm177_vm2, %v821_v27  ;;  %v1279_v27 = vld [vmem:[#allocation5 + $0x288] sm:$0xff] }
 0x56f   :  { %6470 = vmatmul.mubr.msk.f32.vlgmr.msra.gmra.mxu0 %vm177_vm2, %v789_v35  ;;  %1099 = vmatprep.mubr.f32.mxu1 %v8212_v9 }
 0x570   :  { %1003 = vmatprep.mubr.f32.mxu0 %v8212_v9  ;;  %1340 = vmatpush1.msra.mxu1 %v1292_v62 }
 0x571   :  { %v822_v41 = vpop.trf.xlu1  ;;  %1341 = vmatprep.subr.mxu1 %v1291_v11  ;;  %v1262_v11 = vld [vmem:[#allocation5 + $0x200] sm:$0xff] }
 0x572   :  { %v790_v47 = vpop.trf.xlu0  ;;  %6487 = vmatmul.mubr.msk.f32.gmra.mxu1 %vm177_vm2, %v822_v41  ;;  %v1278_v41 = vld [vmem:[#allocation5 + $0x280] sm:$0xff] }
 0x573   :  { %6471 = vmatmul.mubr.msk.f32.gmra.mxu0 %vm177_vm2, %v790_v47  ;;  %1105 = vmatprep.mubr.f32.mxu1 %v8212_v9 }
 0x574   :  { %1009 = vmatprep.mubr.f32.mxu0 %v8212_v9  ;;  %1342 = vmatpush1.msra.mxu1 %v1290_v15  ;;  %v1325_v15 = vld [vmem:[#allocation5 + $0x3f8] sm:$0xff] }
 0x575   :  { %v823_v49 = vpop.trf.xlu1  ;;  %1343 = vmatprep.subr.mxu1 %v1289_v20 }
 0x576   :  { %v791_v57 = vpop.trf.xlu0  ;;  %6488 = vmatmul.mubr.msk.f32.gmra.mxu1 %vm177_vm2, %v823_v49  ;;  %v1277_v49 = vld [vmem:[#allocation5 + $0x278] sm:$0xff] }
 0x577   :  { %6472 = vmatmul.mubr.msk.f32.gmra.mxu0 %vm177_vm2, %v791_v57  ;;  %1111 = vmatprep.mubr.f32.mxu1 %v8212_v9 }
 0x578   :  { %1015 = vmatprep.mubr.f32.mxu0 %v8212_v9  ;;  %1344 = vmatpush1.msra.mxu1 %v1288_v24 }
 0x579   :  { %v824_v1 = vpop.trf.xlu1  ;;  %1345 = vmatprep.subr.mxu1 %v1287_v28  ;;  %v1324_v28 = vld [vmem:[#allocation5 + $0x3f0] sm:$0xff] }
 0x57a   :  { %v792_v7 = vpop.trf.xlu0  ;;  %6489 = vmatmul.mubr.msk.f32.gmra.mxu1 %vm177_vm2, %v824_v1  ;;  %v1276_v1 = vld [vmem:[#allocation5 + $0x270] sm:$0xff] }
 0x57b   :  { %6473 = vmatmul.mubr.msk.f32.gmra.mxu0 %vm177_vm2, %v792_v7  ;;  %1117 = vmatprep.mubr.f32.mxu1 %v8212_v9 }
 0x57c   :  { %1021 = vmatprep.mubr.f32.mxu0 %v8212_v9  ;;  %1346 = vmatpush1.msra.mxu1 %v1286_v32  ;;  %v1323_v32 = vld [vmem:[#allocation5 + $0x3e8] sm:$0xff] }
 0x57d   :  { %v825_v16 = vpop.trf.xlu1  ;;  %1347 = vmatprep.subr.mxu1 %v1285_v38 }
 0x57e   :  { %v793_v29 = vpop.trf.xlu0  ;;  %6490 = vmatmul.mubr.msk.f32.gmra.mxu1 %vm177_vm2, %v825_v16  ;;  %v1275_v16 = vld [vmem:[#allocation5 + $0x268] sm:$0xff] }
 0x57f   :  { %6474 = vmatmul.mubr.msk.f32.gmra.mxu0 %vm177_vm2, %v793_v29  ;;  %1123 = vmatprep.mubr.f32.mxu1 %v8212_v9 }
 0x580   :  { %1027 = vmatprep.mubr.f32.mxu0 %v8212_v9  ;;  %1348 = vmatpush1.msra.mxu1 %v1284_v42  ;;  %v1322_v42 = vld [vmem:[#allocation5 + $0x3e0] sm:$0xff] }
 0x581   :  { %v826_v31 = vpop.trf.xlu1  ;;  %1349 = vmatprep.subr.mxu1 %v1283_v46  ;;  %v1321_v46 = vld [vmem:[#allocation5 + $0x3d8] sm:$0xff] }
 0x582   :  { %v794_v37 = vpop.trf.xlu0  ;;  %6491 = vmatmul.mubr.msk.f32.gmra.mxu1 %vm177_vm2, %v826_v31  ;;  %v1274_v31 = vld [vmem:[#allocation5 + $0x260] sm:$0xff] }
 0x583   :  { %6475 = vmatmul.mubr.msk.f32.gmra.mxu0 %vm177_vm2, %v794_v37  ;;  %1129 = vmatprep.mubr.f32.mxu1 %v8212_v9 }
 0x584   :  { %1033 = vmatprep.mubr.f32.mxu0 %v8212_v9  ;;  %1350 = vmatpush1.msra.mxu1 %v1282_v54 }
 0x585   :  { %v827_v39 = vpop.trf.xlu1  ;;  %1351 = vmatprep.subr.mxu1 %v1281_v61 }
 0x586   :  { %v795_v43 = vpop.trf.xlu0  ;;  %6492 = vmatmul.mubr.msk.f32.gmra.mxu1 %vm177_vm2, %v827_v39  ;;  %v1273_v39 = vld [vmem:[#allocation5 + $0x258] sm:$0xff] }
 0x587   :  { %6476 = vmatmul.mubr.msk.f32.gmra.mxu0 %vm177_vm2, %v795_v43  ;;  %1135 = vmatprep.mubr.f32.mxu1 %v8212_v9 }
 0x588   :  { %1039 = vmatprep.mubr.f32.mxu0 %v8212_v9  ;;  %1352 = vmatpush1.msra.mxu1 %v1280_v12  ;;  %v1320_v12 = vld [vmem:[#allocation5 + $0x3d0] sm:$0xff] }
 0x589   :  { %v828_v45 = vpop.trf.xlu1  ;;  %1353 = vmatprep.subr.mxu1 %v1279_v27  ;;  %v1319_v27 = vld [vmem:[#allocation5 + $0x3c8] sm:$0xff] }
 0x58a   :  { %v796_v51 = vpop.trf.xlu0  ;;  %6493 = vmatmul.mubr.msk.f32.gmra.mxu1 %vm177_vm2, %v828_v45  ;;  %v1272_v45 = vld [vmem:[#allocation5 + $0x250] sm:$0xff] }
 0x58b   :  { %6477 = vmatmul.mubr.msk.f32.gmra.mxu0 %vm177_vm2, %v796_v51  ;;  %1141 = vmatprep.mubr.f32.mxu1 %v8212_v9 }
 0x58c   :  { %1045 = vmatprep.mubr.f32.mxu0 %v8212_v9  ;;  %1354 = vmatpush1.msra.mxu1 %v1278_v41 }
 0x58d   :  { %v829_v53 = vpop.trf.xlu1  ;;  %1355 = vmatprep.subr.mxu1 %v1277_v49  ;;  %v1318_v49 = vld [vmem:[#allocation5 + $0x3c0] sm:$0xff] }
 0x58e   :  { %v797_v59 = vpop.trf.xlu0  ;;  %6494 = vmatmul.mubr.msk.f32.gmra.mxu1 %vm177_vm2, %v829_v53  ;;  %v1271_v53 = vld [vmem:[#allocation5 + $0x248] sm:$0xff] }
 0x58f   :  { %6478 = vmatmul.mubr.msk.f32.gmra.mxu0 %vm177_vm2, %v797_v59  ;;  %1147 = vmatprep.mubr.f32.mxu1 %v8212_v9 }
 0x590   :  { %1051 = vmatprep.mubr.f32.mxu0 %v8212_v9  ;;  %1356 = vmatpush1.msra.mxu1 %v1276_v1  ;;  %v1317_v1 = vld [vmem:[#allocation5 + $0x3b8] sm:$0xff] }
 0x591   :  { %v830_v63 = vpop.trf.xlu1  ;;  %1357 = vmatprep.subr.mxu1 %v1275_v16 }
 0x592   :  { %v798_v10 = vpop.trf.xlu0  ;;  %6495 = vmatmul.mubr.msk.f32.gmra.mxu1 %vm177_vm2, %v830_v63  ;;  %v1270_v63 = vld [vmem:[#allocation5 + $0x240] sm:$0xff] }
 0x593   :  { %6479 = vmatmul.mubr.msk.f32.gmra.mxu0 %vm177_vm2, %v798_v10  ;;  %1153 = vmatprep.mubr.f32.mxu1 %v8212_v9 }
 0x594   :  { %1057 = vmatprep.mubr.f32.mxu0 %v8212_v9  ;;  %1358 = vmatpush1.msra.mxu1 %v1274_v31 }
 0x595   :  { %v831_v14 = vpop.trf.xlu1  ;;  %1359 = vmatprep.subr.mxu1 %v1273_v39  ;;  %v1316_v39 = vld [vmem:[#allocation5 + $0x3b0] sm:$0xff] }
 0x596   :  { %v799_v23 = vpop.trf.xlu0  ;;  %6496 = vmatmul.mubr.msk.f32.gmra.mxu1 %vm177_vm2, %v831_v14  ;;  %v1269_v14 = vld [vmem:[#allocation5 + $0x238] sm:$0xff] }
 0x597   :  { %6480 = vmatmul.mubr.msk.f32.gmra.mxu0 %vm177_vm2, %v799_v23  ;;  %1159 = vmatprep.mubr.f32.mxu1 %v8212_v9 }
 0x598   :  { %1063 = vmatprep.mubr.f32.mxu0 %v8212_v9  ;;  %1360 = vmatpush1.msra.mxu1 %v1272_v45  ;;  %v1315_v45 = vld [vmem:[#allocation5 + $0x3a8] sm:$0xff] }
 0x599   :  { %v832_v25 = vpop.trf.xlu1  ;;  %1361 = vmatprep.subr.mxu1 %v1271_v53 }
 0x59a   :  { %v800_v33 = vpop.trf.xlu0  ;;  %6497 = vmatmul.mubr.msk.f32.gmra.mxu1 %vm177_vm2, %v832_v25  ;;  %v1268_v25 = vld [vmem:[#allocation5 + $0x230] sm:$0xff] }
 0x59b   :  { %6481 = vmatmul.mubr.msk.f32.gmra.mxu0 %vm177_vm2, %v800_v33  ;;  %1165 = vmatprep.mubr.f32.mxu1 %v8212_v9 }
 0x59c   :  { %1069 = vmatprep.mubr.f32.mxu0 %v8212_v9  ;;  %1362 = vmatpush1.msra.mxu1 %v1270_v63  ;;  %v1314_v63 = vld [vmem:[#allocation5 + $0x3a0] sm:$0xff] }
 0x59d   :  { %v833_v3 = vpop.trf.xlu1  ;;  %1363 = vmatprep.subr.mxu1 %v1269_v14  ;;  %v1313_v14 = vld [vmem:[#allocation5 + $0x398] sm:$0xff] }
 0x59e   :  { %v801_v50 = vpop.trf.xlu0  ;;  %6498 = vmatmul.mubr.msk.f32.gmra.mxu1 %vm177_vm2, %v833_v3  ;;  %v1267_v3 = vld [vmem:[#allocation5 + $0x228] sm:$0xff] }
 0x59f   :  { %6482 = vmatmul.mubr.msk.f32.gmra.mxu0 %vm177_vm2, %v801_v50  ;;  %1171 = vmatprep.mubr.f32.mxu1 %v8212_v9 }
 0x5a0   :  { %1075 = vmatprep.mubr.f32.mxu0 %v8212_v9  ;;  %1364 = vmatpush1.msra.mxu1 %v1268_v25 }
 0x5a1   :  { %v834_v34 = vpop.trf.xlu1  ;;  %1365 = vmatprep.subr.mxu1 %v1267_v3 }
 0x5a2   :  { %v802_v56 = vpop.trf.xlu0  ;;  %6499 = vmatmul.mubr.msk.f32.gmra.mxu1 %vm177_vm2, %v834_v34  ;;  %v1266_v34 = vld [vmem:[#allocation5 + $0x220] sm:$0xff] }
 0x5a3   :  { %6483 = vmatmul.mubr.msk.f32.gmra.mxu0 %vm177_vm2, %v802_v56  ;;  %1177 = vmatprep.mubr.f32.mxu1 %v8212_v9 }
 0x5a4   :  { %1081 = vmatprep.mubr.f32.mxu0 %v8212_v9  ;;  %1366 = vmatpush1.msra.mxu1 %v1266_v34  ;;  %v1312_v34 = vld [vmem:[#allocation5 + $0x390] sm:$0xff] }
 0x5a5   :  { %v835_v60 = vpop.trf.xlu1 }
 0x5a6   :  { %v803_v0 = vpop.trf.xlu0  ;;  %6500 = vmatmul.mubr.msk.f32.gmra.mxu1 %vm177_vm2, %v835_v60  ;;  %v1265_v60 = vld [vmem:[#allocation5 + $0x218] sm:$0xff] }
 0x5a7   :  { %6484 = vmatmul.mubr.msk.f32.gmra.mxu0 %vm177_vm2, %v803_v0  ;;  %1183 = vmatprep.mubr.f32.mxu1 %v8212_v9 }
 0x5a8   :  { %1087 = vmatprep.mubr.f32.mxu0 %v8212_v9  ;;  %1367 = vmatprep.subr.mxu1 %v1265_v60  ;;  %v1311_v60 = vld [vmem:[#allocation5 + $0x388] sm:$0xff] }
 0x5a9   :  { %v836_v4 = vpop.trf.xlu1 }
 0x5aa   :  { %v804_v6 = vpop.trf.xlu0  ;;  %6501 = vmatmul.mubr.msk.f32.gmra.mxu1 %vm177_vm2, %v836_v4  ;;  %v1264_v4 = vld [vmem:[#allocation5 + $0x210] sm:$0xff] }
 0x5ab   :  { %6485 = vmatmul.mubr.msk.f32.gmra.mxu0 %vm177_vm2, %v804_v6  ;;  %1368 = vmatpush1.msra.mxu1 %v1264_v4 }
 0x5ac   :  { %1254 = vmatprep.mubr.f32.mxu0 %v7101_v18  ;;  %1369 = vmatprep.subr.mxu1 %v1263_v58  ;;  %v1310_v58 = vld [vmem:[#allocation5 + $0x380] sm:$0xff] }
 0x5ad   :  { %1370 = vmatpush1.msra.mxu1 %v1262_v11  ;;  %v1309_v11 = vld [vmem:[#allocation5 + $0x378] sm:$0xff] }
 0x5ae   :  { %1371 = vmatprep.subr.mxu1 %v1325_v15 }
 0x5af   :  { %1372 = vmatpush2.msra.mxu1 %v1324_v28 }
 0x5b0   :  { %1373 = vmatprep.subr.mxu1 %v1323_v32  ;;  %v1308_v32 = vld [vmem:[#allocation5 + $0x370] sm:$0xff] }
 0x5b1   :  { %1374 = vmatpush2.msra.mxu1 %v1322_v42  ;;  %v1307_v42 = vld [vmem:[#allocation5 + $0x368] sm:$0xff] }
 0x5b2   :  { %1375 = vmatprep.subr.mxu1 %v1321_v46 }
 0x5b3   :  { %1376 = vmatpush2.msra.mxu1 %v1320_v12  ;;  %v1306_v12 = vld [vmem:[#allocation5 + $0x360] sm:$0xff] }
 0x5b4   :  { %1377 = vmatprep.subr.mxu1 %v1319_v27  ;;  %v1305_v27 = vld [vmem:[#allocation5 + $0x358] sm:$0xff] }
 0x5b5   :  { %1378 = vmatpush2.msra.mxu1 %v1318_v49 }
 0x5b6   :  { %1379 = vmatprep.subr.mxu1 %v1317_v1 }
 0x5b7   :  { %1380 = vmatpush2.msra.mxu1 %v1316_v39  ;;  %v1304_v39 = vld [vmem:[#allocation5 + $0x350] sm:$0xff] }
 0x5b8   :  { %1381 = vmatprep.subr.mxu1 %v1315_v45  ;;  %v1303_v45 = vld [vmem:[#allocation5 + $0x348] sm:$0xff] }
 0x5b9   :  { %1382 = vmatpush2.msra.mxu1 %v1314_v63 }
 0x5ba   :  { %1383 = vmatprep.subr.mxu1 %v1313_v14  ;;  %v1302_v14 = vld [vmem:[#allocation5 + $0x340] sm:$0xff] }
 0x5bb   :  { %1384 = vmatpush2.msra.mxu1 %v1312_v34  ;;  %v1301_v34 = vld [vmem:[#allocation5 + $0x338] sm:$0xff] }
 0x5bc   :  { %1385 = vmatprep.subr.mxu1 %v1311_v60 }
 0x5bd   :  { %1386 = vmatpush2.msra.mxu1 %v1310_v58 }
 0x5be   :  { %1387 = vmatprep.subr.mxu1 %v1309_v11  ;;  %v1300_v11 = vld [vmem:[#allocation5 + $0x330] sm:$0xff] }
 0x5bf   :  { %1388 = vmatpush2.msra.mxu1 %v1308_v32  ;;  %v1299_v32 = vld [vmem:[#allocation5 + $0x328] sm:$0xff] }
 0x5c0   :  { %1389 = vmatprep.subr.mxu1 %v1307_v42 }
 0x5c1   :  { %1390 = vmatpush2.msra.mxu1 %v1306_v12 }
 0x5c2   :  { %1391 = vmatprep.subr.mxu1 %v1305_v27 }
 0x5c3   :  { %1392 = vmatpush2.msra.mxu1 %v1304_v39 }
 0x5c4   :  { %1393 = vmatprep.subr.mxu1 %v1303_v45 }
 0x5c5   :  { %1394 = vmatpush2.msra.mxu1 %v1302_v14 }
 0x5c6   :  { %1395 = vmatprep.subr.mxu1 %v1301_v34 }
 0x5c7   :  { %1396 = vmatpush2.msra.mxu1 %v1300_v11 }
 0x5c8   :  { %1397 = vmatprep.subr.mxu1 %v1299_v32 }
 0x5c9   :  { %1398 = vmatpush2.msra.mxu1 %v1298_v8 }
 0x62e   :  { %v7174_v2 = vpop.f32.mrf.mxu1 }
 0x62f   :  { %v7176_v13 = vpop.f32.mrf.mxu0 }
 0x630   :  { %v7178_v17 = vpop.f32.mrf.mxu1 }
 0x631   :  { %v7180_v22 = vpop.f32.mrf.mxu0 }
 0x632   :  { %v7182_v26 = vpop.f32.mrf.mxu1 }
 0x633   :  { %v7184_v30 = vpop.f32.mrf.mxu0 }
 0x634   :  { %v7186_v36 = vpop.f32.mrf.mxu1 }
 0x635   :  { %v7188_v40 = vpop.f32.mrf.mxu0 }
 0x636   :  { %v7190_v44 = vpop.f32.mrf.mxu1 }
 0x637   :  { %v7192_v48 = vpop.f32.mrf.mxu0 }
 0x638   :  { %v7194_v55 = vpop.f32.mrf.mxu1 }
 0x639   :  { %v7196_v5 = vpop.f32.mrf.mxu0 }
 0x63a   :  { %v7198_v18 = vpop.f32.mrf.mxu1 }
 0x63b   :  { %v7200_v35 = vpop.f32.mrf.mxu0 }
 0x63c   :  { %v7202_v47 = vpop.f32.mrf.mxu1 }
 0x63d   :  { %v7204_v57 = vpop.f32.mrf.mxu0 }
 0x63e   :  { %v7206_v7 = vpop.f32.mrf.mxu1 }
 0x63f   :  { %v7208_v29 = vpop.f32.mrf.mxu0 }
 0x640   :  { %v7210_v37 = vpop.f32.mrf.mxu1 }
 0x641   :  { %v7212_v43 = vpop.f32.mrf.mxu0 }
 0x642   :  { %v7214_v51 = vpop.f32.mrf.mxu1 }
 0x643   :  { %v7216_v59 = vpop.f32.mrf.mxu0 }
 0x644   :  { %v7218_v10 = vpop.f32.mrf.mxu1 }
 0x645   :  { %v7220_v23 = vpop.f32.mrf.mxu0 }
 0x646   :  { %v7222_v33 = vpop.f32.mrf.mxu1 }
 0x647   :  { %v7224_v50 = vpop.f32.mrf.mxu0 }
 0x648   :  { %v7226_v56 = vpop.f32.mrf.mxu1 }
 0x649   :  { %v7228_v0 = vpop.f32.mrf.mxu0 }
 0x64a   :  { %v7230_v6 = vpop.f32.mrf.mxu1 }
 0x64b   :  { %v7232_v62 = vpop.f32.mrf.mxu0 }
 0x64c   :  { %v7236_v24 = vpop.f32.mrf.mxu1 }
 0x64d   :  { %v7234_v20 = vpop.f32.mrf.mxu0 }
 0x64e   :  { %v7242_v61 = vpop.f32.mrf.mxu1 }
 0x64f   :  { %v7238_v38 = vpop.f32.mrf.mxu0 }
 0x650   :  { %v7248_v31 = vpop.f32.mrf.mxu1 }
 0x651   :  { %v7240_v54 = vpop.f32.mrf.mxu0 }
 0x652   :  { %v7252_v3 = vpop.f32.mrf.mxu1 }
 0x653   :  { %v7244_v41 = vpop.f32.mrf.mxu0 }
 0x654   :  { %v7254_v28 = vpop.f32.mrf.mxu1 }
 0x655   :  { %v7246_v16 = vpop.f32.mrf.mxu0 }
 0x656   :  { %v7256_v1 = vpop.f32.mrf.mxu1 }
 0x657   :  { %v7250_v53 = vpop.f32.mrf.mxu0 }
 0x658   :  { %v7258_v58 = vpop.f32.mrf.mxu1 }
 0x659   :  { %v1061_v25 = vpop.f32.mrf.mxu0 }
 0x65a   :  { %v1161_v19 = vpop.f32.mrf.mxu1 }
 0x65b   :  { %v1065_v4 = vpop.f32.mrf.mxu0 }
 0x65c   :  { %v1163_v9 = vpop.f32.mrf.mxu1 }
 0x65d   :  { %v1067_v15 = vpop.f32.mrf.mxu0 }
 0x65e   :  { %v1167_v39 = vpop.f32.mrf.mxu1 }
 0x65f   :  { %v1071_v46 = vpop.f32.mrf.mxu0 }
 0x660   :  { %v1169_v45 = vpop.f32.mrf.mxu1 }
 0x661   :  { %v1073_v49 = vpop.f32.mrf.mxu0 }
 0x662   :  { %v1173_v14 = vpop.f32.mrf.mxu1 }
 0x663   :  { %v1077_v63 = vpop.f32.mrf.mxu0 }
 0x665   :  { %v1079_v60 = vpop.f32.mrf.mxu0 }
 0x667   :  { %v1083_v52 = vpop.f32.mrf.mxu0 }
 0x669   :  { %v1085_v42 = vpop.f32.mrf.mxu0 }
 0x66b   :  { %v1089_v12 = vpop.f32.mrf.mxu0 }
 0x66d   :  { %v1091_v27 = vpop.f32.mrf.mxu0 }
 0x66e   :  { %1190 = vmatprep.subr.mxu0 %v1091_v27 }
 0x66f   :  { %1191 = vmatpush1.msra.mxu0 %v1089_v12 }
 0x670   :  { %1192 = vmatprep.subr.mxu0 %v1085_v42 }
 0x671   :  { %1193 = vmatpush1.msra.mxu0 %v1083_v52  ;;  %v1175_v52 = vpop.f32.mrf.mxu1 }
 0x672   :  { %1194 = vmatprep.subr.mxu0 %v1079_v60 }
 0x673   :  { %1195 = vmatpush1.msra.mxu0 %v1077_v63  ;;  %v1179_v8 = vpop.f32.mrf.mxu1 }
 0x674   :  { %1196 = vmatprep.subr.mxu0 %v1073_v49 }
 0x675   :  { %1197 = vmatpush1.msra.mxu0 %v1071_v46 }
 0x676   :  { %1198 = vmatprep.subr.mxu0 %v1067_v15 }
 0x677   :  { %1199 = vmatpush1.msra.mxu0 %v1065_v4 }
 0x678   :  { %1200 = vmatprep.subr.mxu0 %v1061_v25 }
 0x679   :  { %1201 = vmatpush1.msra.mxu0 %v7250_v53 }
 0x67a   :  { %1202 = vmatprep.subr.mxu0 %v7246_v16 }
 0x67b   :  { %1203 = vmatpush1.msra.mxu0 %v7244_v41 }
 0x67c   :  { %1204 = vmatprep.subr.mxu0 %v7240_v54  ;;  %v1181_v54 = vpop.f32.mrf.mxu1 }
 0x67d   :  { %1205 = vmatpush1.msra.mxu0 %v7238_v38 }
 0x67e   :  { %1206 = vmatprep.subr.mxu0 %v7234_v20 }
 0x67f   :  { %1207 = vmatpush1.msra.mxu0 %v7232_v62  ;;  %v1185_v62 = vpop.f32.mrf.mxu1 }
 0x680   :  { %1208 = vmatprep.subr.mxu0 %v7228_v0 }
 0x681   :  { %1209 = vmatpush1.msra.mxu0 %v7224_v50 }
 0x682   :  { %1210 = vmatprep.subr.mxu0 %v7220_v23 }
 0x683   :  { %1211 = vmatpush1.msra.mxu0 %v7216_v59  ;;  %v1187_v59 = vpop.f32.mrf.mxu1 }
 0x684   :  { %1212 = vmatprep.subr.mxu0 %v7212_v43 }
 0x685   :  { %1213 = vmatpush1.msra.mxu0 %v7208_v29 }
 0x686   :  { %1214 = vmatprep.subr.mxu0 %v7204_v57  ;;  %v1414_v57 = vld [vmem:[#allocation2 + $0x28] sm:$0xff] }
 0x687   :  { %1215 = vmatpush1.msra.mxu0 %v7200_v35 }
 0x688   :  { %1216 = vmatprep.subr.mxu0 %v7196_v5  ;;  %v1413_v5 = vld [vmem:[#allocation2 + $0x20] sm:$0xff] }
 0x689   :  { %1217 = vmatpush1.msra.mxu0 %v7192_v48 }
 0x68a   :  { %1218 = vmatprep.subr.mxu0 %v7188_v40 }
 0x68b   :  { %1219 = vmatpush1.msra.mxu0 %v7184_v30  ;;  %v1294_v30 = vld [vmem:[#allocation5 + $0x300] sm:$0xff] }
 0x68c   :  { %1220 = vmatprep.subr.mxu0 %v7180_v22  ;;  %v1295_v22 = vld [vmem:[#allocation5 + $0x308] sm:$0xff] }
 0x68d   :  { %1221 = vmatpush1.msra.mxu0 %v7176_v13  ;;  %v1296_v13 = vld [vmem:[#allocation5 + $0x310] sm:$0xff] }
 0x68e   :  { %1222 = vmatprep.subr.mxu0 %v1187_v59 }
 0x68f   :  { %1223 = vmatpush2.msra.mxu0 %v1185_v62 }
 0x690   :  { %1224 = vmatprep.subr.mxu0 %v1181_v54 }
 0x691   :  { %1225 = vmatpush2.msra.mxu0 %v1179_v8 }
 0x692   :  { %1226 = vmatprep.subr.mxu0 %v1175_v52 }
 0x693   :  { %1227 = vmatpush2.msra.mxu0 %v1173_v14 }
 0x694   :  { %1228 = vmatprep.subr.mxu0 %v1169_v45 }
 0x695   :  { %1229 = vmatpush2.msra.mxu0 %v1167_v39 }
 0x696   :  { %1230 = vmatprep.subr.mxu0 %v1163_v9  ;;  %v8216_v9 = vmov 0.0  }
 0x697   :  { %1231 = vmatpush2.msra.mxu0 %v1161_v19  ;;  %v1297_v19 = vld [vmem:[#allocation5 + $0x318] sm:$0xff] }
 0x698   :  { %1232 = vmatprep.subr.mxu0 %v7258_v58  ;;  %1399 = vmatprep.subr.mxu1 %v1297_v19 }
 0x699   :  { %1233 = vmatpush2.msra.mxu0 %v7256_v1  ;;  %1400 = vmatpush2.msra.mxu1 %v1296_v13 }
 0x69a   :  { %1234 = vmatprep.subr.mxu0 %v7254_v28  ;;  %1401 = vmatprep.subr.mxu1 %v1295_v22 }
 0x69b   :  { %1235 = vmatpush2.msra.mxu0 %v7252_v3  ;;  %1402 = vmatpush2.msra.mxu1 %v1294_v30 }
 0x69c   :  { %1236 = vmatprep.subr.mxu0 %v7248_v31 }
 0x69d   :  { %1237 = vmatpush2.msra.mxu0 %v7242_v61 }
 0x69e   :  { %1238 = vmatprep.subr.mxu0 %v7236_v24 }
 0x69f   :  { %1239 = vmatpush2.msra.mxu0 %v7230_v6 }
 0x6a0   :  { %1240 = vmatprep.subr.mxu0 %v7226_v56 }
 0x6a1   :  { %1241 = vmatpush2.msra.mxu0 %v7222_v33 }
 0x6a2   :  { %1242 = vmatprep.subr.mxu0 %v7218_v10 }
 0x6a3   :  { %1243 = vmatpush2.msra.mxu0 %v7214_v51 }
 0x6a4   :  { %1244 = vmatprep.subr.mxu0 %v7210_v37 }
 0x6a5   :  { %1245 = vmatpush2.msra.mxu0 %v7206_v7 }
 0x6a6   :  { %1246 = vmatprep.subr.mxu0 %v7202_v47 }
 0x6a7   :  { %1247 = vmatpush2.msra.mxu0 %v7198_v18 }
 0x6a8   :  { %1248 = vmatprep.subr.mxu0 %v7194_v55 }
 0x6a9   :  { %1249 = vmatpush2.msra.mxu0 %v7190_v44 }
 0x6aa   :  { %1250 = vmatprep.subr.mxu0 %v7186_v36 }
 0x6ab   :  { %1251 = vmatpush2.msra.mxu0 %v7182_v26 }
 0x6ac   :  { %1252 = vmatprep.subr.mxu0 %v7178_v17  ;;  %v1327_v17 = vld [vmem:[#allocation7 + $0x2] sm:$0x3] }
 0x6ad   :  { %1253 = vmatpush2.msra.mxu0 %v7174_v2  ;;  %v8217_v2 = vld [vmem:[#allocation17_spill] sm:$0xff] }
 0x6ae   :  { %1255 = vmatmul.mubr.f32.vlgmr.msra.gmra.mxu0 %v7103_v21  ;;  %v1332_v26 = vrot.slane %v1327_v17, %v8217_v2  ;;  %v8218_v21 = vld [vmem:[#allocation18_spill] sm:$0xff] }
 0x6af   :  { %1658 = vmatprep.mubr.f32.mxu0 %v8216_v9  ;;  %v1336_v44 = vrot.slane %v1327_v17, %v8218_v21 }
 0x76e   :  { %v1256_v40 = vpop.f32.mrf.mxu0 }
 0x770   :  { %v1258_v36 = vpop.f32.mrf.mxu0 }
 0x771   :  { %1403 = vmatprep.mubr.f32.mxu1 %v1258_v36 }
 0x772   :  { %1404 = vmatmul.mubr.f32.vlgmr.msra.gmra.mxu1 %v1256_v40 }
 0x773   :  { %1754 = vmatprep.mubr.f32.mxu1 %v8216_v9 }
 0x832   :  { %v1405_v48 = vpop.f32.mrf.mxu1 }
 0x833   :  { %v1406_v55 = vadd.f32 %v1405_v48, %v1332_v26 }
 0x834   :  { %v1407_v18 = vpop.f32.mrf.mxu1 }
 0x835   :  { %v1410_v35 = vmax.f32 %v1406_v55, 0.0  ;;  %v1408_v47 = vadd.f32 %v1407_v18, %v1336_v44 }
 0x837   :  { %v1415_v7 = vadd.f32 %v1413_v5, %v1410_v35  ;;  %v1411_v29 = vmax.f32 %v1408_v47, 0.0 }
 0x839   :  { %v1416_v37 = vadd.f32 %v1414_v57, %v1411_v29  ;;  %v1417_v43 = vmul.f32 %v1415_v7, %v1415_v7 }
 0x83b   :  { %v1418_v51 = vmul.f32 %v1416_v37, %v1416_v37 }
 0x83d   :  { %v1419_v10 = vadd.f32 %v1418_v51, %v1417_v43 }
 0x83f   :  { %1420 = vadd.xlane.f32.xlu0 %v1419_v10 }
 0x8c8   :  { %v1421_v23 = vpop.xlane.xlu0 %1420 }
 0x8c9   :  { %6664 = vrsqrt.f32 %v1421_v23  ;;  %vm1424_vm5 = vcmp.eq.f32.partialorder %v1421_v23, inf  ;;  %v1427_v56 = vand.u32 2147483648, %v1421_v23  ;;  %vm1426_vm6 = vcmp.eq.f32.partialorder %v1421_v23, 0.0 }
 0x8d6   :  { %v6665_v33 = vpop.eup %6664 }
 0x8d7   :  { %v1423_v50 = vmul.f32 %v6665_v33, %v1421_v23 }
 0x8d9   :  { %v1425_v0 = vsel %vm1424_vm5, %v1421_v23, %v1423_v50 }
 0x8da   :  { %v1428_v6 = vsel %vm1426_vm6, %v1427_v56, %v1425_v0 }
 0x8db   :  { %v1429_v20 = vadd.f32 1e-06, %v1428_v6 }
 0x8dd   :  { %6666 = vrcp.f32 %v1429_v20 }
 0x8ea   :  { %v6667_v24 = vpop.eup %6666 }
 0x8eb   :  { %v7308_v38 = vmul.f32 %v6667_v24, %v1416_v37  ;;  %v7310_v61 = vmul.f32 %v6667_v24, %v1415_v7 }
 0x8ed   :  { %1466 = vxpose.xlu0.b32.start.end [1/1] (short) %v7308_v38, 128  ;;  %1624 = vmatprep.subr.mxu0 %v7308_v38 }
 0x8ee   :  { %6636 = vmatprep.subr.mxu1 %v7308_v38  ;;  %1434 = vxpose.xlu1.b32.start.end [1/1] (short) %v7310_v61, 128 }
 0x8ef   :  { %1625 = vmatpush1.msra.mxu0 %v7310_v61  ;;  %6637 = vmatpush1.msra.mxu1 %v7310_v61 }
 0x969   :  { %v1482_v41 = vpop.trf.xlu0 }
 0x96a   :  { %v1450_v16 = vpop.trf.xlu1  ;;  %6518 = vmatmul.mubr.msk.f32.vlgmr.msra.gmra.mxu1 %vm177_vm2, %v1482_v41 }
 0x96b   :  { %6502 = vmatmul.mubr.msk.f32.vlgmr.msra.gmra.mxu0 %vm177_vm2, %v1450_v16  ;;  %1760 = vmatprep.mubr.f32.mxu1 %v8216_v9 }
 0x96c   :  { %1664 = vmatprep.mubr.f32.mxu0 %v8216_v9 }
 0x96d   :  { %v1483_v31 = vpop.trf.xlu0 }
 0x96e   :  { %v1451_v53 = vpop.trf.xlu1  ;;  %6519 = vmatmul.mubr.msk.f32.gmra.mxu1 %vm177_vm2, %v1483_v31 }
 0x96f   :  { %6503 = vmatmul.mubr.msk.f32.gmra.mxu0 %vm177_vm2, %v1451_v53  ;;  %1766 = vmatprep.mubr.f32.mxu1 %v8216_v9 }
 0x970   :  { %1670 = vmatprep.mubr.f32.mxu0 %v8216_v9 }
 0x971   :  { %v1484_v25 = vpop.trf.xlu0 }
 0x972   :  { %v1452_v3 = vpop.trf.xlu1  ;;  %6520 = vmatmul.mubr.msk.f32.gmra.mxu1 %vm177_vm2, %v1484_v25 }
 0x973   :  { %6504 = vmatmul.mubr.msk.f32.gmra.mxu0 %vm177_vm2, %v1452_v3  ;;  %1772 = vmatprep.mubr.f32.mxu1 %v8216_v9 }
 0x974   :  { %1676 = vmatprep.mubr.f32.mxu0 %v8216_v9 }
 0x975   :  { %v1485_v4 = vpop.trf.xlu0 }
 0x976   :  { %v1453_v15 = vpop.trf.xlu1  ;;  %6521 = vmatmul.mubr.msk.f32.gmra.mxu1 %vm177_vm2, %v1485_v4 }
 0x977   :  { %6505 = vmatmul.mubr.msk.f32.gmra.mxu0 %vm177_vm2, %v1453_v15  ;;  %1778 = vmatprep.mubr.f32.mxu1 %v8216_v9 }
 0x978   :  { %1682 = vmatprep.mubr.f32.mxu0 %v8216_v9 }
 0x979   :  { %v1486_v28 = vpop.trf.xlu0 }
 0x97a   :  { %v1454_v46 = vpop.trf.xlu1  ;;  %6522 = vmatmul.mubr.msk.f32.gmra.mxu1 %vm177_vm2, %v1486_v28 }
 0x97b   :  { %6506 = vmatmul.mubr.msk.f32.gmra.mxu0 %vm177_vm2, %v1454_v46  ;;  %1784 = vmatprep.mubr.f32.mxu1 %v8216_v9 }
 0x97c   :  { %1688 = vmatprep.mubr.f32.mxu0 %v8216_v9 }
 0x97d   :  { %v1487_v49 = vpop.trf.xlu0 }
 0x97e   :  { %v1455_v1 = vpop.trf.xlu1  ;;  %6523 = vmatmul.mubr.msk.f32.gmra.mxu1 %vm177_vm2, %v1487_v49 }
 0x97f   :  { %6507 = vmatmul.mubr.msk.f32.gmra.mxu0 %vm177_vm2, %v1455_v1  ;;  %1790 = vmatprep.mubr.f32.mxu1 %v8216_v9 }
 0x980   :  { %1694 = vmatprep.mubr.f32.mxu0 %v8216_v9 }
 0x981   :  { %v1488_v63 = vpop.trf.xlu0 }
 0x982   :  { %v1456_v34 = vpop.trf.xlu1  ;;  %6524 = vmatmul.mubr.msk.f32.gmra.mxu1 %vm177_vm2, %v1488_v63 }
 0x983   :  { %6508 = vmatmul.mubr.msk.f32.gmra.mxu0 %vm177_vm2, %v1456_v34  ;;  %1796 = vmatprep.mubr.f32.mxu1 %v8216_v9 }
 0x984   :  { %1700 = vmatprep.mubr.f32.mxu0 %v8216_v9 }
 0x985   :  { %v1489_v60 = vpop.trf.xlu0 }
 0x986   :  { %v1457_v58 = vpop.trf.xlu1  ;;  %6525 = vmatmul.mubr.msk.f32.gmra.mxu1 %vm177_vm2, %v1489_v60 }
 0x987   :  { %6509 = vmatmul.mubr.msk.f32.gmra.mxu0 %vm177_vm2, %v1457_v58  ;;  %1802 = vmatprep.mubr.f32.mxu1 %v8216_v9 }
 0x988   :  { %1706 = vmatprep.mubr.f32.mxu0 %v8216_v9 }
 0x989   :  { %v1490_v11 = vpop.trf.xlu0 }
 0x98a   :  { %v1458_v32 = vpop.trf.xlu1  ;;  %6526 = vmatmul.mubr.msk.f32.gmra.mxu1 %vm177_vm2, %v1490_v11 }
 0x98b   :  { %6510 = vmatmul.mubr.msk.f32.gmra.mxu0 %vm177_vm2, %v1458_v32  ;;  %1808 = vmatprep.mubr.f32.mxu1 %v8216_v9 }
 0x98c   :  { %1712 = vmatprep.mubr.f32.mxu0 %v8216_v9 }
 0x98d   :  { %v1491_v42 = vpop.trf.xlu0 }
 0x98e   :  { %v1459_v12 = vpop.trf.xlu1  ;;  %6527 = vmatmul.mubr.msk.f32.gmra.mxu1 %vm177_vm2, %v1491_v42 }
 0x98f   :  { %6511 = vmatmul.mubr.msk.f32.gmra.mxu0 %vm177_vm2, %v1459_v12  ;;  %1814 = vmatprep.mubr.f32.mxu1 %v8216_v9 }
 0x990   :  { %1718 = vmatprep.mubr.f32.mxu0 %v8216_v9 }
 0x991   :  { %v1492_v27 = vpop.trf.xlu0 }
 0x992   :  { %v1460_v39 = vpop.trf.xlu1  ;;  %6528 = vmatmul.mubr.msk.f32.gmra.mxu1 %vm177_vm2, %v1492_v27 }
 0x993   :  { %6512 = vmatmul.mubr.msk.f32.gmra.mxu0 %vm177_vm2, %v1460_v39  ;;  %1820 = vmatprep.mubr.f32.mxu1 %v8216_v9 }
 0x994   :  { %1724 = vmatprep.mubr.f32.mxu0 %v8216_v9 }
 0x995   :  { %v1493_v45 = vpop.trf.xlu0 }
 0x996   :  { %v1461_v14 = vpop.trf.xlu1  ;;  %6529 = vmatmul.mubr.msk.f32.gmra.mxu1 %vm177_vm2, %v1493_v45 }
 0x997   :  { %6513 = vmatmul.mubr.msk.f32.gmra.mxu0 %vm177_vm2, %v1461_v14  ;;  %1826 = vmatprep.mubr.f32.mxu1 %v8216_v9 }
 0x998   :  { %1730 = vmatprep.mubr.f32.mxu0 %v8216_v9 }
 0x999   :  { %v1494_v52 = vpop.trf.xlu0 }
 0x99a   :  { %v1462_v8 = vpop.trf.xlu1  ;;  %6530 = vmatmul.mubr.msk.f32.gmra.mxu1 %vm177_vm2, %v1494_v52 }
 0x99b   :  { %6514 = vmatmul.mubr.msk.f32.gmra.mxu0 %vm177_vm2, %v1462_v8  ;;  %1832 = vmatprep.mubr.f32.mxu1 %v8216_v9 }
 0x99c   :  { %1736 = vmatprep.mubr.f32.mxu0 %v8216_v9 }
 0x99d   :  { %v1495_v54 = vpop.trf.xlu0 }
 0x99e   :  { %v1463_v62 = vpop.trf.xlu1  ;;  %6531 = vmatmul.mubr.msk.f32.gmra.mxu1 %vm177_vm2, %v1495_v54 }
 0x99f   :  { %6515 = vmatmul.mubr.msk.f32.gmra.mxu0 %vm177_vm2, %v1463_v62  ;;  %1838 = vmatprep.mubr.f32.mxu1 %v8216_v9 }
 0x9a0   :  { %1742 = vmatprep.mubr.f32.mxu0 %v8216_v9 }
 0x9a1   :  { %v1496_v59 = vpop.trf.xlu0 }
 0x9a2   :  { %v1464_v19 = vpop.trf.xlu1  ;;  %6532 = vmatmul.mubr.msk.f32.gmra.mxu1 %vm177_vm2, %v1496_v59 }
 0x9a3   :  { %6516 = vmatmul.mubr.msk.f32.gmra.mxu0 %vm177_vm2, %v1464_v19  ;;  %1844 = vmatprep.mubr.f32.mxu1 %v8216_v9 }
 0x9a4   :  { %1748 = vmatprep.mubr.f32.mxu0 %v8216_v9 }
 0x9a5   :  { %v1497_v13 = vpop.trf.xlu0 }
 0x9a6   :  { %v1465_v22 = vpop.trf.xlu1  ;;  %6533 = vmatmul.mubr.msk.f32.gmra.mxu1 %vm177_vm2, %v1497_v13 }
 0x9a7   :  { %6517 = vmatmul.mubr.msk.f32.gmra.mxu0 %vm177_vm2, %v1465_v22  ;;  %1915 = vmatprep.mubr.f32.mxu1 %v7308_v38 }
 0xa2a   :  { %v7381_v30 = vpop.f32.mrf.mxu1 }
 0xa2b   :  { %v7383_v40 = vpop.f32.mrf.mxu0 }
 0xa2c   :  { %v7385_v36 = vpop.f32.mrf.mxu1 }
 0xa2d   :  { %v7387_v17 = vpop.f32.mrf.mxu0 }
 0xa2e   :  { %v7389_v26 = vpop.f32.mrf.mxu1 }
 0xa2f   :  { %v7391_v44 = vpop.f32.mrf.mxu0 }
 0xa30   :  { %v7393_v48 = vpop.f32.mrf.mxu1 }
 0xa31   :  { %v7395_v55 = vpop.f32.mrf.mxu0 }
 0xa32   :  { %v7397_v5 = vpop.f32.mrf.mxu1 }
 0xa33   :  { %v7399_v18 = vpop.f32.mrf.mxu0 }
 0xa34   :  { %v7401_v35 = vpop.f32.mrf.mxu1 }
 0xa35   :  { %v7403_v47 = vpop.f32.mrf.mxu0 }
 0xa36   :  { %v7405_v57 = vpop.f32.mrf.mxu1 }
 0xa37   :  { %v7407_v7 = vpop.f32.mrf.mxu0 }
 0xa38   :  { %v7409_v29 = vpop.f32.mrf.mxu1 }
 0xa39   :  { %v7411_v37 = vpop.f32.mrf.mxu0 }
 0xa3a   :  { %v7413_v43 = vpop.f32.mrf.mxu1 }
 0xa3b   :  { %v7415_v51 = vpop.f32.mrf.mxu0 }
 0xa3c   :  { %v7417_v10 = vpop.f32.mrf.mxu1 }
 0xa3d   :  { %v7419_v23 = vpop.f32.mrf.mxu0 }
 0xa3e   :  { %v7421_v33 = vpop.f32.mrf.mxu1 }
 0xa3f   :  { %v1690_v50 = vpop.f32.mrf.mxu0 }
 0xa40   :  { %v7423_v56 = vpop.f32.mrf.mxu1 }
 0xa41   :  { %v1692_v0 = vpop.f32.mrf.mxu0 }
 0xa42   :  { %v7425_v6 = vpop.f32.mrf.mxu1 }
 0xa43   :  { %v1696_v20 = vpop.f32.mrf.mxu0 }
 0xa44   :  { %v7427_v24 = vpop.f32.mrf.mxu1 }
 0xa45   :  { %v1698_v38 = vpop.f32.mrf.mxu0 }
 0xa46   :  { %v7429_v41 = vpop.f32.mrf.mxu1 }
 0xa47   :  { %v1702_v16 = vpop.f32.mrf.mxu0 }
 0xa48   :  { %v7431_v53 = vpop.f32.mrf.mxu1 }
 0xa49   :  { %v1704_v31 = vpop.f32.mrf.mxu0 }
 0xa4a   :  { %v7433_v4 = vpop.f32.mrf.mxu1 }
 0xa4b   :  { %v1708_v25 = vpop.f32.mrf.mxu0 }
 0xa4c   :  { %v7435_v46 = vpop.f32.mrf.mxu1 }
 0xa4d   :  { %v1710_v3 = vpop.f32.mrf.mxu0 }
 0xa4e   :  { %v7437_v63 = vpop.f32.mrf.mxu1 }
 0xa4f   :  { %v1714_v15 = vpop.f32.mrf.mxu0 }
 0xa50   :  { %v7439_v58 = vpop.f32.mrf.mxu1 }
 0xa51   :  { %v1716_v28 = vpop.f32.mrf.mxu0 }
 0xa52   :  { %v1816_v42 = vpop.f32.mrf.mxu1 }
 0xa53   :  { %v1720_v49 = vpop.f32.mrf.mxu0 }
 0xa54   :  { %v1818_v39 = vpop.f32.mrf.mxu1 }
 0xa55   :  { %v1722_v1 = vpop.f32.mrf.mxu0 }
 0xa56   :  { %v1822_v52 = vpop.f32.mrf.mxu1 }
 0xa57   :  { %v1726_v34 = vpop.f32.mrf.mxu0 }
 0xa58   :  { %v1824_v62 = vpop.f32.mrf.mxu1 }
 0xa59   :  { %v1728_v60 = vpop.f32.mrf.mxu0 }
 0xa5a   :  { %v1828_v59 = vpop.f32.mrf.mxu1 }
 0xa5b   :  { %v1732_v11 = vpop.f32.mrf.mxu0 }
 0xa5c   :  { %v1830_v19 = vpop.f32.mrf.mxu1 }
 0xa5d   :  { %v1734_v32 = vpop.f32.mrf.mxu0 }
 0xa5e   :  { %v1834_v13 = vpop.f32.mrf.mxu1 }
 0xa5f   :  { %v1738_v12 = vpop.f32.mrf.mxu0 }
 0xa60   :  { %v1836_v22 = vpop.f32.mrf.mxu1 }
 0xa61   :  { %v1740_v27 = vpop.f32.mrf.mxu0 }
 0xa63   :  { %v1744_v45 = vpop.f32.mrf.mxu0 }
 0xa65   :  { %v1746_v14 = vpop.f32.mrf.mxu0 }
 0xa67   :  { %v1750_v8 = vpop.f32.mrf.mxu0 }
 0xa69   :  { %v1752_v54 = vpop.f32.mrf.mxu0 }
 0xa6a   :  { %1851 = vmatprep.subr.mxu1 %v1752_v54  ;;  %v1967_v54 = vld [vmem:[#allocation5 + $0x560] sm:$0xff] }
 0xa6b   :  { %1852 = vmatpush1.msra.mxu1 %v1750_v8  ;;  %v1968_v8 = vld [vmem:[#allocation5 + $0x568] sm:$0xff] }
 0xa6c   :  { %1853 = vmatprep.subr.mxu1 %v1746_v14  ;;  %v1970_v14 = vld [vmem:[#allocation5 + $0x578] sm:$0xff] }
 0xa6d   :  { %1854 = vmatpush1.msra.mxu1 %v1744_v45  ;;  %v1840_v45 = vpop.f32.mrf.mxu1 }
 0xa6e   :  { %1855 = vmatprep.subr.mxu1 %v1740_v27  ;;  %v1972_v27 = vld [vmem:[#allocation5 + $0x588] sm:$0xff] }
 0xa6f   :  { %1856 = vmatpush1.msra.mxu1 %v1738_v12  ;;  %v1973_v12 = vld [vmem:[#allocation5 + $0x590] sm:$0xff] }
 0xa70   :  { %1857 = vmatprep.subr.mxu1 %v1734_v32  ;;  %v1975_v32 = vld [vmem:[#allocation5 + $0x5a0] sm:$0xff] }
 0xa71   :  { %1858 = vmatpush1.msra.mxu1 %v1732_v11  ;;  %v1976_v11 = vld [vmem:[#allocation5 + $0x5a8] sm:$0xff] }
 0xa72   :  { %1859 = vmatprep.subr.mxu1 %v1728_v60  ;;  %v1978_v60 = vld [vmem:[#allocation5 + $0x5b8] sm:$0xff] }
 0xa73   :  { %1860 = vmatpush1.msra.mxu1 %v1726_v34  ;;  %v1842_v34 = vpop.f32.mrf.mxu1 }
 0xa74   :  { %1861 = vmatprep.subr.mxu1 %v1722_v1  ;;  %v1980_v1 = vld [vmem:[#allocation5 + $0x5c8] sm:$0xff] }
 0xa75   :  { %1862 = vmatpush1.msra.mxu1 %v1720_v49  ;;  %v1981_v49 = vld [vmem:[#allocation5 + $0x5d0] sm:$0xff] }
 0xa76   :  { %1863 = vmatprep.subr.mxu1 %v1716_v28  ;;  %v1983_v28 = vld [vmem:[#allocation5 + $0x5e0] sm:$0xff] }
 0xa77   :  { %1864 = vmatpush1.msra.mxu1 %v1714_v15  ;;  %v1984_v15 = vld [vmem:[#allocation5 + $0x5e8] sm:$0xff] }
 0xa78   :  { %1865 = vmatprep.subr.mxu1 %v1710_v3  ;;  %v1986_v3 = vld [vmem:[#allocation5 + $0x5f8] sm:$0xff] }
 0xa79   :  { %1866 = vmatpush1.msra.mxu1 %v1708_v25  ;;  %v1846_v25 = vpop.f32.mrf.mxu1 }
 0xa7a   :  { %1867 = vmatprep.subr.mxu1 %v1704_v31  ;;  %v1924_v31 = vld [vmem:[#allocation5 + $0x408] sm:$0xff] }
 0xa7b   :  { %1868 = vmatpush1.msra.mxu1 %v1702_v16  ;;  %v1925_v16 = vld [vmem:[#allocation5 + $0x410] sm:$0xff] }
 0xa7c   :  { %1869 = vmatprep.subr.mxu1 %v1698_v38  ;;  %v1927_v38 = vld [vmem:[#allocation5 + $0x420] sm:$0xff] }
 0xa7d   :  { %1870 = vmatpush1.msra.mxu1 %v1696_v20  ;;  %v1929_v20 = vld [vmem:[#allocation5 + $0x430] sm:$0xff] }
 0xa7e   :  { %1871 = vmatprep.subr.mxu1 %v1692_v0  ;;  %v1931_v0 = vld [vmem:[#allocation5 + $0x440] sm:$0xff] }
 0xa7f   :  { %1872 = vmatpush1.msra.mxu1 %v1690_v50  ;;  %v1848_v50 = vpop.f32.mrf.mxu1 }
 0xa80   :  { %1873 = vmatprep.subr.mxu1 %v7419_v23  ;;  %v1934_v23 = vld [vmem:[#allocation5 + $0x458] sm:$0xff] }
 0xa81   :  { %1874 = vmatpush1.msra.mxu1 %v7415_v51  ;;  %v1936_v51 = vld [vmem:[#allocation5 + $0x468] sm:$0xff] }
 0xa82   :  { %1875 = vmatprep.subr.mxu1 %v7411_v37  ;;  %v1938_v37 = vld [vmem:[#allocation5 + $0x478] sm:$0xff] }
 0xa83   :  { %1876 = vmatpush1.msra.mxu1 %v7407_v7  ;;  %v1940_v7 = vld [vmem:[#allocation5 + $0x488] sm:$0xff] }
 0xa84   :  { %1877 = vmatprep.subr.mxu1 %v7403_v47  ;;  %v1944_v47 = vld [vmem:[#allocation5 + $0x4a8] sm:$0xff] }
 0xa85   :  { %1878 = vmatpush1.msra.mxu1 %v7399_v18  ;;  %v1950_v18 = vld [vmem:[#allocation5 + $0x4d8] sm:$0xff] }
 0xa86   :  { %1879 = vmatprep.subr.mxu1 %v7395_v55  ;;  %v1951_v55 = vld [vmem:[#allocation5 + $0x4e0] sm:$0xff] }
 0xa87   :  { %1880 = vmatpush1.msra.mxu1 %v7391_v44  ;;  %v1952_v44 = vld [vmem:[#allocation5 + $0x4e8] sm:$0xff] }
 0xa88   :  { %1881 = vmatprep.subr.mxu1 %v7387_v17  ;;  %v1953_v17 = vld [vmem:[#allocation5 + $0x4f0] sm:$0xff] }
 0xa89   :  { %1882 = vmatpush1.msra.mxu1 %v7383_v40  ;;  %v1954_v40 = vld [vmem:[#allocation5 + $0x4f8] sm:$0xff] }
 0xa8a   :  { %1883 = vmatprep.subr.mxu1 %v1848_v50  ;;  %v1958_v50 = vld [vmem:[#allocation5 + $0x518] sm:$0xff] }
 0xa8b   :  { %1884 = vmatpush2.msra.mxu1 %v1846_v25  ;;  %v1959_v25 = vld [vmem:[#allocation5 + $0x520] sm:$0xff] }
 0xa8c   :  { %1885 = vmatprep.subr.mxu1 %v1842_v34  ;;  %v1960_v34 = vld [vmem:[#allocation5 + $0x528] sm:$0xff] }
 0xa8d   :  { %1886 = vmatpush2.msra.mxu1 %v1840_v45  ;;  %v1961_v45 = vld [vmem:[#allocation5 + $0x530] sm:$0xff] }
 0xa8e   :  { %1887 = vmatprep.subr.mxu1 %v1836_v22  ;;  %v1962_v22 = vld [vmem:[#allocation5 + $0x538] sm:$0xff] }
 0xa8f   :  { %1888 = vmatpush2.msra.mxu1 %v1834_v13  ;;  %v1963_v13 = vld [vmem:[#allocation5 + $0x540] sm:$0xff] }
 0xa90   :  { %1889 = vmatprep.subr.mxu1 %v1830_v19  ;;  %v1964_v19 = vld [vmem:[#allocation5 + $0x548] sm:$0xff] }
 0xa91   :  { %1890 = vmatpush2.msra.mxu1 %v1828_v59  ;;  %v1965_v59 = vld [vmem:[#allocation5 + $0x550] sm:$0xff] }
 0xa92   :  { %1891 = vmatprep.subr.mxu1 %v1824_v62  ;;  %v1966_v62 = vld [vmem:[#allocation5 + $0x558] sm:$0xff] }
 0xa93   :  { %1892 = vmatpush2.msra.mxu1 %v1822_v52  ;;  %v1969_v52 = vld [vmem:[#allocation5 + $0x570] sm:$0xff] }
 0xa94   :  { %1893 = vmatprep.subr.mxu1 %v1818_v39  ;;  %v1971_v39 = vld [vmem:[#allocation5 + $0x580] sm:$0xff] }
 0xa95   :  { %1894 = vmatpush2.msra.mxu1 %v1816_v42  ;;  %v1974_v42 = vld [vmem:[#allocation5 + $0x598] sm:$0xff] }
 0xa96   :  { %1895 = vmatprep.subr.mxu1 %v7439_v58  ;;  %v1977_v58 = vld [vmem:[#allocation5 + $0x5b0] sm:$0xff] }
 0xa97   :  { %1896 = vmatpush2.msra.mxu1 %v7437_v63  ;;  %v1979_v63 = vld [vmem:[#allocation5 + $0x5c0] sm:$0xff] }
 0xa98   :  { %1897 = vmatprep.subr.mxu1 %v7435_v46  ;;  %v1982_v46 = vld [vmem:[#allocation5 + $0x5d8] sm:$0xff] }
 0xa99   :  { %1898 = vmatpush2.msra.mxu1 %v7433_v4  ;;  %v1985_v4 = vld [vmem:[#allocation5 + $0x5f0] sm:$0xff] }
 0xa9a   :  { %1899 = vmatprep.subr.mxu1 %v7431_v53  ;;  %v1923_v53 = vld [vmem:[#allocation5 + $0x400] sm:$0xff] }
 0xa9b   :  { %1900 = vmatpush2.msra.mxu1 %v7429_v41  ;;  %v1926_v41 = vld [vmem:[#allocation5 + $0x418] sm:$0xff] }
 0xa9c   :  { %1901 = vmatprep.subr.mxu1 %v7427_v24  ;;  %v1928_v24 = vld [vmem:[#allocation5 + $0x428] sm:$0xff] }
 0xa9d   :  { %1902 = vmatpush2.msra.mxu1 %v7425_v6  ;;  %v1930_v6 = vld [vmem:[#allocation5 + $0x438] sm:$0xff] }
 0xa9e   :  { %1903 = vmatprep.subr.mxu1 %v7423_v56  ;;  %v1932_v56 = vld [vmem:[#allocation5 + $0x448] sm:$0xff] }
 0xa9f   :  { %1904 = vmatpush2.msra.mxu1 %v7421_v33  ;;  %v1933_v33 = vld [vmem:[#allocation5 + $0x450] sm:$0xff] }
 0xaa0   :  { %1905 = vmatprep.subr.mxu1 %v7417_v10  ;;  %v1935_v10 = vld [vmem:[#allocation5 + $0x460] sm:$0xff] }
 0xaa1   :  { %1906 = vmatpush2.msra.mxu1 %v7413_v43  ;;  %v1937_v43 = vld [vmem:[#allocation5 + $0x470] sm:$0xff] }
 0xaa2   :  { %1907 = vmatprep.subr.mxu1 %v7409_v29  ;;  %v1939_v29 = vld [vmem:[#allocation5 + $0x480] sm:$0xff] }
 0xaa3   :  { %1908 = vmatpush2.msra.mxu1 %v7405_v57  ;;  %v1941_v57 = vld [vmem:[#allocation5 + $0x490] sm:$0xff] }
 0xaa4   :  { %1909 = vmatprep.subr.mxu1 %v7401_v35  ;;  %v1949_v35 = vld [vmem:[#allocation5 + $0x4d0] sm:$0xff] }
 0xaa5   :  { %1910 = vmatpush2.msra.mxu1 %v7397_v5  ;;  %v1948_v5 = vld [vmem:[#allocation5 + $0x4c8] sm:$0xff] }
 0xaa6   :  { %1911 = vmatprep.subr.mxu1 %v7393_v48  ;;  %v1947_v48 = vld [vmem:[#allocation5 + $0x4c0] sm:$0xff] }
 0xaa7   :  { %1912 = vmatpush2.msra.mxu1 %v7389_v26  ;;  %v1946_v26 = vld [vmem:[#allocation5 + $0x4b8] sm:$0xff] }
 0xaa8   :  { %1913 = vmatprep.subr.mxu1 %v7385_v36  ;;  %v1945_v36 = vld [vmem:[#allocation5 + $0x4b0] sm:$0xff] }
 0xaa9   :  { %1914 = vmatpush2.msra.mxu1 %v7381_v30  ;;  %v1943_v30 = vld [vmem:[#allocation5 + $0x4a0] sm:$0xff] }
 0xaaa   :  { %1916 = vmatmul.mubr.f32.vlgmr.msra.gmra.mxu1 %v7310_v61  ;;  %2000 = vmatprep.subr.mxu1 %v1954_v40  ;;  %v1942_v61 = vld [vmem:[#allocation5 + $0x498] sm:$0xff]  ;;  %v1957_v40 = vld [vmem:[#allocation5 + $0x510] sm:$0xff] }
 0xaab   :  { %2001 = vmatpush1.msra.mxu1 %v1953_v17  ;;  %v1956_v17 = vld [vmem:[#allocation5 + $0x508] sm:$0xff] }
 0xaac   :  { %2002 = vmatprep.subr.mxu1 %v1952_v44  ;;  %v1955_v44 = vld [vmem:[#allocation5 + $0x500] sm:$0xff] }
 0xaad   :  { %2003 = vmatpush1.msra.mxu1 %v1951_v55  ;;  %v6534_v55 = vld [vmem:[%s8188_s0 + $0x10] sm:$0xff] }
 0xaae   :  { %2004 = vmatprep.subr.mxu1 %v1950_v18  ;;  %v6535_v18 = vld [vmem:[%s8188_s0 + $0x18] sm:$0xff]  ;;  %s6821_s0 = smov [#allocation11]  }
 0xaaf   :  { %2005 = vmatpush1.msra.mxu1 %v1949_v35  ;;  %v3260_v35 = vld [vmem:[#allocation2] sm:$0xff]  ;;  %s6424_s10 = sshll.u32 %s6821_s0, 4  ;;  %s6425_s10 = int_to_ptr.vmem [resolvable:$true] %s6424_s10 }
 0xab0   :  { %2006 = vmatprep.subr.mxu1 %v1948_v5  ;;  %v3261_v5 = vld [vmem:[#allocation2 + $0x8] sm:$0xff]  ;;  %s6780_s11 = scalar_lea.vmem %s6425_s10, 4096  ;;  %p6785_p12 = scmp.lt.s32.totalorder %s6425_s10, %s6425_s10 }
 0xab1   :  { %2007 = vmatpush1.msra.mxu1 %v1947_v48  ;;  %v7478_v48 = vadd.f32 %v6534_v55, %v3260_v35  ;;  %v2161_v55 = vld [vmem:[#allocation8 + $0xb00] sm:$0xff]  ;;  %p6781_p11 = scmp.ne.s32.totalorder %s6425_s10, %s6780_s11  ;;  %p6786_p13 = scmp.lt.s32.totalorder %s6780_s11, %s6780_s11 }
 0xab2   :  { %2008 = vmatprep.subr.mxu1 %v1946_v26  ;;  %v2134_v26 = vld [vmem:[#allocation8 + $0x788] sm:$0xff]  ;;  %v2157_v35 = vld [vmem:[#allocation8 + $0xa80] sm:$0xff] }
 0xab3   :  { %2009 = vmatpush1.msra.mxu1 %v1945_v36  ;;  %v2136_v36 = vld [vmem:[#allocation8 + $0x798] sm:$0xff]  ;;  %2223 = vmatprep.subr.mxu0 %v2134_v26  ;;  %v2153_v26 = vld [vmem:[#allocation8 + $0xa00] sm:$0xff]  ;;  %p6787_p0 = por %p6786_p13, %p6785_p12 }
 0xab4   :  { %2010 = vmatprep.subr.mxu1 %v1944_v47  ;;  %v7480_v47 = vadd.f32 %v6535_v18, %v3261_v5  ;;  %v2158_v18 = vld [vmem:[#allocation8 + $0xa88] sm:$0xff] }
 0xab5   :  { %2011 = vmatpush1.msra.mxu1 %v1943_v30  ;;  %v2133_v30 = vld [vmem:[#allocation8 + $0x780] sm:$0xff]  ;;  %v2154_v5 = vld [vmem:[#allocation8 + $0xa08] sm:$0xff]  ;;  %p6788_p1 = pnand %p6787_p0, %p6781_p11 }
 0xab6   :  { %2012 = vmatprep.subr.mxu1 %v1942_v61  ;;  %v2130_v61 = vld [vmem:[#allocation8 + $0x708] sm:$0xff]  ;;  %2224 = vmatpush1.msra.mxu0 %v2133_v30 }
 0xab7   :  { %2013 = vmatpush1.msra.mxu1 %v1941_v57  ;;  %v3264_v57 = vmul.f32 %v7478_v48, %v7478_v48  ;;  %2225 = vmatprep.subr.mxu0 %v2130_v61 }
 0xab8   :  { %2014 = vmatprep.subr.mxu1 %v1940_v7  ;;  %v2129_v7 = vld [vmem:[#allocation8 + $0x700] sm:$0xff] }
 0xab9   :  { %2015 = vmatpush1.msra.mxu1 %v1939_v29  ;;  %v3265_v29 = vmul.f32 %v7480_v47, %v7480_v47  ;;  %2226 = vmatpush1.msra.mxu0 %v2129_v7  ;;  %v2132_v7 = vld [vmem:[#allocation8 + $0x718] sm:$0xff] }
 0xaba   :  { %2016 = vmatprep.subr.mxu1 %v1938_v37  ;;  %v2126_v37 = vld [vmem:[#allocation8 + $0x688] sm:$0xff] }
 0xabb   :  { %2017 = vmatpush1.msra.mxu1 %v1937_v43  ;;  %v2125_v43 = vld [vmem:[#allocation8 + $0x680] sm:$0xff]  ;;  %2227 = vmatprep.subr.mxu0 %v2126_v37  ;;  %v2128_v37 = vld [vmem:[#allocation8 + $0x698] sm:$0xff] }
 0xabc   :  { %2018 = vmatprep.subr.mxu1 %v1936_v51  ;;  %v2122_v51 = vld [vmem:[#allocation8 + $0x608] sm:$0xff]  ;;  %2228 = vmatpush1.msra.mxu0 %v2125_v43  ;;  %v2127_v43 = vld [vmem:[#allocation8 + $0x690] sm:$0xff] }
 0xabd   :  { %2019 = vmatpush1.msra.mxu1 %v1935_v10  ;;  %v3266_v10 = vadd.f32 %v3265_v29, %v3264_v57  ;;  %2229 = vmatprep.subr.mxu0 %v2122_v51  ;;  %v2135_v57 = vld [vmem:[#allocation8 + $0x790] sm:$0xff]  ;;  %v2124_v51 = vld [vmem:[#allocation8 + $0x618] sm:$0xff] }
 0xabe   :  { %2020 = vmatprep.subr.mxu1 %v1934_v23  ;;  %v2121_v23 = vld [vmem:[#allocation8 + $0x600] sm:$0xff]  ;;  %v2131_v29 = vld [vmem:[#allocation8 + $0x710] sm:$0xff] }
 0xabf   :  { %2021 = vmatpush1.msra.mxu1 %v1933_v33  ;;  %v2118_v33 = vld [vmem:[#allocation8 + $0x588] sm:$0xff]  ;;  %3267 = vadd.xlane.f32.xlu1 %v3266_v10  ;;  %v2123_v10 = vld [vmem:[#allocation8 + $0x610] sm:$0xff] }
 0xac0   :  { %2022 = vmatprep.subr.mxu1 %v1932_v56  ;;  %v2117_v56 = vld [vmem:[#allocation8 + $0x580] sm:$0xff]  ;;  %2230 = vmatpush1.msra.mxu0 %v2121_v23  ;;  %v2120_v23 = vld [vmem:[#allocation8 + $0x598] sm:$0xff] }
 0xac1   :  { %2023 = vmatpush1.msra.mxu1 %v1931_v0  ;;  %v2114_v0 = vld [vmem:[#allocation8 + $0x508] sm:$0xff]  ;;  %2231 = vmatprep.subr.mxu0 %v2118_v33  ;;  %v2119_v33 = vld [vmem:[#allocation8 + $0x590] sm:$0xff] }
 0xac2   :  { %2024 = vmatprep.subr.mxu1 %v1930_v6  ;;  %v2113_v6 = vld [vmem:[#allocation8 + $0x500] sm:$0xff]  ;;  %2232 = vmatpush1.msra.mxu0 %v2117_v56  ;;  %v2116_v56 = vld [vmem:[#allocation8 + $0x518] sm:$0xff] }
 0xac3   :  { %2025 = vmatpush1.msra.mxu1 %v1929_v20  ;;  %v2110_v20 = vld [vmem:[#allocation8 + $0x488] sm:$0xff]  ;;  %2233 = vmatprep.subr.mxu0 %v2114_v0  ;;  %v2115_v0 = vld [vmem:[#allocation8 + $0x510] sm:$0xff] }
 0xac4   :  { %2026 = vmatprep.subr.mxu1 %v1928_v24  ;;  %v2109_v24 = vld [vmem:[#allocation8 + $0x480] sm:$0xff]  ;;  %2234 = vmatpush1.msra.mxu0 %v2113_v6  ;;  %v2112_v6 = vld [vmem:[#allocation8 + $0x498] sm:$0xff] }
 0xac5   :  { %2027 = vmatpush1.msra.mxu1 %v1927_v38  ;;  %v2106_v38 = vld [vmem:[#allocation8 + $0x408] sm:$0xff]  ;;  %2235 = vmatprep.subr.mxu0 %v2110_v20  ;;  %v2111_v20 = vld [vmem:[#allocation8 + $0x490] sm:$0xff] }
 0xac6   :  { %2028 = vmatprep.subr.mxu1 %v1926_v41  ;;  %v2105_v41 = vld [vmem:[#allocation8 + $0x400] sm:$0xff]  ;;  %2236 = vmatpush1.msra.mxu0 %v2109_v24  ;;  %v2108_v24 = vld [vmem:[#allocation8 + $0x418] sm:$0xff] }
 0xac7   :  { %2029 = vmatpush1.msra.mxu1 %v1925_v16  ;;  %v2102_v16 = vld [vmem:[#allocation8 + $0x388] sm:$0xff]  ;;  %2237 = vmatprep.subr.mxu0 %v2106_v38  ;;  %v2107_v38 = vld [vmem:[#allocation8 + $0x410] sm:$0xff] }
 0xac8   :  { %2030 = vmatprep.subr.mxu1 %v1924_v31  ;;  %v2101_v31 = vld [vmem:[#allocation8 + $0x380] sm:$0xff]  ;;  %2238 = vmatpush1.msra.mxu0 %v2105_v41  ;;  %v2104_v41 = vld [vmem:[#allocation8 + $0x398] sm:$0xff] }
 0xac9   :  { %2031 = vmatpush1.msra.mxu1 %v1923_v53  ;;  %v2098_v53 = vld [vmem:[#allocation8 + $0x308] sm:$0xff]  ;;  %2239 = vmatprep.subr.mxu0 %v2102_v16  ;;  %v2103_v16 = vld [vmem:[#allocation8 + $0x390] sm:$0xff] }
 0xaca   :  { %2032 = vmatprep.subr.mxu1 %v1986_v3  ;;  %v2097_v3 = vld [vmem:[#allocation8 + $0x300] sm:$0xff]  ;;  %2240 = vmatpush1.msra.mxu0 %v2101_v31  ;;  %v2100_v31 = vld [vmem:[#allocation8 + $0x318] sm:$0xff] }
 0xacb   :  { %2033 = vmatpush2.msra.mxu1 %v1985_v4  ;;  %v2094_v4 = vld [vmem:[#allocation8 + $0x288] sm:$0xff]  ;;  %2241 = vmatprep.subr.mxu0 %v2098_v53  ;;  %v2099_v53 = vld [vmem:[#allocation8 + $0x310] sm:$0xff] }
 0xacc   :  { %2034 = vmatprep.subr.mxu1 %v1984_v15  ;;  %v2093_v15 = vld [vmem:[#allocation8 + $0x280] sm:$0xff]  ;;  %2242 = vmatpush1.msra.mxu0 %v2097_v3  ;;  %v2096_v3 = vld [vmem:[#allocation8 + $0x298] sm:$0xff] }
 0xacd   :  { %2035 = vmatpush2.msra.mxu1 %v1983_v28  ;;  %v2090_v28 = vld [vmem:[#allocation8 + $0x208] sm:$0xff]  ;;  %2243 = vmatprep.subr.mxu0 %v2094_v4  ;;  %v2095_v4 = vld [vmem:[#allocation8 + $0x290] sm:$0xff] }
 0xace   :  { %2036 = vmatprep.subr.mxu1 %v1982_v46  ;;  %v2089_v46 = vld [vmem:[#allocation8 + $0x200] sm:$0xff]  ;;  %2244 = vmatpush1.msra.mxu0 %v2093_v15  ;;  %v2092_v15 = vld [vmem:[#allocation8 + $0x218] sm:$0xff] }
 0xacf   :  { %2037 = vmatpush2.msra.mxu1 %v1981_v49  ;;  %v2086_v49 = vld [vmem:[#allocation8 + $0x188] sm:$0xff]  ;;  %2245 = vmatprep.subr.mxu0 %v2090_v28  ;;  %v2091_v28 = vld [vmem:[#allocation8 + $0x210] sm:$0xff] }
 0xad0   :  { %2038 = vmatprep.subr.mxu1 %v1980_v1  ;;  %v2085_v1 = vld [vmem:[#allocation8 + $0x180] sm:$0xff]  ;;  %2246 = vmatpush1.msra.mxu0 %v2089_v46  ;;  %v2088_v46 = vld [vmem:[#allocation8 + $0x198] sm:$0xff] }
 0xad1   :  { %2039 = vmatpush2.msra.mxu1 %v1979_v63  ;;  %v2082_v63 = vld [vmem:[#allocation8 + $0x108] sm:$0xff]  ;;  %2247 = vmatprep.subr.mxu0 %v2086_v49  ;;  %v2087_v49 = vld [vmem:[#allocation8 + $0x190] sm:$0xff] }
 0xad2   :  { %2040 = vmatprep.subr.mxu1 %v1978_v60  ;;  %v2081_v60 = vld [vmem:[#allocation8 + $0x100] sm:$0xff]  ;;  %2248 = vmatpush1.msra.mxu0 %v2085_v1  ;;  %v2084_v1 = vld [vmem:[#allocation8 + $0x118] sm:$0xff] }
 0xad3   :  { %2041 = vmatpush2.msra.mxu1 %v1977_v58  ;;  %v2078_v58 = vld [vmem:[#allocation8 + $0x88] sm:$0xff]  ;;  %2249 = vmatprep.subr.mxu0 %v2082_v63  ;;  %v2083_v63 = vld [vmem:[#allocation8 + $0x110] sm:$0xff] }
 0xad4   :  { %2042 = vmatprep.subr.mxu1 %v1976_v11  ;;  %v2077_v11 = vld [vmem:[#allocation8 + $0x80] sm:$0xff]  ;;  %2250 = vmatpush1.msra.mxu0 %v2081_v60  ;;  %v2080_v60 = vld [vmem:[#allocation8 + $0x98] sm:$0xff] }
 0xad5   :  { %2043 = vmatpush2.msra.mxu1 %v1975_v32  ;;  %v2074_v32 = vld [vmem:[#allocation8 + $0x8] sm:$0xff]  ;;  %2251 = vmatprep.subr.mxu0 %v2078_v58  ;;  %v2079_v58 = vld [vmem:[#allocation8 + $0x90] sm:$0xff] }
 0xad6   :  { %2044 = vmatprep.subr.mxu1 %v1974_v42  ;;  %v2073_v42 = vld [vmem:[#allocation8] sm:$0xff]  ;;  %2252 = vmatpush1.msra.mxu0 %v2077_v11  ;;  %v2076_v11 = vld [vmem:[#allocation8 + $0x18] sm:$0xff] }
 0xad7   :  { %2045 = vmatpush2.msra.mxu1 %v1973_v12  ;;  %v2198_v12 = vld [vmem:[#allocation8 + $0xf88] sm:$0xff]  ;;  %2253 = vmatprep.subr.mxu0 %v2074_v32  ;;  %v2075_v32 = vld [vmem:[#allocation8 + $0x10] sm:$0xff] }
 0xad8   :  { %2046 = vmatprep.subr.mxu1 %v1972_v27  ;;  %v2197_v27 = vld [vmem:[#allocation8 + $0xf80] sm:$0xff]  ;;  %2254 = vmatpush1.msra.mxu0 %v2073_v42  ;;  %v2200_v42 = vld [vmem:[#allocation8 + $0xf98] sm:$0xff] }
 0xad9   :  { %2047 = vmatpush2.msra.mxu1 %v1971_v39  ;;  %v2194_v39 = vld [vmem:[#allocation8 + $0xf08] sm:$0xff]  ;;  %2255 = vmatprep.subr.mxu0 %v2198_v12  ;;  %v2199_v12 = vld [vmem:[#allocation8 + $0xf90] sm:$0xff] }
 0xada   :  { %2048 = vmatprep.subr.mxu1 %v1970_v14  ;;  %v2193_v14 = vld [vmem:[#allocation8 + $0xf00] sm:$0xff]  ;;  %2256 = vmatpush2.msra.mxu0 %v2197_v27  ;;  %v2196_v27 = vld [vmem:[#allocation8 + $0xf18] sm:$0xff] }
 0xadb   :  { %2049 = vmatpush2.msra.mxu1 %v1969_v52  ;;  %v2190_v52 = vld [vmem:[#allocation8 + $0xe88] sm:$0xff]  ;;  %2257 = vmatprep.subr.mxu0 %v2194_v39  ;;  %v2195_v39 = vld [vmem:[#allocation8 + $0xf10] sm:$0xff] }
 0xadc   :  { %2050 = vmatprep.subr.mxu1 %v1968_v8  ;;  %v2189_v8 = vld [vmem:[#allocation8 + $0xe80] sm:$0xff]  ;;  %2258 = vmatpush2.msra.mxu0 %v2193_v14  ;;  %v2192_v14 = vld [vmem:[#allocation8 + $0xe98] sm:$0xff] }
 0xadd   :  { %2051 = vmatpush2.msra.mxu1 %v1967_v54  ;;  %v2186_v54 = vld [vmem:[#allocation8 + $0xe08] sm:$0xff]  ;;  %2259 = vmatprep.subr.mxu0 %v2190_v52  ;;  %v2191_v52 = vld [vmem:[#allocation8 + $0xe90] sm:$0xff] }
 0xade   :  { %2052 = vmatprep.subr.mxu1 %v1966_v62  ;;  %v2185_v62 = vld [vmem:[#allocation8 + $0xe00] sm:$0xff]  ;;  %2260 = vmatpush2.msra.mxu0 %v2189_v8  ;;  %v2188_v8 = vld [vmem:[#allocation8 + $0xe18] sm:$0xff] }
 0xadf   :  { %2053 = vmatpush2.msra.mxu1 %v1965_v59  ;;  %v2182_v59 = vld [vmem:[#allocation8 + $0xd88] sm:$0xff]  ;;  %2261 = vmatprep.subr.mxu0 %v2186_v54  ;;  %v2187_v54 = vld [vmem:[#allocation8 + $0xe10] sm:$0xff] }
 0xae0   :  { %2054 = vmatprep.subr.mxu1 %v1964_v19  ;;  %v2181_v19 = vld [vmem:[#allocation8 + $0xd80] sm:$0xff]  ;;  %2262 = vmatpush2.msra.mxu0 %v2185_v62  ;;  %v2184_v62 = vld [vmem:[#allocation8 + $0xd98] sm:$0xff] }
 0xae1   :  { %2055 = vmatpush2.msra.mxu1 %v1963_v13  ;;  %v2178_v13 = vld [vmem:[#allocation8 + $0xd08] sm:$0xff]  ;;  %2263 = vmatprep.subr.mxu0 %v2182_v59  ;;  %v2183_v59 = vld [vmem:[#allocation8 + $0xd90] sm:$0xff] }
 0xae2   :  { %2056 = vmatprep.subr.mxu1 %v1962_v22  ;;  %v2177_v22 = vld [vmem:[#allocation8 + $0xd00] sm:$0xff]  ;;  %2264 = vmatpush2.msra.mxu0 %v2181_v19  ;;  %v2180_v19 = vld [vmem:[#allocation8 + $0xd18] sm:$0xff] }
 0xae3   :  { %2057 = vmatpush2.msra.mxu1 %v1961_v45  ;;  %v2174_v45 = vld [vmem:[#allocation8 + $0xc88] sm:$0xff]  ;;  %2265 = vmatprep.subr.mxu0 %v2178_v13  ;;  %v2179_v13 = vld [vmem:[#allocation8 + $0xd10] sm:$0xff] }
 0xae4   :  { %2058 = vmatprep.subr.mxu1 %v1960_v34  ;;  %v2173_v34 = vld [vmem:[#allocation8 + $0xc80] sm:$0xff]  ;;  %2266 = vmatpush2.msra.mxu0 %v2177_v22  ;;  %v2176_v22 = vld [vmem:[#allocation8 + $0xc98] sm:$0xff] }
 0xae5   :  { %2059 = vmatpush2.msra.mxu1 %v1959_v25  ;;  %v2170_v25 = vld [vmem:[#allocation8 + $0xc08] sm:$0xff]  ;;  %2267 = vmatprep.subr.mxu0 %v2174_v45  ;;  %v2175_v45 = vld [vmem:[#allocation8 + $0xc90] sm:$0xff] }
 0xae6   :  { %2060 = vmatprep.subr.mxu1 %v1958_v50  ;;  %v2169_v50 = vld [vmem:[#allocation8 + $0xc00] sm:$0xff]  ;;  %2268 = vmatpush2.msra.mxu0 %v2173_v34  ;;  %v2172_v34 = vld [vmem:[#allocation8 + $0xc18] sm:$0xff] }
 0xae7   :  { %2061 = vmatpush2.msra.mxu1 %v1957_v40  ;;  %v2166_v40 = vld [vmem:[#allocation8 + $0xb88] sm:$0xff]  ;;  %2269 = vmatprep.subr.mxu0 %v2170_v25  ;;  %v2171_v25 = vld [vmem:[#allocation8 + $0xc10] sm:$0xff] }
 0xae8   :  { %2062 = vmatprep.subr.mxu1 %v1956_v17  ;;  %v2165_v17 = vld [vmem:[#allocation8 + $0xb80] sm:$0xff]  ;;  %2270 = vmatpush2.msra.mxu0 %v2169_v50  ;;  %v2168_v50 = vld [vmem:[#allocation8 + $0xb98] sm:$0xff] }
 0xae9   :  { %2063 = vmatpush2.msra.mxu1 %v1955_v44  ;;  %v2162_v44 = vld [vmem:[#allocation8 + $0xb08] sm:$0xff]  ;;  %2271 = vmatprep.subr.mxu0 %v2166_v40  ;;  %v2167_v40 = vld [vmem:[#allocation8 + $0xb90] sm:$0xff] }
 0xaea   :  { %2294 = vmatprep.subr.mxu1 %v2136_v36  ;;  %2272 = vmatpush2.msra.mxu0 %v2165_v17  ;;  %v2150_v36 = vld [vmem:[#allocation8 + $0x988] sm:$0xff]  ;;  %v2164_v17 = vld [vmem:[#allocation8 + $0xb18] sm:$0xff] }
 0xaeb   :  { %2273 = vmatprep.subr.mxu0 %v2162_v44  ;;  %v2163_v44 = vld [vmem:[#allocation8 + $0xb10] sm:$0xff] }
 0xaec   :  { %2274 = vmatpush2.msra.mxu0 %v2161_v55  ;;  %v2160_v55 = vld [vmem:[#allocation8 + $0xa98] sm:$0xff] }
 0xaed   :  { %2275 = vmatprep.subr.mxu0 %v2158_v18  ;;  %v2159_v18 = vld [vmem:[#allocation8 + $0xa90] sm:$0xff] }
 0xaee   :  { %2276 = vmatpush2.msra.mxu0 %v2157_v35  ;;  %v2156_v35 = vld [vmem:[#allocation8 + $0xa18] sm:$0xff] }
 0xaef   :  { %2277 = vmatprep.subr.mxu0 %v2154_v5  ;;  %v2155_v5 = vld [vmem:[#allocation8 + $0xa10] sm:$0xff] }
 0xaf0   :  { %2278 = vmatpush2.msra.mxu0 %v2153_v26  ;;  %v2152_v26 = vld [vmem:[#allocation8 + $0x998] sm:$0xff] }
 0xaf1   :  { %2279 = vmatprep.subr.mxu0 %v2150_v36  ;;  %v2149_v36 = vld [vmem:[#allocation8 + $0x980] sm:$0xff] }
 0xaf2   :  { %2280 = vmatpush2.msra.mxu0 %v2149_v36  ;;  %v2402_v36 = vld [vmem:[#allocation8 + $0x428] sm:$0xff] }
 0xb6a   :  { %v1917_v30 = vpop.f32.mrf.mxu1 }
 0xb6c   :  { %v1919_v61 = vpop.f32.mrf.mxu1 }
 0xb6d   :  { %2064 = vmatprep.mubr.f32.mxu1 %v1919_v61  ;;  %v2146_v61 = vld [vmem:[#allocation8 + $0x908] sm:$0xff] }
 0xb6e   :  { %2065 = vmatmul.mubr.f32.vlgmr.msra.gmra.mxu1 %v1917_v30  ;;  %v2151_v30 = vld [vmem:[#allocation8 + $0x990] sm:$0xff]  ;;  %2281 = vmatprep.subr.mxu0 %v2146_v61  ;;  %v2401_v61 = vld [vmem:[#allocation8 + $0x420] sm:$0xff] }
 0xb6f   :  { %2295 = vmatpush1.msra.mxu1 %v2135_v57  ;;  %v2148_v57 = vld [vmem:[#allocation8 + $0x918] sm:$0xff] }
 0xb70   :  { %2296 = vmatprep.subr.mxu1 %v2132_v7  ;;  %v2145_v7 = vld [vmem:[#allocation8 + $0x900] sm:$0xff] }
 0xb71   :  { %2297 = vmatpush1.msra.mxu1 %v2131_v29  ;;  %v2147_v29 = vld [vmem:[#allocation8 + $0x910] sm:$0xff]  ;;  %2282 = vmatpush2.msra.mxu0 %v2145_v7  ;;  %v2398_v7 = vld [vmem:[#allocation8 + $0x3a8] sm:$0xff] }
 0xb72   :  { %2298 = vmatprep.subr.mxu1 %v2128_v37  ;;  %v2142_v37 = vld [vmem:[#allocation8 + $0x888] sm:$0xff] }
 0xb73   :  { %2299 = vmatpush1.msra.mxu1 %v2127_v43  ;;  %v2144_v43 = vld [vmem:[#allocation8 + $0x898] sm:$0xff]  ;;  %2283 = vmatprep.subr.mxu0 %v2142_v37  ;;  %v2397_v37 = vld [vmem:[#allocation8 + $0x3a0] sm:$0xff] }
 0xb74   :  { %2300 = vmatprep.subr.mxu1 %v2124_v51  ;;  %v2141_v51 = vld [vmem:[#allocation8 + $0x880] sm:$0xff] }
 0xb75   :  { %2301 = vmatpush1.msra.mxu1 %v2123_v10  ;;  %v2143_v10 = vld [vmem:[#allocation8 + $0x890] sm:$0xff]  ;;  %2284 = vmatpush2.msra.mxu0 %v2141_v51  ;;  %v2394_v51 = vld [vmem:[#allocation8 + $0x328] sm:$0xff] }
 0xb76   :  { %2302 = vmatprep.subr.mxu1 %v2120_v23  ;;  %v2138_v23 = vld [vmem:[#allocation8 + $0x808] sm:$0xff] }
 0xb77   :  { %2303 = vmatpush1.msra.mxu1 %v2119_v33  ;;  %v2140_v33 = vld [vmem:[#allocation8 + $0x818] sm:$0xff]  ;;  %2285 = vmatprep.subr.mxu0 %v2138_v23  ;;  %v2393_v23 = vld [vmem:[#allocation8 + $0x320] sm:$0xff] }
 0xb78   :  { %2304 = vmatprep.subr.mxu1 %v2116_v56  ;;  %v2137_v56 = vld [vmem:[#allocation8 + $0x800] sm:$0xff] }
 0xb79   :  { %2305 = vmatpush1.msra.mxu1 %v2115_v0  ;;  %v2139_v0 = vld [vmem:[#allocation8 + $0x810] sm:$0xff]  ;;  %2286 = vmatpush2.msra.mxu0 %v2137_v56  ;;  %v2390_v56 = vld [vmem:[#allocation8 + $0x2a8] sm:$0xff] }
 0xb7a   :  { %2306 = vmatprep.subr.mxu1 %v2112_v6  ;;  %v2430_v6 = vld [vmem:[#allocation8 + $0x7a8] sm:$0xff] }
 0xb7b   :  { %2307 = vmatpush1.msra.mxu1 %v2111_v20  ;;  %v2432_v20 = vld [vmem:[#allocation8 + $0x7b8] sm:$0xff]  ;;  %2519 = vmatprep.subr.mxu0 %v2430_v6  ;;  %v2389_v6 = vld [vmem:[#allocation8 + $0x2a0] sm:$0xff] }
 0xb7c   :  { %2308 = vmatprep.subr.mxu1 %v2108_v24  ;;  %v3268_v24 = vpop.xlane.xlu1 %3267 }
 0xb7d   :  { %2309 = vmatpush1.msra.mxu1 %v2107_v38  ;;  %6668 = vrsqrt.f32 %v3268_v24  ;;  %vm3271_vm7 = vcmp.eq.f32.partialorder %v3268_v24, inf  ;;  %vm3273_vm8 = vcmp.eq.f32.partialorder %v3268_v24, 0.0 }
 0xb7e   :  { %2310 = vmatprep.subr.mxu1 %v2104_v41  ;;  %v3274_v41 = vand.u32 2147483648, %v3268_v24 }
 0xb7f   :  { %2311 = vmatpush1.msra.mxu1 %v2103_v16 }
 0xb80   :  { %2312 = vmatprep.subr.mxu1 %v2100_v31 }
 0xb81   :  { %2313 = vmatpush1.msra.mxu1 %v2099_v53 }
 0xb82   :  { %2314 = vmatprep.subr.mxu1 %v2096_v3 }
 0xb83   :  { %2315 = vmatpush1.msra.mxu1 %v2095_v4 }
 0xb84   :  { %2316 = vmatprep.subr.mxu1 %v2092_v15 }
 0xb85   :  { %2317 = vmatpush1.msra.mxu1 %v2091_v28 }
 0xb86   :  { %2318 = vmatprep.subr.mxu1 %v2088_v46  ;;  %v1988_v46 = vld [vmem:[#allocation7 + $0x4] sm:$0x3] }
 0xb87   :  { %2319 = vmatpush1.msra.mxu1 %v2087_v49  ;;  %v1993_v49 = vrot.slane %v1988_v46, %v8217_v2 }
 0xb88   :  { %2320 = vmatprep.subr.mxu1 %v2084_v1  ;;  %v1997_v1 = vrot.slane %v1988_v46, %v8218_v21  ;;  %v2378_v46 = vld [vmem:[#allocation8 + $0x128] sm:$0xff] }
 0xb89   :  { %2321 = vmatpush1.msra.mxu1 %v2083_v63 }
 0xb8a   :  { %2322 = vmatprep.subr.mxu1 %v2080_v60  ;;  %v6669_v38 = vpop.eup %6668 }
 0xb8b   :  { %2323 = vmatpush1.msra.mxu1 %v2079_v58  ;;  %v3270_v16 = vmul.f32 %v6669_v38, %v3268_v24  ;;  %v2388_v38 = vld [vmem:[#allocation8 + $0x238] sm:$0xff] }
 0xb8c   :  { %2324 = vmatprep.subr.mxu1 %v2076_v11 }
 0xb8d   :  { %2325 = vmatpush1.msra.mxu1 %v2075_v32  ;;  %v3272_v31 = vsel %vm3271_vm7, %v3268_v24, %v3270_v16  ;;  %v2386_v24 = vld [vmem:[#allocation8 + $0x228] sm:$0xff]  ;;  %v2387_v16 = vld [vmem:[#allocation8 + $0x230] sm:$0xff] }
 0xb8e   :  { %2326 = vmatprep.subr.mxu1 %v2200_v42  ;;  %v3275_v53 = vsel %vm3273_vm8, %v3274_v41, %v3272_v31  ;;  %v2429_v42 = vld [vmem:[#allocation8 + $0x7a0] sm:$0xff]  ;;  %v2382_v31 = vld [vmem:[#allocation8 + $0x1a8] sm:$0xff] }
 0xb8f   :  { %2327 = vmatpush2.msra.mxu1 %v2199_v12  ;;  %v3276_v3 = vadd.f32 1e-06, %v3275_v53  ;;  %v2426_v12 = vld [vmem:[#allocation8 + $0x728] sm:$0xff]  ;;  %v2385_v41 = vld [vmem:[#allocation8 + $0x220] sm:$0xff]  ;;  %v2384_v53 = vld [vmem:[#allocation8 + $0x1b8] sm:$0xff] }
 0xb90   :  { %2328 = vmatprep.subr.mxu1 %v2196_v27  ;;  %v2428_v27 = vld [vmem:[#allocation8 + $0x738] sm:$0xff] }
 0xb91   :  { %2329 = vmatpush2.msra.mxu1 %v2195_v39  ;;  %6670 = vrcp.f32 %v3276_v3  ;;  %v2425_v39 = vld [vmem:[#allocation8 + $0x720] sm:$0xff] }
 0xb92   :  { %2330 = vmatprep.subr.mxu1 %v2192_v14  ;;  %v2427_v14 = vld [vmem:[#allocation8 + $0x730] sm:$0xff]  ;;  %v2381_v3 = vld [vmem:[#allocation8 + $0x1a0] sm:$0xff] }
 0xb93   :  { %2331 = vmatpush2.msra.mxu1 %v2191_v52  ;;  %v2422_v52 = vld [vmem:[#allocation8 + $0x6a8] sm:$0xff] }
 0xb94   :  { %2332 = vmatprep.subr.mxu1 %v2188_v8  ;;  %v2424_v8 = vld [vmem:[#allocation8 + $0x6b8] sm:$0xff] }
 0xb95   :  { %2333 = vmatpush2.msra.mxu1 %v2187_v54  ;;  %v2421_v54 = vld [vmem:[#allocation8 + $0x6a0] sm:$0xff] }
 0xb96   :  { %2334 = vmatprep.subr.mxu1 %v2184_v62  ;;  %v2423_v62 = vld [vmem:[#allocation8 + $0x6b0] sm:$0xff] }
 0xb97   :  { %2335 = vmatpush2.msra.mxu1 %v2183_v59  ;;  %v2418_v59 = vld [vmem:[#allocation8 + $0x628] sm:$0xff] }
 0xb98   :  { %2336 = vmatprep.subr.mxu1 %v2180_v19  ;;  %v2420_v19 = vld [vmem:[#allocation8 + $0x638] sm:$0xff] }
 0xb99   :  { %2337 = vmatpush2.msra.mxu1 %v2179_v13  ;;  %v2417_v13 = vld [vmem:[#allocation8 + $0x620] sm:$0xff] }
 0xb9a   :  { %2338 = vmatprep.subr.mxu1 %v2176_v22  ;;  %v2419_v22 = vld [vmem:[#allocation8 + $0x630] sm:$0xff] }
 0xb9b   :  { %2339 = vmatpush2.msra.mxu1 %v2175_v45  ;;  %v2414_v45 = vld [vmem:[#allocation8 + $0x5a8] sm:$0xff] }
 0xb9c   :  { %2340 = vmatprep.subr.mxu1 %v2172_v34  ;;  %v2416_v34 = vld [vmem:[#allocation8 + $0x5b8] sm:$0xff] }
 0xb9d   :  { %2341 = vmatpush2.msra.mxu1 %v2171_v25  ;;  %v2413_v25 = vld [vmem:[#allocation8 + $0x5a0] sm:$0xff] }
 0xb9e   :  { %2342 = vmatprep.subr.mxu1 %v2168_v50  ;;  %v6671_v4 = vpop.eup %6670  ;;  %v2415_v50 = vld [vmem:[#allocation8 + $0x5b0] sm:$0xff] }
 0xb9f   :  { %2343 = vmatpush2.msra.mxu1 %v2167_v40  ;;  %v7487_v15 = vmul.f32 %v6671_v4, %v7480_v47  ;;  %v7490_v28 = vmul.f32 %v6671_v4, %v7478_v48  ;;  %v2431_v48 = vld [vmem:[#allocation8 + $0x7b0] sm:$0xff]  ;;  %v2410_v40 = vld [vmem:[#allocation8 + $0x528] sm:$0xff] }
 0xba0   :  { %2344 = vmatprep.subr.mxu1 %v2164_v17  ;;  %v2412_v17 = vld [vmem:[#allocation8 + $0x538] sm:$0xff]  ;;  %v2383_v4 = vld [vmem:[#allocation8 + $0x1b0] sm:$0xff] }
 0xba1   :  { %2345 = vmatpush2.msra.mxu1 %v2163_v44  ;;  %3313 = vxpose.xlu1.b32.start.end [1/1] (short) %v7487_v15, 128  ;;  %v2409_v44 = vld [vmem:[#allocation8 + $0x520] sm:$0xff] }
 0xba2   :  { %2346 = vmatprep.subr.mxu1 %v2160_v55  ;;  %3281 = vxpose.xlu0.b32.start.end [1/1] (short) %v7490_v28, 128  ;;  %v2411_v55 = vld [vmem:[#allocation8 + $0x530] sm:$0xff] }
 0xba3   :  { %2347 = vmatpush2.msra.mxu1 %v2159_v18  ;;  %v2406_v18 = vld [vmem:[#allocation8 + $0x4a8] sm:$0xff] }
 0xba4   :  { %2348 = vmatprep.subr.mxu1 %v2156_v35  ;;  %v2408_v35 = vld [vmem:[#allocation8 + $0x4b8] sm:$0xff] }
 0xba5   :  { %2349 = vmatpush2.msra.mxu1 %v2155_v5  ;;  %v2405_v5 = vld [vmem:[#allocation8 + $0x4a0] sm:$0xff] }
 0xba6   :  { %2350 = vmatprep.subr.mxu1 %v2152_v26  ;;  %v2407_v26 = vld [vmem:[#allocation8 + $0x4b0] sm:$0xff] }
 0xba7   :  { %2351 = vmatpush2.msra.mxu1 %v2151_v30  ;;  %v2404_v30 = vld [vmem:[#allocation8 + $0x438] sm:$0xff] }
 0xba8   :  { %2352 = vmatprep.subr.mxu1 %v2148_v57  ;;  %v2403_v57 = vld [vmem:[#allocation8 + $0x430] sm:$0xff] }
 0xba9   :  { %2353 = vmatpush2.msra.mxu1 %v2147_v29  ;;  %v2400_v29 = vld [vmem:[#allocation8 + $0x3b8] sm:$0xff] }
 0xbaa   :  { %2354 = vmatprep.subr.mxu1 %v2144_v43  ;;  %v2399_v43 = vld [vmem:[#allocation8 + $0x3b0] sm:$0xff] }
 0xbab   :  { %2355 = vmatpush2.msra.mxu1 %v2143_v10  ;;  %v2396_v10 = vld [vmem:[#allocation8 + $0x338] sm:$0xff] }
 0xbac   :  { %2356 = vmatprep.subr.mxu1 %v2140_v33  ;;  %v2395_v33 = vld [vmem:[#allocation8 + $0x330] sm:$0xff] }
 0xbad   :  { %2357 = vmatpush2.msra.mxu1 %v2139_v0  ;;  %v2392_v0 = vld [vmem:[#allocation8 + $0x2b8] sm:$0xff] }
 0xbae   :  { %2590 = vmatprep.subr.mxu1 %v2432_v20  ;;  %v2391_v20 = vld [vmem:[#allocation8 + $0x2b0] sm:$0xff] }
 0xc2e   :  { %v2066_v63 = vpop.f32.mrf.mxu1 }
 0xc2f   :  { %v2067_v60 = vadd.f32 %v2066_v63, %v1993_v49  ;;  %v2380_v49 = vld [vmem:[#allocation8 + $0x138] sm:$0xff]  ;;  %v2379_v63 = vld [vmem:[#allocation8 + $0x130] sm:$0xff] }
 0xc30   :  { %v2068_v58 = vpop.f32.mrf.mxu1 }
 0xc31   :  { %v2069_v11 = vadd.f32 %v2068_v58, %v1997_v1  ;;  %v7498_v47 = vmax.f32 %v2067_v60, 0.0  ;;  %v2377_v1 = vld [vmem:[#allocation8 + $0x120] sm:$0xff]  ;;  %v2374_v60 = vld [vmem:[#allocation8 + $0xa8] sm:$0xff]  ;;  %v2376_v58 = vld [vmem:[#allocation8 + $0xb8] sm:$0xff] }
 0xc33   :  { %v7496_v32 = vmax.f32 %v2069_v11, 0.0  ;;  %v2373_v11 = vld [vmem:[#allocation8 + $0xa0] sm:$0xff] }
 0xc35   :  { %2287 = vmatprep.mubr.f32.mxu0 %v7496_v32  ;;  %2358 = vmatprep.mubr.f32.mxu1 %v7496_v32 }
 0xc36   :  { %2288 = vmatmul.mubr.f32.vlgmr.msra.gmra.mxu0 %v7498_v47  ;;  %2359 = vmatmul.mubr.f32.vlgmr.msra.gmra.mxu1 %v7498_v47 }
 0xc37   :  { %2520 = vmatpush1.msra.mxu0 %v2429_v42  ;;  %2591 = vmatpush1.msra.mxu1 %v2431_v48  ;;  %v2375_v42 = vld [vmem:[#allocation8 + $0xb0] sm:$0xff]  ;;  %v2370_v48 = vld [vmem:[#allocation8 + $0x28] sm:$0xff] }
 0xc38   :  { %2521 = vmatprep.subr.mxu0 %v2426_v12  ;;  %2583 = vmatprep.mubr.f32.mxu0 %v7496_v32  ;;  %v2372_v12 = vld [vmem:[#allocation8 + $0x38] sm:$0xff] }
 0xc39   :  { %2592 = vmatprep.subr.mxu1 %v2428_v27  ;;  %2654 = vmatprep.mubr.f32.mxu1 %v7496_v32  ;;  %v2369_v27 = vld [vmem:[#allocation8 + $0x20] sm:$0xff] }
 0xc3a   :  { %2522 = vmatpush1.msra.mxu0 %v2425_v39  ;;  %2593 = vmatpush1.msra.mxu1 %v2427_v14  ;;  %v2371_v39 = vld [vmem:[#allocation8 + $0x30] sm:$0xff]  ;;  %v2494_v14 = vld [vmem:[#allocation8 + $0xfa8] sm:$0xff] }
 0xc3b   :  { %2523 = vmatprep.subr.mxu0 %v2422_v52  ;;  %2594 = vmatprep.subr.mxu1 %v2424_v8  ;;  %v2496_v52 = vld [vmem:[#allocation8 + $0xfb8] sm:$0xff]  ;;  %v2493_v8 = vld [vmem:[#allocation8 + $0xfa0] sm:$0xff] }
 0xc3c   :  { %2524 = vmatpush1.msra.mxu0 %v2421_v54  ;;  %2595 = vmatpush1.msra.mxu1 %v2423_v62  ;;  %v2495_v54 = vld [vmem:[#allocation8 + $0xfb0] sm:$0xff]  ;;  %v2490_v62 = vld [vmem:[#allocation8 + $0xf28] sm:$0xff] }
 0xc3d   :  { %2525 = vmatprep.subr.mxu0 %v2418_v59  ;;  %2596 = vmatprep.subr.mxu1 %v2420_v19  ;;  %v2492_v59 = vld [vmem:[#allocation8 + $0xf38] sm:$0xff]  ;;  %v2489_v19 = vld [vmem:[#allocation8 + $0xf20] sm:$0xff] }
 0xc3e   :  { %2526 = vmatpush1.msra.mxu0 %v2417_v13  ;;  %2597 = vmatpush1.msra.mxu1 %v2419_v22  ;;  %v2491_v13 = vld [vmem:[#allocation8 + $0xf30] sm:$0xff]  ;;  %v2486_v22 = vld [vmem:[#allocation8 + $0xea8] sm:$0xff] }
 0xc3f   :  { %2527 = vmatprep.subr.mxu0 %v2414_v45  ;;  %2598 = vmatprep.subr.mxu1 %v2416_v34  ;;  %v2488_v45 = vld [vmem:[#allocation8 + $0xeb8] sm:$0xff]  ;;  %v2485_v34 = vld [vmem:[#allocation8 + $0xea0] sm:$0xff] }
 0xc40   :  { %2528 = vmatpush1.msra.mxu0 %v2413_v25  ;;  %2599 = vmatpush1.msra.mxu1 %v2415_v50  ;;  %v2487_v25 = vld [vmem:[#allocation8 + $0xeb0] sm:$0xff]  ;;  %v2482_v50 = vld [vmem:[#allocation8 + $0xe28] sm:$0xff] }
 0xc41   :  { %2529 = vmatprep.subr.mxu0 %v2410_v40  ;;  %2600 = vmatprep.subr.mxu1 %v2412_v17  ;;  %v2484_v40 = vld [vmem:[#allocation8 + $0xe38] sm:$0xff]  ;;  %v2481_v17 = vld [vmem:[#allocation8 + $0xe20] sm:$0xff] }
 0xc42   :  { %2530 = vmatpush1.msra.mxu0 %v2409_v44  ;;  %2601 = vmatpush1.msra.mxu1 %v2411_v55  ;;  %v2483_v44 = vld [vmem:[#allocation8 + $0xe30] sm:$0xff]  ;;  %v2478_v55 = vld [vmem:[#allocation8 + $0xda8] sm:$0xff] }
 0xc43   :  { %2531 = vmatprep.subr.mxu0 %v2406_v18  ;;  %2602 = vmatprep.subr.mxu1 %v2408_v35  ;;  %v2480_v18 = vld [vmem:[#allocation8 + $0xdb8] sm:$0xff]  ;;  %v2477_v35 = vld [vmem:[#allocation8 + $0xda0] sm:$0xff] }
 0xc44   :  { %2532 = vmatpush1.msra.mxu0 %v2405_v5  ;;  %2603 = vmatpush1.msra.mxu1 %v2407_v26  ;;  %v2479_v5 = vld [vmem:[#allocation8 + $0xdb0] sm:$0xff]  ;;  %v2474_v26 = vld [vmem:[#allocation8 + $0xd28] sm:$0xff] }
 0xc45   :  { %2533 = vmatprep.subr.mxu0 %v2402_v36  ;;  %2604 = vmatprep.subr.mxu1 %v2404_v30  ;;  %v2476_v36 = vld [vmem:[#allocation8 + $0xd38] sm:$0xff]  ;;  %v2473_v30 = vld [vmem:[#allocation8 + $0xd20] sm:$0xff] }
 0xc46   :  { %2534 = vmatpush1.msra.mxu0 %v2401_v61  ;;  %2605 = vmatpush1.msra.mxu1 %v2403_v57  ;;  %v2475_v61 = vld [vmem:[#allocation8 + $0xd30] sm:$0xff]  ;;  %v2470_v57 = vld [vmem:[#allocation8 + $0xca8] sm:$0xff] }
 0xc47   :  { %2535 = vmatprep.subr.mxu0 %v2398_v7  ;;  %2606 = vmatprep.subr.mxu1 %v2400_v29  ;;  %v2472_v7 = vld [vmem:[#allocation8 + $0xcb8] sm:$0xff]  ;;  %v2469_v29 = vld [vmem:[#allocation8 + $0xca0] sm:$0xff] }
 0xc48   :  { %2536 = vmatpush1.msra.mxu0 %v2397_v37  ;;  %2607 = vmatpush1.msra.mxu1 %v2399_v43  ;;  %v2471_v37 = vld [vmem:[#allocation8 + $0xcb0] sm:$0xff]  ;;  %v2466_v43 = vld [vmem:[#allocation8 + $0xc28] sm:$0xff] }
 0xc49   :  { %2537 = vmatprep.subr.mxu0 %v2394_v51  ;;  %2608 = vmatprep.subr.mxu1 %v2396_v10  ;;  %v2468_v51 = vld [vmem:[#allocation8 + $0xc38] sm:$0xff]  ;;  %v2465_v10 = vld [vmem:[#allocation8 + $0xc20] sm:$0xff] }
 0xc4a   :  { %2538 = vmatpush1.msra.mxu0 %v2393_v23  ;;  %2609 = vmatpush1.msra.mxu1 %v2395_v33  ;;  %v2467_v23 = vld [vmem:[#allocation8 + $0xc30] sm:$0xff]  ;;  %v2462_v33 = vld [vmem:[#allocation8 + $0xba8] sm:$0xff] }
 0xc4b   :  { %2539 = vmatprep.subr.mxu0 %v2390_v56  ;;  %2610 = vmatprep.subr.mxu1 %v2392_v0  ;;  %v2464_v56 = vld [vmem:[#allocation8 + $0xbb8] sm:$0xff]  ;;  %v2461_v0 = vld [vmem:[#allocation8 + $0xba0] sm:$0xff] }
 0xc4c   :  { %2540 = vmatpush1.msra.mxu0 %v2389_v6  ;;  %2611 = vmatpush1.msra.mxu1 %v2391_v20  ;;  %v2463_v6 = vld [vmem:[#allocation8 + $0xbb0] sm:$0xff]  ;;  %v2458_v20 = vld [vmem:[#allocation8 + $0xb28] sm:$0xff] }
 0xc4d   :  { %2541 = vmatprep.subr.mxu0 %v2386_v24  ;;  %2612 = vmatprep.subr.mxu1 %v2388_v38  ;;  %v2460_v24 = vld [vmem:[#allocation8 + $0xb38] sm:$0xff]  ;;  %v2457_v38 = vld [vmem:[#allocation8 + $0xb20] sm:$0xff] }
 0xc4e   :  { %2542 = vmatpush1.msra.mxu0 %v2385_v41  ;;  %2613 = vmatpush1.msra.mxu1 %v2387_v16  ;;  %v2459_v41 = vld [vmem:[#allocation8 + $0xb30] sm:$0xff]  ;;  %v2454_v16 = vld [vmem:[#allocation8 + $0xaa8] sm:$0xff] }
 0xc4f   :  { %2543 = vmatprep.subr.mxu0 %v2382_v31  ;;  %2614 = vmatprep.subr.mxu1 %v2384_v53  ;;  %v2456_v31 = vld [vmem:[#allocation8 + $0xab8] sm:$0xff]  ;;  %v2453_v53 = vld [vmem:[#allocation8 + $0xaa0] sm:$0xff] }
 0xc50   :  { %2544 = vmatpush1.msra.mxu0 %v2381_v3  ;;  %2615 = vmatpush1.msra.mxu1 %v2383_v4  ;;  %v2455_v3 = vld [vmem:[#allocation8 + $0xab0] sm:$0xff]  ;;  %v2450_v4 = vld [vmem:[#allocation8 + $0xa28] sm:$0xff] }
 0xc51   :  { %2545 = vmatprep.subr.mxu0 %v2378_v46  ;;  %2616 = vmatprep.subr.mxu1 %v2380_v49  ;;  %v2452_v46 = vld [vmem:[#allocation8 + $0xa38] sm:$0xff]  ;;  %v2449_v49 = vld [vmem:[#allocation8 + $0xa20] sm:$0xff] }
 0xc52   :  { %2546 = vmatpush1.msra.mxu0 %v2377_v1  ;;  %2617 = vmatpush1.msra.mxu1 %v2379_v63  ;;  %v2451_v1 = vld [vmem:[#allocation8 + $0xa30] sm:$0xff]  ;;  %v2446_v63 = vld [vmem:[#allocation8 + $0x9a8] sm:$0xff] }
 0xc53   :  { %2547 = vmatprep.subr.mxu0 %v2374_v60  ;;  %2618 = vmatprep.subr.mxu1 %v2376_v58  ;;  %v2448_v60 = vld [vmem:[#allocation8 + $0x9b8] sm:$0xff]  ;;  %v2445_v58 = vld [vmem:[#allocation8 + $0x9a0] sm:$0xff] }
 0xc54   :  { %2548 = vmatpush1.msra.mxu0 %v2373_v11  ;;  %2619 = vmatpush1.msra.mxu1 %v2375_v42  ;;  %v2447_v11 = vld [vmem:[#allocation8 + $0x9b0] sm:$0xff]  ;;  %v2442_v42 = vld [vmem:[#allocation8 + $0x928] sm:$0xff] }
 0xc55   :  { %2549 = vmatprep.subr.mxu0 %v2370_v48  ;;  %2620 = vmatprep.subr.mxu1 %v2372_v12  ;;  %v2444_v48 = vld [vmem:[#allocation8 + $0x938] sm:$0xff]  ;;  %v2441_v12 = vld [vmem:[#allocation8 + $0x920] sm:$0xff] }
 0xc56   :  { %2550 = vmatpush1.msra.mxu0 %v2369_v27  ;;  %2621 = vmatpush1.msra.mxu1 %v2371_v39  ;;  %v2443_v27 = vld [vmem:[#allocation8 + $0x930] sm:$0xff]  ;;  %v2438_v39 = vld [vmem:[#allocation8 + $0x8a8] sm:$0xff] }
 0xc57   :  { %2551 = vmatprep.subr.mxu0 %v2494_v14  ;;  %2622 = vmatprep.subr.mxu1 %v2496_v52  ;;  %v2440_v14 = vld [vmem:[#allocation8 + $0x8b8] sm:$0xff]  ;;  %v2437_v52 = vld [vmem:[#allocation8 + $0x8a0] sm:$0xff] }
 0xc58   :  { %2552 = vmatpush2.msra.mxu0 %v2493_v8  ;;  %2623 = vmatpush2.msra.mxu1 %v2495_v54  ;;  %v2439_v8 = vld [vmem:[#allocation8 + $0x8b0] sm:$0xff]  ;;  %v2434_v54 = vld [vmem:[#allocation8 + $0x828] sm:$0xff] }
 0xc59   :  { %2553 = vmatprep.subr.mxu0 %v2490_v62  ;;  %2624 = vmatprep.subr.mxu1 %v2492_v59  ;;  %v2436_v62 = vld [vmem:[#allocation8 + $0x838] sm:$0xff]  ;;  %v2433_v59 = vld [vmem:[#allocation8 + $0x820] sm:$0xff] }
 0xc5a   :  { %2554 = vmatpush2.msra.mxu0 %v2489_v19  ;;  %2625 = vmatpush2.msra.mxu1 %v2491_v13  ;;  %v2435_v19 = vld [vmem:[#allocation8 + $0x830] sm:$0xff]  ;;  %v2726_v13 = vld [vmem:[#allocation8 + $0x7c8] sm:$0xff] }
 0xc5b   :  { %2555 = vmatprep.subr.mxu0 %v2486_v22  ;;  %2626 = vmatprep.subr.mxu1 %v2488_v45  ;;  %v2728_v22 = vld [vmem:[#allocation8 + $0x7d8] sm:$0xff]  ;;  %v2725_v45 = vld [vmem:[#allocation8 + $0x7c0] sm:$0xff] }
 0xc5c   :  { %2556 = vmatpush2.msra.mxu0 %v2485_v34  ;;  %2627 = vmatpush2.msra.mxu1 %v2487_v25  ;;  %v2727_v34 = vld [vmem:[#allocation8 + $0x7d0] sm:$0xff]  ;;  %v2722_v25 = vld [vmem:[#allocation8 + $0x748] sm:$0xff] }
 0xc5d   :  { %2557 = vmatprep.subr.mxu0 %v2482_v50  ;;  %2628 = vmatprep.subr.mxu1 %v2484_v40  ;;  %v2724_v50 = vld [vmem:[#allocation8 + $0x758] sm:$0xff]  ;;  %v2721_v40 = vld [vmem:[#allocation8 + $0x740] sm:$0xff] }
 0xc5e   :  { %2558 = vmatpush2.msra.mxu0 %v2481_v17  ;;  %2629 = vmatpush2.msra.mxu1 %v2483_v44  ;;  %v2723_v17 = vld [vmem:[#allocation8 + $0x750] sm:$0xff]  ;;  %v2718_v44 = vld [vmem:[#allocation8 + $0x6c8] sm:$0xff] }
 0xc5f   :  { %2559 = vmatprep.subr.mxu0 %v2478_v55  ;;  %2630 = vmatprep.subr.mxu1 %v2480_v18  ;;  %v2720_v55 = vld [vmem:[#allocation8 + $0x6d8] sm:$0xff]  ;;  %v2717_v18 = vld [vmem:[#allocation8 + $0x6c0] sm:$0xff] }
 0xc60   :  { %2560 = vmatpush2.msra.mxu0 %v2477_v35  ;;  %2631 = vmatpush2.msra.mxu1 %v2479_v5  ;;  %v2719_v35 = vld [vmem:[#allocation8 + $0x6d0] sm:$0xff]  ;;  %v2714_v5 = vld [vmem:[#allocation8 + $0x648] sm:$0xff] }
 0xc61   :  { %2561 = vmatprep.subr.mxu0 %v2474_v26  ;;  %2632 = vmatprep.subr.mxu1 %v2476_v36  ;;  %v2716_v26 = vld [vmem:[#allocation8 + $0x658] sm:$0xff]  ;;  %v2713_v36 = vld [vmem:[#allocation8 + $0x640] sm:$0xff] }
 0xc62   :  { %2562 = vmatpush2.msra.mxu0 %v2473_v30  ;;  %2633 = vmatpush2.msra.mxu1 %v2475_v61  ;;  %v2715_v30 = vld [vmem:[#allocation8 + $0x650] sm:$0xff]  ;;  %v2710_v61 = vld [vmem:[#allocation8 + $0x5c8] sm:$0xff] }
 0xc63   :  { %2563 = vmatprep.subr.mxu0 %v2470_v57  ;;  %2634 = vmatprep.subr.mxu1 %v2472_v7  ;;  %v2712_v57 = vld [vmem:[#allocation8 + $0x5d8] sm:$0xff]  ;;  %v2709_v7 = vld [vmem:[#allocation8 + $0x5c0] sm:$0xff] }
 0xc64   :  { %2564 = vmatpush2.msra.mxu0 %v2469_v29  ;;  %2635 = vmatpush2.msra.mxu1 %v2471_v37  ;;  %v2711_v29 = vld [vmem:[#allocation8 + $0x5d0] sm:$0xff]  ;;  %v2706_v37 = vld [vmem:[#allocation8 + $0x548] sm:$0xff] }
 0xc65   :  { %2565 = vmatprep.subr.mxu0 %v2466_v43  ;;  %2636 = vmatprep.subr.mxu1 %v2468_v51  ;;  %v2708_v43 = vld [vmem:[#allocation8 + $0x558] sm:$0xff]  ;;  %v2705_v51 = vld [vmem:[#allocation8 + $0x540] sm:$0xff] }
 0xc66   :  { %2566 = vmatpush2.msra.mxu0 %v2465_v10  ;;  %2637 = vmatpush2.msra.mxu1 %v2467_v23  ;;  %v2707_v10 = vld [vmem:[#allocation8 + $0x550] sm:$0xff]  ;;  %v2702_v23 = vld [vmem:[#allocation8 + $0x4c8] sm:$0xff] }
 0xc67   :  { %2567 = vmatprep.subr.mxu0 %v2462_v33  ;;  %2638 = vmatprep.subr.mxu1 %v2464_v56  ;;  %v2704_v33 = vld [vmem:[#allocation8 + $0x4d8] sm:$0xff]  ;;  %v2701_v56 = vld [vmem:[#allocation8 + $0x4c0] sm:$0xff] }
 0xc68   :  { %2568 = vmatpush2.msra.mxu0 %v2461_v0  ;;  %2639 = vmatpush2.msra.mxu1 %v2463_v6  ;;  %v2703_v0 = vld [vmem:[#allocation8 + $0x4d0] sm:$0xff]  ;;  %v2698_v6 = vld [vmem:[#allocation8 + $0x448] sm:$0xff] }
 0xc69   :  { %2569 = vmatprep.subr.mxu0 %v2458_v20  ;;  %2640 = vmatprep.subr.mxu1 %v2460_v24  ;;  %v2700_v20 = vld [vmem:[#allocation8 + $0x458] sm:$0xff]  ;;  %v2697_v24 = vld [vmem:[#allocation8 + $0x440] sm:$0xff] }
 0xc6a   :  { %2570 = vmatpush2.msra.mxu0 %v2457_v38  ;;  %2641 = vmatpush2.msra.mxu1 %v2459_v41  ;;  %v2699_v38 = vld [vmem:[#allocation8 + $0x450] sm:$0xff]  ;;  %v2694_v41 = vld [vmem:[#allocation8 + $0x3c8] sm:$0xff] }
 0xc6b   :  { %2571 = vmatprep.subr.mxu0 %v2454_v16  ;;  %2642 = vmatprep.subr.mxu1 %v2456_v31  ;;  %v2696_v16 = vld [vmem:[#allocation8 + $0x3d8] sm:$0xff]  ;;  %v2693_v31 = vld [vmem:[#allocation8 + $0x3c0] sm:$0xff] }
 0xc6c   :  { %2572 = vmatpush2.msra.mxu0 %v2453_v53  ;;  %2643 = vmatpush2.msra.mxu1 %v2455_v3  ;;  %v2695_v53 = vld [vmem:[#allocation8 + $0x3d0] sm:$0xff]  ;;  %v2690_v3 = vld [vmem:[#allocation8 + $0x348] sm:$0xff] }
 0xc6d   :  { %2573 = vmatprep.subr.mxu0 %v2450_v4  ;;  %2644 = vmatprep.subr.mxu1 %v2452_v46  ;;  %v2692_v4 = vld [vmem:[#allocation8 + $0x358] sm:$0xff]  ;;  %v2689_v46 = vld [vmem:[#allocation8 + $0x340] sm:$0xff] }
 0xc6e   :  { %2574 = vmatpush2.msra.mxu0 %v2449_v49  ;;  %2645 = vmatpush2.msra.mxu1 %v2451_v1  ;;  %v2691_v49 = vld [vmem:[#allocation8 + $0x350] sm:$0xff]  ;;  %v2686_v1 = vld [vmem:[#allocation8 + $0x2c8] sm:$0xff] }
 0xc6f   :  { %2575 = vmatprep.subr.mxu0 %v2446_v63  ;;  %2646 = vmatprep.subr.mxu1 %v2448_v60  ;;  %v2688_v63 = vld [vmem:[#allocation8 + $0x2d8] sm:$0xff]  ;;  %v2685_v60 = vld [vmem:[#allocation8 + $0x2c0] sm:$0xff] }
 0xc70   :  { %2576 = vmatpush2.msra.mxu0 %v2445_v58  ;;  %2647 = vmatpush2.msra.mxu1 %v2447_v11  ;;  %v2687_v58 = vld [vmem:[#allocation8 + $0x2d0] sm:$0xff]  ;;  %v2682_v11 = vld [vmem:[#allocation8 + $0x248] sm:$0xff] }
 0xc71   :  { %2577 = vmatprep.subr.mxu0 %v2442_v42  ;;  %2648 = vmatprep.subr.mxu1 %v2444_v48  ;;  %v2684_v42 = vld [vmem:[#allocation8 + $0x258] sm:$0xff]  ;;  %v2681_v48 = vld [vmem:[#allocation8 + $0x240] sm:$0xff] }
 0xc72   :  { %2578 = vmatpush2.msra.mxu0 %v2441_v12  ;;  %2649 = vmatpush2.msra.mxu1 %v2443_v27  ;;  %v2683_v12 = vld [vmem:[#allocation8 + $0x250] sm:$0xff]  ;;  %v2678_v27 = vld [vmem:[#allocation8 + $0x1c8] sm:$0xff] }
 0xc73   :  { %2579 = vmatprep.subr.mxu0 %v2438_v39  ;;  %2650 = vmatprep.subr.mxu1 %v2440_v14  ;;  %v2680_v39 = vld [vmem:[#allocation8 + $0x1d8] sm:$0xff]  ;;  %v2677_v14 = vld [vmem:[#allocation8 + $0x1c0] sm:$0xff] }
 0xc74   :  { %2580 = vmatpush2.msra.mxu0 %v2437_v52  ;;  %2651 = vmatpush2.msra.mxu1 %v2439_v8  ;;  %v2679_v52 = vld [vmem:[#allocation8 + $0x1d0] sm:$0xff]  ;;  %v2674_v8 = vld [vmem:[#allocation8 + $0x148] sm:$0xff] }
 0xc75   :  { %2581 = vmatprep.subr.mxu0 %v2434_v54  ;;  %2652 = vmatprep.subr.mxu1 %v2436_v62  ;;  %v2676_v54 = vld [vmem:[#allocation8 + $0x158] sm:$0xff]  ;;  %v2673_v62 = vld [vmem:[#allocation8 + $0x140] sm:$0xff] }
 0xc76   :  { %2582 = vmatpush2.msra.mxu0 %v2433_v59  ;;  %2653 = vmatpush2.msra.mxu1 %v2435_v19  ;;  %v2675_v59 = vld [vmem:[#allocation8 + $0x150] sm:$0xff]  ;;  %v2670_v19 = vld [vmem:[#allocation8 + $0xc8] sm:$0xff] }
 0xc77   :  { %2584 = vmatmul.mubr.f32.vlgmr.msra.gmra.mxu0 %v7498_v47  ;;  %2655 = vmatmul.mubr.f32.vlgmr.msra.gmra.mxu1 %v7498_v47 }
 0xc78   :  { %2815 = vmatprep.subr.mxu0 %v2726_v13  ;;  %2886 = vmatprep.subr.mxu1 %v2728_v22  ;;  %v2672_v13 = vld [vmem:[#allocation8 + $0xd8] sm:$0xff]  ;;  %v2669_v22 = vld [vmem:[#allocation8 + $0xc0] sm:$0xff] }
 0xc79   :  { %2816 = vmatpush1.msra.mxu0 %v2725_v45  ;;  %2879 = vmatprep.mubr.f32.mxu0 %v7496_v32  ;;  %v2671_v45 = vld [vmem:[#allocation8 + $0xd0] sm:$0xff] }
 0xc7a   :  { %2887 = vmatpush1.msra.mxu1 %v2727_v34  ;;  %2950 = vmatprep.mubr.f32.mxu1 %v7496_v32  ;;  %v2666_v34 = vld [vmem:[#allocation8 + $0x48] sm:$0xff] }
 0xc7b   :  { %2817 = vmatprep.subr.mxu0 %v2722_v25  ;;  %2888 = vmatprep.subr.mxu1 %v2724_v50  ;;  %v2668_v25 = vld [vmem:[#allocation8 + $0x58] sm:$0xff]  ;;  %v2665_v50 = vld [vmem:[#allocation8 + $0x40] sm:$0xff] }
 0xc7c   :  { %2818 = vmatpush1.msra.mxu0 %v2721_v40  ;;  %2889 = vmatpush1.msra.mxu1 %v2723_v17  ;;  %v2667_v40 = vld [vmem:[#allocation8 + $0x50] sm:$0xff]  ;;  %v2790_v17 = vld [vmem:[#allocation8 + $0xfc8] sm:$0xff] }
 0xc7d   :  { %2819 = vmatprep.subr.mxu0 %v2718_v44  ;;  %2890 = vmatprep.subr.mxu1 %v2720_v55  ;;  %v2792_v44 = vld [vmem:[#allocation8 + $0xfd8] sm:$0xff]  ;;  %v2789_v55 = vld [vmem:[#allocation8 + $0xfc0] sm:$0xff] }
 0xc7e   :  { %2820 = vmatpush1.msra.mxu0 %v2717_v18  ;;  %2891 = vmatpush1.msra.mxu1 %v2719_v35  ;;  %v2791_v18 = vld [vmem:[#allocation8 + $0xfd0] sm:$0xff]  ;;  %v2786_v35 = vld [vmem:[#allocation8 + $0xf48] sm:$0xff] }
 0xc7f   :  { %2821 = vmatprep.subr.mxu0 %v2714_v5  ;;  %2892 = vmatprep.subr.mxu1 %v2716_v26  ;;  %v2788_v5 = vld [vmem:[#allocation8 + $0xf58] sm:$0xff]  ;;  %v2785_v26 = vld [vmem:[#allocation8 + $0xf40] sm:$0xff] }
 0xc80   :  { %2822 = vmatpush1.msra.mxu0 %v2713_v36  ;;  %2893 = vmatpush1.msra.mxu1 %v2715_v30  ;;  %v2787_v36 = vld [vmem:[#allocation8 + $0xf50] sm:$0xff]  ;;  %v2782_v30 = vld [vmem:[#allocation8 + $0xec8] sm:$0xff] }
 0xc81   :  { %2823 = vmatprep.subr.mxu0 %v2710_v61  ;;  %2894 = vmatprep.subr.mxu1 %v2712_v57  ;;  %v2784_v61 = vld [vmem:[#allocation8 + $0xed8] sm:$0xff]  ;;  %v2781_v57 = vld [vmem:[#allocation8 + $0xec0] sm:$0xff] }
 0xc82   :  { %2824 = vmatpush1.msra.mxu0 %v2709_v7  ;;  %2895 = vmatpush1.msra.mxu1 %v2711_v29  ;;  %v2783_v7 = vld [vmem:[#allocation8 + $0xed0] sm:$0xff]  ;;  %v2778_v29 = vld [vmem:[#allocation8 + $0xe48] sm:$0xff] }
 0xc83   :  { %2825 = vmatprep.subr.mxu0 %v2706_v37  ;;  %2896 = vmatprep.subr.mxu1 %v2708_v43  ;;  %v2780_v37 = vld [vmem:[#allocation8 + $0xe58] sm:$0xff]  ;;  %v2777_v43 = vld [vmem:[#allocation8 + $0xe40] sm:$0xff] }
 0xc84   :  { %2826 = vmatpush1.msra.mxu0 %v2705_v51  ;;  %2897 = vmatpush1.msra.mxu1 %v2707_v10  ;;  %v2779_v51 = vld [vmem:[#allocation8 + $0xe50] sm:$0xff]  ;;  %v2774_v10 = vld [vmem:[#allocation8 + $0xdc8] sm:$0xff] }
 0xc85   :  { %2827 = vmatprep.subr.mxu0 %v2702_v23  ;;  %2898 = vmatprep.subr.mxu1 %v2704_v33  ;;  %v2776_v23 = vld [vmem:[#allocation8 + $0xdd8] sm:$0xff]  ;;  %v2773_v33 = vld [vmem:[#allocation8 + $0xdc0] sm:$0xff] }
 0xc86   :  { %2828 = vmatpush1.msra.mxu0 %v2701_v56  ;;  %2899 = vmatpush1.msra.mxu1 %v2703_v0  ;;  %v2775_v56 = vld [vmem:[#allocation8 + $0xdd0] sm:$0xff]  ;;  %v2770_v0 = vld [vmem:[#allocation8 + $0xd48] sm:$0xff] }
 0xc87   :  { %2829 = vmatprep.subr.mxu0 %v2698_v6  ;;  %2900 = vmatprep.subr.mxu1 %v2700_v20  ;;  %v2772_v6 = vld [vmem:[#allocation8 + $0xd58] sm:$0xff]  ;;  %v2769_v20 = vld [vmem:[#allocation8 + $0xd40] sm:$0xff] }
 0xc88   :  { %2830 = vmatpush1.msra.mxu0 %v2697_v24  ;;  %2901 = vmatpush1.msra.mxu1 %v2699_v38  ;;  %v2771_v24 = vld [vmem:[#allocation8 + $0xd50] sm:$0xff]  ;;  %v2766_v38 = vld [vmem:[#allocation8 + $0xcc8] sm:$0xff] }
 0xc89   :  { %2831 = vmatprep.subr.mxu0 %v2694_v41  ;;  %2902 = vmatprep.subr.mxu1 %v2696_v16  ;;  %v2768_v41 = vld [vmem:[#allocation8 + $0xcd8] sm:$0xff]  ;;  %v2765_v16 = vld [vmem:[#allocation8 + $0xcc0] sm:$0xff] }
 0xc8a   :  { %2832 = vmatpush1.msra.mxu0 %v2693_v31  ;;  %2903 = vmatpush1.msra.mxu1 %v2695_v53  ;;  %v2767_v31 = vld [vmem:[#allocation8 + $0xcd0] sm:$0xff]  ;;  %v2762_v53 = vld [vmem:[#allocation8 + $0xc48] sm:$0xff] }
 0xc8b   :  { %2833 = vmatprep.subr.mxu0 %v2690_v3  ;;  %2904 = vmatprep.subr.mxu1 %v2692_v4  ;;  %v2764_v3 = vld [vmem:[#allocation8 + $0xc58] sm:$0xff]  ;;  %v2761_v4 = vld [vmem:[#allocation8 + $0xc40] sm:$0xff] }
 0xc8c   :  { %2834 = vmatpush1.msra.mxu0 %v2689_v46  ;;  %2905 = vmatpush1.msra.mxu1 %v2691_v49  ;;  %v2763_v46 = vld [vmem:[#allocation8 + $0xc50] sm:$0xff]  ;;  %v2758_v49 = vld [vmem:[#allocation8 + $0xbc8] sm:$0xff] }
 0xc8d   :  { %2835 = vmatprep.subr.mxu0 %v2686_v1  ;;  %2906 = vmatprep.subr.mxu1 %v2688_v63  ;;  %v2760_v1 = vld [vmem:[#allocation8 + $0xbd8] sm:$0xff]  ;;  %v2757_v63 = vld [vmem:[#allocation8 + $0xbc0] sm:$0xff] }
 0xc8e   :  { %2836 = vmatpush1.msra.mxu0 %v2685_v60  ;;  %2907 = vmatpush1.msra.mxu1 %v2687_v58  ;;  %v2759_v60 = vld [vmem:[#allocation8 + $0xbd0] sm:$0xff]  ;;  %v2754_v58 = vld [vmem:[#allocation8 + $0xb48] sm:$0xff] }
 0xc8f   :  { %2837 = vmatprep.subr.mxu0 %v2682_v11  ;;  %2908 = vmatprep.subr.mxu1 %v2684_v42  ;;  %v2756_v11 = vld [vmem:[#allocation8 + $0xb58] sm:$0xff]  ;;  %v2753_v42 = vld [vmem:[#allocation8 + $0xb40] sm:$0xff] }
 0xc90   :  { %2838 = vmatpush1.msra.mxu0 %v2681_v48  ;;  %2909 = vmatpush1.msra.mxu1 %v2683_v12  ;;  %v2755_v48 = vld [vmem:[#allocation8 + $0xb50] sm:$0xff]  ;;  %v2750_v12 = vld [vmem:[#allocation8 + $0xac8] sm:$0xff] }
 0xc91   :  { %2839 = vmatprep.subr.mxu0 %v2678_v27  ;;  %2910 = vmatprep.subr.mxu1 %v2680_v39  ;;  %v2752_v27 = vld [vmem:[#allocation8 + $0xad8] sm:$0xff]  ;;  %v2749_v39 = vld [vmem:[#allocation8 + $0xac0] sm:$0xff] }
 0xc92   :  { %2840 = vmatpush1.msra.mxu0 %v2677_v14  ;;  %2911 = vmatpush1.msra.mxu1 %v2679_v52  ;;  %v2751_v14 = vld [vmem:[#allocation8 + $0xad0] sm:$0xff]  ;;  %v2746_v52 = vld [vmem:[#allocation8 + $0xa48] sm:$0xff] }
 0xc93   :  { %2841 = vmatprep.subr.mxu0 %v2674_v8  ;;  %2912 = vmatprep.subr.mxu1 %v2676_v54  ;;  %v2748_v8 = vld [vmem:[#allocation8 + $0xa58] sm:$0xff]  ;;  %v2745_v54 = vld [vmem:[#allocation8 + $0xa40] sm:$0xff] }
 0xc94   :  { %2842 = vmatpush1.msra.mxu0 %v2673_v62  ;;  %2913 = vmatpush1.msra.mxu1 %v2675_v59  ;;  %v2747_v62 = vld [vmem:[#allocation8 + $0xa50] sm:$0xff]  ;;  %v2742_v59 = vld [vmem:[#allocation8 + $0x9c8] sm:$0xff] }
 0xc95   :  { %2843 = vmatprep.subr.mxu0 %v2670_v19  ;;  %2914 = vmatprep.subr.mxu1 %v2672_v13  ;;  %v2744_v19 = vld [vmem:[#allocation8 + $0x9d8] sm:$0xff]  ;;  %v2741_v13 = vld [vmem:[#allocation8 + $0x9c0] sm:$0xff] }
 0xc96   :  { %2844 = vmatpush1.msra.mxu0 %v2669_v22  ;;  %2915 = vmatpush1.msra.mxu1 %v2671_v45  ;;  %v2743_v22 = vld [vmem:[#allocation8 + $0x9d0] sm:$0xff]  ;;  %v2738_v45 = vld [vmem:[#allocation8 + $0x948] sm:$0xff] }
 0xc97   :  { %2845 = vmatprep.subr.mxu0 %v2666_v34  ;;  %2916 = vmatprep.subr.mxu1 %v2668_v25  ;;  %v2740_v34 = vld [vmem:[#allocation8 + $0x958] sm:$0xff]  ;;  %v2737_v25 = vld [vmem:[#allocation8 + $0x940] sm:$0xff] }
 0xc98   :  { %2846 = vmatpush1.msra.mxu0 %v2665_v50  ;;  %2917 = vmatpush1.msra.mxu1 %v2667_v40  ;;  %v2739_v50 = vld [vmem:[#allocation8 + $0x950] sm:$0xff]  ;;  %v2734_v40 = vld [vmem:[#allocation8 + $0x8c8] sm:$0xff] }
 0xc99   :  { %2847 = vmatprep.subr.mxu0 %v2790_v17  ;;  %2918 = vmatprep.subr.mxu1 %v2792_v44  ;;  %v2736_v17 = vld [vmem:[#allocation8 + $0x8d8] sm:$0xff]  ;;  %v2733_v44 = vld [vmem:[#allocation8 + $0x8c0] sm:$0xff] }
 0xc9a   :  { %2848 = vmatpush2.msra.mxu0 %v2789_v55  ;;  %2919 = vmatpush2.msra.mxu1 %v2791_v18  ;;  %v2735_v55 = vld [vmem:[#allocation8 + $0x8d0] sm:$0xff]  ;;  %v2730_v18 = vld [vmem:[#allocation8 + $0x848] sm:$0xff] }
 0xc9b   :  { %2849 = vmatprep.subr.mxu0 %v2786_v35  ;;  %2920 = vmatprep.subr.mxu1 %v2788_v5  ;;  %v2732_v35 = vld [vmem:[#allocation8 + $0x858] sm:$0xff]  ;;  %v2729_v5 = vld [vmem:[#allocation8 + $0x840] sm:$0xff] }
 0xc9c   :  { %2850 = vmatpush2.msra.mxu0 %v2785_v26  ;;  %2921 = vmatpush2.msra.mxu1 %v2787_v36  ;;  %v2731_v26 = vld [vmem:[#allocation8 + $0x850] sm:$0xff]  ;;  %v3022_v36 = vld [vmem:[#allocation8 + $0x7e8] sm:$0xff] }
 0xc9d   :  { %2851 = vmatprep.subr.mxu0 %v2782_v30  ;;  %2922 = vmatprep.subr.mxu1 %v2784_v61  ;;  %v3024_v30 = vld [vmem:[#allocation8 + $0x7f8] sm:$0xff]  ;;  %v3021_v61 = vld [vmem:[#allocation8 + $0x7e0] sm:$0xff] }
 0xc9e   :  { %2852 = vmatpush2.msra.mxu0 %v2781_v57  ;;  %2923 = vmatpush2.msra.mxu1 %v2783_v7  ;;  %v3023_v57 = vld [vmem:[#allocation8 + $0x7f0] sm:$0xff]  ;;  %v3018_v7 = vld [vmem:[#allocation8 + $0x768] sm:$0xff] }
 0xc9f   :  { %2853 = vmatprep.subr.mxu0 %v2778_v29  ;;  %2924 = vmatprep.subr.mxu1 %v2780_v37  ;;  %v3020_v29 = vld [vmem:[#allocation8 + $0x778] sm:$0xff]  ;;  %v3017_v37 = vld [vmem:[#allocation8 + $0x760] sm:$0xff] }
 0xca0   :  { %2854 = vmatpush2.msra.mxu0 %v2777_v43  ;;  %2925 = vmatpush2.msra.mxu1 %v2779_v51  ;;  %v3019_v43 = vld [vmem:[#allocation8 + $0x770] sm:$0xff]  ;;  %v3014_v51 = vld [vmem:[#allocation8 + $0x6e8] sm:$0xff] }
 0xca1   :  { %2855 = vmatprep.subr.mxu0 %v2774_v10  ;;  %2926 = vmatprep.subr.mxu1 %v2776_v23  ;;  %v3016_v10 = vld [vmem:[#allocation8 + $0x6f8] sm:$0xff]  ;;  %v3013_v23 = vld [vmem:[#allocation8 + $0x6e0] sm:$0xff] }
 0xca2   :  { %2856 = vmatpush2.msra.mxu0 %v2773_v33  ;;  %2927 = vmatpush2.msra.mxu1 %v2775_v56  ;;  %v3015_v33 = vld [vmem:[#allocation8 + $0x6f0] sm:$0xff]  ;;  %v3010_v56 = vld [vmem:[#allocation8 + $0x668] sm:$0xff] }
 0xca3   :  { %2857 = vmatprep.subr.mxu0 %v2770_v0  ;;  %2928 = vmatprep.subr.mxu1 %v2772_v6  ;;  %v3012_v0 = vld [vmem:[#allocation8 + $0x678] sm:$0xff]  ;;  %v3009_v6 = vld [vmem:[#allocation8 + $0x660] sm:$0xff] }
 0xca4   :  { %2858 = vmatpush2.msra.mxu0 %v2769_v20  ;;  %2929 = vmatpush2.msra.mxu1 %v2771_v24  ;;  %v3011_v20 = vld [vmem:[#allocation8 + $0x670] sm:$0xff]  ;;  %v3006_v24 = vld [vmem:[#allocation8 + $0x5e8] sm:$0xff] }
 0xca5   :  { %2859 = vmatprep.subr.mxu0 %v2766_v38  ;;  %2930 = vmatprep.subr.mxu1 %v2768_v41  ;;  %v3008_v38 = vld [vmem:[#allocation8 + $0x5f8] sm:$0xff]  ;;  %v3007_v41 = vld [vmem:[#allocation8 + $0x5f0] sm:$0xff] }
 0xca6   :  { %2860 = vmatpush2.msra.mxu0 %v2765_v16  ;;  %2931 = vmatpush2.msra.mxu1 %v2767_v31  ;;  %v3002_v16 = vld [vmem:[#allocation8 + $0x568] sm:$0xff]  ;;  %v3004_v31 = vld [vmem:[#allocation8 + $0x578] sm:$0xff] }
 0xca7   :  { %2861 = vmatprep.subr.mxu0 %v2762_v53  ;;  %2932 = vmatprep.subr.mxu1 %v2764_v3  ;;  %v3001_v53 = vld [vmem:[#allocation8 + $0x560] sm:$0xff]  ;;  %v3003_v3 = vld [vmem:[#allocation8 + $0x570] sm:$0xff] }
 0xca8   :  { %2862 = vmatpush2.msra.mxu0 %v2761_v4  ;;  %2933 = vmatpush2.msra.mxu1 %v2763_v46  ;;  %v2998_v4 = vld [vmem:[#allocation8 + $0x4e8] sm:$0xff]  ;;  %v3000_v46 = vld [vmem:[#allocation8 + $0x4f8] sm:$0xff] }
 0xca9   :  { %2863 = vmatprep.subr.mxu0 %v2758_v49  ;;  %2934 = vmatprep.subr.mxu1 %v2760_v1  ;;  %v2997_v49 = vld [vmem:[#allocation8 + $0x4e0] sm:$0xff]  ;;  %v2999_v1 = vld [vmem:[#allocation8 + $0x4f0] sm:$0xff] }
 0xcaa   :  { %2864 = vmatpush2.msra.mxu0 %v2757_v63  ;;  %2935 = vmatpush2.msra.mxu1 %v2759_v60  ;;  %v2994_v63 = vld [vmem:[#allocation8 + $0x468] sm:$0xff]  ;;  %v2996_v60 = vld [vmem:[#allocation8 + $0x478] sm:$0xff] }
 0xcab   :  { %2865 = vmatprep.subr.mxu0 %v2754_v58  ;;  %2936 = vmatprep.subr.mxu1 %v2756_v11  ;;  %v2993_v58 = vld [vmem:[#allocation8 + $0x460] sm:$0xff]  ;;  %v2995_v11 = vld [vmem:[#allocation8 + $0x470] sm:$0xff] }
 0xcac   :  { %2866 = vmatpush2.msra.mxu0 %v2753_v42  ;;  %2937 = vmatpush2.msra.mxu1 %v2755_v48  ;;  %v2990_v42 = vld [vmem:[#allocation8 + $0x3e8] sm:$0xff]  ;;  %v2992_v48 = vld [vmem:[#allocation8 + $0x3f8] sm:$0xff] }
 0xcad   :  { %2867 = vmatprep.subr.mxu0 %v2750_v12  ;;  %2938 = vmatprep.subr.mxu1 %v2752_v27  ;;  %v2989_v12 = vld [vmem:[#allocation8 + $0x3e0] sm:$0xff]  ;;  %v2991_v27 = vld [vmem:[#allocation8 + $0x3f0] sm:$0xff] }
 0xcae   :  { %2868 = vmatpush2.msra.mxu0 %v2749_v39  ;;  %2939 = vmatpush2.msra.mxu1 %v2751_v14  ;;  %v2986_v39 = vld [vmem:[#allocation8 + $0x368] sm:$0xff]  ;;  %v2988_v14 = vld [vmem:[#allocation8 + $0x378] sm:$0xff] }
 0xcaf   :  { %2869 = vmatprep.subr.mxu0 %v2746_v52  ;;  %2940 = vmatprep.subr.mxu1 %v2748_v8  ;;  %v2985_v52 = vld [vmem:[#allocation8 + $0x360] sm:$0xff]  ;;  %v2987_v8 = vld [vmem:[#allocation8 + $0x370] sm:$0xff] }
 0xcb0   :  { %2870 = vmatpush2.msra.mxu0 %v2745_v54  ;;  %2941 = vmatpush2.msra.mxu1 %v2747_v62  ;;  %v2982_v54 = vld [vmem:[#allocation8 + $0x2e8] sm:$0xff]  ;;  %v2984_v62 = vld [vmem:[#allocation8 + $0x2f8] sm:$0xff] }
 0xcb1   :  { %2871 = vmatprep.subr.mxu0 %v2742_v59  ;;  %2942 = vmatprep.subr.mxu1 %v2744_v19  ;;  %v2981_v59 = vld [vmem:[#allocation8 + $0x2e0] sm:$0xff]  ;;  %v2983_v19 = vld [vmem:[#allocation8 + $0x2f0] sm:$0xff] }
 0xcb2   :  { %2872 = vmatpush2.msra.mxu0 %v2741_v13  ;;  %2943 = vmatpush2.msra.mxu1 %v2743_v22  ;;  %v2978_v13 = vld [vmem:[#allocation8 + $0x268] sm:$0xff]  ;;  %v2980_v22 = vld [vmem:[#allocation8 + $0x278] sm:$0xff] }
 0xcb3   :  { %2873 = vmatprep.subr.mxu0 %v2738_v45  ;;  %2944 = vmatprep.subr.mxu1 %v2740_v34  ;;  %v2977_v45 = vld [vmem:[#allocation8 + $0x260] sm:$0xff]  ;;  %v2979_v34 = vld [vmem:[#allocation8 + $0x270] sm:$0xff] }
 0xcb4   :  { %2874 = vmatpush2.msra.mxu0 %v2737_v25  ;;  %2945 = vmatpush2.msra.mxu1 %v2739_v50  ;;  %v2974_v25 = vld [vmem:[#allocation8 + $0x1e8] sm:$0xff]  ;;  %v2976_v50 = vld [vmem:[#allocation8 + $0x1f8] sm:$0xff] }
 0xcb5   :  { %2875 = vmatprep.subr.mxu0 %v2734_v40  ;;  %2946 = vmatprep.subr.mxu1 %v2736_v17  ;;  %v2973_v40 = vld [vmem:[#allocation8 + $0x1e0] sm:$0xff]  ;;  %v2975_v17 = vld [vmem:[#allocation8 + $0x1f0] sm:$0xff] }
 0xcb6   :  { %2876 = vmatpush2.msra.mxu0 %v2733_v44  ;;  %2947 = vmatpush2.msra.mxu1 %v2735_v55  ;;  %v2970_v44 = vld [vmem:[#allocation8 + $0x168] sm:$0xff]  ;;  %v2972_v55 = vld [vmem:[#allocation8 + $0x178] sm:$0xff] }
 0xcb7   :  { %2877 = vmatprep.subr.mxu0 %v2730_v18  ;;  %2948 = vmatprep.subr.mxu1 %v2732_v35  ;;  %v2969_v18 = vld [vmem:[#allocation8 + $0x160] sm:$0xff]  ;;  %v2971_v35 = vld [vmem:[#allocation8 + $0x170] sm:$0xff] }
 0xcb8   :  { %2878 = vmatpush2.msra.mxu0 %v2729_v5  ;;  %2949 = vmatpush2.msra.mxu1 %v2731_v26  ;;  %v2966_v5 = vld [vmem:[#allocation8 + $0xe8] sm:$0xff]  ;;  %v2968_v26 = vld [vmem:[#allocation8 + $0xf8] sm:$0xff] }
 0xcb9   :  { %2880 = vmatmul.mubr.f32.vlgmr.msra.gmra.mxu0 %v7498_v47  ;;  %2951 = vmatmul.mubr.f32.vlgmr.msra.gmra.mxu1 %v7498_v47 }
 0xcba   :  { %3111 = vmatprep.subr.mxu0 %v3022_v36  ;;  %3182 = vmatprep.subr.mxu1 %v3024_v30  ;;  %v2965_v36 = vld [vmem:[#allocation8 + $0xe0] sm:$0xff]  ;;  %v2967_v30 = vld [vmem:[#allocation8 + $0xf0] sm:$0xff] }
 0xcbb   :  { %3112 = vmatpush1.msra.mxu0 %v3021_v61  ;;  %3175 = vmatprep.mubr.f32.mxu0 %v7496_v32  ;;  %v2962_v61 = vld [vmem:[#allocation8 + $0x68] sm:$0xff] }
 0xcbc   :  { %3183 = vmatpush1.msra.mxu1 %v3023_v57  ;;  %3246 = vmatprep.mubr.f32.mxu1 %v7496_v32  ;;  %v3005_v32 = vld [vmem:[#allocation8 + $0x5e0] sm:$0xff]  ;;  %v2964_v57 = vld [vmem:[#allocation8 + $0x78] sm:$0xff] }
 0xcbd   :  { %3113 = vmatprep.subr.mxu0 %v3018_v7  ;;  %3184 = vmatprep.subr.mxu1 %v3020_v29  ;;  %v2961_v7 = vld [vmem:[#allocation8 + $0x60] sm:$0xff]  ;;  %v2963_v29 = vld [vmem:[#allocation8 + $0x70] sm:$0xff] }
 0xcbe   :  { %3114 = vmatpush1.msra.mxu0 %v3017_v37  ;;  %3185 = vmatpush1.msra.mxu1 %v3019_v43  ;;  %v3086_v37 = vld [vmem:[#allocation8 + $0xfe8] sm:$0xff]  ;;  %v3088_v43 = vld [vmem:[#allocation8 + $0xff8] sm:$0xff] }
 0xcbf   :  { %3115 = vmatprep.subr.mxu0 %v3014_v51  ;;  %3186 = vmatprep.subr.mxu1 %v3016_v10  ;;  %v3085_v51 = vld [vmem:[#allocation8 + $0xfe0] sm:$0xff]  ;;  %v3087_v10 = vld [vmem:[#allocation8 + $0xff0] sm:$0xff] }
 0xcc0   :  { %3116 = vmatpush1.msra.mxu0 %v3013_v23  ;;  %3187 = vmatpush1.msra.mxu1 %v3015_v33  ;;  %v3082_v23 = vld [vmem:[#allocation8 + $0xf68] sm:$0xff]  ;;  %v3084_v33 = vld [vmem:[#allocation8 + $0xf78] sm:$0xff] }
 0xcc1   :  { %3117 = vmatprep.subr.mxu0 %v3010_v56  ;;  %3188 = vmatprep.subr.mxu1 %v3012_v0  ;;  %v3081_v56 = vld [vmem:[#allocation8 + $0xf60] sm:$0xff]  ;;  %v3083_v0 = vld [vmem:[#allocation8 + $0xf70] sm:$0xff] }
 0xcc2   :  { %3118 = vmatpush1.msra.mxu0 %v3009_v6  ;;  %3189 = vmatpush1.msra.mxu1 %v3011_v20  ;;  %v3078_v6 = vld [vmem:[#allocation8 + $0xee8] sm:$0xff]  ;;  %v3080_v20 = vld [vmem:[#allocation8 + $0xef8] sm:$0xff] }
 0xcc3   :  { %3119 = vmatprep.subr.mxu0 %v3006_v24  ;;  %3190 = vmatprep.subr.mxu1 %v3008_v38  ;;  %v3077_v24 = vld [vmem:[#allocation8 + $0xee0] sm:$0xff]  ;;  %v3079_v38 = vld [vmem:[#allocation8 + $0xef0] sm:$0xff] }
 0xcc4   :  { %3120 = vmatpush1.msra.mxu0 %v3005_v32  ;;  %3191 = vmatpush1.msra.mxu1 %v3007_v41  ;;  %v7514_v32 = vpop.trf.xlu1  ;;  %v7516_v41 = vpop.trf.xlu0 }
 0xcc5   :  { %3121 = vmatprep.subr.mxu0 %v3002_v16  ;;  %3192 = vmatprep.subr.mxu1 %v3004_v31  ;;  %v3074_v16 = vld [vmem:[#allocation8 + $0xe68] sm:$0xff]  ;;  %v3076_v31 = vld [vmem:[#allocation8 + $0xe78] sm:$0xff] }
 0xcc6   :  { %3122 = vmatpush1.msra.mxu0 %v3001_v53  ;;  %3193 = vmatpush1.msra.mxu1 %v3003_v3  ;;  %v3073_v53 = vld [vmem:[#allocation8 + $0xe60] sm:$0xff]  ;;  %v3075_v3 = vld [vmem:[#allocation8 + $0xe70] sm:$0xff] }
 0xcc7   :  { %3123 = vmatprep.subr.mxu0 %v2998_v4  ;;  %3194 = vmatprep.subr.mxu1 %v3000_v46  ;;  %v3070_v4 = vld [vmem:[#allocation8 + $0xde8] sm:$0xff]  ;;  %v3072_v46 = vld [vmem:[#allocation8 + $0xdf8] sm:$0xff] }
 0xcc8   :  { %3124 = vmatpush1.msra.mxu0 %v2997_v49  ;;  %3195 = vmatpush1.msra.mxu1 %v2999_v1  ;;  %v3069_v49 = vld [vmem:[#allocation8 + $0xde0] sm:$0xff]  ;;  %v3071_v1 = vld [vmem:[#allocation8 + $0xdf0] sm:$0xff] }
 0xcc9   :  { %3125 = vmatprep.subr.mxu0 %v2994_v63  ;;  %3196 = vmatprep.subr.mxu1 %v2996_v60  ;;  %v3066_v63 = vld [vmem:[#allocation8 + $0xd68] sm:$0xff]  ;;  %v3068_v60 = vld [vmem:[#allocation8 + $0xd78] sm:$0xff] }
 0xcca   :  { %3126 = vmatpush1.msra.mxu0 %v2993_v58  ;;  %3197 = vmatpush1.msra.mxu1 %v2995_v11  ;;  %v3065_v58 = vld [vmem:[#allocation8 + $0xd60] sm:$0xff]  ;;  %v3067_v11 = vld [vmem:[#allocation8 + $0xd70] sm:$0xff] }
 0xccb   :  { %3127 = vmatprep.subr.mxu0 %v2990_v42  ;;  %3198 = vmatprep.subr.mxu1 %v2992_v48  ;;  %v7518_v42 = vpop.trf.xlu1  ;;  %v7520_v48 = vpop.trf.xlu0 }
 0xccc   :  { %3128 = vmatpush1.msra.mxu0 %v2989_v12  ;;  %3199 = vmatpush1.msra.mxu1 %v2991_v27  ;;  %v3062_v12 = vld [vmem:[#allocation8 + $0xce8] sm:$0xff]  ;;  %v3064_v27 = vld [vmem:[#allocation8 + $0xcf8] sm:$0xff] }
 0xccd   :  { %3129 = vmatprep.subr.mxu0 %v2986_v39  ;;  %3200 = vmatprep.subr.mxu1 %v2988_v14  ;;  %v3061_v39 = vld [vmem:[#allocation8 + $0xce0] sm:$0xff]  ;;  %v3063_v14 = vld [vmem:[#allocation8 + $0xcf0] sm:$0xff] }
 0xcce   :  { %3130 = vmatpush1.msra.mxu0 %v2985_v52  ;;  %3201 = vmatpush1.msra.mxu1 %v2987_v8  ;;  %v3058_v52 = vld [vmem:[#allocation8 + $0xc68] sm:$0xff]  ;;  %v3060_v8 = vld [vmem:[#allocation8 + $0xc78] sm:$0xff] }
 0xccf   :  { %3131 = vmatprep.subr.mxu0 %v2982_v54  ;;  %3202 = vmatprep.subr.mxu1 %v2984_v62  ;;  %v3057_v54 = vld [vmem:[#allocation8 + $0xc60] sm:$0xff]  ;;  %v3059_v62 = vld [vmem:[#allocation8 + $0xc70] sm:$0xff] }
 0xcd0   :  { %3132 = vmatpush1.msra.mxu0 %v2981_v59  ;;  %3203 = vmatpush1.msra.mxu1 %v2983_v19  ;;  %v3054_v59 = vld [vmem:[#allocation8 + $0xbe8] sm:$0xff]  ;;  %v3056_v19 = vld [vmem:[#allocation8 + $0xbf8] sm:$0xff] }
 0xcd1   :  { %3133 = vmatprep.subr.mxu0 %v2978_v13  ;;  %3204 = vmatprep.subr.mxu1 %v2980_v22  ;;  %v3053_v13 = vld [vmem:[#allocation8 + $0xbe0] sm:$0xff]  ;;  %v3055_v22 = vld [vmem:[#allocation8 + $0xbf0] sm:$0xff] }
 0xcd2   :  { %3134 = vmatpush1.msra.mxu0 %v2977_v45  ;;  %3205 = vmatpush1.msra.mxu1 %v2979_v34  ;;  %v7522_v45 = vpop.trf.xlu1  ;;  %v7524_v34 = vpop.trf.xlu0 }
 0xcd3   :  { %3135 = vmatprep.subr.mxu0 %v2974_v25  ;;  %3206 = vmatprep.subr.mxu1 %v2976_v50  ;;  %v3050_v25 = vld [vmem:[#allocation8 + $0xb68] sm:$0xff]  ;;  %v3052_v50 = vld [vmem:[#allocation8 + $0xb78] sm:$0xff] }
 0xcd4   :  { %3136 = vmatpush1.msra.mxu0 %v2973_v40  ;;  %3207 = vmatpush1.msra.mxu1 %v2975_v17  ;;  %v3049_v40 = vld [vmem:[#allocation8 + $0xb60] sm:$0xff]  ;;  %v3051_v17 = vld [vmem:[#allocation8 + $0xb70] sm:$0xff] }
 0xcd5   :  { %3137 = vmatprep.subr.mxu0 %v2970_v44  ;;  %3208 = vmatprep.subr.mxu1 %v2972_v55  ;;  %v3046_v44 = vld [vmem:[#allocation8 + $0xae8] sm:$0xff]  ;;  %v3048_v55 = vld [vmem:[#allocation8 + $0xaf8] sm:$0xff] }
 0xcd6   :  { %3138 = vmatpush1.msra.mxu0 %v2969_v18  ;;  %3209 = vmatpush1.msra.mxu1 %v2971_v35  ;;  %v3045_v18 = vld [vmem:[#allocation8 + $0xae0] sm:$0xff]  ;;  %v3047_v35 = vld [vmem:[#allocation8 + $0xaf0] sm:$0xff] }
 0xcd7   :  { %3139 = vmatprep.subr.mxu0 %v2966_v5  ;;  %3210 = vmatprep.subr.mxu1 %v2968_v26  ;;  %v3042_v5 = vld [vmem:[#allocation8 + $0xa68] sm:$0xff]  ;;  %v3044_v26 = vld [vmem:[#allocation8 + $0xa78] sm:$0xff] }
 0xcd8   :  { %3140 = vmatpush1.msra.mxu0 %v2965_v36  ;;  %3211 = vmatpush1.msra.mxu1 %v2967_v30  ;;  %v3041_v36 = vld [vmem:[#allocation8 + $0xa60] sm:$0xff]  ;;  %v3043_v30 = vld [vmem:[#allocation8 + $0xa70] sm:$0xff] }
 0xcd9   :  { %3141 = vmatprep.subr.mxu0 %v2962_v61  ;;  %3212 = vmatprep.subr.mxu1 %v2964_v57  ;;  %v8219_v61 = vld [vmem:[#allocation16_spill] sm:$0xff] }
 0xcda   :  { %3142 = vmatpush1.msra.mxu0 %v2961_v7  ;;  %3213 = vmatpush1.msra.mxu1 %v2963_v29  ;;  %v7527_v57 = vsub.s32 2, %v8219_v61  ;;  %v7529_v7 = vpop.trf.xlu1  ;;  %v7531_v29 = vpop.trf.xlu0 }
 0xcdb   :  { %3143 = vmatprep.subr.mxu0 %v3086_v37  ;;  %3214 = vmatprep.subr.mxu1 %v3088_v43  ;;  %v3038_v37 = vld [vmem:[#allocation8 + $0x9e8] sm:$0xff]  ;;  %v3040_v43 = vld [vmem:[#allocation8 + $0x9f8] sm:$0xff] }
 0xcdc   :  { %3144 = vmatpush2.msra.mxu0 %v3085_v51  ;;  %3215 = vmatpush2.msra.mxu1 %v3087_v10  ;;  %8220 = vst [vmem:[#allocation16_spill] sm:$0xff] %v7527_v57  ;;  %v2201_v51 = vld [vmem:[#allocation10] sm:$0xf] }
 0xcdd   :  { %3145 = vmatprep.subr.mxu0 %v3082_v23  ;;  %3216 = vmatprep.subr.mxu1 %v3084_v33  ;;  %v3037_v10 = vld [vmem:[#allocation8 + $0x9e0] sm:$0xff]  ;;  %v3039_v23 = vld [vmem:[#allocation8 + $0x9f0] sm:$0xff]  ;;  %v7534_v33 = vsub.s32 3, %v8219_v61 }
 0xcde   :  { %3146 = vmatpush2.msra.mxu0 %v3081_v56  ;;  %3217 = vmatpush2.msra.mxu1 %v3083_v0  ;;  %v3034_v56 = vld [vmem:[#allocation8 + $0x968] sm:$0xff]  ;;  %v3036_v0 = vld [vmem:[#allocation8 + $0x978] sm:$0xff] }
 0xcdf   :  { %3147 = vmatprep.subr.mxu0 %v3078_v6  ;;  %3218 = vmatprep.subr.mxu1 %v3080_v20  ;;  %8221 = vst [vmem:[#allocation19_spill] sm:$0xff] %v7534_v33  ;;  %v3033_v6 = vld [vmem:[#allocation8 + $0x960] sm:$0xff]  ;;  %v3035_v20 = vld [vmem:[#allocation8 + $0x970] sm:$0xff] }
 0xce0   :  { %3148 = vmatpush2.msra.mxu0 %v3077_v24  ;;  %3219 = vmatpush2.msra.mxu1 %v3079_v38  ;;  %v2206_v24 = vrot.slane %v2201_v51, %v8217_v2  ;;  %v2214_v38 = vrot.slane %v2201_v51, %v7527_v57 }
 0xce1   :  { %3149 = vmatprep.subr.mxu0 %v3074_v16  ;;  %3220 = vmatprep.subr.mxu1 %v3076_v31  ;;  %v3030_v16 = vld [vmem:[#allocation8 + $0x8e8] sm:$0xff]  ;;  %v3032_v31 = vld [vmem:[#allocation8 + $0x8f8] sm:$0xff] }
 0xce2   :  { %3150 = vmatpush2.msra.mxu0 %v3073_v53  ;;  %3221 = vmatpush2.msra.mxu1 %v3075_v3  ;;  %v3029_v53 = vld [vmem:[#allocation8 + $0x8e0] sm:$0xff]  ;;  %v3031_v3 = vld [vmem:[#allocation8 + $0x8f0] sm:$0xff] }
 0xce3   :  { %3151 = vmatprep.subr.mxu0 %v3070_v4  ;;  %3222 = vmatprep.subr.mxu1 %v3072_v46  ;;  %v2210_v4 = vrot.slane %v2201_v51, %v8218_v21  ;;  %v2218_v46 = vrot.slane %v2201_v51, %v7534_v33 }
 0xce4   :  { %3152 = vmatpush2.msra.mxu0 %v3069_v49  ;;  %3223 = vmatpush2.msra.mxu1 %v3071_v1  ;;  %v3333_v49 = vpop.trf.xlu1  ;;  %v3301_v1 = vpop.trf.xlu0 }
 0xce5   :  { %3153 = vmatprep.subr.mxu0 %v3066_v63  ;;  %3224 = vmatprep.subr.mxu1 %v3068_v60  ;;  %v3026_v63 = vld [vmem:[#allocation8 + $0x868] sm:$0xff]  ;;  %v3028_v60 = vld [vmem:[#allocation8 + $0x878] sm:$0xff] }
 0xce6   :  { %3154 = vmatpush2.msra.mxu0 %v3065_v58  ;;  %3225 = vmatpush2.msra.mxu1 %v3067_v11 }
 0xce7   :  { %3155 = vmatprep.subr.mxu0 %v3062_v12  ;;  %3226 = vmatprep.subr.mxu1 %v3064_v27  ;;  %v3025_v12 = vld [vmem:[#allocation8 + $0x860] sm:$0xff]  ;;  %v3027_v27 = vld [vmem:[#allocation8 + $0x870] sm:$0xff] }
 0xce8   :  { %3156 = vmatpush2.msra.mxu0 %v3061_v39  ;;  %3227 = vmatpush2.msra.mxu1 %v3063_v14 }
 0xce9   :  { %3157 = vmatprep.subr.mxu0 %v3058_v52  ;;  %3228 = vmatprep.subr.mxu1 %v3060_v8 }
 0xcea   :  { %3158 = vmatpush2.msra.mxu0 %v3057_v54  ;;  %3229 = vmatpush2.msra.mxu1 %v3059_v62 }
 0xceb   :  { %3159 = vmatprep.subr.mxu0 %v3054_v59  ;;  %3230 = vmatprep.subr.mxu1 %v3056_v19  ;;  %v3334_v59 = vpop.trf.xlu1  ;;  %v3302_v19 = vpop.trf.xlu0 }
 0xcec   :  { %3160 = vmatpush2.msra.mxu0 %v3053_v13  ;;  %3231 = vmatpush2.msra.mxu1 %v3055_v22 }
 0xced   :  { %3161 = vmatprep.subr.mxu0 %v3050_v25  ;;  %3232 = vmatprep.subr.mxu1 %v3052_v50 }
 0xcee   :  { %3162 = vmatpush2.msra.mxu0 %v3049_v40  ;;  %3233 = vmatpush2.msra.mxu1 %v3051_v17 }
 0xcef   :  { %3163 = vmatprep.subr.mxu0 %v3046_v44  ;;  %3234 = vmatprep.subr.mxu1 %v3048_v55  ;;  %v3303_v13 = vpop.trf.xlu0 }
 0xcf0   :  { %3164 = vmatpush2.msra.mxu0 %v3045_v18  ;;  %3235 = vmatpush2.msra.mxu1 %v3047_v35  ;;  %v2497_v35 = vld [vmem:[#allocation10 + $0x4] sm:$0xf] }
 0xcf1   :  { %3165 = vmatprep.subr.mxu0 %v3042_v5  ;;  %3236 = vmatprep.subr.mxu1 %v3044_v26  ;;  %v2506_v61 = vrot.slane %v2497_v35, %v8218_v21 }
 0xcf2   :  { %3166 = vmatpush2.msra.mxu0 %v3041_v36  ;;  %3237 = vmatpush2.msra.mxu1 %v3043_v30  ;;  %v2502_v36 = vrot.slane %v2497_v35, %v8217_v2  ;;  %v2510_v30 = vrot.slane %v2497_v35, %v7527_v57 }
 0xcf3   :  { %3167 = vmatprep.subr.mxu0 %v3038_v37  ;;  %3238 = vmatprep.subr.mxu1 %v3040_v43 }
 0xcf4   :  { %3168 = vmatpush2.msra.mxu0 %v3037_v10  ;;  %3239 = vmatpush2.msra.mxu1 %v3039_v23 }
 0xcf5   :  { %3169 = vmatprep.subr.mxu0 %v3034_v56  ;;  %3240 = vmatprep.subr.mxu1 %v3036_v0 }
 0xcf6   :  { %3170 = vmatpush2.msra.mxu0 %v3033_v6  ;;  %3241 = vmatpush2.msra.mxu1 %v3035_v20  ;;  %v2289_v58 = vpop.f32.mrf.mxu0  ;;  %v2360_v11 = vpop.f32.mrf.mxu1 }
 0xcf7   :  { %3171 = vmatprep.subr.mxu0 %v3030_v16  ;;  %3242 = vmatprep.subr.mxu1 %v3032_v31  ;;  %v2290_v39 = vadd.f32 %v2289_v58, %v2206_v24  ;;  %v2361_v14 = vadd.f32 %v2360_v11, %v2214_v38  ;;  %v2793_v24 = vld [vmem:[#allocation10 + $0x8] sm:$0xf]  ;;  %v3089_v58 = vld [vmem:[#allocation10 + $0xc] sm:$0xf] }
 0xcf8   :  { %3172 = vmatpush2.msra.mxu0 %v3029_v53  ;;  %3243 = vmatpush2.msra.mxu1 %v3031_v3  ;;  %v2291_v52 = vpop.f32.mrf.mxu0  ;;  %v2362_v8 = vpop.f32.mrf.mxu1  ;;  %v2798_v38 = vrot.slane %v2793_v24, %v8217_v2  ;;  %v2806_v16 = vrot.slane %v2793_v24, %v7527_v57  ;;  %v2802_v31 = vrot.slane %v2793_v24, %v8218_v21 }
 0xcf9   :  { %3173 = vmatprep.subr.mxu0 %v3026_v63  ;;  %3244 = vmatprep.subr.mxu1 %v3028_v60  ;;  %2365 = vst [vmem:[#allocation11] sm:$0xff] %v2290_v39  ;;  %2367 = vst [vmem:[#allocation11 + $0x10] sm:$0xff] %v2361_v14  ;;  %v2292_v54 = vadd.f32 %v2291_v52, %v2210_v4  ;;  %v2363_v62 = vadd.f32 %v2362_v8, %v2218_v46 }
 0xcfa   :  { %3174 = vmatpush2.msra.mxu0 %v3025_v12  ;;  %3245 = vmatpush2.msra.mxu1 %v3027_v27  ;;  %v2810_v53 = vrot.slane %v2793_v24, %v7534_v33  ;;  %v3094_v11 = vrot.slane %v3089_v58, %v8217_v2  ;;  %v3102_v12 = vrot.slane %v3089_v58, %v7527_v57 }
 0xcfb   :  { %3176 = vmatmul.mubr.f32.vlgmr.msra.gmra.mxu0 %v7498_v47  ;;  %3247 = vmatmul.mubr.f32.vlgmr.msra.gmra.mxu1 %v7498_v47  ;;  %2366 = vst [vmem:[#allocation11 + $0x8] sm:$0xff] %v2292_v54  ;;  %2368 = vst [vmem:[#allocation11 + $0x18] sm:$0xff] %v2363_v62  ;;  %v3335_v47 = vpop.trf.xlu1  ;;  %v3098_v27 = vrot.slane %v3089_v58, %v8218_v21  ;;  %v3106_v39 = vrot.slane %v3089_v58, %v7534_v33  ;;  %v3777_v58 = vld [vmem:[#allocation5 + $0x40] sm:$0xff] }
 0xcfc   :  { %3471 = vmatprep.subr.mxu0 %v7487_v15  ;;  %6638 = vmatprep.subr.mxu1 %v7487_v15  ;;  %v3805_v21 = vld [vmem:[#allocation5 + $0x120] sm:$0xff] }
 0xcfd   :  { %3472 = vmatpush1.msra.mxu0 %v7490_v28  ;;  %6639 = vmatpush1.msra.mxu1 %v7490_v28 }
 0xcfe   :  { %3505 = vmatprep.mubr.f32.mxu0 %v8216_v9  ;;  %3601 = vmatprep.mubr.f32.mxu1 %v8216_v9 }
 0xcff   :  { %6536 = vmatmul.mubr.msk.f32.vlgmr.msra.gmra.mxu0 %vm177_vm2, %v7516_v41  ;;  %6552 = vmatmul.mubr.msk.f32.vlgmr.msra.gmra.mxu1 %vm177_vm2, %v7514_v32  ;;  %v3336_v32 = vpop.trf.xlu1  ;;  %v3304_v41 = vpop.trf.xlu0 }
 0xd00   :  { %3511 = vmatprep.mubr.f32.mxu0 %v8216_v9  ;;  %3607 = vmatprep.mubr.f32.mxu1 %v8216_v9 }
 0xd03   :  { %6537 = vmatmul.mubr.msk.f32.gmra.mxu0 %vm177_vm2, %v7520_v48  ;;  %6553 = vmatmul.mubr.msk.f32.gmra.mxu1 %vm177_vm2, %v7518_v42  ;;  %v3337_v42 = vpop.trf.xlu1  ;;  %v3305_v48 = vpop.trf.xlu0 }
 0xd04   :  { %3517 = vmatprep.mubr.f32.mxu0 %v8216_v9  ;;  %3613 = vmatprep.mubr.f32.mxu1 %v8216_v9 }
 0xd07   :  { %6538 = vmatmul.mubr.msk.f32.gmra.mxu0 %vm177_vm2, %v7524_v34  ;;  %6554 = vmatmul.mubr.msk.f32.gmra.mxu1 %vm177_vm2, %v7522_v45  ;;  %v3338_v22 = vpop.trf.xlu1  ;;  %v3306_v45 = vpop.trf.xlu0 }
 0xd08   :  { %3523 = vmatprep.mubr.f32.mxu0 %v8216_v9  ;;  %3619 = vmatprep.mubr.f32.mxu1 %v8216_v9 }
 0xd0b   :  { %6539 = vmatmul.mubr.msk.f32.gmra.mxu0 %vm177_vm2, %v7531_v29  ;;  %6555 = vmatmul.mubr.msk.f32.gmra.mxu1 %vm177_vm2, %v7529_v7  ;;  %v3339_v34 = vpop.trf.xlu1  ;;  %v3307_v25 = vpop.trf.xlu0  ;;  %v2514_v7 = vrot.slane %v2497_v35, %v7534_v33 }
 0xd0c   :  { %3529 = vmatprep.mubr.f32.mxu0 %v8216_v9  ;;  %3625 = vmatprep.mubr.f32.mxu1 %v8216_v9 }
 0xd0f   :  { %6540 = vmatmul.mubr.msk.f32.gmra.mxu0 %vm177_vm2, %v3301_v1  ;;  %6556 = vmatmul.mubr.msk.f32.gmra.mxu1 %vm177_vm2, %v3333_v49  ;;  %v3340_v50 = vpop.trf.xlu1  ;;  %v3308_v40 = vpop.trf.xlu0 }
 0xd10   :  { %3535 = vmatprep.mubr.f32.mxu0 %v8216_v9  ;;  %3631 = vmatprep.mubr.f32.mxu1 %v8216_v9 }
 0xd13   :  { %6541 = vmatmul.mubr.msk.f32.gmra.mxu0 %vm177_vm2, %v3302_v19  ;;  %6557 = vmatmul.mubr.msk.f32.gmra.mxu1 %vm177_vm2, %v3334_v59  ;;  %v3341_v17 = vpop.trf.xlu1  ;;  %v3309_v44 = vpop.trf.xlu0 }
 0xd14   :  { %3541 = vmatprep.mubr.f32.mxu0 %v8216_v9  ;;  %3637 = vmatprep.mubr.f32.mxu1 %v8216_v9 }
 0xd17   :  { %6542 = vmatmul.mubr.msk.f32.gmra.mxu0 %vm177_vm2, %v3303_v13  ;;  %6558 = vmatmul.mubr.msk.f32.gmra.mxu1 %vm177_vm2, %v3335_v47  ;;  %v3342_v55 = vpop.trf.xlu1  ;;  %v3310_v18 = vpop.trf.xlu0  ;;  %v3800_v13 = vld [vmem:[#allocation5 + $0xf8] sm:$0xff] }
 0xd18   :  { %3547 = vmatprep.mubr.f32.mxu0 %v8216_v9  ;;  %3643 = vmatprep.mubr.f32.mxu1 %v8216_v9 }
 0xd19   :  { %3845 = vmatprep.subr.mxu0 %v3800_v13  ;;  %v3770_v13 = vld [vmem:[#allocation5 + $0x8] sm:$0xff] }
 0xd1b   :  { %6543 = vmatmul.mubr.msk.f32.gmra.mxu0 %vm177_vm2, %v3304_v41  ;;  %6559 = vmatmul.mubr.msk.f32.gmra.mxu1 %vm177_vm2, %v3336_v32  ;;  %v3343_v5 = vpop.trf.xlu1  ;;  %v3311_v26 = vpop.trf.xlu0  ;;  %v3799_v32 = vld [vmem:[#allocation5 + $0xf0] sm:$0xff]  ;;  %v3798_v41 = vld [vmem:[#allocation5 + $0xe8] sm:$0xff] }
 0xd1c   :  { %3553 = vmatprep.mubr.f32.mxu0 %v8216_v9  ;;  %3649 = vmatprep.mubr.f32.mxu1 %v8216_v9 }
 0xd1d   :  { %3846 = vmatpush1.msra.mxu0 %v3799_v32 }
 0xd1e   :  { %3847 = vmatprep.subr.mxu0 %v3798_v41 }
 0xd1f   :  { %6544 = vmatmul.mubr.msk.f32.gmra.mxu0 %vm177_vm2, %v3305_v48  ;;  %6560 = vmatmul.mubr.msk.f32.gmra.mxu1 %vm177_vm2, %v3337_v42  ;;  %v3344_v43 = vpop.trf.xlu1  ;;  %v3312_v51 = vpop.trf.xlu0 }
 0xd20   :  { %3559 = vmatprep.mubr.f32.mxu0 %v8216_v9  ;;  %3655 = vmatprep.mubr.f32.mxu1 %v8216_v9 }
 0xd23   :  { %6545 = vmatmul.mubr.msk.f32.gmra.mxu0 %vm177_vm2, %v3306_v45  ;;  %6561 = vmatmul.mubr.msk.f32.gmra.mxu1 %vm177_vm2, %v3338_v22  ;;  %v3797_v22 = vld [vmem:[#allocation5 + $0xe0] sm:$0xff]  ;;  %v3796_v45 = vld [vmem:[#allocation5 + $0xd8] sm:$0xff] }
 0xd24   :  { %3565 = vmatprep.mubr.f32.mxu0 %v8216_v9  ;;  %3661 = vmatprep.mubr.f32.mxu1 %v8216_v9 }
 0xd25   :  { %3848 = vmatpush1.msra.mxu0 %v3797_v22  ;;  %v3769_v22 = vld [vmem:[#allocation5] sm:$0xff] }
 0xd26   :  { %3849 = vmatprep.subr.mxu0 %v3796_v45  ;;  %v3832_v45 = vld [vmem:[#allocation5 + $0x1f8] sm:$0xff] }
 0xd27   :  { %6546 = vmatmul.mubr.msk.f32.gmra.mxu0 %vm177_vm2, %v3307_v25  ;;  %6562 = vmatmul.mubr.msk.f32.gmra.mxu1 %vm177_vm2, %v3339_v34 }
 0xd28   :  { %3571 = vmatprep.mubr.f32.mxu0 %v8216_v9  ;;  %3667 = vmatprep.mubr.f32.mxu1 %v8216_v9 }
 0xd2b   :  { %6547 = vmatmul.mubr.msk.f32.gmra.mxu0 %vm177_vm2, %v3308_v40  ;;  %6563 = vmatmul.mubr.msk.f32.gmra.mxu1 %vm177_vm2, %v3340_v50  ;;  %v3795_v50 = vld [vmem:[#allocation5 + $0xd0] sm:$0xff]  ;;  %v3794_v40 = vld [vmem:[#allocation5 + $0xc8] sm:$0xff] }
 0xd2c   :  { %3577 = vmatprep.mubr.f32.mxu0 %v8216_v9  ;;  %3673 = vmatprep.mubr.f32.mxu1 %v8216_v9 }
 0xd2d   :  { %3850 = vmatpush1.msra.mxu0 %v3795_v50 }
 0xd2e   :  { %3851 = vmatprep.subr.mxu0 %v3794_v40 }
 0xd2f   :  { %6548 = vmatmul.mubr.msk.f32.gmra.mxu0 %vm177_vm2, %v3309_v44  ;;  %6564 = vmatmul.mubr.msk.f32.gmra.mxu1 %vm177_vm2, %v3341_v17 }
 0xd30   :  { %3583 = vmatprep.mubr.f32.mxu0 %v8216_v9  ;;  %3679 = vmatprep.mubr.f32.mxu1 %v8216_v9 }
 0xd33   :  { %6549 = vmatmul.mubr.msk.f32.gmra.mxu0 %vm177_vm2, %v3310_v18  ;;  %6565 = vmatmul.mubr.msk.f32.gmra.mxu1 %vm177_vm2, %v3342_v55  ;;  %v3793_v55 = vld [vmem:[#allocation5 + $0xc0] sm:$0xff]  ;;  %v3792_v18 = vld [vmem:[#allocation5 + $0xb8] sm:$0xff] }
 0xd34   :  { %3589 = vmatprep.mubr.f32.mxu0 %v8216_v9  ;;  %3685 = vmatprep.mubr.f32.mxu1 %v8216_v9 }
 0xd35   :  { %3852 = vmatpush1.msra.mxu0 %v3793_v55  ;;  %v3831_v55 = vld [vmem:[#allocation5 + $0x1f0] sm:$0xff] }
 0xd36   :  { %3853 = vmatprep.subr.mxu0 %v3792_v18  ;;  %v3830_v18 = vld [vmem:[#allocation5 + $0x1e8] sm:$0xff] }
 0xd37   :  { %6550 = vmatmul.mubr.msk.f32.gmra.mxu0 %vm177_vm2, %v3311_v26  ;;  %6566 = vmatmul.mubr.msk.f32.gmra.mxu1 %vm177_vm2, %v3343_v5  ;;  %v2585_v29 = vpop.f32.mrf.mxu0  ;;  %v2656_v37 = vpop.f32.mrf.mxu1  ;;  %v3791_v26 = vld [vmem:[#allocation5 + $0xb0] sm:$0xff] }
 0xd38   :  { %3595 = vmatprep.mubr.f32.mxu0 %v8216_v9  ;;  %3691 = vmatprep.mubr.f32.mxu1 %v8216_v9  ;;  %v2586_v10 = vadd.f32 %v2585_v29, %v2502_v36  ;;  %v2657_v23 = vadd.f32 %v2656_v37, %v2510_v30  ;;  %v3790_v36 = vld [vmem:[#allocation5 + $0xa8] sm:$0xff]  ;;  %v3788_v29 = vld [vmem:[#allocation5 + $0x98] sm:$0xff] }
 0xd39   :  { %v2587_v56 = vpop.f32.mrf.mxu0  ;;  %v2658_v0 = vpop.f32.mrf.mxu1  ;;  %3854 = vmatpush1.msra.mxu0 %v3791_v26 }
 0xd3a   :  { %2661 = vst [vmem:[#allocation11 + $0x20] sm:$0xff] %v2586_v10  ;;  %2663 = vst [vmem:[#allocation11 + $0x30] sm:$0xff] %v2657_v23  ;;  %v2588_v6 = vadd.f32 %v2587_v56, %v2506_v61  ;;  %v2659_v20 = vadd.f32 %v2658_v0, %v2514_v7  ;;  %v3789_v7 = vld [vmem:[#allocation5 + $0xa0] sm:$0xff]  ;;  %3855 = vmatprep.subr.mxu0 %v3790_v36  ;;  %v3786_v10 = vld [vmem:[#allocation5 + $0x88] sm:$0xff] }
 0xd3b   :  { %6551 = vmatmul.mubr.msk.f32.gmra.mxu0 %vm177_vm2, %v3312_v51  ;;  %6567 = vmatmul.mubr.msk.f32.gmra.mxu1 %vm177_vm2, %v3344_v43  ;;  %v3787_v51 = vld [vmem:[#allocation5 + $0x90] sm:$0xff]  ;;  %v3785_v0 = vld [vmem:[#allocation5 + $0x80] sm:$0xff] }
 0xd3c   :  { %3762 = vmatprep.mubr.f32.mxu1 %v7487_v15  ;;  %2662 = vst [vmem:[#allocation11 + $0x28] sm:$0xff] %v2588_v6  ;;  %2664 = vst [vmem:[#allocation11 + $0x38] sm:$0xff] %v2659_v20  ;;  %3856 = vmatpush1.msra.mxu0 %v3789_v7  ;;  %v3784_v6 = vld [vmem:[#allocation5 + $0x78] sm:$0xff]  ;;  %v3829_v36 = vld [vmem:[#allocation5 + $0x1e0] sm:$0xff] }
 0xd3d   :  { %3857 = vmatprep.subr.mxu0 %v3788_v29  ;;  %v3828_v7 = vld [vmem:[#allocation5 + $0x1d8] sm:$0xff] }
 0xd3e   :  { %3858 = vmatpush1.msra.mxu0 %v3787_v51 }
 0xd3f   :  { %3859 = vmatprep.subr.mxu0 %v3786_v10  ;;  %v3827_v10 = vld [vmem:[#allocation5 + $0x1d0] sm:$0xff] }
 0xd40   :  { %3860 = vmatpush1.msra.mxu0 %v3785_v0  ;;  %v3826_v0 = vld [vmem:[#allocation5 + $0x1c8] sm:$0xff] }
 0xd41   :  { %3861 = vmatprep.subr.mxu0 %v3784_v6 }
 0xd79   :  { %v2881_v3 = vpop.f32.mrf.mxu0  ;;  %v2952_v4 = vpop.f32.mrf.mxu1 }
 0xd7a   :  { %v2882_v46 = vadd.f32 %v2881_v3, %v2798_v38  ;;  %v2953_v49 = vadd.f32 %v2952_v4, %v2806_v16  ;;  %v3783_v38 = vld [vmem:[#allocation5 + $0x70] sm:$0xff]  ;;  %v3782_v16 = vld [vmem:[#allocation5 + $0x68] sm:$0xff]  ;;  %v3781_v3 = vld [vmem:[#allocation5 + $0x60] sm:$0xff] }
 0xd7b   :  { %v2883_v1 = vpop.f32.mrf.mxu0  ;;  %v2954_v63 = vpop.f32.mrf.mxu1  ;;  %3862 = vmatpush1.msra.mxu0 %v3783_v38  ;;  %v3780_v4 = vld [vmem:[#allocation5 + $0x58] sm:$0xff]  ;;  %v3825_v38 = vld [vmem:[#allocation5 + $0x1c0] sm:$0xff] }
 0xd7c   :  { %2957 = vst [vmem:[#allocation11 + $0x40] sm:$0xff] %v2882_v46  ;;  %2959 = vst [vmem:[#allocation11 + $0x50] sm:$0xff] %v2953_v49  ;;  %v2884_v15 = vadd.f32 %v2883_v1, %v2802_v31  ;;  %v2955_v60 = vadd.f32 %v2954_v63, %v2810_v53  ;;  %3863 = vmatprep.subr.mxu0 %v3782_v16  ;;  %v3779_v1 = vld [vmem:[#allocation5 + $0x50] sm:$0xff]  ;;  %v3778_v63 = vld [vmem:[#allocation5 + $0x48] sm:$0xff] }
 0xd7d   :  { %3864 = vmatpush1.msra.mxu0 %v3781_v3  ;;  %v3824_v16 = vld [vmem:[#allocation5 + $0x1b8] sm:$0xff] }
 0xd7e   :  { %2958 = vst [vmem:[#allocation11 + $0x48] sm:$0xff] %v2884_v15  ;;  %2960 = vst [vmem:[#allocation11 + $0x58] sm:$0xff] %v2955_v60  ;;  %3865 = vmatprep.subr.mxu0 %v3780_v4 }
 0xd7f   :  { %3866 = vmatpush1.msra.mxu0 %v3779_v1  ;;  %v3823_v1 = vld [vmem:[#allocation5 + $0x1b0] sm:$0xff] }
 0xd80   :  { %3867 = vmatprep.subr.mxu0 %v3778_v63  ;;  %v3822_v63 = vld [vmem:[#allocation5 + $0x1a8] sm:$0xff] }
 0xd81   :  { %3868 = vmatpush1.msra.mxu0 %v3777_v58 }
 0xdbb   :  { %v3177_v14 = vpop.f32.mrf.mxu0  ;;  %v3248_v52 = vpop.f32.mrf.mxu1 }
 0xdbc   :  { %v3178_v8 = vadd.f32 %v3177_v14, %v3094_v11  ;;  %v3249_v54 = vadd.f32 %v3248_v52, %v3102_v12  ;;  %v3776_v11 = vld [vmem:[#allocation5 + $0x38] sm:$0xff]  ;;  %v3774_v14 = vld [vmem:[#allocation5 + $0x28] sm:$0xff] }
 0xdbd   :  { %v3179_v62 = vpop.f32.mrf.mxu0  ;;  %v3250_v59 = vpop.f32.mrf.mxu1  ;;  %3869 = vmatprep.subr.mxu0 %v3776_v11  ;;  %v3821_v11 = vld [vmem:[#allocation5 + $0x1a0] sm:$0xff] }
 0xdbe   :  { %3253 = vst [vmem:[#allocation11 + $0x60] sm:$0xff] %v3178_v8  ;;  %3255 = vst [vmem:[#allocation11 + $0x70] sm:$0xff] %v3249_v54  ;;  %v3180_v19 = vadd.f32 %v3179_v62, %v3098_v27  ;;  %v3251_v47 = vadd.f32 %v3250_v59, %v3106_v39  ;;  %v3775_v39 = vld [vmem:[#allocation5 + $0x30] sm:$0xff]  ;;  %v3773_v54 = vld [vmem:[#allocation5 + $0x20] sm:$0xff] }
 0xdbf   :  { %v7631_v42 = vpop.f32.mrf.mxu0  ;;  %v7633_v48 = vpop.f32.mrf.mxu1  ;;  %3870 = vmatpush1.msra.mxu0 %v3775_v39  ;;  %v3772_v62 = vld [vmem:[#allocation5 + $0x18] sm:$0xff] }
 0xdc0   :  { %3254 = vst [vmem:[#allocation11 + $0x68] sm:$0xff] %v3180_v19  ;;  %3256 = vst [vmem:[#allocation11 + $0x78] sm:$0xff] %v3251_v47  ;;  %3871 = vmatprep.subr.mxu0 %v3774_v14  ;;  %v3771_v47 = vld [vmem:[#allocation5 + $0x10] sm:$0xff]  ;;  %v3820_v39 = vld [vmem:[#allocation5 + $0x198] sm:$0xff] }
 0xdc1   :  { %v7635_v34 = vpop.f32.mrf.mxu0  ;;  %v7637_v25 = vpop.f32.mrf.mxu1  ;;  %3872 = vmatpush1.msra.mxu0 %v3773_v54 }
 0xdc2   :  { %3873 = vmatprep.subr.mxu0 %v3772_v62  ;;  %v3819_v62 = vld [vmem:[#allocation5 + $0x190] sm:$0xff] }
 0xdc3   :  { %v7639_v17 = vpop.f32.mrf.mxu0  ;;  %v7641_v44 = vpop.f32.mrf.mxu1  ;;  %3874 = vmatpush1.msra.mxu0 %v3771_v47  ;;  %v3818_v47 = vld [vmem:[#allocation5 + $0x188] sm:$0xff] }
 0xdc4   :  { %3875 = vmatprep.subr.mxu0 %v3770_v13 }
 0xdc5   :  { %v7643_v35 = vpop.f32.mrf.mxu0  ;;  %v7645_v5 = vpop.f32.mrf.mxu1  ;;  %3876 = vmatpush1.msra.mxu0 %v3769_v22  ;;  %v3817_v22 = vld [vmem:[#allocation5 + $0x180] sm:$0xff] }
 0xdc6   :  { %3877 = vmatprep.subr.mxu0 %v3832_v45  ;;  %v3816_v45 = vld [vmem:[#allocation5 + $0x178] sm:$0xff] }
 0xdc7   :  { %v7647_v30 = vpop.f32.mrf.mxu0  ;;  %v7649_v61 = vpop.f32.mrf.mxu1  ;;  %3878 = vmatpush2.msra.mxu0 %v3831_v55 }
 0xdc8   :  { %3879 = vmatprep.subr.mxu0 %v3830_v18 }
 0xdc9   :  { %v7651_v37 = vpop.f32.mrf.mxu0  ;;  %v7653_v43 = vpop.f32.mrf.mxu1  ;;  %3880 = vmatpush2.msra.mxu0 %v3829_v36  ;;  %v3815_v36 = vld [vmem:[#allocation5 + $0x170] sm:$0xff] }
 0xdca   :  { %3881 = vmatprep.subr.mxu0 %v3828_v7  ;;  %v3814_v7 = vld [vmem:[#allocation5 + $0x168] sm:$0xff] }
 0xdcb   :  { %v7655_v23 = vpop.f32.mrf.mxu0  ;;  %v7657_v56 = vpop.f32.mrf.mxu1  ;;  %3882 = vmatpush2.msra.mxu0 %v3827_v10 }
 0xdcc   :  { %3883 = vmatprep.subr.mxu0 %v3826_v0  ;;  %v3813_v0 = vld [vmem:[#allocation5 + $0x160] sm:$0xff] }
 0xdcd   :  { %v7659_v20 = vpop.f32.mrf.mxu0  ;;  %v7661_v24 = vpop.f32.mrf.mxu1  ;;  %3884 = vmatpush2.msra.mxu0 %v3825_v38  ;;  %v3812_v38 = vld [vmem:[#allocation5 + $0x158] sm:$0xff] }
 0xdce   :  { %3885 = vmatprep.subr.mxu0 %v3824_v16 }
 0xdcf   :  { %v7663_v31 = vpop.f32.mrf.mxu0  ;;  %v7665_v53 = vpop.f32.mrf.mxu1  ;;  %3886 = vmatpush2.msra.mxu0 %v3823_v1 }
 0xdd0   :  { %3887 = vmatprep.subr.mxu0 %v3822_v63  ;;  %v3811_v63 = vld [vmem:[#allocation5 + $0x150] sm:$0xff] }
 0xdd1   :  { %v7667_v46 = vpop.f32.mrf.mxu0  ;;  %v7669_v49 = vpop.f32.mrf.mxu1  ;;  %3888 = vmatpush2.msra.mxu0 %v3821_v11  ;;  %v3810_v11 = vld [vmem:[#allocation5 + $0x148] sm:$0xff] }
 0xdd2   :  { %3889 = vmatprep.subr.mxu0 %v3820_v39 }
 0xdd3   :  { %v7671_v15 = vpop.f32.mrf.mxu0  ;;  %v7673_v60 = vpop.f32.mrf.mxu1  ;;  %3890 = vmatpush2.msra.mxu0 %v3819_v62  ;;  %v3809_v62 = vld [vmem:[#allocation5 + $0x140] sm:$0xff] }
 0xdd4   :  { %3891 = vmatprep.subr.mxu0 %v3818_v47  ;;  %v3808_v47 = vld [vmem:[#allocation5 + $0x138] sm:$0xff] }
 0xdd5   :  { %v7675_v12 = vpop.f32.mrf.mxu0  ;;  %v7677_v27 = vpop.f32.mrf.mxu1  ;;  %3892 = vmatpush2.msra.mxu0 %v3817_v22 }
 0xdd6   :  { %3893 = vmatprep.subr.mxu0 %v3816_v45  ;;  %v3807_v45 = vld [vmem:[#allocation5 + $0x130] sm:$0xff] }
 0xdd7   :  { %v7679_v52 = vpop.f32.mrf.mxu0  ;;  %v7681_v8 = vpop.f32.mrf.mxu1  ;;  %3894 = vmatpush2.msra.mxu0 %v3815_v36  ;;  %v3806_v36 = vld [vmem:[#allocation5 + $0x128] sm:$0xff] }
 0xdd8   :  { %3895 = vmatprep.subr.mxu0 %v3814_v7 }
 0xdd9   :  { %v7683_v59 = vpop.f32.mrf.mxu0  ;;  %v7685_v19 = vpop.f32.mrf.mxu1  ;;  %3896 = vmatpush2.msra.mxu0 %v3813_v0 }
 0xdda   :  { %3897 = vmatprep.subr.mxu0 %v3812_v38 }
 0xddb   :  { %v7687_v32 = vpop.f32.mrf.mxu0  ;;  %v7689_v41 = vpop.f32.mrf.mxu1  ;;  %3898 = vmatpush2.msra.mxu0 %v3811_v63 }
 0xddc   :  { %3899 = vmatprep.subr.mxu0 %v3810_v11 }
 0xddd   :  { %v7691_v50 = vpop.f32.mrf.mxu0  ;;  %v7693_v40 = vpop.f32.mrf.mxu1  ;;  %3900 = vmatpush2.msra.mxu0 %v3809_v62 }
 0xdde   :  { %3901 = vmatprep.subr.mxu0 %v3808_v47 }
 0xddf   :  { %v7695_v26 = vpop.f32.mrf.mxu0  ;;  %v7699_v51 = vpop.f32.mrf.mxu1  ;;  %3902 = vmatpush2.msra.mxu0 %v3807_v45 }
 0xde0   :  { %3903 = vmatprep.subr.mxu0 %v3806_v36 }
 0xde1   :  { %v7697_v29 = vpop.f32.mrf.mxu0  ;;  %v7705_v4 = vpop.f32.mrf.mxu1  ;;  %3904 = vmatpush2.msra.mxu0 %v3805_v21 }
 0xde3   :  { %v7701_v6 = vpop.f32.mrf.mxu0  ;;  %v7709_v54 = vpop.f32.mrf.mxu1 }
 0xde5   :  { %v7703_v3 = vpop.f32.mrf.mxu0  ;;  %v7711_v18 = vpop.f32.mrf.mxu1 }
 0xde7   :  { %v7707_v58 = vpop.f32.mrf.mxu0  ;;  %v7713_v1 = vpop.f32.mrf.mxu1 }
 0xde9   :  { %v3569_v14 = vpop.f32.mrf.mxu0  ;;  %v7715_v22 = vpop.f32.mrf.mxu1 }
 0xdeb   :  { %v3573_v13 = vpop.f32.mrf.mxu0  ;;  %v3669_v2 = vpop.f32.mrf.mxu1 }
 0xded   :  { %v3575_v55 = vpop.f32.mrf.mxu0  ;;  %v3671_v9 = vpop.f32.mrf.mxu1 }
 0xdef   :  { %v3579_v10 = vpop.f32.mrf.mxu0  ;;  %v3675_v63 = vpop.f32.mrf.mxu1 }
 0xdf1   :  { %v3581_v16 = vpop.f32.mrf.mxu0  ;;  %v3677_v11 = vpop.f32.mrf.mxu1 }
 0xdf3   :  { %v3585_v39 = vpop.f32.mrf.mxu0  ;;  %v3681_v62 = vpop.f32.mrf.mxu1 }
 0xdf5   :  { %v3587_v33 = vpop.f32.mrf.mxu0  ;;  %v3683_v21 = vpop.f32.mrf.mxu1 }
 0xdf7   :  { %v3591_v57 = vpop.f32.mrf.mxu0 }
 0xdf9   :  { %v3593_v7 = vpop.f32.mrf.mxu0 }
 0xdfb   :  { %v3597_v0 = vpop.f32.mrf.mxu0 }
 0xdfd   :  { %v3599_v38 = vpop.f32.mrf.mxu0 }
 0xdfe   :  { %3698 = vmatprep.subr.mxu1 %v3599_v38 }
 0xdff   :  { %3699 = vmatpush1.msra.mxu1 %v3597_v0 }
 0xe00   :  { %3700 = vmatprep.subr.mxu1 %v3593_v7 }
 0xe01   :  { %3701 = vmatpush1.msra.mxu1 %v3591_v57  ;;  %v3687_v57 = vpop.f32.mrf.mxu1 }
 0xe02   :  { %3702 = vmatprep.subr.mxu1 %v3587_v33 }
 0xe03   :  { %3703 = vmatpush1.msra.mxu1 %v3585_v39  ;;  %v3689_v33 = vpop.f32.mrf.mxu1 }
 0xe04   :  { %3704 = vmatprep.subr.mxu1 %v3581_v16 }
 0xe05   :  { %3705 = vmatpush1.msra.mxu1 %v3579_v10 }
 0xe06   :  { %3706 = vmatprep.subr.mxu1 %v3575_v55 }
 0xe07   :  { %3707 = vmatpush1.msra.mxu1 %v3573_v13 }
 0xe08   :  { %3708 = vmatprep.subr.mxu1 %v3569_v14 }
 0xe09   :  { %3709 = vmatpush1.msra.mxu1 %v7707_v58 }
 0xe0a   :  { %3710 = vmatprep.subr.mxu1 %v7703_v3 }
 0xe0b   :  { %3711 = vmatpush1.msra.mxu1 %v7701_v6 }
 0xe0c   :  { %3712 = vmatprep.subr.mxu1 %v7697_v29 }
 0xe0d   :  { %3713 = vmatpush1.msra.mxu1 %v7695_v26 }
 0xe0e   :  { %3714 = vmatprep.subr.mxu1 %v7691_v50 }
 0xe0f   :  { %3715 = vmatpush1.msra.mxu1 %v7687_v32  ;;  %v3693_v32 = vpop.f32.mrf.mxu1 }
 0xe10   :  { %3716 = vmatprep.subr.mxu1 %v7683_v59 }
 0xe11   :  { %3717 = vmatpush1.msra.mxu1 %v7679_v52 }
 0xe12   :  { %3718 = vmatprep.subr.mxu1 %v7675_v12 }
 0xe13   :  { %3719 = vmatpush1.msra.mxu1 %v7671_v15  ;;  %v3695_v15 = vpop.f32.mrf.mxu1 }
 0xe14   :  { %3720 = vmatprep.subr.mxu1 %v7667_v46 }
 0xe15   :  { %3721 = vmatpush1.msra.mxu1 %v7663_v31 }
 0xe16   :  { %3722 = vmatprep.subr.mxu1 %v7659_v20 }
 0xe17   :  { %3723 = vmatpush1.msra.mxu1 %v7655_v23 }
 0xe18   :  { %3724 = vmatprep.subr.mxu1 %v7651_v37 }
 0xe19   :  { %3725 = vmatpush1.msra.mxu1 %v7647_v30 }
 0xe1a   :  { %3726 = vmatprep.subr.mxu1 %v7643_v35 }
 0xe1b   :  { %3727 = vmatpush1.msra.mxu1 %v7639_v17  ;;  %v3801_v17 = vld [vmem:[#allocation5 + $0x100] sm:$0xff] }
 0xe1c   :  { %3728 = vmatprep.subr.mxu1 %v7635_v34  ;;  %v3802_v34 = vld [vmem:[#allocation5 + $0x108] sm:$0xff] }
 0xe1d   :  { %3729 = vmatpush1.msra.mxu1 %v7631_v42  ;;  %v3803_v42 = vld [vmem:[#allocation5 + $0x110] sm:$0xff] }
 0xe1e   :  { %3730 = vmatprep.subr.mxu1 %v3695_v15 }
 0xe1f   :  { %3731 = vmatpush2.msra.mxu1 %v3693_v32 }
 0xe20   :  { %3732 = vmatprep.subr.mxu1 %v3689_v33 }
 0xe21   :  { %3733 = vmatpush2.msra.mxu1 %v3687_v57 }
 0xe22   :  { %3734 = vmatprep.subr.mxu1 %v3683_v21 }
 0xe23   :  { %3735 = vmatpush2.msra.mxu1 %v3681_v62 }
 0xe24   :  { %3736 = vmatprep.subr.mxu1 %v3677_v11 }
 0xe25   :  { %3737 = vmatpush2.msra.mxu1 %v3675_v63 }
 0xe26   :  { %3738 = vmatprep.subr.mxu1 %v3671_v9  ;;  %v8222_v9 = vmov 0.0  }
 0xe27   :  { %3739 = vmatpush2.msra.mxu1 %v3669_v2  ;;  %v3804_v2 = vld [vmem:[#allocation5 + $0x118] sm:$0xff] }
 0xe28   :  { %3740 = vmatprep.subr.mxu1 %v7715_v22  ;;  %3905 = vmatprep.subr.mxu0 %v3804_v2 }
 0xe29   :  { %3741 = vmatpush2.msra.mxu1 %v7713_v1  ;;  %3906 = vmatpush2.msra.mxu0 %v3803_v42 }
 0xe2a   :  { %3742 = vmatprep.subr.mxu1 %v7711_v18  ;;  %3907 = vmatprep.subr.mxu0 %v3802_v34 }
 0xe2b   :  { %3743 = vmatpush2.msra.mxu1 %v7709_v54  ;;  %3908 = vmatpush2.msra.mxu0 %v3801_v17 }
 0xe2c   :  { %3744 = vmatprep.subr.mxu1 %v7705_v4 }
 0xe2d   :  { %3745 = vmatpush2.msra.mxu1 %v7699_v51 }
 0xe2e   :  { %3746 = vmatprep.subr.mxu1 %v7693_v40 }
 0xe2f   :  { %3747 = vmatpush2.msra.mxu1 %v7689_v41 }
 0xe30   :  { %3748 = vmatprep.subr.mxu1 %v7685_v19 }
 0xe31   :  { %3749 = vmatpush2.msra.mxu1 %v7681_v8 }
 0xe32   :  { %3750 = vmatprep.subr.mxu1 %v7677_v27 }
 0xe33   :  { %3751 = vmatpush2.msra.mxu1 %v7673_v60 }
 0xe34   :  { %3752 = vmatprep.subr.mxu1 %v7669_v49 }
 0xe35   :  { %3753 = vmatpush2.msra.mxu1 %v7665_v53 }
 0xe36   :  { %3754 = vmatprep.subr.mxu1 %v7661_v24  ;;  %v3919_v24 = vld [vmem:[#allocation2 + $0x18] sm:$0xff] }
 0xe37   :  { %3755 = vmatpush2.msra.mxu1 %v7657_v56 }
 0xe38   :  { %3756 = vmatprep.subr.mxu1 %v7653_v43  ;;  %v3918_v43 = vld [vmem:[#allocation2 + $0x10] sm:$0xff] }
 0xe39   :  { %3757 = vmatpush2.msra.mxu1 %v7649_v61 }
 0xe3a   :  { %3758 = vmatprep.subr.mxu1 %v7645_v5 }
 0xe3b   :  { %3759 = vmatpush2.msra.mxu1 %v7641_v44 }
 0xe3c   :  { %3760 = vmatprep.subr.mxu1 %v7637_v25  ;;  %v3833_v25 = vld [vmem:[#allocation7] sm:$0x3] }
 0xe3d   :  { %3761 = vmatpush2.msra.mxu1 %v7633_v48  ;;  %v8223_v48 = vld [vmem:[#allocation17_spill] sm:$0xff] }
 0xe3e   :  { %3763 = vmatmul.mubr.f32.vlgmr.msra.gmra.mxu1 %v7490_v28  ;;  %v3838_v44 = vrot.slane %v3833_v25, %v8223_v48  ;;  %v8224_v28 = vld [vmem:[#allocation18_spill] sm:$0xff] }
 0xe3f   :  { %4259 = vmatprep.mubr.f32.mxu1 %v8222_v9  ;;  %v3842_v30 = vrot.slane %v3833_v25, %v8224_v28  ;;  %v4456_v25 = vld [vmem:[#allocation5 + $0x2e8] sm:$0xff]  ;;  %v4463_v28 = vld [vmem:[#allocation5 + $0x320] sm:$0xff] }
 0xefe   :  { %v3764_v35 = vpop.f32.mrf.mxu1 }
 0xf00   :  { %v3766_v5 = vpop.f32.mrf.mxu1 }
 0xf01   :  { %3909 = vmatprep.mubr.f32.mxu0 %v3766_v5  ;;  %v4457_v5 = vld [vmem:[#allocation5 + $0x2f0] sm:$0xff] }
 0xf02   :  { %3910 = vmatmul.mubr.f32.vlgmr.msra.gmra.mxu0 %v3764_v35  ;;  %v4458_v35 = vld [vmem:[#allocation5 + $0x2f8] sm:$0xff] }
 0xf03   :  { %4163 = vmatprep.mubr.f32.mxu0 %v8222_v9 }
 0xfc2   :  { %v3911_v61 = vpop.f32.mrf.mxu0 }
 0xfc3   :  { %v3912_v37 = vadd.f32 %v3911_v61, %v3838_v44 }
 0xfc4   :  { %v3913_v23 = vpop.f32.mrf.mxu0 }
 0xfc5   :  { %v3916_v56 = vmax.f32 %v3912_v37, 0.0  ;;  %v3914_v20 = vadd.f32 %v3913_v23, %v3842_v30  ;;  %v4455_v30 = vld [vmem:[#allocation5 + $0x2e0] sm:$0xff]  ;;  %v4454_v37 = vld [vmem:[#allocation5 + $0x2d8] sm:$0xff]  ;;  %v4453_v23 = vld [vmem:[#allocation5 + $0x2d0] sm:$0xff] }
 0xfc7   :  { %v3920_v31 = vadd.f32 %v3918_v43, %v3916_v56  ;;  %v3917_v53 = vmax.f32 %v3914_v20, 0.0  ;;  %v4452_v20 = vld [vmem:[#allocation5 + $0x2c8] sm:$0xff] }
 0xfc9   :  { %v3921_v46 = vadd.f32 %v3919_v24, %v3917_v53  ;;  %v3922_v49 = vmul.f32 %v3920_v31, %v3920_v31 }
 0xfcb   :  { %v3923_v60 = vmul.f32 %v3921_v46, %v3921_v46 }
 0xfcd   :  { %v3924_v12 = vadd.f32 %v3923_v60, %v3922_v49  ;;  %v4449_v60 = vld [vmem:[#allocation5 + $0x2b0] sm:$0xff] }
 0xfcf   :  { %3925 = vadd.xlane.f32.xlu0 %v3924_v12 }
0x1058   :  { %v3926_v27 = vpop.xlane.xlu0 %3925 }
0x1059   :  { %6672 = vrsqrt.f32 %v3926_v27  ;;  %vm3929_vm9 = vcmp.eq.f32.partialorder %v3926_v27, inf  ;;  %v3932_v59 = vand.u32 2147483648, %v3926_v27  ;;  %vm3931_vm10 = vcmp.eq.f32.partialorder %v3926_v27, 0.0 }
0x1066   :  { %v6673_v52 = vpop.eup %6672 }
0x1067   :  { %v3928_v8 = vmul.f32 %v6673_v52, %v3926_v27 }
0x1069   :  { %v3930_v19 = vsel %vm3929_vm9, %v3926_v27, %v3928_v8  ;;  %v4448_v27 = vld [vmem:[#allocation5 + $0x2a8] sm:$0xff]  ;;  %v4447_v8 = vld [vmem:[#allocation5 + $0x2a0] sm:$0xff] }
0x106a   :  { %v3933_v41 = vsel %vm3931_vm10, %v3932_v59, %v3930_v19  ;;  %v4446_v19 = vld [vmem:[#allocation5 + $0x298] sm:$0xff] }
0x106b   :  { %v3934_v50 = vadd.f32 1e-06, %v3933_v41 }
0x106d   :  { %6674 = vrcp.f32 %v3934_v50  ;;  %v4445_v50 = vld [vmem:[#allocation5 + $0x290] sm:$0xff] }
0x107a   :  { %v6675_v40 = vpop.eup %6674 }
0x107b   :  { %v7765_v26 = vmul.f32 %v6675_v40, %v3921_v46  ;;  %v7767_v29 = vmul.f32 %v6675_v40, %v3920_v31  ;;  %v4451_v31 = vld [vmem:[#allocation5 + $0x2c0] sm:$0xff]  ;;  %v4450_v46 = vld [vmem:[#allocation5 + $0x2b8] sm:$0xff] }
0x107d   :  { %3971 = vxpose.xlu0.b32.start.end [1/1] (short) %v7765_v26, 128  ;;  %4129 = vmatprep.subr.mxu0 %v7765_v26 }
0x107e   :  { %6640 = vmatprep.subr.mxu1 %v7765_v26  ;;  %3939 = vxpose.xlu1.b32.start.end [1/1] (short) %v7767_v29, 128 }
0x107f   :  { %4130 = vmatpush1.msra.mxu0 %v7767_v29  ;;  %6641 = vmatpush1.msra.mxu1 %v7767_v29 }
0x1080   :  { %4503 = vmatprep.subr.mxu1 %v4458_v35 }
0x10f9   :  { %v3987_v51 = vpop.trf.xlu0 }
0x10fa   :  { %v3955_v6 = vpop.trf.xlu1  ;;  %6584 = vmatmul.mubr.msk.f32.vlgmr.msra.gmra.mxu1 %vm177_vm2, %v3987_v51 }
0x10fb   :  { %6568 = vmatmul.mubr.msk.f32.vlgmr.msra.gmra.mxu0 %vm177_vm2, %v3955_v6  ;;  %4265 = vmatprep.mubr.f32.mxu1 %v8222_v9  ;;  %v4443_v6 = vld [vmem:[#allocation5 + $0x280] sm:$0xff] }
0x10fc   :  { %4169 = vmatprep.mubr.f32.mxu0 %v8222_v9  ;;  %4504 = vmatpush1.msra.mxu1 %v4457_v5  ;;  %v4427_v5 = vld [vmem:[#allocation5 + $0x200] sm:$0xff] }
0x10fd   :  { %v3988_v3 = vpop.trf.xlu0  ;;  %4505 = vmatprep.subr.mxu1 %v4456_v25  ;;  %v4490_v25 = vld [vmem:[#allocation5 + $0x3f8] sm:$0xff] }
0x10fe   :  { %v3956_v4 = vpop.trf.xlu1  ;;  %6585 = vmatmul.mubr.msk.f32.gmra.mxu1 %vm177_vm2, %v3988_v3 }
0x10ff   :  { %6569 = vmatmul.mubr.msk.f32.gmra.mxu0 %vm177_vm2, %v3956_v4  ;;  %4271 = vmatprep.mubr.f32.mxu1 %v8222_v9  ;;  %v4442_v4 = vld [vmem:[#allocation5 + $0x278] sm:$0xff] }
0x1100   :  { %4175 = vmatprep.mubr.f32.mxu0 %v8222_v9  ;;  %4506 = vmatpush1.msra.mxu1 %v4455_v30 }
0x1101   :  { %v3989_v58 = vpop.trf.xlu0  ;;  %4507 = vmatprep.subr.mxu1 %v4454_v37 }
0x1102   :  { %v3957_v14 = vpop.trf.xlu1  ;;  %6586 = vmatmul.mubr.msk.f32.gmra.mxu1 %vm177_vm2, %v3989_v58 }
0x1103   :  { %6570 = vmatmul.mubr.msk.f32.gmra.mxu0 %vm177_vm2, %v3957_v14  ;;  %4277 = vmatprep.mubr.f32.mxu1 %v8222_v9  ;;  %v4441_v14 = vld [vmem:[#allocation5 + $0x270] sm:$0xff] }
0x1104   :  { %4181 = vmatprep.mubr.f32.mxu0 %v8222_v9  ;;  %4508 = vmatpush1.msra.mxu1 %v4453_v23  ;;  %v4489_v23 = vld [vmem:[#allocation5 + $0x3f0] sm:$0xff] }
0x1105   :  { %v3990_v54 = vpop.trf.xlu0  ;;  %4509 = vmatprep.subr.mxu1 %v4452_v20  ;;  %v4488_v20 = vld [vmem:[#allocation5 + $0x3e8] sm:$0xff] }
0x1106   :  { %v3958_v13 = vpop.trf.xlu1  ;;  %6587 = vmatmul.mubr.msk.f32.gmra.mxu1 %vm177_vm2, %v3990_v54 }
0x1107   :  { %6571 = vmatmul.mubr.msk.f32.gmra.mxu0 %vm177_vm2, %v3958_v13  ;;  %4283 = vmatprep.mubr.f32.mxu1 %v8222_v9  ;;  %v4440_v13 = vld [vmem:[#allocation5 + $0x268] sm:$0xff] }
0x1108   :  { %4187 = vmatprep.mubr.f32.mxu0 %v8222_v9  ;;  %4510 = vmatpush1.msra.mxu1 %v4451_v31 }
0x1109   :  { %v3991_v55 = vpop.trf.xlu0  ;;  %4511 = vmatprep.subr.mxu1 %v4450_v46  ;;  %v4487_v46 = vld [vmem:[#allocation5 + $0x3e0] sm:$0xff] }
0x110a   :  { %v3959_v18 = vpop.trf.xlu1  ;;  %6588 = vmatmul.mubr.msk.f32.gmra.mxu1 %vm177_vm2, %v3991_v55 }
0x110b   :  { %6572 = vmatmul.mubr.msk.f32.gmra.mxu0 %vm177_vm2, %v3959_v18  ;;  %4289 = vmatprep.mubr.f32.mxu1 %v8222_v9  ;;  %v4439_v18 = vld [vmem:[#allocation5 + $0x260] sm:$0xff] }
0x110c   :  { %4193 = vmatprep.mubr.f32.mxu0 %v8222_v9  ;;  %4512 = vmatpush1.msra.mxu1 %v4449_v60  ;;  %v4486_v60 = vld [vmem:[#allocation5 + $0x3d8] sm:$0xff] }
0x110d   :  { %v3992_v10 = vpop.trf.xlu0  ;;  %4513 = vmatprep.subr.mxu1 %v4448_v27 }
0x110e   :  { %v3960_v16 = vpop.trf.xlu1  ;;  %6589 = vmatmul.mubr.msk.f32.gmra.mxu1 %vm177_vm2, %v3992_v10 }
0x110f   :  { %6573 = vmatmul.mubr.msk.f32.gmra.mxu0 %vm177_vm2, %v3960_v16  ;;  %4295 = vmatprep.mubr.f32.mxu1 %v8222_v9  ;;  %v4438_v16 = vld [vmem:[#allocation5 + $0x258] sm:$0xff] }
0x1110   :  { %4199 = vmatprep.mubr.f32.mxu0 %v8222_v9  ;;  %4514 = vmatpush1.msra.mxu1 %v4447_v8 }
0x1111   :  { %v3993_v1 = vpop.trf.xlu0  ;;  %4515 = vmatprep.subr.mxu1 %v4446_v19  ;;  %v4485_v19 = vld [vmem:[#allocation5 + $0x3d0] sm:$0xff] }
0x1112   :  { %v3961_v39 = vpop.trf.xlu1  ;;  %6590 = vmatmul.mubr.msk.f32.gmra.mxu1 %vm177_vm2, %v3993_v1 }
0x1113   :  { %6574 = vmatmul.mubr.msk.f32.gmra.mxu0 %vm177_vm2, %v3961_v39  ;;  %4301 = vmatprep.mubr.f32.mxu1 %v8222_v9  ;;  %v4437_v39 = vld [vmem:[#allocation5 + $0x250] sm:$0xff] }
0x1114   :  { %4205 = vmatprep.mubr.f32.mxu0 %v8222_v9  ;;  %4516 = vmatpush1.msra.mxu1 %v4445_v50  ;;  %v4484_v50 = vld [vmem:[#allocation5 + $0x3c8] sm:$0xff] }
0x1115   :  { %v3994_v47 = vpop.trf.xlu0 }
0x1116   :  { %v3962_v22 = vpop.trf.xlu1  ;;  %6591 = vmatmul.mubr.msk.f32.gmra.mxu1 %vm177_vm2, %v3994_v47 }
0x1117   :  { %6575 = vmatmul.mubr.msk.f32.gmra.mxu0 %vm177_vm2, %v3962_v22  ;;  %4307 = vmatprep.mubr.f32.mxu1 %v8222_v9  ;;  %v4436_v22 = vld [vmem:[#allocation5 + $0x248] sm:$0xff] }
0x1118   :  { %4211 = vmatprep.mubr.f32.mxu0 %v8222_v9 }
0x1119   :  { %v3995_v45 = vpop.trf.xlu0 }
0x111a   :  { %v3963_v36 = vpop.trf.xlu1  ;;  %6592 = vmatmul.mubr.msk.f32.gmra.mxu1 %vm177_vm2, %v3995_v45 }
0x111b   :  { %6576 = vmatmul.mubr.msk.f32.gmra.mxu0 %vm177_vm2, %v3963_v36  ;;  %4313 = vmatprep.mubr.f32.mxu1 %v8222_v9  ;;  %v4435_v36 = vld [vmem:[#allocation5 + $0x240] sm:$0xff] }
0x111c   :  { %4217 = vmatprep.mubr.f32.mxu0 %v8222_v9 }
0x111d   :  { %v3996_v7 = vpop.trf.xlu0 }
0x111e   :  { %v3964_v0 = vpop.trf.xlu1  ;;  %6593 = vmatmul.mubr.msk.f32.gmra.mxu1 %vm177_vm2, %v3996_v7 }
0x111f   :  { %6577 = vmatmul.mubr.msk.f32.gmra.mxu0 %vm177_vm2, %v3964_v0  ;;  %4319 = vmatprep.mubr.f32.mxu1 %v8222_v9  ;;  %v4434_v0 = vld [vmem:[#allocation5 + $0x238] sm:$0xff] }
0x1120   :  { %4223 = vmatprep.mubr.f32.mxu0 %v8222_v9 }
0x1121   :  { %v3997_v38 = vpop.trf.xlu0 }
0x1122   :  { %v3965_v63 = vpop.trf.xlu1  ;;  %6594 = vmatmul.mubr.msk.f32.gmra.mxu1 %vm177_vm2, %v3997_v38 }
0x1123   :  { %6578 = vmatmul.mubr.msk.f32.gmra.mxu0 %vm177_vm2, %v3965_v63  ;;  %4325 = vmatprep.mubr.f32.mxu1 %v8222_v9  ;;  %v4433_v63 = vld [vmem:[#allocation5 + $0x230] sm:$0xff] }
0x1124   :  { %4229 = vmatprep.mubr.f32.mxu0 %v8222_v9 }
0x1125   :  { %v3998_v11 = vpop.trf.xlu0 }
0x1126   :  { %v3966_v62 = vpop.trf.xlu1  ;;  %6595 = vmatmul.mubr.msk.f32.gmra.mxu1 %vm177_vm2, %v3998_v11 }
0x1127   :  { %6579 = vmatmul.mubr.msk.f32.gmra.mxu0 %vm177_vm2, %v3966_v62  ;;  %4331 = vmatprep.mubr.f32.mxu1 %v8222_v9  ;;  %v4432_v62 = vld [vmem:[#allocation5 + $0x228] sm:$0xff] }
0x1128   :  { %4235 = vmatprep.mubr.f32.mxu0 %v8222_v9 }
0x1129   :  { %v3999_v21 = vpop.trf.xlu0 }
0x112a   :  { %v3967_v57 = vpop.trf.xlu1  ;;  %6596 = vmatmul.mubr.msk.f32.gmra.mxu1 %vm177_vm2, %v3999_v21 }
0x112b   :  { %6580 = vmatmul.mubr.msk.f32.gmra.mxu0 %vm177_vm2, %v3967_v57  ;;  %4337 = vmatprep.mubr.f32.mxu1 %v8222_v9  ;;  %v4431_v57 = vld [vmem:[#allocation5 + $0x220] sm:$0xff] }
0x112c   :  { %4241 = vmatprep.mubr.f32.mxu0 %v8222_v9 }
0x112d   :  { %v4000_v33 = vpop.trf.xlu0 }
0x112e   :  { %v3968_v32 = vpop.trf.xlu1  ;;  %6597 = vmatmul.mubr.msk.f32.gmra.mxu1 %vm177_vm2, %v4000_v33 }
0x112f   :  { %6581 = vmatmul.mubr.msk.f32.gmra.mxu0 %vm177_vm2, %v3968_v32  ;;  %4343 = vmatprep.mubr.f32.mxu1 %v8222_v9  ;;  %v4430_v32 = vld [vmem:[#allocation5 + $0x218] sm:$0xff] }
0x1130   :  { %4247 = vmatprep.mubr.f32.mxu0 %v8222_v9 }
0x1131   :  { %v4001_v15 = vpop.trf.xlu0 }
0x1132   :  { %v3969_v2 = vpop.trf.xlu1  ;;  %6598 = vmatmul.mubr.msk.f32.gmra.mxu1 %vm177_vm2, %v4001_v15 }
0x1133   :  { %6582 = vmatmul.mubr.msk.f32.gmra.mxu0 %vm177_vm2, %v3969_v2  ;;  %4349 = vmatprep.mubr.f32.mxu1 %v8222_v9  ;;  %v4429_v2 = vld [vmem:[#allocation5 + $0x210] sm:$0xff] }
0x1134   :  { %4253 = vmatprep.mubr.f32.mxu0 %v8222_v9 }
0x1135   :  { %v4002_v42 = vpop.trf.xlu0 }
0x1136   :  { %v3970_v34 = vpop.trf.xlu1  ;;  %6599 = vmatmul.mubr.msk.f32.gmra.mxu1 %vm177_vm2, %v4002_v42 }
0x1137   :  { %6583 = vmatmul.mubr.msk.f32.gmra.mxu0 %vm177_vm2, %v3970_v34  ;;  %v4428_v34 = vld [vmem:[#allocation5 + $0x208] sm:$0xff] }
0x1138   :  { %4420 = vmatprep.mubr.f32.mxu0 %v7765_v26  ;;  %v4444_v26 = vld [vmem:[#allocation5 + $0x288] sm:$0xff] }
0x1139   :  { %4517 = vmatprep.subr.mxu1 %v4444_v26 }
0x113a   :  { %4518 = vmatpush1.msra.mxu1 %v4443_v6  ;;  %v4483_v6 = vld [vmem:[#allocation5 + $0x3c0] sm:$0xff] }
0x113b   :  { %4519 = vmatprep.subr.mxu1 %v4442_v4  ;;  %v4482_v4 = vld [vmem:[#allocation5 + $0x3b8] sm:$0xff] }
0x113c   :  { %4520 = vmatpush1.msra.mxu1 %v4441_v14 }
0x113d   :  { %4521 = vmatprep.subr.mxu1 %v4440_v13 }
0x113e   :  { %4522 = vmatpush1.msra.mxu1 %v4439_v18  ;;  %v4481_v18 = vld [vmem:[#allocation5 + $0x3b0] sm:$0xff] }
0x113f   :  { %4523 = vmatprep.subr.mxu1 %v4438_v16  ;;  %v4480_v16 = vld [vmem:[#allocation5 + $0x3a8] sm:$0xff] }
0x1140   :  { %4524 = vmatpush1.msra.mxu1 %v4437_v39 }
0x1141   :  { %4525 = vmatprep.subr.mxu1 %v4436_v22  ;;  %v4479_v22 = vld [vmem:[#allocation5 + $0x3a0] sm:$0xff] }
0x1142   :  { %4526 = vmatpush1.msra.mxu1 %v4435_v36  ;;  %v4478_v36 = vld [vmem:[#allocation5 + $0x398] sm:$0xff] }
0x1143   :  { %4527 = vmatprep.subr.mxu1 %v4434_v0 }
0x1144   :  { %4528 = vmatpush1.msra.mxu1 %v4433_v63 }
0x1145   :  { %4529 = vmatprep.subr.mxu1 %v4432_v62  ;;  %v4477_v62 = vld [vmem:[#allocation5 + $0x390] sm:$0xff] }
0x1146   :  { %4530 = vmatpush1.msra.mxu1 %v4431_v57  ;;  %v4476_v57 = vld [vmem:[#allocation5 + $0x388] sm:$0xff] }
0x1147   :  { %4531 = vmatprep.subr.mxu1 %v4430_v32 }
0x1148   :  { %4532 = vmatpush1.msra.mxu1 %v4429_v2  ;;  %v4475_v2 = vld [vmem:[#allocation5 + $0x380] sm:$0xff] }
0x1149   :  { %4533 = vmatprep.subr.mxu1 %v4428_v34  ;;  %v4474_v34 = vld [vmem:[#allocation5 + $0x378] sm:$0xff] }
0x114a   :  { %4534 = vmatpush1.msra.mxu1 %v4427_v5 }
0x114b   :  { %4535 = vmatprep.subr.mxu1 %v4490_v25 }
0x114c   :  { %4536 = vmatpush2.msra.mxu1 %v4489_v23  ;;  %v4473_v23 = vld [vmem:[#allocation5 + $0x370] sm:$0xff] }
0x114d   :  { %4537 = vmatprep.subr.mxu1 %v4488_v20  ;;  %v4472_v20 = vld [vmem:[#allocation5 + $0x368] sm:$0xff] }
0x114e   :  { %4538 = vmatpush2.msra.mxu1 %v4487_v46 }
0x114f   :  { %4539 = vmatprep.subr.mxu1 %v4486_v60  ;;  %v4471_v60 = vld [vmem:[#allocation5 + $0x360] sm:$0xff] }
0x1150   :  { %4540 = vmatpush2.msra.mxu1 %v4485_v19  ;;  %v4470_v19 = vld [vmem:[#allocation5 + $0x358] sm:$0xff] }
0x1151   :  { %4541 = vmatprep.subr.mxu1 %v4484_v50 }
0x1152   :  { %4542 = vmatpush2.msra.mxu1 %v4483_v6 }
0x1153   :  { %4543 = vmatprep.subr.mxu1 %v4482_v4  ;;  %v4469_v4 = vld [vmem:[#allocation5 + $0x350] sm:$0xff] }
0x1154   :  { %4544 = vmatpush2.msra.mxu1 %v4481_v18  ;;  %v4468_v18 = vld [vmem:[#allocation5 + $0x348] sm:$0xff] }
0x1155   :  { %4545 = vmatprep.subr.mxu1 %v4480_v16 }
0x1156   :  { %4546 = vmatpush2.msra.mxu1 %v4479_v22  ;;  %v4467_v22 = vld [vmem:[#allocation5 + $0x340] sm:$0xff] }
0x1157   :  { %4547 = vmatprep.subr.mxu1 %v4478_v36  ;;  %v4466_v36 = vld [vmem:[#allocation5 + $0x338] sm:$0xff] }
0x1158   :  { %4548 = vmatpush2.msra.mxu1 %v4477_v62 }
0x1159   :  { %4549 = vmatprep.subr.mxu1 %v4476_v57 }
0x115a   :  { %4550 = vmatpush2.msra.mxu1 %v4475_v2  ;;  %v4465_v2 = vld [vmem:[#allocation5 + $0x330] sm:$0xff] }
0x115b   :  { %4551 = vmatprep.subr.mxu1 %v4474_v34  ;;  %v4464_v34 = vld [vmem:[#allocation5 + $0x328] sm:$0xff] }
0x115c   :  { %4552 = vmatpush2.msra.mxu1 %v4473_v23 }
0x115d   :  { %4553 = vmatprep.subr.mxu1 %v4472_v20 }
0x115e   :  { %4554 = vmatpush2.msra.mxu1 %v4471_v60 }
0x115f   :  { %4555 = vmatprep.subr.mxu1 %v4470_v19 }
0x1160   :  { %4556 = vmatpush2.msra.mxu1 %v4469_v4 }
0x1161   :  { %4557 = vmatprep.subr.mxu1 %v4468_v18 }
0x1162   :  { %4558 = vmatpush2.msra.mxu1 %v4467_v22 }
0x1163   :  { %4559 = vmatprep.subr.mxu1 %v4466_v36 }
0x1164   :  { %4560 = vmatpush2.msra.mxu1 %v4465_v2 }
0x1165   :  { %4561 = vmatprep.subr.mxu1 %v4464_v34 }
0x1166   :  { %4562 = vmatpush2.msra.mxu1 %v4463_v28 }
0x11ba   :  { %v7838_v17 = vpop.f32.mrf.mxu1 }
0x11bb   :  { %v7840_v44 = vpop.f32.mrf.mxu0 }
0x11bc   :  { %v7842_v61 = vpop.f32.mrf.mxu1 }
0x11bd   :  { %v7844_v43 = vpop.f32.mrf.mxu0 }
0x11be   :  { %v7846_v56 = vpop.f32.mrf.mxu1 }
0x11bf   :  { %v7848_v24 = vpop.f32.mrf.mxu0 }
0x11c0   :  { %v7850_v53 = vpop.f32.mrf.mxu1 }
0x11c1   :  { %v7852_v49 = vpop.f32.mrf.mxu0 }
0x11c2   :  { %v7854_v12 = vpop.f32.mrf.mxu1 }
0x11c3   :  { %v7856_v52 = vpop.f32.mrf.mxu0 }
0x11c4   :  { %v7858_v59 = vpop.f32.mrf.mxu1 }
0x11c5   :  { %v7860_v41 = vpop.f32.mrf.mxu0 }
0x11c6   :  { %v7862_v40 = vpop.f32.mrf.mxu1 }
0x11c7   :  { %v7864_v51 = vpop.f32.mrf.mxu0 }
0x11c8   :  { %v7866_v3 = vpop.f32.mrf.mxu1 }
0x11c9   :  { %v7868_v58 = vpop.f32.mrf.mxu0 }
0x11ca   :  { %v7870_v54 = vpop.f32.mrf.mxu1 }
0x11cb   :  { %v7872_v55 = vpop.f32.mrf.mxu0 }
0x11cc   :  { %v7874_v10 = vpop.f32.mrf.mxu1 }
0x11cd   :  { %v7876_v1 = vpop.f32.mrf.mxu0 }
0x11ce   :  { %v7878_v47 = vpop.f32.mrf.mxu1 }
0x11cf   :  { %v7880_v45 = vpop.f32.mrf.mxu0 }
0x11d0   :  { %v7882_v7 = vpop.f32.mrf.mxu1 }
0x11d1   :  { %v7884_v38 = vpop.f32.mrf.mxu0 }
0x11d2   :  { %v7886_v11 = vpop.f32.mrf.mxu1 }
0x11d3   :  { %v7888_v21 = vpop.f32.mrf.mxu0 }
0x11d4   :  { %v7890_v33 = vpop.f32.mrf.mxu1 }
0x11d5   :  { %v7892_v15 = vpop.f32.mrf.mxu0 }
0x11d6   :  { %v7894_v42 = vpop.f32.mrf.mxu1 }
0x11d7   :  { %v7896_v35 = vpop.f32.mrf.mxu0 }
0x11d8   :  { %v7900_v37 = vpop.f32.mrf.mxu1 }
0x11d9   :  { %v7898_v30 = vpop.f32.mrf.mxu0 }
0x11da   :  { %v7906_v8 = vpop.f32.mrf.mxu1 }
0x11db   :  { %v7902_v31 = vpop.f32.mrf.mxu0 }
0x11dc   :  { %v7912_v13 = vpop.f32.mrf.mxu1 }
0x11dd   :  { %v7904_v27 = vpop.f32.mrf.mxu0 }
0x11de   :  { %v7916_v63 = vpop.f32.mrf.mxu1 }
0x11df   :  { %v7908_v26 = vpop.f32.mrf.mxu0 }
0x11e0   :  { %v7918_v25 = vpop.f32.mrf.mxu1 }
0x11e1   :  { %v7910_v14 = vpop.f32.mrf.mxu0 }
0x11e2   :  { %v7920_v6 = vpop.f32.mrf.mxu1 }
0x11e3   :  { %v7914_v39 = vpop.f32.mrf.mxu0 }
0x11e4   :  { %v7922_v57 = vpop.f32.mrf.mxu1 }
0x11e5   :  { %v4227_v0 = vpop.f32.mrf.mxu0 }
0x11e6   :  { %v4327_v48 = vpop.f32.mrf.mxu1 }
0x11e7   :  { %v4231_v32 = vpop.f32.mrf.mxu0 }
0x11e8   :  { %v4329_v9 = vpop.f32.mrf.mxu1 }
0x11e9   :  { %v4233_v5 = vpop.f32.mrf.mxu0 }
0x11ea   :  { %v4333_v4 = vpop.f32.mrf.mxu1 }
0x11eb   :  { %v4237_v46 = vpop.f32.mrf.mxu0 }
0x11ec   :  { %v4335_v18 = vpop.f32.mrf.mxu1 }
0x11ed   :  { %v4239_v50 = vpop.f32.mrf.mxu0 }
0x11ee   :  { %v4339_v22 = vpop.f32.mrf.mxu1 }
0x11ef   :  { %v4243_v16 = vpop.f32.mrf.mxu0 }
0x11f0   :  { %v4341_v28 = vpop.f32.mrf.mxu1 }
0x11f1   :  { %v4245_v62 = vpop.f32.mrf.mxu0 }
0x11f3   :  { %v4249_v23 = vpop.f32.mrf.mxu0 }
0x11f5   :  { %v4251_v20 = vpop.f32.mrf.mxu0 }
0x11f7   :  { %v4255_v60 = vpop.f32.mrf.mxu0 }
0x11f9   :  { %v4257_v19 = vpop.f32.mrf.mxu0 }
0x11fa   :  { %4356 = vmatprep.subr.mxu0 %v4257_v19 }
0x11fb   :  { %4357 = vmatpush1.msra.mxu0 %v4255_v60 }
0x11fc   :  { %4358 = vmatprep.subr.mxu0 %v4251_v20 }
0x11fd   :  { %4359 = vmatpush1.msra.mxu0 %v4249_v23 }
0x11fe   :  { %4360 = vmatprep.subr.mxu0 %v4245_v62 }
0x11ff   :  { %4361 = vmatpush1.msra.mxu0 %v4243_v16 }
0x1200   :  { %4362 = vmatprep.subr.mxu0 %v4239_v50 }
0x1201   :  { %4363 = vmatpush1.msra.mxu0 %v4237_v46 }
0x1202   :  { %4364 = vmatprep.subr.mxu0 %v4233_v5 }
0x1203   :  { %4365 = vmatpush1.msra.mxu0 %v4231_v32 }
0x1204   :  { %4366 = vmatprep.subr.mxu0 %v4227_v0  ;;  %v4345_v0 = vpop.f32.mrf.mxu1 }
0x1205   :  { %4367 = vmatpush1.msra.mxu0 %v7914_v39 }
0x1206   :  { %4368 = vmatprep.subr.mxu0 %v7910_v14 }
0x1207   :  { %4369 = vmatpush1.msra.mxu0 %v7908_v26 }
0x1208   :  { %4370 = vmatprep.subr.mxu0 %v7904_v27  ;;  %v4347_v27 = vpop.f32.mrf.mxu1 }
0x1209   :  { %4371 = vmatpush1.msra.mxu0 %v7902_v31 }
0x120a   :  { %4372 = vmatprep.subr.mxu0 %v7898_v30 }
0x120b   :  { %4373 = vmatpush1.msra.mxu0 %v7896_v35  ;;  %v4351_v35 = vpop.f32.mrf.mxu1 }
0x120c   :  { %4374 = vmatprep.subr.mxu0 %v7892_v15 }
0x120d   :  { %4375 = vmatpush1.msra.mxu0 %v7888_v21 }
0x120e   :  { %4376 = vmatprep.subr.mxu0 %v7884_v38 }
0x120f   :  { %4377 = vmatpush1.msra.mxu0 %v7880_v45  ;;  %v4353_v45 = vpop.f32.mrf.mxu1 }
0x1210   :  { %4378 = vmatprep.subr.mxu0 %v7876_v1 }
0x1211   :  { %4379 = vmatpush1.msra.mxu0 %v7872_v55 }
0x1212   :  { %4380 = vmatprep.subr.mxu0 %v7868_v58  ;;  %v4577_v58 = vld [vmem:[#allocation2 + $0x28] sm:$0xff] }
0x1213   :  { %4381 = vmatpush1.msra.mxu0 %v7864_v51 }
0x1214   :  { %4382 = vmatprep.subr.mxu0 %v7860_v41  ;;  %v4576_v41 = vld [vmem:[#allocation2 + $0x20] sm:$0xff] }
0x1215   :  { %4383 = vmatpush1.msra.mxu0 %v7856_v52 }
0x1216   :  { %4384 = vmatprep.subr.mxu0 %v7852_v49 }
0x1217   :  { %4385 = vmatpush1.msra.mxu0 %v7848_v24  ;;  %v4459_v24 = vld [vmem:[#allocation5 + $0x300] sm:$0xff] }
0x1218   :  { %4386 = vmatprep.subr.mxu0 %v7844_v43  ;;  %v4460_v43 = vld [vmem:[#allocation5 + $0x308] sm:$0xff] }
0x1219   :  { %4387 = vmatpush1.msra.mxu0 %v7840_v44  ;;  %v4461_v44 = vld [vmem:[#allocation5 + $0x310] sm:$0xff] }
0x121a   :  { %4388 = vmatprep.subr.mxu0 %v4353_v45 }
0x121b   :  { %4389 = vmatpush2.msra.mxu0 %v4351_v35 }
0x121c   :  { %4390 = vmatprep.subr.mxu0 %v4347_v27 }
0x121d   :  { %4391 = vmatpush2.msra.mxu0 %v4345_v0 }
0x121e   :  { %4392 = vmatprep.subr.mxu0 %v4341_v28 }
0x121f   :  { %4393 = vmatpush2.msra.mxu0 %v4339_v22 }
0x1220   :  { %4394 = vmatprep.subr.mxu0 %v4335_v18 }
0x1221   :  { %4395 = vmatpush2.msra.mxu0 %v4333_v4 }
0x1222   :  { %4396 = vmatprep.subr.mxu0 %v4329_v9  ;;  %v8225_v9 = vmov 0.0  }
0x1223   :  { %4397 = vmatpush2.msra.mxu0 %v4327_v48  ;;  %v4462_v48 = vld [vmem:[#allocation5 + $0x318] sm:$0xff] }
0x1224   :  { %4398 = vmatprep.subr.mxu0 %v7922_v57  ;;  %4563 = vmatprep.subr.mxu1 %v4462_v48 }
0x1225   :  { %4399 = vmatpush2.msra.mxu0 %v7920_v6  ;;  %4564 = vmatpush2.msra.mxu1 %v4461_v44 }
0x1226   :  { %4400 = vmatprep.subr.mxu0 %v7918_v25  ;;  %4565 = vmatprep.subr.mxu1 %v4460_v43 }
0x1227   :  { %4401 = vmatpush2.msra.mxu0 %v7916_v63  ;;  %4566 = vmatpush2.msra.mxu1 %v4459_v24 }
0x1228   :  { %4402 = vmatprep.subr.mxu0 %v7912_v13 }
0x1229   :  { %4403 = vmatpush2.msra.mxu0 %v7906_v8 }
0x122a   :  { %4404 = vmatprep.subr.mxu0 %v7900_v37 }
0x122b   :  { %4405 = vmatpush2.msra.mxu0 %v7894_v42 }
0x122c   :  { %4406 = vmatprep.subr.mxu0 %v7890_v33 }
0x122d   :  { %4407 = vmatpush2.msra.mxu0 %v7886_v11 }
0x122e   :  { %4408 = vmatprep.subr.mxu0 %v7882_v7 }
0x122f   :  { %4409 = vmatpush2.msra.mxu0 %v7878_v47 }
0x1230   :  { %4410 = vmatprep.subr.mxu0 %v7874_v10 }
0x1231   :  { %4411 = vmatpush2.msra.mxu0 %v7870_v54 }
0x1232   :  { %4412 = vmatprep.subr.mxu0 %v7866_v3 }
0x1233   :  { %4413 = vmatpush2.msra.mxu0 %v7862_v40 }
0x1234   :  { %4414 = vmatprep.subr.mxu0 %v7858_v59 }
0x1235   :  { %4415 = vmatpush2.msra.mxu0 %v7854_v12 }
0x1236   :  { %4416 = vmatprep.subr.mxu0 %v7850_v53 }
0x1237   :  { %4417 = vmatpush2.msra.mxu0 %v7846_v56  ;;  %v4491_v56 = vld [vmem:[#allocation7 + $0x2] sm:$0x3] }
0x1238   :  { %4418 = vmatprep.subr.mxu0 %v7842_v61  ;;  %v8226_v61 = vld [vmem:[#allocation17_spill] sm:$0xff] }
0x1239   :  { %4419 = vmatpush2.msra.mxu0 %v7838_v17  ;;  %v4496_v12 = vrot.slane %v4491_v56, %v8226_v61  ;;  %v8227_v17 = vld [vmem:[#allocation18_spill] sm:$0xff] }
0x123a   :  { %4421 = vmatmul.mubr.f32.vlgmr.msra.gmra.mxu0 %v7767_v29  ;;  %v4500_v52 = vrot.slane %v4491_v56, %v8227_v17 }
0x123b   :  { %4821 = vmatprep.mubr.f32.mxu0 %v8225_v9 }
0x12fa   :  { %v4422_v49 = vpop.f32.mrf.mxu0 }
0x12fc   :  { %v4424_v53 = vpop.f32.mrf.mxu0 }
0x12fd   :  { %4567 = vmatprep.mubr.f32.mxu1 %v4424_v53 }
0x12fe   :  { %4568 = vmatmul.mubr.f32.vlgmr.msra.gmra.mxu1 %v4422_v49 }
0x13be   :  { %v4569_v29 = vpop.f32.mrf.mxu1 }
0x13bf   :  { %v4570_v59 = vadd.f32 %v4569_v29, %v4496_v12 }
0x13c0   :  { %v4571_v40 = vpop.f32.mrf.mxu1 }
0x13c1   :  { %v4574_v51 = vmax.f32 %v4570_v59, 0.0  ;;  %v4572_v3 = vadd.f32 %v4571_v40, %v4500_v52 }
0x13c3   :  { %v4578_v54 = vadd.f32 %v4576_v41, %v4574_v51  ;;  %v4575_v55 = vmax.f32 %v4572_v3, 0.0 }
0x13c5   :  { %v4579_v10 = vadd.f32 %v4577_v58, %v4575_v55  ;;  %v4580_v1 = vmul.f32 %v4578_v54, %v4578_v54 }
0x13c7   :  { %v4581_v47 = vmul.f32 %v4579_v10, %v4579_v10 }
0x13c9   :  { %v4582_v7 = vadd.f32 %v4581_v47, %v4580_v1  ;;  %v5115_v1 = vld [vmem:[#allocation5 + $0x4f0] sm:$0xff]  ;;  %v5114_v47 = vld [vmem:[#allocation5 + $0x4e8] sm:$0xff] }
0x13cb   :  { %4583 = vadd.xlane.f32.xlu1 %v4582_v7 }
0x1454   :  { %v4584_v38 = vpop.xlane.xlu1 %4583 }
0x1455   :  { %6676 = vrsqrt.f32 %v4584_v38  ;;  %vm4587_vm11 = vcmp.eq.f32.partialorder %v4584_v38, inf  ;;  %v4590_v33 = vand.u32 2147483648, %v4584_v38  ;;  %vm4589_vm12 = vcmp.eq.f32.partialorder %v4584_v38, 0.0 }
0x1462   :  { %v6677_v11 = vpop.eup %6676 }
0x1463   :  { %v4586_v21 = vmul.f32 %v6677_v11, %v4584_v38  ;;  %v5112_v11 = vld [vmem:[#allocation5 + $0x4d8] sm:$0xff] }
0x1465   :  { %v4588_v15 = vsel %vm4587_vm11, %v4584_v38, %v4586_v21  ;;  %v5113_v38 = vld [vmem:[#allocation5 + $0x4e0] sm:$0xff] }
0x1466   :  { %v4591_v42 = vsel %vm4589_vm12, %v4590_v33, %v4588_v15  ;;  %v5111_v33 = vld [vmem:[#allocation5 + $0x4d0] sm:$0xff]  ;;  %v5110_v15 = vld [vmem:[#allocation5 + $0x4c8] sm:$0xff] }
0x1467   :  { %v4592_v30 = vadd.f32 1e-06, %v4591_v42 }
0x1469   :  { %6678 = vrcp.f32 %v4592_v30  ;;  %v5109_v30 = vld [vmem:[#allocation5 + $0x4c0] sm:$0xff] }
0x1476   :  { %v6679_v37 = vpop.eup %6678 }
0x1477   :  { %v4596_v31 = vmul.f32 %v6679_v37, %v4579_v10  ;;  %v7971_v8 = vmul.f32 %v6679_v37, %v4578_v54  ;;  %v5116_v10 = vld [vmem:[#allocation5 + $0x4f8] sm:$0xff] }
0x1478   :  { %v5108_v37 = vld [vmem:[#allocation5 + $0x4b8] sm:$0xff] }
0x1479   :  { %4629 = vxpose.xlu1.b32.start.end [1/1] (short) %v4596_v31, 128  ;;  %4787 = vmatprep.subr.mxu0 %v4596_v31 }
0x147a   :  { %5078 = vmatprep.mubr.f32.mxu1 %v4596_v31  ;;  %4597 = vxpose.xlu0.b32.start.end [1/1] (short) %v7971_v8, 128 }
0x147b   :  { %4788 = vmatpush1.msra.mxu0 %v7971_v8 }
0x147c   :  { %5161 = vmatprep.subr.mxu0 %v5116_v10 }
0x14f5   :  { %v4645_v50 = vpop.trf.xlu1 }
0x14f6   :  { %v4613_v26 = vpop.trf.xlu0 }
0x14f7   :  { %6600 = vmatmul.mubr.msk.f32.vlgmr.msra.gmra.mxu0 %vm177_vm2, %v4613_v26  ;;  %v5107_v26 = vld [vmem:[#allocation5 + $0x4b0] sm:$0xff] }
0x14f8   :  { %4827 = vmatprep.mubr.f32.mxu0 %v8225_v9  ;;  %5162 = vmatpush1.msra.mxu0 %v5115_v1  ;;  %v5085_v1 = vld [vmem:[#allocation5 + $0x400] sm:$0xff] }
0x14f9   :  { %v4646_v16 = vpop.trf.xlu1  ;;  %5163 = vmatprep.subr.mxu0 %v5114_v47  ;;  %v5148_v47 = vld [vmem:[#allocation5 + $0x5f8] sm:$0xff] }
0x14fa   :  { %v4614_v14 = vpop.trf.xlu0  ;;  %5164 = vmatpush1.msra.mxu0 %v5113_v38 }
0x14fb   :  { %6601 = vmatmul.mubr.msk.f32.gmra.mxu0 %vm177_vm2, %v4614_v14  ;;  %5165 = vmatprep.subr.mxu0 %v5112_v11  ;;  %v5106_v14 = vld [vmem:[#allocation5 + $0x4a8] sm:$0xff]  ;;  %v5147_v11 = vld [vmem:[#allocation5 + $0x5f0] sm:$0xff] }
0x14fc   :  { %4833 = vmatprep.mubr.f32.mxu0 %v8225_v9  ;;  %5166 = vmatpush1.msra.mxu0 %v5111_v33  ;;  %v5146_v33 = vld [vmem:[#allocation5 + $0x5e8] sm:$0xff] }
0x14fd   :  { %v4647_v57 = vpop.trf.xlu1  ;;  %5167 = vmatprep.subr.mxu0 %v5110_v15 }
0x14fe   :  { %v4615_v13 = vpop.trf.xlu0  ;;  %5168 = vmatpush1.msra.mxu0 %v5109_v30  ;;  %v5145_v30 = vld [vmem:[#allocation5 + $0x5e0] sm:$0xff] }
0x14ff   :  { %6602 = vmatmul.mubr.msk.f32.gmra.mxu0 %vm177_vm2, %v4615_v13  ;;  %5169 = vmatprep.subr.mxu0 %v5108_v37  ;;  %v5144_v37 = vld [vmem:[#allocation5 + $0x5d8] sm:$0xff] }
0x1500   :  { %4839 = vmatprep.mubr.f32.mxu0 %v8225_v9  ;;  %5170 = vmatpush1.msra.mxu0 %v5107_v26 }
0x1501   :  { %v4648_v34 = vpop.trf.xlu1  ;;  %5171 = vmatprep.subr.mxu0 %v5106_v14  ;;  %v5143_v14 = vld [vmem:[#allocation5 + $0x5d0] sm:$0xff] }
0x1502   :  { %v4616_v39 = vpop.trf.xlu0 }
0x1503   :  { %6603 = vmatmul.mubr.msk.f32.gmra.mxu0 %vm177_vm2, %v4616_v39  ;;  %v5105_v39 = vld [vmem:[#allocation5 + $0x4a0] sm:$0xff] }
0x1504   :  { %4845 = vmatprep.mubr.f32.mxu0 %v8225_v9  ;;  %5172 = vmatpush1.msra.mxu0 %v5105_v39  ;;  %v5142_v39 = vld [vmem:[#allocation5 + $0x5c8] sm:$0xff] }
0x1505   :  { %v4649_v60 = vpop.trf.xlu1 }
0x1506   :  { %v4617_v63 = vpop.trf.xlu0 }
0x1507   :  { %6604 = vmatmul.mubr.msk.f32.gmra.mxu0 %vm177_vm2, %v4617_v63  ;;  %v5104_v63 = vld [vmem:[#allocation5 + $0x498] sm:$0xff] }
0x1508   :  { %4851 = vmatprep.mubr.f32.mxu0 %v8225_v9  ;;  %5173 = vmatprep.subr.mxu0 %v5104_v63 }
0x1509   :  { %v4650_v4 = vpop.trf.xlu1 }
0x150a   :  { %v4618_v32 = vpop.trf.xlu0 }
0x150b   :  { %6605 = vmatmul.mubr.msk.f32.gmra.mxu0 %vm177_vm2, %v4618_v32 }
0x150c   :  { %4857 = vmatprep.mubr.f32.mxu0 %v8225_v9 }
0x150d   :  { %v4651_v18 = vpop.trf.xlu1 }
0x150e   :  { %v4619_v5 = vpop.trf.xlu0 }
0x150f   :  { %6606 = vmatmul.mubr.msk.f32.gmra.mxu0 %vm177_vm2, %v4619_v5  ;;  %v5103_v5 = vld [vmem:[#allocation5 + $0x490] sm:$0xff] }
0x1510   :  { %4863 = vmatprep.mubr.f32.mxu0 %v8225_v9  ;;  %5174 = vmatpush1.msra.mxu0 %v5103_v5  ;;  %v5141_v5 = vld [vmem:[#allocation5 + $0x5c0] sm:$0xff] }
0x1511   :  { %v4652_v22 = vpop.trf.xlu1 }
0x1512   :  { %v4620_v25 = vpop.trf.xlu0 }
0x1513   :  { %6607 = vmatmul.mubr.msk.f32.gmra.mxu0 %vm177_vm2, %v4620_v25  ;;  %v5102_v25 = vld [vmem:[#allocation5 + $0x488] sm:$0xff] }
0x1514   :  { %4869 = vmatprep.mubr.f32.mxu0 %v8225_v9  ;;  %5175 = vmatprep.subr.mxu0 %v5102_v25  ;;  %v5140_v25 = vld [vmem:[#allocation5 + $0x5b8] sm:$0xff] }
0x1515   :  { %v4653_v28 = vpop.trf.xlu1 }
0x1516   :  { %v4621_v46 = vpop.trf.xlu0 }
0x1517   :  { %6608 = vmatmul.mubr.msk.f32.gmra.mxu0 %vm177_vm2, %v4621_v46 }
0x1518   :  { %4875 = vmatprep.mubr.f32.mxu0 %v8225_v9 }
0x1519   :  { %v4654_v0 = vpop.trf.xlu1 }
0x151a   :  { %v4622_v6 = vpop.trf.xlu0 }
0x151b   :  { %6609 = vmatmul.mubr.msk.f32.gmra.mxu0 %vm177_vm2, %v4622_v6  ;;  %v5100_v6 = vld [vmem:[#allocation5 + $0x478] sm:$0xff] }
0x151c   :  { %4881 = vmatprep.mubr.f32.mxu0 %v8225_v9 }
0x151d   :  { %v4655_v27 = vpop.trf.xlu1 }
0x151e   :  { %v4623_v36 = vpop.trf.xlu0 }
0x151f   :  { %6610 = vmatmul.mubr.msk.f32.gmra.mxu0 %vm177_vm2, %v4623_v36  ;;  %v5099_v36 = vld [vmem:[#allocation5 + $0x470] sm:$0xff] }
0x1520   :  { %4887 = vmatprep.mubr.f32.mxu0 %v8225_v9 }
0x1521   :  { %v4656_v35 = vpop.trf.xlu1 }
0x1522   :  { %v4624_v62 = vpop.trf.xlu0 }
0x1523   :  { %6611 = vmatmul.mubr.msk.f32.gmra.mxu0 %vm177_vm2, %v4624_v62  ;;  %v5098_v62 = vld [vmem:[#allocation5 + $0x468] sm:$0xff] }
0x1524   :  { %4893 = vmatprep.mubr.f32.mxu0 %v8225_v9 }
0x1525   :  { %v4657_v45 = vpop.trf.xlu1 }
0x1526   :  { %v4625_v2 = vpop.trf.xlu0 }
0x1527   :  { %6612 = vmatmul.mubr.msk.f32.gmra.mxu0 %vm177_vm2, %v4625_v2  ;;  %v5097_v2 = vld [vmem:[#allocation5 + $0x460] sm:$0xff] }
0x1528   :  { %4899 = vmatprep.mubr.f32.mxu0 %v8225_v9 }
0x1529   :  { %v4658_v48 = vpop.trf.xlu1 }
0x152a   :  { %v4626_v23 = vpop.trf.xlu0 }
0x152b   :  { %6613 = vmatmul.mubr.msk.f32.gmra.mxu0 %vm177_vm2, %v4626_v23 }
0x152c   :  { %4905 = vmatprep.mubr.f32.mxu0 %v8225_v9 }
0x152d   :  { %v4659_v44 = vpop.trf.xlu1 }
0x152e   :  { %v4627_v20 = vpop.trf.xlu0 }
0x152f   :  { %6614 = vmatmul.mubr.msk.f32.gmra.mxu0 %vm177_vm2, %v4627_v20  ;;  %v5095_v20 = vld [vmem:[#allocation5 + $0x450] sm:$0xff] }
0x1530   :  { %4911 = vmatprep.mubr.f32.mxu0 %v8225_v9 }
0x1531   :  { %v4660_v43 = vpop.trf.xlu1 }
0x1532   :  { %v4628_v19 = vpop.trf.xlu0 }
0x1533   :  { %6615 = vmatmul.mubr.msk.f32.gmra.mxu0 %vm177_vm2, %v4628_v19 }
0x1534   :  { %4917 = vmatprep.mubr.f32.mxu0 %v8225_v9 }
0x1537   :  { %6616 = vmatmul.mubr.msk.f32.gmra.mxu0 %vm177_vm2, %v4645_v50  ;;  %v5101_v50 = vld [vmem:[#allocation5 + $0x480] sm:$0xff] }
0x1538   :  { %4923 = vmatprep.mubr.f32.mxu0 %v8225_v9  ;;  %5176 = vmatpush1.msra.mxu0 %v5101_v50 }
0x1539   :  { %5177 = vmatprep.subr.mxu0 %v5100_v6  ;;  %v5139_v6 = vld [vmem:[#allocation5 + $0x5b0] sm:$0xff] }
0x153a   :  { %5178 = vmatpush1.msra.mxu0 %v5099_v36  ;;  %v5138_v36 = vld [vmem:[#allocation5 + $0x5a8] sm:$0xff] }
0x153b   :  { %6617 = vmatmul.mubr.msk.f32.gmra.mxu0 %vm177_vm2, %v4646_v16  ;;  %5179 = vmatprep.subr.mxu0 %v5098_v62 }
0x153c   :  { %4929 = vmatprep.mubr.f32.mxu0 %v8225_v9  ;;  %5180 = vmatpush1.msra.mxu0 %v5097_v2  ;;  %v5137_v2 = vld [vmem:[#allocation5 + $0x5a0] sm:$0xff] }
0x153f   :  { %6618 = vmatmul.mubr.msk.f32.gmra.mxu0 %vm177_vm2, %v4647_v57 }
0x1540   :  { %4935 = vmatprep.mubr.f32.mxu0 %v8225_v9 }
0x1543   :  { %6619 = vmatmul.mubr.msk.f32.gmra.mxu0 %vm177_vm2, %v4648_v34  ;;  %v5096_v34 = vld [vmem:[#allocation5 + $0x458] sm:$0xff] }
0x1544   :  { %4941 = vmatprep.mubr.f32.mxu0 %v8225_v9  ;;  %5181 = vmatprep.subr.mxu0 %v5096_v34  ;;  %v5136_v34 = vld [vmem:[#allocation5 + $0x598] sm:$0xff] }
0x1545   :  { %5182 = vmatpush1.msra.mxu0 %v5095_v20 }
0x1547   :  { %6620 = vmatmul.mubr.msk.f32.gmra.mxu0 %vm177_vm2, %v4649_v60  ;;  %v5094_v60 = vld [vmem:[#allocation5 + $0x448] sm:$0xff] }
0x1548   :  { %4947 = vmatprep.mubr.f32.mxu0 %v8225_v9  ;;  %5183 = vmatprep.subr.mxu0 %v5094_v60 }
0x154b   :  { %6621 = vmatmul.mubr.msk.f32.gmra.mxu0 %vm177_vm2, %v4650_v4  ;;  %v5093_v4 = vld [vmem:[#allocation5 + $0x440] sm:$0xff] }
0x154c   :  { %4953 = vmatprep.mubr.f32.mxu0 %v8225_v9  ;;  %5184 = vmatpush1.msra.mxu0 %v5093_v4 }
0x154f   :  { %6622 = vmatmul.mubr.msk.f32.gmra.mxu0 %vm177_vm2, %v4651_v18  ;;  %v5092_v18 = vld [vmem:[#allocation5 + $0x438] sm:$0xff] }
0x1550   :  { %4959 = vmatprep.mubr.f32.mxu0 %v8225_v9  ;;  %5185 = vmatprep.subr.mxu0 %v5092_v18 }
0x1553   :  { %6623 = vmatmul.mubr.msk.f32.gmra.mxu0 %vm177_vm2, %v4652_v22 }
0x1554   :  { %4965 = vmatprep.mubr.f32.mxu0 %v8225_v9 }
0x1557   :  { %6624 = vmatmul.mubr.msk.f32.gmra.mxu0 %vm177_vm2, %v4653_v28  ;;  %v5091_v28 = vld [vmem:[#allocation5 + $0x430] sm:$0xff] }
0x1558   :  { %4971 = vmatprep.mubr.f32.mxu0 %v8225_v9  ;;  %5186 = vmatpush1.msra.mxu0 %v5091_v28 }
0x155b   :  { %6625 = vmatmul.mubr.msk.f32.gmra.mxu0 %vm177_vm2, %v4654_v0  ;;  %v5090_v0 = vld [vmem:[#allocation5 + $0x428] sm:$0xff] }
0x155c   :  { %4977 = vmatprep.mubr.f32.mxu0 %v8225_v9  ;;  %5187 = vmatprep.subr.mxu0 %v5090_v0 }
0x155f   :  { %6626 = vmatmul.mubr.msk.f32.gmra.mxu0 %vm177_vm2, %v4655_v27 }
0x1560   :  { %4983 = vmatprep.mubr.f32.mxu0 %v8225_v9 }
0x1563   :  { %6627 = vmatmul.mubr.msk.f32.gmra.mxu0 %vm177_vm2, %v4656_v35  ;;  %v5089_v35 = vld [vmem:[#allocation5 + $0x420] sm:$0xff] }
0x1564   :  { %4989 = vmatprep.mubr.f32.mxu0 %v8225_v9  ;;  %5188 = vmatpush1.msra.mxu0 %v5089_v35 }
0x1567   :  { %6628 = vmatmul.mubr.msk.f32.gmra.mxu0 %vm177_vm2, %v4657_v45  ;;  %v5088_v45 = vld [vmem:[#allocation5 + $0x418] sm:$0xff] }
0x1568   :  { %4995 = vmatprep.mubr.f32.mxu0 %v8225_v9  ;;  %5189 = vmatprep.subr.mxu0 %v5088_v45 }
0x156b   :  { %6629 = vmatmul.mubr.msk.f32.gmra.mxu0 %vm177_vm2, %v4658_v48 }
0x156c   :  { %5001 = vmatprep.mubr.f32.mxu0 %v8225_v9 }
0x156f   :  { %6630 = vmatmul.mubr.msk.f32.gmra.mxu0 %vm177_vm2, %v4659_v44  ;;  %v5087_v44 = vld [vmem:[#allocation5 + $0x410] sm:$0xff] }
0x1570   :  { %5007 = vmatprep.mubr.f32.mxu0 %v8225_v9  ;;  %5190 = vmatpush1.msra.mxu0 %v5087_v44 }
0x1573   :  { %6631 = vmatmul.mubr.msk.f32.gmra.mxu0 %vm177_vm2, %v4660_v43  ;;  %v5086_v43 = vld [vmem:[#allocation5 + $0x408] sm:$0xff] }
0x1574   :  { %5191 = vmatprep.subr.mxu0 %v5086_v43 }
0x1575   :  { %5192 = vmatpush1.msra.mxu0 %v5085_v1 }
0x1576   :  { %5193 = vmatprep.subr.mxu0 %v5148_v47 }
0x1577   :  { %5194 = vmatpush2.msra.mxu0 %v5147_v11 }
0x1578   :  { %5195 = vmatprep.subr.mxu0 %v5146_v33  ;;  %v5117_v33 = vld [vmem:[#allocation5 + $0x500] sm:$0xff] }
0x1579   :  { %5196 = vmatpush2.msra.mxu0 %v5145_v30  ;;  %v5295_v30 = vld [vmem:[#allocation8 + $0x788] sm:$0xff] }
0x157a   :  { %5197 = vmatprep.subr.mxu0 %v5144_v37  ;;  %v5297_v37 = vld [vmem:[#allocation8 + $0x798] sm:$0xff] }
0x157b   :  { %5198 = vmatpush2.msra.mxu0 %v5143_v14  ;;  %v5294_v14 = vld [vmem:[#allocation8 + $0x780] sm:$0xff] }
0x157c   :  { %5199 = vmatprep.subr.mxu0 %v5142_v39  ;;  %v5291_v39 = vld [vmem:[#allocation8 + $0x708] sm:$0xff] }
0x157d   :  { %5200 = vmatpush2.msra.mxu0 %v5141_v5  ;;  %v5290_v5 = vld [vmem:[#allocation8 + $0x700] sm:$0xff] }
0x157e   :  { %5201 = vmatprep.subr.mxu0 %v5140_v25  ;;  %v5279_v25 = vld [vmem:[#allocation8 + $0x588] sm:$0xff] }
0x157f   :  { %5202 = vmatpush2.msra.mxu0 %v5139_v6  ;;  %v5275_v6 = vld [vmem:[#allocation8 + $0x508] sm:$0xff] }
0x1580   :  { %5203 = vmatprep.subr.mxu0 %v5138_v36  ;;  %v5274_v36 = vld [vmem:[#allocation8 + $0x500] sm:$0xff] }
0x1581   :  { %5204 = vmatpush2.msra.mxu0 %v5137_v2  ;;  %v5270_v2 = vld [vmem:[#allocation8 + $0x480] sm:$0xff] }
0x1582   :  { %5205 = vmatprep.subr.mxu0 %v5136_v34  ;;  %v5267_v34 = vld [vmem:[#allocation8 + $0x408] sm:$0xff] }
0x15b7   :  { %v8038_v24 = vpop.f32.mrf.mxu0 }
0x15b9   :  { %v8040_v49 = vpop.f32.mrf.mxu0 }
0x15bb   :  { %v8042_v53 = vpop.f32.mrf.mxu0 }
0x15bd   :  { %v8044_v56 = vpop.f32.mrf.mxu0 }
0x15bf   :  { %v8046_v12 = vpop.f32.mrf.mxu0 }
0x15c1   :  { %v8048_v52 = vpop.f32.mrf.mxu0 }
0x15c3   :  { %v8050_v29 = vpop.f32.mrf.mxu0 }
0x15c5   :  { %v8052_v59 = vpop.f32.mrf.mxu0 }
0x15c7   :  { %v8054_v41 = vpop.f32.mrf.mxu0 }
0x15c9   :  { %v8056_v9 = vpop.f32.mrf.mxu0 }
0x15cb   :  { %v8058_v40 = vpop.f32.mrf.mxu0 }
0x15cd   :  { %v8060_v51 = vpop.f32.mrf.mxu0 }
0x15cf   :  { %v8062_v3 = vpop.f32.mrf.mxu0 }
0x15d1   :  { %v8064_v58 = vpop.f32.mrf.mxu0 }
0x15d3   :  { %v8066_v54 = vpop.f32.mrf.mxu0 }
0x15d5   :  { %v8068_v55 = vpop.f32.mrf.mxu0 }
0x15d7   :  { %v8070_v7 = vpop.f32.mrf.mxu0 }
0x15d9   :  { %v8072_v21 = vpop.f32.mrf.mxu0 }
0x15db   :  { %v8074_v42 = vpop.f32.mrf.mxu0 }
0x15dd   :  { %v8076_v31 = vpop.f32.mrf.mxu0 }
0x15df   :  { %v8078_v13 = vpop.f32.mrf.mxu0 }
0x15e1   :  { %v8080_v32 = vpop.f32.mrf.mxu0 }
0x15e3   :  { %v8082_v46 = vpop.f32.mrf.mxu0 }
0x15e5   :  { %v8084_v16 = vpop.f32.mrf.mxu0 }
0x15e7   :  { %v4895_v57 = vpop.f32.mrf.mxu0 }
0x15e9   :  { %v4897_v23 = vpop.f32.mrf.mxu0 }
0x15eb   :  { %v4901_v19 = vpop.f32.mrf.mxu0 }
0x15ed   :  { %v4903_v22 = vpop.f32.mrf.mxu0 }
0x15ef   :  { %v4907_v27 = vpop.f32.mrf.mxu0 }
0x15f1   :  { %v4909_v48 = vpop.f32.mrf.mxu0 }
0x15f3   :  { %v4913_v10 = vpop.f32.mrf.mxu0 }
0x15f5   :  { %v4915_v38 = vpop.f32.mrf.mxu0 }
0x15f6   :  { %5014 = vmatprep.subr.mxu1 %v4915_v38 }
0x15f7   :  { %v8086_v15 = vpop.f32.mrf.mxu0  ;;  %5015 = vmatpush1.msra.mxu1 %v4913_v10 }
0x15f8   :  { %5016 = vmatprep.subr.mxu1 %v4909_v48 }
0x15f9   :  { %v8088_v26 = vpop.f32.mrf.mxu0  ;;  %5017 = vmatpush1.msra.mxu1 %v4907_v27 }
0x15fa   :  { %5018 = vmatprep.subr.mxu1 %v4903_v22 }
0x15fb   :  { %v8090_v63 = vpop.f32.mrf.mxu0  ;;  %5019 = vmatpush1.msra.mxu1 %v4901_v19 }
0x15fc   :  { %5020 = vmatprep.subr.mxu1 %v4897_v23 }
0x15fd   :  { %v8092_v50 = vpop.f32.mrf.mxu0  ;;  %5021 = vmatpush1.msra.mxu1 %v4895_v57  ;;  %v5135_v57 = vld [vmem:[#allocation5 + $0x590] sm:$0xff] }
0x15fe   :  { %5022 = vmatprep.subr.mxu1 %v8084_v16  ;;  %v5134_v16 = vld [vmem:[#allocation5 + $0x588] sm:$0xff]  ;;  %5206 = vmatpush2.msra.mxu0 %v5135_v57 }
0x15ff   :  { %v8095_v62 = vpop.f32.mrf.mxu0  ;;  %5023 = vmatpush1.msra.mxu1 %v8082_v46  ;;  %v5133_v46 = vld [vmem:[#allocation5 + $0x580] sm:$0xff]  ;;  %5207 = vmatprep.subr.mxu0 %v5134_v16  ;;  %v5263_v57 = vld [vmem:[#allocation8 + $0x388] sm:$0xff] }
0x1600   :  { %5024 = vmatprep.subr.mxu1 %v8080_v32  ;;  %v5132_v32 = vld [vmem:[#allocation5 + $0x578] sm:$0xff]  ;;  %5208 = vmatpush2.msra.mxu0 %v5133_v46  ;;  %v5262_v16 = vld [vmem:[#allocation8 + $0x380] sm:$0xff] }
0x1601   :  { %v8099_v23 = vpop.f32.mrf.mxu0  ;;  %5025 = vmatpush1.msra.mxu1 %v8078_v13  ;;  %v5131_v13 = vld [vmem:[#allocation5 + $0x570] sm:$0xff]  ;;  %5209 = vmatprep.subr.mxu0 %v5132_v32  ;;  %v5258_v46 = vld [vmem:[#allocation8 + $0x300] sm:$0xff] }
0x1602   :  { %5026 = vmatprep.subr.mxu1 %v8076_v31  ;;  %v5130_v31 = vld [vmem:[#allocation5 + $0x568] sm:$0xff]  ;;  %5210 = vmatpush2.msra.mxu0 %v5131_v13 }
0x1603   :  { %v8103_v20 = vpop.f32.mrf.mxu0  ;;  %5027 = vmatpush1.msra.mxu1 %v8074_v42  ;;  %v5129_v42 = vld [vmem:[#allocation5 + $0x560] sm:$0xff]  ;;  %5211 = vmatprep.subr.mxu0 %v5130_v31  ;;  %v5255_v32 = vld [vmem:[#allocation8 + $0x288] sm:$0xff] }
0x1604   :  { %5028 = vmatprep.subr.mxu1 %v8072_v21  ;;  %v5128_v21 = vld [vmem:[#allocation5 + $0x558] sm:$0xff]  ;;  %5212 = vmatpush2.msra.mxu0 %v5129_v42  ;;  %v5251_v13 = vld [vmem:[#allocation8 + $0x208] sm:$0xff]  ;;  %v5250_v31 = vld [vmem:[#allocation8 + $0x200] sm:$0xff] }
0x1605   :  { %v8107_v60 = vpop.f32.mrf.mxu0  ;;  %5029 = vmatpush1.msra.mxu1 %v8070_v7  ;;  %v5127_v7 = vld [vmem:[#allocation5 + $0x550] sm:$0xff]  ;;  %5213 = vmatprep.subr.mxu0 %v5128_v21  ;;  %v5246_v42 = vld [vmem:[#allocation8 + $0x180] sm:$0xff] }
0x1606   :  { %5030 = vmatprep.subr.mxu1 %v8068_v55  ;;  %v5126_v55 = vld [vmem:[#allocation5 + $0x548] sm:$0xff]  ;;  %5214 = vmatpush2.msra.mxu0 %v5127_v7 }
0x1607   :  { %v8111_v19 = vpop.f32.mrf.mxu0  ;;  %5031 = vmatpush1.msra.mxu1 %v8066_v54  ;;  %v5125_v54 = vld [vmem:[#allocation5 + $0x540] sm:$0xff]  ;;  %5215 = vmatprep.subr.mxu0 %v5126_v55  ;;  %v5243_v21 = vld [vmem:[#allocation8 + $0x108] sm:$0xff] }
0x1608   :  { %5032 = vmatprep.subr.mxu1 %v8064_v58  ;;  %v5124_v58 = vld [vmem:[#allocation5 + $0x538] sm:$0xff]  ;;  %5216 = vmatpush2.msra.mxu0 %v5125_v54  ;;  %v5239_v7 = vld [vmem:[#allocation8 + $0x88] sm:$0xff]  ;;  %v5238_v55 = vld [vmem:[#allocation8 + $0x80] sm:$0xff] }
0x1609   :  { %v8115_v4 = vpop.f32.mrf.mxu0  ;;  %5033 = vmatpush1.msra.mxu1 %v8062_v3  ;;  %v5123_v3 = vld [vmem:[#allocation5 + $0x530] sm:$0xff]  ;;  %5217 = vmatprep.subr.mxu0 %v5124_v58  ;;  %v5234_v54 = vld [vmem:[#allocation8] sm:$0xff] }
0x160a   :  { %5034 = vmatprep.subr.mxu1 %v8060_v51  ;;  %v5122_v51 = vld [vmem:[#allocation5 + $0x528] sm:$0xff]  ;;  %5218 = vmatpush2.msra.mxu0 %v5123_v3 }
0x160b   :  { %v8119_v18 = vpop.f32.mrf.mxu0  ;;  %5035 = vmatpush1.msra.mxu1 %v8058_v40  ;;  %v5121_v40 = vld [vmem:[#allocation5 + $0x520] sm:$0xff]  ;;  %5219 = vmatprep.subr.mxu0 %v5122_v51  ;;  %v5359_v58 = vld [vmem:[#allocation8 + $0xf88] sm:$0xff] }
0x160c   :  { %5036 = vmatprep.subr.mxu1 %v8056_v9  ;;  %v5120_v9 = vld [vmem:[#allocation5 + $0x518] sm:$0xff]  ;;  %5220 = vmatpush2.msra.mxu0 %v5121_v40  ;;  %v5355_v3 = vld [vmem:[#allocation8 + $0xf08] sm:$0xff]  ;;  %v5354_v51 = vld [vmem:[#allocation8 + $0xf00] sm:$0xff] }
0x160d   :  { %v4951_v22 = vpop.f32.mrf.mxu0  ;;  %5037 = vmatpush1.msra.mxu1 %v8054_v41  ;;  %v5119_v41 = vld [vmem:[#allocation5 + $0x510] sm:$0xff]  ;;  %5221 = vmatprep.subr.mxu0 %v5120_v9  ;;  %v5350_v40 = vld [vmem:[#allocation8 + $0xe80] sm:$0xff] }
0x160e   :  { %5038 = vmatprep.subr.mxu1 %v8052_v59  ;;  %5222 = vmatpush2.msra.mxu0 %v5119_v41  ;;  %v5347_v9 = vld [vmem:[#allocation8 + $0xe08] sm:$0xff] }
0x160f   :  { %v4955_v28 = vpop.f32.mrf.mxu0  ;;  %5039 = vmatpush1.msra.mxu1 %v8050_v29  ;;  %v5343_v41 = vld [vmem:[#allocation8 + $0xd88] sm:$0xff] }
0x1610   :  { %5040 = vmatprep.subr.mxu1 %v8048_v52 }
0x1611   :  { %v4957_v0 = vpop.f32.mrf.mxu0  ;;  %5041 = vmatpush1.msra.mxu1 %v8046_v12 }
0x1612   :  { %5042 = vmatprep.subr.mxu1 %v8044_v56 }
0x1613   :  { %v4961_v59 = vpop.f32.mrf.mxu0  ;;  %5043 = vmatpush1.msra.mxu1 %v8042_v53 }
0x1614   :  { %5044 = vmatprep.subr.mxu1 %v8040_v49 }
0x1615   :  { %v4963_v29 = vpop.f32.mrf.mxu0  ;;  %5045 = vmatpush1.msra.mxu1 %v8038_v24  ;;  %v5118_v24 = vld [vmem:[#allocation5 + $0x508] sm:$0xff] }
0x1616   :  { %5223 = vmatprep.subr.mxu0 %v5118_v24  ;;  %v5296_v24 = vld [vmem:[#allocation8 + $0x790] sm:$0xff] }
0x1617   :  { %v4967_v52 = vpop.f32.mrf.mxu0  ;;  %5224 = vmatpush2.msra.mxu0 %v5117_v33  ;;  %v5293_v33 = vld [vmem:[#allocation8 + $0x718] sm:$0xff] }
0x1618   :  { %5455 = vmatprep.subr.mxu0 %v5297_v37  ;;  %v5289_v37 = vld [vmem:[#allocation8 + $0x698] sm:$0xff] }
0x1619   :  { %v4969_v27 = vpop.f32.mrf.mxu0 }
0x161b   :  { %v4973_v35 = vpop.f32.mrf.mxu0 }
0x161d   :  { %v4975_v45 = vpop.f32.mrf.mxu0 }
0x161f   :  { %v4979_v12 = vpop.f32.mrf.mxu0 }
0x1621   :  { %v4981_v48 = vpop.f32.mrf.mxu0 }
0x1623   :  { %v4985_v44 = vpop.f32.mrf.mxu0 }
0x1625   :  { %v4987_v43 = vpop.f32.mrf.mxu0 }
0x1627   :  { %v4991_v56 = vpop.f32.mrf.mxu0 }
0x1629   :  { %v4993_v10 = vpop.f32.mrf.mxu0 }
0x162b   :  { %v4997_v1 = vpop.f32.mrf.mxu0 }
0x162d   :  { %v4999_v47 = vpop.f32.mrf.mxu0 }
0x162f   :  { %v5003_v53 = vpop.f32.mrf.mxu0 }
0x1631   :  { %v5005_v38 = vpop.f32.mrf.mxu0 }
0x1633   :  { %v5009_v11 = vpop.f32.mrf.mxu0 }
0x1635   :  { %v5011_v49 = vpop.f32.mrf.mxu0 }
0x1636   :  { %5046 = vmatprep.subr.mxu1 %v5011_v49 }
0x1637   :  { %5047 = vmatpush2.msra.mxu1 %v5009_v11 }
0x1638   :  { %5048 = vmatprep.subr.mxu1 %v5005_v38  ;;  %v5311_v38 = vld [vmem:[#allocation8 + $0x988] sm:$0xff] }
0x1639   :  { %5049 = vmatpush2.msra.mxu1 %v5003_v53  ;;  %v5314_v53 = vld [vmem:[#allocation8 + $0xa00] sm:$0xff] }
0x163a   :  { %5050 = vmatprep.subr.mxu1 %v4999_v47  ;;  %v5315_v47 = vld [vmem:[#allocation8 + $0xa08] sm:$0xff] }
0x163b   :  { %5051 = vmatpush2.msra.mxu1 %v4997_v1  ;;  %v5318_v1 = vld [vmem:[#allocation8 + $0xa80] sm:$0xff] }
0x163c   :  { %5052 = vmatprep.subr.mxu1 %v4993_v10  ;;  %v5319_v10 = vld [vmem:[#allocation8 + $0xa88] sm:$0xff] }
0x163d   :  { %5053 = vmatpush2.msra.mxu1 %v4991_v56  ;;  %v5322_v56 = vld [vmem:[#allocation8 + $0xb00] sm:$0xff] }
0x163e   :  { %5054 = vmatprep.subr.mxu1 %v4987_v43  ;;  %v5323_v43 = vld [vmem:[#allocation8 + $0xb08] sm:$0xff] }
0x163f   :  { %5055 = vmatpush2.msra.mxu1 %v4985_v44  ;;  %v5326_v44 = vld [vmem:[#allocation8 + $0xb80] sm:$0xff] }
0x1640   :  { %5056 = vmatprep.subr.mxu1 %v4981_v48  ;;  %v5327_v48 = vld [vmem:[#allocation8 + $0xb88] sm:$0xff] }
0x1641   :  { %5057 = vmatpush2.msra.mxu1 %v4979_v12  ;;  %v5330_v12 = vld [vmem:[#allocation8 + $0xc00] sm:$0xff] }
0x1642   :  { %5058 = vmatprep.subr.mxu1 %v4975_v45  ;;  %v5331_v45 = vld [vmem:[#allocation8 + $0xc08] sm:$0xff] }
0x1643   :  { %5059 = vmatpush2.msra.mxu1 %v4973_v35  ;;  %v5334_v35 = vld [vmem:[#allocation8 + $0xc80] sm:$0xff] }
0x1644   :  { %5060 = vmatprep.subr.mxu1 %v4969_v27  ;;  %v5335_v27 = vld [vmem:[#allocation8 + $0xc88] sm:$0xff] }
0x1645   :  { %5061 = vmatpush2.msra.mxu1 %v4967_v52  ;;  %v5338_v52 = vld [vmem:[#allocation8 + $0xd00] sm:$0xff] }
0x1646   :  { %5062 = vmatprep.subr.mxu1 %v4963_v29  ;;  %v5339_v29 = vld [vmem:[#allocation8 + $0xd08] sm:$0xff] }
0x1647   :  { %5063 = vmatpush2.msra.mxu1 %v4961_v59  ;;  %v5342_v59 = vld [vmem:[#allocation8 + $0xd80] sm:$0xff] }
0x1648   :  { %5064 = vmatprep.subr.mxu1 %v4957_v0  ;;  %v5346_v0 = vld [vmem:[#allocation8 + $0xe00] sm:$0xff] }
0x1649   :  { %5065 = vmatpush2.msra.mxu1 %v4955_v28  ;;  %v5351_v28 = vld [vmem:[#allocation8 + $0xe88] sm:$0xff] }
0x164a   :  { %5066 = vmatprep.subr.mxu1 %v4951_v22  ;;  %v5358_v22 = vld [vmem:[#allocation8 + $0xf80] sm:$0xff] }
0x164b   :  { %5067 = vmatpush2.msra.mxu1 %v8119_v18  ;;  %v5235_v18 = vld [vmem:[#allocation8 + $0x8] sm:$0xff] }
0x164c   :  { %5068 = vmatprep.subr.mxu1 %v8115_v4  ;;  %v5242_v4 = vld [vmem:[#allocation8 + $0x100] sm:$0xff] }
0x164d   :  { %5069 = vmatpush2.msra.mxu1 %v8111_v19  ;;  %v5247_v19 = vld [vmem:[#allocation8 + $0x188] sm:$0xff] }
0x164e   :  { %5070 = vmatprep.subr.mxu1 %v8107_v60  ;;  %v5254_v60 = vld [vmem:[#allocation8 + $0x280] sm:$0xff] }
0x164f   :  { %5071 = vmatpush2.msra.mxu1 %v8103_v20  ;;  %v5259_v20 = vld [vmem:[#allocation8 + $0x308] sm:$0xff] }
0x1650   :  { %5072 = vmatprep.subr.mxu1 %v8099_v23  ;;  %v5266_v23 = vld [vmem:[#allocation8 + $0x400] sm:$0xff] }
0x1651   :  { %5073 = vmatpush2.msra.mxu1 %v8095_v62  ;;  %v5271_v62 = vld [vmem:[#allocation8 + $0x488] sm:$0xff] }
0x1652   :  { %5074 = vmatprep.subr.mxu1 %v8092_v50  ;;  %v5278_v50 = vld [vmem:[#allocation8 + $0x580] sm:$0xff] }
0x1653   :  { %5075 = vmatpush2.msra.mxu1 %v8090_v63  ;;  %v5287_v63 = vld [vmem:[#allocation8 + $0x688] sm:$0xff] }
0x1654   :  { %5076 = vmatprep.subr.mxu1 %v8088_v26  ;;  %v5286_v26 = vld [vmem:[#allocation8 + $0x680] sm:$0xff] }
0x1655   :  { %5077 = vmatpush2.msra.mxu1 %v8086_v15  ;;  %v5283_v15 = vld [vmem:[#allocation8 + $0x608] sm:$0xff] }
0x1656   :  { %5079 = vmatmul.mubr.f32.vlgmr.msra.gmra.mxu1 %v7971_v8  ;;  %5384 = vmatprep.subr.mxu1 %v5295_v30  ;;  %v5282_v8 = vld [vmem:[#allocation8 + $0x600] sm:$0xff]  ;;  %v5292_v30 = vld [vmem:[#allocation8 + $0x710] sm:$0xff] }
0x1657   :  { %5385 = vmatpush1.msra.mxu1 %v5294_v14  ;;  %v5288_v14 = vld [vmem:[#allocation8 + $0x690] sm:$0xff] }
0x1658   :  { %5386 = vmatprep.subr.mxu1 %v5291_v39  ;;  %v5285_v39 = vld [vmem:[#allocation8 + $0x618] sm:$0xff] }
0x1659   :  { %5387 = vmatpush1.msra.mxu1 %v5290_v5  ;;  %v5284_v5 = vld [vmem:[#allocation8 + $0x610] sm:$0xff] }
0x165a   :  { %5388 = vmatprep.subr.mxu1 %v5287_v63  ;;  %v5281_v63 = vld [vmem:[#allocation8 + $0x598] sm:$0xff] }
0x165b   :  { %5389 = vmatpush1.msra.mxu1 %v5286_v26  ;;  %v5280_v26 = vld [vmem:[#allocation8 + $0x590] sm:$0xff] }
0x165c   :  { %5390 = vmatprep.subr.mxu1 %v5283_v15  ;;  %v5277_v15 = vld [vmem:[#allocation8 + $0x518] sm:$0xff] }
0x165d   :  { %5391 = vmatpush1.msra.mxu1 %v5282_v8  ;;  %v5276_v8 = vld [vmem:[#allocation8 + $0x510] sm:$0xff] }
0x165e   :  { %5392 = vmatprep.subr.mxu1 %v5279_v25  ;;  %v5273_v25 = vld [vmem:[#allocation8 + $0x498] sm:$0xff] }
0x165f   :  { %5393 = vmatpush1.msra.mxu1 %v5278_v50  ;;  %v5272_v50 = vld [vmem:[#allocation8 + $0x490] sm:$0xff] }
0x1660   :  { %5394 = vmatprep.subr.mxu1 %v5275_v6  ;;  %v5269_v6 = vld [vmem:[#allocation8 + $0x418] sm:$0xff] }
0x1661   :  { %5395 = vmatpush1.msra.mxu1 %v5274_v36  ;;  %v5268_v36 = vld [vmem:[#allocation8 + $0x410] sm:$0xff] }
0x1662   :  { %5396 = vmatprep.subr.mxu1 %v5271_v62  ;;  %v5265_v62 = vld [vmem:[#allocation8 + $0x398] sm:$0xff] }
0x1663   :  { %5397 = vmatpush1.msra.mxu1 %v5270_v2  ;;  %v5264_v2 = vld [vmem:[#allocation8 + $0x390] sm:$0xff] }
0x1664   :  { %5398 = vmatprep.subr.mxu1 %v5267_v34  ;;  %v5261_v34 = vld [vmem:[#allocation8 + $0x318] sm:$0xff] }
0x1665   :  { %5399 = vmatpush1.msra.mxu1 %v5266_v23  ;;  %v5260_v23 = vld [vmem:[#allocation8 + $0x310] sm:$0xff] }
0x1666   :  { %5400 = vmatprep.subr.mxu1 %v5263_v57  ;;  %v5257_v57 = vld [vmem:[#allocation8 + $0x298] sm:$0xff] }
0x1667   :  { %5401 = vmatpush1.msra.mxu1 %v5262_v16  ;;  %v5256_v16 = vld [vmem:[#allocation8 + $0x290] sm:$0xff] }
0x1668   :  { %5402 = vmatprep.subr.mxu1 %v5259_v20  ;;  %v5253_v20 = vld [vmem:[#allocation8 + $0x218] sm:$0xff] }
0x1669   :  { %5403 = vmatpush1.msra.mxu1 %v5258_v46  ;;  %v5252_v46 = vld [vmem:[#allocation8 + $0x210] sm:$0xff] }
0x166a   :  { %5404 = vmatprep.subr.mxu1 %v5255_v32  ;;  %v5249_v32 = vld [vmem:[#allocation8 + $0x198] sm:$0xff] }
0x166b   :  { %5405 = vmatpush1.msra.mxu1 %v5254_v60  ;;  %v5248_v60 = vld [vmem:[#allocation8 + $0x190] sm:$0xff] }
0x166c   :  { %5406 = vmatprep.subr.mxu1 %v5251_v13  ;;  %v5245_v13 = vld [vmem:[#allocation8 + $0x118] sm:$0xff] }
0x166d   :  { %5407 = vmatpush1.msra.mxu1 %v5250_v31  ;;  %v5244_v31 = vld [vmem:[#allocation8 + $0x110] sm:$0xff] }
0x166e   :  { %5408 = vmatprep.subr.mxu1 %v5247_v19  ;;  %v5241_v19 = vld [vmem:[#allocation8 + $0x98] sm:$0xff] }
0x166f   :  { %5409 = vmatpush1.msra.mxu1 %v5246_v42  ;;  %v5240_v42 = vld [vmem:[#allocation8 + $0x90] sm:$0xff] }
0x1670   :  { %5410 = vmatprep.subr.mxu1 %v5243_v21  ;;  %v5237_v21 = vld [vmem:[#allocation8 + $0x18] sm:$0xff] }
0x1671   :  { %5411 = vmatpush1.msra.mxu1 %v5242_v4  ;;  %v5236_v4 = vld [vmem:[#allocation8 + $0x10] sm:$0xff] }
0x1672   :  { %5412 = vmatprep.subr.mxu1 %v5239_v7  ;;  %v5361_v7 = vld [vmem:[#allocation8 + $0xf98] sm:$0xff] }
0x1673   :  { %5413 = vmatpush1.msra.mxu1 %v5238_v55  ;;  %v5360_v55 = vld [vmem:[#allocation8 + $0xf90] sm:$0xff] }
0x1674   :  { %5414 = vmatprep.subr.mxu1 %v5235_v18  ;;  %v5357_v18 = vld [vmem:[#allocation8 + $0xf18] sm:$0xff] }
0x1675   :  { %5415 = vmatpush1.msra.mxu1 %v5234_v54  ;;  %v5356_v54 = vld [vmem:[#allocation8 + $0xf10] sm:$0xff] }
0x1676   :  { %5416 = vmatprep.subr.mxu1 %v5359_v58  ;;  %v5353_v58 = vld [vmem:[#allocation8 + $0xe98] sm:$0xff] }
0x1677   :  { %5417 = vmatpush2.msra.mxu1 %v5358_v22  ;;  %v5352_v22 = vld [vmem:[#allocation8 + $0xe90] sm:$0xff] }
0x1678   :  { %5418 = vmatprep.subr.mxu1 %v5355_v3  ;;  %v5349_v3 = vld [vmem:[#allocation8 + $0xe18] sm:$0xff] }
0x1679   :  { %5419 = vmatpush2.msra.mxu1 %v5354_v51  ;;  %v5348_v51 = vld [vmem:[#allocation8 + $0xe10] sm:$0xff] }
0x167a   :  { %5420 = vmatprep.subr.mxu1 %v5351_v28  ;;  %v5345_v28 = vld [vmem:[#allocation8 + $0xd98] sm:$0xff] }
0x167b   :  { %5421 = vmatpush2.msra.mxu1 %v5350_v40  ;;  %v5344_v40 = vld [vmem:[#allocation8 + $0xd90] sm:$0xff] }
0x167c   :  { %5422 = vmatprep.subr.mxu1 %v5347_v9  ;;  %v5341_v9 = vld [vmem:[#allocation8 + $0xd18] sm:$0xff] }
0x167d   :  { %5423 = vmatpush2.msra.mxu1 %v5346_v0  ;;  %v5340_v0 = vld [vmem:[#allocation8 + $0xd10] sm:$0xff] }
0x167e   :  { %5424 = vmatprep.subr.mxu1 %v5343_v41  ;;  %v5337_v41 = vld [vmem:[#allocation8 + $0xc98] sm:$0xff] }
0x167f   :  { %5425 = vmatpush2.msra.mxu1 %v5342_v59  ;;  %v5336_v59 = vld [vmem:[#allocation8 + $0xc90] sm:$0xff] }
0x1680   :  { %5426 = vmatprep.subr.mxu1 %v5339_v29  ;;  %v5333_v29 = vld [vmem:[#allocation8 + $0xc18] sm:$0xff] }
0x1681   :  { %5427 = vmatpush2.msra.mxu1 %v5338_v52  ;;  %v5332_v52 = vld [vmem:[#allocation8 + $0xc10] sm:$0xff] }
0x1682   :  { %5428 = vmatprep.subr.mxu1 %v5335_v27  ;;  %v5329_v27 = vld [vmem:[#allocation8 + $0xb98] sm:$0xff] }
0x1683   :  { %5429 = vmatpush2.msra.mxu1 %v5334_v35  ;;  %v5328_v35 = vld [vmem:[#allocation8 + $0xb90] sm:$0xff] }
0x1684   :  { %5430 = vmatprep.subr.mxu1 %v5331_v45  ;;  %v5325_v45 = vld [vmem:[#allocation8 + $0xb18] sm:$0xff] }
0x1685   :  { %5431 = vmatpush2.msra.mxu1 %v5330_v12  ;;  %v5324_v12 = vld [vmem:[#allocation8 + $0xb10] sm:$0xff] }
0x1686   :  { %5432 = vmatprep.subr.mxu1 %v5327_v48  ;;  %v5321_v48 = vld [vmem:[#allocation8 + $0xa98] sm:$0xff] }
0x1687   :  { %5433 = vmatpush2.msra.mxu1 %v5326_v44  ;;  %v5320_v44 = vld [vmem:[#allocation8 + $0xa90] sm:$0xff] }
0x1688   :  { %5434 = vmatprep.subr.mxu1 %v5323_v43  ;;  %v5317_v43 = vld [vmem:[#allocation8 + $0xa18] sm:$0xff] }
0x1689   :  { %5435 = vmatpush2.msra.mxu1 %v5322_v56  ;;  %v5316_v56 = vld [vmem:[#allocation8 + $0xa10] sm:$0xff] }
0x168a   :  { %5436 = vmatprep.subr.mxu1 %v5319_v10  ;;  %v5313_v10 = vld [vmem:[#allocation8 + $0x998] sm:$0xff] }
0x168b   :  { %5437 = vmatpush2.msra.mxu1 %v5318_v1  ;;  %v5310_v1 = vld [vmem:[#allocation8 + $0x980] sm:$0xff] }
0x168c   :  { %5438 = vmatprep.subr.mxu1 %v5315_v47  ;;  %v5312_v47 = vld [vmem:[#allocation8 + $0x990] sm:$0xff] }
0x168d   :  { %5439 = vmatpush2.msra.mxu1 %v5314_v53  ;;  %v5307_v53 = vld [vmem:[#allocation8 + $0x908] sm:$0xff] }
0x168e   :  { %5440 = vmatprep.subr.mxu1 %v5311_v38  ;;  %v5309_v38 = vld [vmem:[#allocation8 + $0x918] sm:$0xff] }
0x168f   :  { %5441 = vmatpush2.msra.mxu1 %v5310_v1  ;;  %v5557_v1 = vld [vmem:[#allocation8 + $0x330] sm:$0xff] }
0x1690   :  { %5442 = vmatprep.subr.mxu1 %v5307_v53  ;;  %v5554_v53 = vld [vmem:[#allocation8 + $0x2b8] sm:$0xff] }
0x1716   :  { %v5080_v11 = vpop.f32.mrf.mxu1 }
0x1718   :  { %v5082_v49 = vpop.f32.mrf.mxu1 }
0x1719   :  { %5225 = vmatprep.mubr.f32.mxu0 %v5082_v49  ;;  %v5308_v49 = vld [vmem:[#allocation8 + $0x910] sm:$0xff] }
0x171a   :  { %5226 = vmatmul.mubr.f32.vlgmr.msra.gmra.mxu0 %v5080_v11  ;;  %v5306_v11 = vld [vmem:[#allocation8 + $0x900] sm:$0xff] }
0x171b   :  { %5456 = vmatpush1.msra.mxu0 %v5296_v24  ;;  %5443 = vmatpush2.msra.mxu1 %v5306_v11  ;;  %v5303_v24 = vld [vmem:[#allocation8 + $0x888] sm:$0xff]  ;;  %v5553_v11 = vld [vmem:[#allocation8 + $0x2b0] sm:$0xff] }
0x171c   :  { %5457 = vmatprep.subr.mxu0 %v5293_v33  ;;  %v5305_v33 = vld [vmem:[#allocation8 + $0x898] sm:$0xff]  ;;  %5444 = vmatprep.subr.mxu1 %v5303_v24 }
0x171d   :  { %5458 = vmatpush1.msra.mxu0 %v5292_v30  ;;  %v5302_v30 = vld [vmem:[#allocation8 + $0x880] sm:$0xff]  ;;  %v5550_v24 = vld [vmem:[#allocation8 + $0x238] sm:$0xff] }
0x171e   :  { %5459 = vmatprep.subr.mxu0 %v5289_v37  ;;  %v5304_v37 = vld [vmem:[#allocation8 + $0x890] sm:$0xff]  ;;  %5445 = vmatpush2.msra.mxu1 %v5302_v30 }
0x171f   :  { %5460 = vmatpush1.msra.mxu0 %v5288_v14  ;;  %v5299_v14 = vld [vmem:[#allocation8 + $0x808] sm:$0xff]  ;;  %v5549_v30 = vld [vmem:[#allocation8 + $0x230] sm:$0xff] }
0x1720   :  { %5461 = vmatprep.subr.mxu0 %v5285_v39  ;;  %v5301_v39 = vld [vmem:[#allocation8 + $0x818] sm:$0xff]  ;;  %5446 = vmatprep.subr.mxu1 %v5299_v14 }
0x1721   :  { %5462 = vmatpush1.msra.mxu0 %v5284_v5  ;;  %v5298_v5 = vld [vmem:[#allocation8 + $0x800] sm:$0xff]  ;;  %v5546_v14 = vld [vmem:[#allocation8 + $0x1b8] sm:$0xff] }
0x1722   :  { %5463 = vmatprep.subr.mxu0 %v5281_v63  ;;  %v5300_v63 = vld [vmem:[#allocation8 + $0x810] sm:$0xff]  ;;  %5447 = vmatpush2.msra.mxu1 %v5298_v5 }
0x1723   :  { %5464 = vmatpush1.msra.mxu0 %v5280_v26  ;;  %v5592_v26 = vld [vmem:[#allocation8 + $0x7a8] sm:$0xff]  ;;  %v5545_v5 = vld [vmem:[#allocation8 + $0x1b0] sm:$0xff] }
0x1724   :  { %5465 = vmatprep.subr.mxu0 %v5277_v15  ;;  %v5594_v15 = vld [vmem:[#allocation8 + $0x7b8] sm:$0xff]  ;;  %5681 = vmatprep.subr.mxu1 %v5592_v26 }
0x1725   :  { %5466 = vmatpush1.msra.mxu0 %v5276_v8  ;;  %v5149_v8 = vld [vmem:[#allocation7 + $0x4] sm:$0x3] }
0x1726   :  { %5467 = vmatprep.subr.mxu0 %v5273_v25  ;;  %v5154_v25 = vrot.slane %v5149_v8, %v8226_v61  ;;  %v5542_v26 = vld [vmem:[#allocation8 + $0x138] sm:$0xff] }
0x1727   :  { %5468 = vmatpush1.msra.mxu0 %v5272_v50  ;;  %v5158_v50 = vrot.slane %v5149_v8, %v8227_v17  ;;  %v5541_v8 = vld [vmem:[#allocation8 + $0x130] sm:$0xff] }
0x1728   :  { %5469 = vmatprep.subr.mxu0 %v5269_v6 }
0x1729   :  { %5470 = vmatpush1.msra.mxu0 %v5268_v36 }
0x172a   :  { %5471 = vmatprep.subr.mxu0 %v5265_v62 }
0x172b   :  { %5472 = vmatpush1.msra.mxu0 %v5264_v2 }
0x172c   :  { %5473 = vmatprep.subr.mxu0 %v5261_v34 }
0x172d   :  { %5474 = vmatpush1.msra.mxu0 %v5260_v23 }
0x172e   :  { %5475 = vmatprep.subr.mxu0 %v5257_v57  ;;  %v5591_v57 = vld [vmem:[#allocation8 + $0x7a0] sm:$0xff] }
0x172f   :  { %5476 = vmatpush1.msra.mxu0 %v5256_v16  ;;  %v5593_v16 = vld [vmem:[#allocation8 + $0x7b0] sm:$0xff] }
0x1730   :  { %5477 = vmatprep.subr.mxu0 %v5253_v20  ;;  %v5588_v20 = vld [vmem:[#allocation8 + $0x728] sm:$0xff] }
0x1731   :  { %5478 = vmatpush1.msra.mxu0 %v5252_v46  ;;  %v5590_v46 = vld [vmem:[#allocation8 + $0x738] sm:$0xff] }
0x1732   :  { %5479 = vmatprep.subr.mxu0 %v5249_v32  ;;  %v5587_v32 = vld [vmem:[#allocation8 + $0x720] sm:$0xff] }
0x1733   :  { %5480 = vmatpush1.msra.mxu0 %v5248_v60  ;;  %v5589_v60 = vld [vmem:[#allocation8 + $0x730] sm:$0xff] }
0x1734   :  { %5481 = vmatprep.subr.mxu0 %v5245_v13  ;;  %v5584_v13 = vld [vmem:[#allocation8 + $0x6a8] sm:$0xff] }
0x1735   :  { %5482 = vmatpush1.msra.mxu0 %v5244_v31  ;;  %v5586_v31 = vld [vmem:[#allocation8 + $0x6b8] sm:$0xff] }
0x1736   :  { %5483 = vmatprep.subr.mxu0 %v5241_v19  ;;  %v5583_v19 = vld [vmem:[#allocation8 + $0x6a0] sm:$0xff] }
0x1737   :  { %5484 = vmatpush1.msra.mxu0 %v5240_v42  ;;  %v5585_v42 = vld [vmem:[#allocation8 + $0x6b0] sm:$0xff] }
0x1738   :  { %5485 = vmatprep.subr.mxu0 %v5237_v21  ;;  %v5580_v21 = vld [vmem:[#allocation8 + $0x628] sm:$0xff] }
0x1739   :  { %5486 = vmatpush1.msra.mxu0 %v5236_v4  ;;  %v5582_v4 = vld [vmem:[#allocation8 + $0x638] sm:$0xff] }
0x173a   :  { %5487 = vmatprep.subr.mxu0 %v5361_v7  ;;  %v5579_v7 = vld [vmem:[#allocation8 + $0x620] sm:$0xff] }
0x173b   :  { %5488 = vmatpush2.msra.mxu0 %v5360_v55  ;;  %v5581_v55 = vld [vmem:[#allocation8 + $0x630] sm:$0xff] }
0x173c   :  { %5489 = vmatprep.subr.mxu0 %v5357_v18  ;;  %v5576_v18 = vld [vmem:[#allocation8 + $0x5a8] sm:$0xff] }
0x173d   :  { %5490 = vmatpush2.msra.mxu0 %v5356_v54  ;;  %v5578_v54 = vld [vmem:[#allocation8 + $0x5b8] sm:$0xff] }
0x173e   :  { %5491 = vmatprep.subr.mxu0 %v5353_v58  ;;  %v5575_v58 = vld [vmem:[#allocation8 + $0x5a0] sm:$0xff] }
0x173f   :  { %5492 = vmatpush2.msra.mxu0 %v5352_v22  ;;  %v5577_v22 = vld [vmem:[#allocation8 + $0x5b0] sm:$0xff] }
0x1740   :  { %5493 = vmatprep.subr.mxu0 %v5349_v3  ;;  %v5572_v3 = vld [vmem:[#allocation8 + $0x528] sm:$0xff] }
0x1741   :  { %5494 = vmatpush2.msra.mxu0 %v5348_v51  ;;  %v5574_v51 = vld [vmem:[#allocation8 + $0x538] sm:$0xff] }
0x1742   :  { %5495 = vmatprep.subr.mxu0 %v5345_v28  ;;  %v5571_v28 = vld [vmem:[#allocation8 + $0x520] sm:$0xff] }
0x1743   :  { %5496 = vmatpush2.msra.mxu0 %v5344_v40  ;;  %v5573_v40 = vld [vmem:[#allocation8 + $0x530] sm:$0xff] }
0x1744   :  { %5497 = vmatprep.subr.mxu0 %v5341_v9  ;;  %v5568_v9 = vld [vmem:[#allocation8 + $0x4a8] sm:$0xff] }
0x1745   :  { %5498 = vmatpush2.msra.mxu0 %v5340_v0  ;;  %v5570_v0 = vld [vmem:[#allocation8 + $0x4b8] sm:$0xff] }
0x1746   :  { %5499 = vmatprep.subr.mxu0 %v5337_v41  ;;  %v5567_v41 = vld [vmem:[#allocation8 + $0x4a0] sm:$0xff] }
0x1747   :  { %5500 = vmatpush2.msra.mxu0 %v5336_v59  ;;  %v5569_v59 = vld [vmem:[#allocation8 + $0x4b0] sm:$0xff] }
0x1748   :  { %5501 = vmatprep.subr.mxu0 %v5333_v29  ;;  %v5564_v29 = vld [vmem:[#allocation8 + $0x428] sm:$0xff] }
0x1749   :  { %5502 = vmatpush2.msra.mxu0 %v5332_v52  ;;  %v5566_v52 = vld [vmem:[#allocation8 + $0x438] sm:$0xff] }
0x174a   :  { %5503 = vmatprep.subr.mxu0 %v5329_v27  ;;  %v5563_v27 = vld [vmem:[#allocation8 + $0x420] sm:$0xff] }
0x174b   :  { %5504 = vmatpush2.msra.mxu0 %v5328_v35  ;;  %v5565_v35 = vld [vmem:[#allocation8 + $0x430] sm:$0xff] }
0x174c   :  { %5505 = vmatprep.subr.mxu0 %v5325_v45  ;;  %v5560_v45 = vld [vmem:[#allocation8 + $0x3a8] sm:$0xff] }
0x174d   :  { %5506 = vmatpush2.msra.mxu0 %v5324_v12  ;;  %v5562_v12 = vld [vmem:[#allocation8 + $0x3b8] sm:$0xff] }
0x174e   :  { %5507 = vmatprep.subr.mxu0 %v5321_v48  ;;  %v5559_v48 = vld [vmem:[#allocation8 + $0x3a0] sm:$0xff] }
0x174f   :  { %5508 = vmatpush2.msra.mxu0 %v5320_v44  ;;  %v5561_v44 = vld [vmem:[#allocation8 + $0x3b0] sm:$0xff] }
0x1750   :  { %5509 = vmatprep.subr.mxu0 %v5317_v43  ;;  %v5556_v43 = vld [vmem:[#allocation8 + $0x328] sm:$0xff] }
0x1751   :  { %5510 = vmatpush2.msra.mxu0 %v5316_v56  ;;  %v5558_v56 = vld [vmem:[#allocation8 + $0x338] sm:$0xff] }
0x1752   :  { %5511 = vmatprep.subr.mxu0 %v5313_v10  ;;  %v5555_v10 = vld [vmem:[#allocation8 + $0x320] sm:$0xff] }
0x1753   :  { %5512 = vmatpush2.msra.mxu0 %v5312_v47  ;;  %v5552_v47 = vld [vmem:[#allocation8 + $0x2a8] sm:$0xff] }
0x1754   :  { %5513 = vmatprep.subr.mxu0 %v5309_v38  ;;  %v5551_v38 = vld [vmem:[#allocation8 + $0x2a0] sm:$0xff] }
0x1755   :  { %5514 = vmatpush2.msra.mxu0 %v5308_v49  ;;  %v5548_v49 = vld [vmem:[#allocation8 + $0x228] sm:$0xff] }
0x1756   :  { %5515 = vmatprep.subr.mxu0 %v5305_v33  ;;  %v5547_v33 = vld [vmem:[#allocation8 + $0x220] sm:$0xff] }
0x1757   :  { %5516 = vmatpush2.msra.mxu0 %v5304_v37  ;;  %v5544_v37 = vld [vmem:[#allocation8 + $0x1a8] sm:$0xff] }
0x1758   :  { %5517 = vmatprep.subr.mxu0 %v5301_v39  ;;  %v5543_v39 = vld [vmem:[#allocation8 + $0x1a0] sm:$0xff] }
0x1759   :  { %5518 = vmatpush2.msra.mxu0 %v5300_v63  ;;  %v5540_v63 = vld [vmem:[#allocation8 + $0x128] sm:$0xff] }
0x175a   :  { %5752 = vmatprep.subr.mxu0 %v5594_v15  ;;  %v5539_v15 = vld [vmem:[#allocation8 + $0x120] sm:$0xff] }
0x17da   :  { %v5227_v6 = vpop.f32.mrf.mxu0 }
0x17db   :  { %v5228_v36 = vadd.f32 %v5227_v6, %v5154_v25  ;;  %v5536_v25 = vld [vmem:[#allocation8 + $0xa8] sm:$0xff]  ;;  %v5535_v6 = vld [vmem:[#allocation8 + $0xa0] sm:$0xff] }
0x17dc   :  { %v5229_v62 = vpop.f32.mrf.mxu0 }
0x17dd   :  { %v5230_v2 = vadd.f32 %v5229_v62, %v5158_v50  ;;  %v8148_v23 = vmax.f32 %v5228_v36, 0.0  ;;  %v5538_v50 = vld [vmem:[#allocation8 + $0xb8] sm:$0xff]  ;;  %v5537_v36 = vld [vmem:[#allocation8 + $0xb0] sm:$0xff]  ;;  %v5532_v62 = vld [vmem:[#allocation8 + $0x28] sm:$0xff] }
0x17df   :  { %v8146_v34 = vmax.f32 %v5230_v2, 0.0  ;;  %v5534_v2 = vld [vmem:[#allocation8 + $0x38] sm:$0xff] }
0x17e1   :  { %5448 = vmatprep.mubr.f32.mxu1 %v8146_v34  ;;  %5519 = vmatprep.mubr.f32.mxu0 %v8146_v34 }
0x17e2   :  { %5449 = vmatmul.mubr.f32.vlgmr.msra.gmra.mxu1 %v8148_v23  ;;  %5520 = vmatmul.mubr.f32.vlgmr.msra.gmra.mxu0 %v8148_v23 }
0x17e3   :  { %5682 = vmatpush1.msra.mxu1 %v5591_v57  ;;  %5753 = vmatpush1.msra.mxu0 %v5593_v16  ;;  %v5531_v57 = vld [vmem:[#allocation8 + $0x20] sm:$0xff]  ;;  %v5533_v16 = vld [vmem:[#allocation8 + $0x30] sm:$0xff] }
0x17e4   :  { %5683 = vmatprep.subr.mxu1 %v5588_v20  ;;  %5745 = vmatprep.mubr.f32.mxu1 %v8146_v34  ;;  %v5656_v20 = vld [vmem:[#allocation8 + $0xfa8] sm:$0xff] }
0x17e5   :  { %5754 = vmatprep.subr.mxu0 %v5590_v46  ;;  %5816 = vmatprep.mubr.f32.mxu0 %v8146_v34  ;;  %v5658_v46 = vld [vmem:[#allocation8 + $0xfb8] sm:$0xff] }
0x17e6   :  { %5684 = vmatpush1.msra.mxu1 %v5587_v32  ;;  %5755 = vmatpush1.msra.mxu0 %v5589_v60  ;;  %v5655_v32 = vld [vmem:[#allocation8 + $0xfa0] sm:$0xff]  ;;  %v5657_v60 = vld [vmem:[#allocation8 + $0xfb0] sm:$0xff] }
0x17e7   :  { %5685 = vmatprep.subr.mxu1 %v5584_v13  ;;  %5756 = vmatprep.subr.mxu0 %v5586_v31  ;;  %v5652_v13 = vld [vmem:[#allocation8 + $0xf28] sm:$0xff]  ;;  %v5654_v31 = vld [vmem:[#allocation8 + $0xf38] sm:$0xff] }
0x17e8   :  { %5686 = vmatpush1.msra.mxu1 %v5583_v19  ;;  %5757 = vmatpush1.msra.mxu0 %v5585_v42  ;;  %v5651_v19 = vld [vmem:[#allocation8 + $0xf20] sm:$0xff]  ;;  %v5653_v42 = vld [vmem:[#allocation8 + $0xf30] sm:$0xff] }
0x17e9   :  { %5687 = vmatprep.subr.mxu1 %v5580_v21  ;;  %5758 = vmatprep.subr.mxu0 %v5582_v4  ;;  %v5648_v21 = vld [vmem:[#allocation8 + $0xea8] sm:$0xff]  ;;  %v5650_v4 = vld [vmem:[#allocation8 + $0xeb8] sm:$0xff] }
0x17ea   :  { %5688 = vmatpush1.msra.mxu1 %v5579_v7  ;;  %5759 = vmatpush1.msra.mxu0 %v5581_v55  ;;  %v5647_v7 = vld [vmem:[#allocation8 + $0xea0] sm:$0xff]  ;;  %v5649_v55 = vld [vmem:[#allocation8 + $0xeb0] sm:$0xff] }
0x17eb   :  { %5689 = vmatprep.subr.mxu1 %v5576_v18  ;;  %5760 = vmatprep.subr.mxu0 %v5578_v54  ;;  %v5644_v18 = vld [vmem:[#allocation8 + $0xe28] sm:$0xff]  ;;  %v5646_v54 = vld [vmem:[#allocation8 + $0xe38] sm:$0xff] }
0x17ec   :  { %5690 = vmatpush1.msra.mxu1 %v5575_v58  ;;  %5761 = vmatpush1.msra.mxu0 %v5577_v22  ;;  %v5643_v58 = vld [vmem:[#allocation8 + $0xe20] sm:$0xff]  ;;  %v5645_v22 = vld [vmem:[#allocation8 + $0xe30] sm:$0xff] }
0x17ed   :  { %5691 = vmatprep.subr.mxu1 %v5572_v3  ;;  %5762 = vmatprep.subr.mxu0 %v5574_v51  ;;  %v5640_v3 = vld [vmem:[#allocation8 + $0xda8] sm:$0xff]  ;;  %v5642_v51 = vld [vmem:[#allocation8 + $0xdb8] sm:$0xff] }
0x17ee   :  { %5692 = vmatpush1.msra.mxu1 %v5571_v28  ;;  %5763 = vmatpush1.msra.mxu0 %v5573_v40  ;;  %v5639_v28 = vld [vmem:[#allocation8 + $0xda0] sm:$0xff]  ;;  %v5641_v40 = vld [vmem:[#allocation8 + $0xdb0] sm:$0xff] }
0x17ef   :  { %5693 = vmatprep.subr.mxu1 %v5568_v9  ;;  %5764 = vmatprep.subr.mxu0 %v5570_v0  ;;  %v5636_v9 = vld [vmem:[#allocation8 + $0xd28] sm:$0xff]  ;;  %v5638_v0 = vld [vmem:[#allocation8 + $0xd38] sm:$0xff] }
0x17f0   :  { %5694 = vmatpush1.msra.mxu1 %v5567_v41  ;;  %5765 = vmatpush1.msra.mxu0 %v5569_v59  ;;  %v5635_v41 = vld [vmem:[#allocation8 + $0xd20] sm:$0xff]  ;;  %v5637_v59 = vld [vmem:[#allocation8 + $0xd30] sm:$0xff] }
0x17f1   :  { %5695 = vmatprep.subr.mxu1 %v5564_v29  ;;  %5766 = vmatprep.subr.mxu0 %v5566_v52  ;;  %v5632_v29 = vld [vmem:[#allocation8 + $0xca8] sm:$0xff]  ;;  %v5634_v52 = vld [vmem:[#allocation8 + $0xcb8] sm:$0xff] }
0x17f2   :  { %5696 = vmatpush1.msra.mxu1 %v5563_v27  ;;  %5767 = vmatpush1.msra.mxu0 %v5565_v35  ;;  %v5631_v27 = vld [vmem:[#allocation8 + $0xca0] sm:$0xff]  ;;  %v5633_v35 = vld [vmem:[#allocation8 + $0xcb0] sm:$0xff] }
0x17f3   :  { %5697 = vmatprep.subr.mxu1 %v5560_v45  ;;  %5768 = vmatprep.subr.mxu0 %v5562_v12  ;;  %v5628_v45 = vld [vmem:[#allocation8 + $0xc28] sm:$0xff]  ;;  %v5630_v12 = vld [vmem:[#allocation8 + $0xc38] sm:$0xff] }
0x17f4   :  { %5698 = vmatpush1.msra.mxu1 %v5559_v48  ;;  %5769 = vmatpush1.msra.mxu0 %v5561_v44  ;;  %v5627_v48 = vld [vmem:[#allocation8 + $0xc20] sm:$0xff]  ;;  %v5629_v44 = vld [vmem:[#allocation8 + $0xc30] sm:$0xff] }
0x17f5   :  { %5699 = vmatprep.subr.mxu1 %v5556_v43  ;;  %5770 = vmatprep.subr.mxu0 %v5558_v56  ;;  %v5624_v43 = vld [vmem:[#allocation8 + $0xba8] sm:$0xff]  ;;  %v5626_v56 = vld [vmem:[#allocation8 + $0xbb8] sm:$0xff] }
0x17f6   :  { %5700 = vmatpush1.msra.mxu1 %v5555_v10  ;;  %5771 = vmatpush1.msra.mxu0 %v5557_v1  ;;  %v5623_v10 = vld [vmem:[#allocation8 + $0xba0] sm:$0xff]  ;;  %v5625_v1 = vld [vmem:[#allocation8 + $0xbb0] sm:$0xff] }
0x17f7   :  { %5701 = vmatprep.subr.mxu1 %v5552_v47  ;;  %5772 = vmatprep.subr.mxu0 %v5554_v53  ;;  %v5620_v47 = vld [vmem:[#allocation8 + $0xb28] sm:$0xff]  ;;  %v5622_v53 = vld [vmem:[#allocation8 + $0xb38] sm:$0xff] }
0x17f8   :  { %5702 = vmatpush1.msra.mxu1 %v5551_v38  ;;  %5773 = vmatpush1.msra.mxu0 %v5553_v11  ;;  %v5619_v38 = vld [vmem:[#allocation8 + $0xb20] sm:$0xff]  ;;  %v5621_v11 = vld [vmem:[#allocation8 + $0xb30] sm:$0xff] }
0x17f9   :  { %5703 = vmatprep.subr.mxu1 %v5548_v49  ;;  %5774 = vmatprep.subr.mxu0 %v5550_v24  ;;  %v5616_v49 = vld [vmem:[#allocation8 + $0xaa8] sm:$0xff]  ;;  %v5618_v24 = vld [vmem:[#allocation8 + $0xab8] sm:$0xff] }
0x17fa   :  { %5704 = vmatpush1.msra.mxu1 %v5547_v33  ;;  %5775 = vmatpush1.msra.mxu0 %v5549_v30  ;;  %v5615_v33 = vld [vmem:[#allocation8 + $0xaa0] sm:$0xff]  ;;  %v5617_v30 = vld [vmem:[#allocation8 + $0xab0] sm:$0xff] }
0x17fb   :  { %5705 = vmatprep.subr.mxu1 %v5544_v37  ;;  %5776 = vmatprep.subr.mxu0 %v5546_v14  ;;  %v5612_v37 = vld [vmem:[#allocation8 + $0xa28] sm:$0xff]  ;;  %v5614_v14 = vld [vmem:[#allocation8 + $0xa38] sm:$0xff] }
0x17fc   :  { %5706 = vmatpush1.msra.mxu1 %v5543_v39  ;;  %5777 = vmatpush1.msra.mxu0 %v5545_v5  ;;  %v5611_v39 = vld [vmem:[#allocation8 + $0xa20] sm:$0xff]  ;;  %v5613_v5 = vld [vmem:[#allocation8 + $0xa30] sm:$0xff] }
0x17fd   :  { %5707 = vmatprep.subr.mxu1 %v5540_v63  ;;  %5778 = vmatprep.subr.mxu0 %v5542_v26  ;;  %v5608_v63 = vld [vmem:[#allocation8 + $0x9a8] sm:$0xff]  ;;  %v5610_v26 = vld [vmem:[#allocation8 + $0x9b8] sm:$0xff] }
0x17fe   :  { %5708 = vmatpush1.msra.mxu1 %v5539_v15  ;;  %5779 = vmatpush1.msra.mxu0 %v5541_v8  ;;  %v5607_v15 = vld [vmem:[#allocation8 + $0x9a0] sm:$0xff]  ;;  %v5609_v8 = vld [vmem:[#allocation8 + $0x9b0] sm:$0xff] }
0x17ff   :  { %5709 = vmatprep.subr.mxu1 %v5536_v25  ;;  %5780 = vmatprep.subr.mxu0 %v5538_v50  ;;  %v5604_v25 = vld [vmem:[#allocation8 + $0x928] sm:$0xff]  ;;  %v5606_v50 = vld [vmem:[#allocation8 + $0x938] sm:$0xff] }
0x1800   :  { %5710 = vmatpush1.msra.mxu1 %v5535_v6  ;;  %5781 = vmatpush1.msra.mxu0 %v5537_v36  ;;  %v5603_v6 = vld [vmem:[#allocation8 + $0x920] sm:$0xff]  ;;  %v5605_v36 = vld [vmem:[#allocation8 + $0x930] sm:$0xff] }
0x1801   :  { %5711 = vmatprep.subr.mxu1 %v5532_v62  ;;  %5782 = vmatprep.subr.mxu0 %v5534_v2  ;;  %v5600_v62 = vld [vmem:[#allocation8 + $0x8a8] sm:$0xff]  ;;  %v5602_v2 = vld [vmem:[#allocation8 + $0x8b8] sm:$0xff] }
0x1802   :  { %5712 = vmatpush1.msra.mxu1 %v5531_v57  ;;  %5783 = vmatpush1.msra.mxu0 %v5533_v16  ;;  %v5599_v57 = vld [vmem:[#allocation8 + $0x8a0] sm:$0xff]  ;;  %v5601_v16 = vld [vmem:[#allocation8 + $0x8b0] sm:$0xff] }
0x1803   :  { %5713 = vmatprep.subr.mxu1 %v5656_v20  ;;  %5784 = vmatprep.subr.mxu0 %v5658_v46  ;;  %v5596_v20 = vld [vmem:[#allocation8 + $0x828] sm:$0xff]  ;;  %v5598_v46 = vld [vmem:[#allocation8 + $0x838] sm:$0xff] }
0x1804   :  { %5714 = vmatpush2.msra.mxu1 %v5655_v32  ;;  %5785 = vmatpush2.msra.mxu0 %v5657_v60  ;;  %v5595_v32 = vld [vmem:[#allocation8 + $0x820] sm:$0xff]  ;;  %v5597_v60 = vld [vmem:[#allocation8 + $0x830] sm:$0xff] }
0x1805   :  { %5715 = vmatprep.subr.mxu1 %v5652_v13  ;;  %5786 = vmatprep.subr.mxu0 %v5654_v31  ;;  %v5888_v13 = vld [vmem:[#allocation8 + $0x7c8] sm:$0xff]  ;;  %v5890_v31 = vld [vmem:[#allocation8 + $0x7d8] sm:$0xff] }
0x1806   :  { %5716 = vmatpush2.msra.mxu1 %v5651_v19  ;;  %5787 = vmatpush2.msra.mxu0 %v5653_v42  ;;  %v5887_v19 = vld [vmem:[#allocation8 + $0x7c0] sm:$0xff]  ;;  %v5889_v42 = vld [vmem:[#allocation8 + $0x7d0] sm:$0xff] }
0x1807   :  { %5717 = vmatprep.subr.mxu1 %v5648_v21  ;;  %5788 = vmatprep.subr.mxu0 %v5650_v4  ;;  %v5884_v21 = vld [vmem:[#allocation8 + $0x748] sm:$0xff]  ;;  %v5886_v4 = vld [vmem:[#allocation8 + $0x758] sm:$0xff] }
0x1808   :  { %5718 = vmatpush2.msra.mxu1 %v5647_v7  ;;  %5789 = vmatpush2.msra.mxu0 %v5649_v55  ;;  %v5883_v7 = vld [vmem:[#allocation8 + $0x740] sm:$0xff]  ;;  %v5885_v55 = vld [vmem:[#allocation8 + $0x750] sm:$0xff] }
0x1809   :  { %5719 = vmatprep.subr.mxu1 %v5644_v18  ;;  %5790 = vmatprep.subr.mxu0 %v5646_v54  ;;  %v5880_v18 = vld [vmem:[#allocation8 + $0x6c8] sm:$0xff]  ;;  %v5882_v54 = vld [vmem:[#allocation8 + $0x6d8] sm:$0xff] }
0x180a   :  { %5720 = vmatpush2.msra.mxu1 %v5643_v58  ;;  %5791 = vmatpush2.msra.mxu0 %v5645_v22  ;;  %v5879_v58 = vld [vmem:[#allocation8 + $0x6c0] sm:$0xff]  ;;  %v5881_v22 = vld [vmem:[#allocation8 + $0x6d0] sm:$0xff] }
0x180b   :  { %5721 = vmatprep.subr.mxu1 %v5640_v3  ;;  %5792 = vmatprep.subr.mxu0 %v5642_v51  ;;  %v5876_v3 = vld [vmem:[#allocation8 + $0x648] sm:$0xff]  ;;  %v5878_v51 = vld [vmem:[#allocation8 + $0x658] sm:$0xff] }
0x180c   :  { %5722 = vmatpush2.msra.mxu1 %v5639_v28  ;;  %5793 = vmatpush2.msra.mxu0 %v5641_v40  ;;  %v5875_v28 = vld [vmem:[#allocation8 + $0x640] sm:$0xff]  ;;  %v5877_v40 = vld [vmem:[#allocation8 + $0x650] sm:$0xff] }
0x180d   :  { %5723 = vmatprep.subr.mxu1 %v5636_v9  ;;  %5794 = vmatprep.subr.mxu0 %v5638_v0  ;;  %v5872_v9 = vld [vmem:[#allocation8 + $0x5c8] sm:$0xff]  ;;  %v5874_v0 = vld [vmem:[#allocation8 + $0x5d8] sm:$0xff] }
0x180e   :  { %5724 = vmatpush2.msra.mxu1 %v5635_v41  ;;  %5795 = vmatpush2.msra.mxu0 %v5637_v59  ;;  %v5871_v41 = vld [vmem:[#allocation8 + $0x5c0] sm:$0xff]  ;;  %v5873_v59 = vld [vmem:[#allocation8 + $0x5d0] sm:$0xff] }
0x180f   :  { %5725 = vmatprep.subr.mxu1 %v5632_v29  ;;  %5796 = vmatprep.subr.mxu0 %v5634_v52  ;;  %v5868_v29 = vld [vmem:[#allocation8 + $0x548] sm:$0xff]  ;;  %v5870_v52 = vld [vmem:[#allocation8 + $0x558] sm:$0xff] }
0x1810   :  { %5726 = vmatpush2.msra.mxu1 %v5631_v27  ;;  %5797 = vmatpush2.msra.mxu0 %v5633_v35  ;;  %v5867_v27 = vld [vmem:[#allocation8 + $0x540] sm:$0xff]  ;;  %v5869_v35 = vld [vmem:[#allocation8 + $0x550] sm:$0xff] }
0x1811   :  { %5727 = vmatprep.subr.mxu1 %v5628_v45  ;;  %5798 = vmatprep.subr.mxu0 %v5630_v12  ;;  %v5864_v45 = vld [vmem:[#allocation8 + $0x4c8] sm:$0xff]  ;;  %v5866_v12 = vld [vmem:[#allocation8 + $0x4d8] sm:$0xff] }
0x1812   :  { %5728 = vmatpush2.msra.mxu1 %v5627_v48  ;;  %5799 = vmatpush2.msra.mxu0 %v5629_v44  ;;  %v5863_v48 = vld [vmem:[#allocation8 + $0x4c0] sm:$0xff]  ;;  %v5865_v44 = vld [vmem:[#allocation8 + $0x4d0] sm:$0xff] }
0x1813   :  { %5729 = vmatprep.subr.mxu1 %v5624_v43  ;;  %5800 = vmatprep.subr.mxu0 %v5626_v56  ;;  %v5860_v43 = vld [vmem:[#allocation8 + $0x448] sm:$0xff]  ;;  %v5862_v56 = vld [vmem:[#allocation8 + $0x458] sm:$0xff] }
0x1814   :  { %5730 = vmatpush2.msra.mxu1 %v5623_v10  ;;  %5801 = vmatpush2.msra.mxu0 %v5625_v1  ;;  %v5859_v10 = vld [vmem:[#allocation8 + $0x440] sm:$0xff]  ;;  %v5861_v1 = vld [vmem:[#allocation8 + $0x450] sm:$0xff] }
0x1815   :  { %5731 = vmatprep.subr.mxu1 %v5620_v47  ;;  %5802 = vmatprep.subr.mxu0 %v5622_v53  ;;  %v5856_v47 = vld [vmem:[#allocation8 + $0x3c8] sm:$0xff]  ;;  %v5858_v53 = vld [vmem:[#allocation8 + $0x3d8] sm:$0xff] }
0x1816   :  { %5732 = vmatpush2.msra.mxu1 %v5619_v38  ;;  %5803 = vmatpush2.msra.mxu0 %v5621_v11  ;;  %v5855_v38 = vld [vmem:[#allocation8 + $0x3c0] sm:$0xff]  ;;  %v5857_v11 = vld [vmem:[#allocation8 + $0x3d0] sm:$0xff] }
0x1817   :  { %5733 = vmatprep.subr.mxu1 %v5616_v49  ;;  %5804 = vmatprep.subr.mxu0 %v5618_v24  ;;  %v5852_v49 = vld [vmem:[#allocation8 + $0x348] sm:$0xff]  ;;  %v5854_v24 = vld [vmem:[#allocation8 + $0x358] sm:$0xff] }
0x1818   :  { %5734 = vmatpush2.msra.mxu1 %v5615_v33  ;;  %5805 = vmatpush2.msra.mxu0 %v5617_v30  ;;  %v5851_v33 = vld [vmem:[#allocation8 + $0x340] sm:$0xff]  ;;  %v5853_v30 = vld [vmem:[#allocation8 + $0x350] sm:$0xff] }
0x1819   :  { %5735 = vmatprep.subr.mxu1 %v5612_v37  ;;  %5806 = vmatprep.subr.mxu0 %v5614_v14  ;;  %v5848_v37 = vld [vmem:[#allocation8 + $0x2c8] sm:$0xff]  ;;  %v5850_v14 = vld [vmem:[#allocation8 + $0x2d8] sm:$0xff] }
0x181a   :  { %5736 = vmatpush2.msra.mxu1 %v5611_v39  ;;  %5807 = vmatpush2.msra.mxu0 %v5613_v5  ;;  %v5847_v39 = vld [vmem:[#allocation8 + $0x2c0] sm:$0xff]  ;;  %v5849_v5 = vld [vmem:[#allocation8 + $0x2d0] sm:$0xff] }
0x181b   :  { %5737 = vmatprep.subr.mxu1 %v5608_v63  ;;  %5808 = vmatprep.subr.mxu0 %v5610_v26  ;;  %v5844_v63 = vld [vmem:[#allocation8 + $0x248] sm:$0xff]  ;;  %v5846_v26 = vld [vmem:[#allocation8 + $0x258] sm:$0xff] }
0x181c   :  { %5738 = vmatpush2.msra.mxu1 %v5607_v15  ;;  %5809 = vmatpush2.msra.mxu0 %v5609_v8  ;;  %v5843_v15 = vld [vmem:[#allocation8 + $0x240] sm:$0xff]  ;;  %v5845_v8 = vld [vmem:[#allocation8 + $0x250] sm:$0xff] }
0x181d   :  { %5739 = vmatprep.subr.mxu1 %v5604_v25  ;;  %5810 = vmatprep.subr.mxu0 %v5606_v50  ;;  %v5840_v25 = vld [vmem:[#allocation8 + $0x1c8] sm:$0xff]  ;;  %v5842_v50 = vld [vmem:[#allocation8 + $0x1d8] sm:$0xff] }
0x181e   :  { %5740 = vmatpush2.msra.mxu1 %v5603_v6  ;;  %5811 = vmatpush2.msra.mxu0 %v5605_v36  ;;  %v5839_v6 = vld [vmem:[#allocation8 + $0x1c0] sm:$0xff]  ;;  %v5841_v36 = vld [vmem:[#allocation8 + $0x1d0] sm:$0xff] }
0x181f   :  { %5741 = vmatprep.subr.mxu1 %v5600_v62  ;;  %5812 = vmatprep.subr.mxu0 %v5602_v2  ;;  %v5836_v62 = vld [vmem:[#allocation8 + $0x148] sm:$0xff]  ;;  %v5838_v2 = vld [vmem:[#allocation8 + $0x158] sm:$0xff] }
0x1820   :  { %5742 = vmatpush2.msra.mxu1 %v5599_v57  ;;  %5813 = vmatpush2.msra.mxu0 %v5601_v16  ;;  %v5835_v57 = vld [vmem:[#allocation8 + $0x140] sm:$0xff]  ;;  %v5837_v16 = vld [vmem:[#allocation8 + $0x150] sm:$0xff] }
0x1821   :  { %5743 = vmatprep.subr.mxu1 %v5596_v20  ;;  %5814 = vmatprep.subr.mxu0 %v5598_v46  ;;  %v5832_v20 = vld [vmem:[#allocation8 + $0xc8] sm:$0xff]  ;;  %v5834_v46 = vld [vmem:[#allocation8 + $0xd8] sm:$0xff] }
0x1822   :  { %5744 = vmatpush2.msra.mxu1 %v5595_v32  ;;  %5815 = vmatpush2.msra.mxu0 %v5597_v60  ;;  %v5831_v32 = vld [vmem:[#allocation8 + $0xc0] sm:$0xff]  ;;  %v5833_v60 = vld [vmem:[#allocation8 + $0xd0] sm:$0xff] }
0x1823   :  { %5746 = vmatmul.mubr.f32.vlgmr.msra.gmra.mxu1 %v8148_v23  ;;  %5817 = vmatmul.mubr.f32.vlgmr.msra.gmra.mxu0 %v8148_v23 }
0x1824   :  { %5977 = vmatprep.subr.mxu1 %v5888_v13  ;;  %6048 = vmatprep.subr.mxu0 %v5890_v31  ;;  %v5828_v13 = vld [vmem:[#allocation8 + $0x48] sm:$0xff]  ;;  %v5830_v31 = vld [vmem:[#allocation8 + $0x58] sm:$0xff] }
0x1825   :  { %5978 = vmatpush1.msra.mxu1 %v5887_v19  ;;  %6041 = vmatprep.mubr.f32.mxu1 %v8146_v34  ;;  %v5827_v19 = vld [vmem:[#allocation8 + $0x40] sm:$0xff] }
0x1826   :  { %6049 = vmatpush1.msra.mxu0 %v5889_v42  ;;  %6112 = vmatprep.mubr.f32.mxu0 %v8146_v34  ;;  %v5829_v42 = vld [vmem:[#allocation8 + $0x50] sm:$0xff] }
0x1827   :  { %5979 = vmatprep.subr.mxu1 %v5884_v21  ;;  %6050 = vmatprep.subr.mxu0 %v5886_v4  ;;  %v5952_v21 = vld [vmem:[#allocation8 + $0xfc8] sm:$0xff]  ;;  %v5954_v4 = vld [vmem:[#allocation8 + $0xfd8] sm:$0xff] }
0x1828   :  { %5980 = vmatpush1.msra.mxu1 %v5883_v7  ;;  %6051 = vmatpush1.msra.mxu0 %v5885_v55  ;;  %v5951_v7 = vld [vmem:[#allocation8 + $0xfc0] sm:$0xff]  ;;  %v5953_v55 = vld [vmem:[#allocation8 + $0xfd0] sm:$0xff] }
0x1829   :  { %5981 = vmatprep.subr.mxu1 %v5880_v18  ;;  %6052 = vmatprep.subr.mxu0 %v5882_v54  ;;  %v5948_v18 = vld [vmem:[#allocation8 + $0xf48] sm:$0xff]  ;;  %v5950_v54 = vld [vmem:[#allocation8 + $0xf58] sm:$0xff] }
0x182a   :  { %5982 = vmatpush1.msra.mxu1 %v5879_v58  ;;  %6053 = vmatpush1.msra.mxu0 %v5881_v22  ;;  %v5947_v58 = vld [vmem:[#allocation8 + $0xf40] sm:$0xff]  ;;  %v5949_v22 = vld [vmem:[#allocation8 + $0xf50] sm:$0xff] }
0x182b   :  { %5983 = vmatprep.subr.mxu1 %v5876_v3  ;;  %6054 = vmatprep.subr.mxu0 %v5878_v51  ;;  %v5944_v3 = vld [vmem:[#allocation8 + $0xec8] sm:$0xff]  ;;  %v5946_v51 = vld [vmem:[#allocation8 + $0xed8] sm:$0xff] }
0x182c   :  { %5984 = vmatpush1.msra.mxu1 %v5875_v28  ;;  %6055 = vmatpush1.msra.mxu0 %v5877_v40  ;;  %v5943_v28 = vld [vmem:[#allocation8 + $0xec0] sm:$0xff]  ;;  %v5945_v40 = vld [vmem:[#allocation8 + $0xed0] sm:$0xff] }
0x182d   :  { %5985 = vmatprep.subr.mxu1 %v5872_v9  ;;  %6056 = vmatprep.subr.mxu0 %v5874_v0  ;;  %v5940_v9 = vld [vmem:[#allocation8 + $0xe48] sm:$0xff]  ;;  %v5942_v0 = vld [vmem:[#allocation8 + $0xe58] sm:$0xff] }
0x182e   :  { %5986 = vmatpush1.msra.mxu1 %v5871_v41  ;;  %6057 = vmatpush1.msra.mxu0 %v5873_v59  ;;  %v5939_v41 = vld [vmem:[#allocation8 + $0xe40] sm:$0xff]  ;;  %v5941_v59 = vld [vmem:[#allocation8 + $0xe50] sm:$0xff] }
0x182f   :  { %5987 = vmatprep.subr.mxu1 %v5868_v29  ;;  %6058 = vmatprep.subr.mxu0 %v5870_v52  ;;  %v5936_v29 = vld [vmem:[#allocation8 + $0xdc8] sm:$0xff]  ;;  %v5938_v52 = vld [vmem:[#allocation8 + $0xdd8] sm:$0xff] }
0x1830   :  { %5988 = vmatpush1.msra.mxu1 %v5867_v27  ;;  %6059 = vmatpush1.msra.mxu0 %v5869_v35  ;;  %v5935_v27 = vld [vmem:[#allocation8 + $0xdc0] sm:$0xff]  ;;  %v5937_v35 = vld [vmem:[#allocation8 + $0xdd0] sm:$0xff] }
0x1831   :  { %5989 = vmatprep.subr.mxu1 %v5864_v45  ;;  %6060 = vmatprep.subr.mxu0 %v5866_v12  ;;  %v5932_v45 = vld [vmem:[#allocation8 + $0xd48] sm:$0xff]  ;;  %v5934_v12 = vld [vmem:[#allocation8 + $0xd58] sm:$0xff] }
0x1832   :  { %5990 = vmatpush1.msra.mxu1 %v5863_v48  ;;  %6061 = vmatpush1.msra.mxu0 %v5865_v44  ;;  %v5931_v48 = vld [vmem:[#allocation8 + $0xd40] sm:$0xff]  ;;  %v5933_v44 = vld [vmem:[#allocation8 + $0xd50] sm:$0xff] }
0x1833   :  { %5991 = vmatprep.subr.mxu1 %v5860_v43  ;;  %6062 = vmatprep.subr.mxu0 %v5862_v56  ;;  %v5928_v43 = vld [vmem:[#allocation8 + $0xcc8] sm:$0xff]  ;;  %v5930_v56 = vld [vmem:[#allocation8 + $0xcd8] sm:$0xff] }
0x1834   :  { %5992 = vmatpush1.msra.mxu1 %v5859_v10  ;;  %6063 = vmatpush1.msra.mxu0 %v5861_v1  ;;  %v5927_v10 = vld [vmem:[#allocation8 + $0xcc0] sm:$0xff]  ;;  %v5929_v1 = vld [vmem:[#allocation8 + $0xcd0] sm:$0xff] }
0x1835   :  { %5993 = vmatprep.subr.mxu1 %v5856_v47  ;;  %6064 = vmatprep.subr.mxu0 %v5858_v53  ;;  %v5924_v47 = vld [vmem:[#allocation8 + $0xc48] sm:$0xff]  ;;  %v5926_v53 = vld [vmem:[#allocation8 + $0xc58] sm:$0xff] }
0x1836   :  { %5994 = vmatpush1.msra.mxu1 %v5855_v38  ;;  %6065 = vmatpush1.msra.mxu0 %v5857_v11  ;;  %v5923_v38 = vld [vmem:[#allocation8 + $0xc40] sm:$0xff]  ;;  %v5925_v11 = vld [vmem:[#allocation8 + $0xc50] sm:$0xff] }
0x1837   :  { %5995 = vmatprep.subr.mxu1 %v5852_v49  ;;  %6066 = vmatprep.subr.mxu0 %v5854_v24  ;;  %v5920_v49 = vld [vmem:[#allocation8 + $0xbc8] sm:$0xff]  ;;  %v5922_v24 = vld [vmem:[#allocation8 + $0xbd8] sm:$0xff] }
0x1838   :  { %5996 = vmatpush1.msra.mxu1 %v5851_v33  ;;  %6067 = vmatpush1.msra.mxu0 %v5853_v30  ;;  %v5919_v33 = vld [vmem:[#allocation8 + $0xbc0] sm:$0xff]  ;;  %v5921_v30 = vld [vmem:[#allocation8 + $0xbd0] sm:$0xff] }
0x1839   :  { %5997 = vmatprep.subr.mxu1 %v5848_v37  ;;  %6068 = vmatprep.subr.mxu0 %v5850_v14  ;;  %v5916_v37 = vld [vmem:[#allocation8 + $0xb48] sm:$0xff]  ;;  %v5918_v14 = vld [vmem:[#allocation8 + $0xb58] sm:$0xff] }
0x183a   :  { %5998 = vmatpush1.msra.mxu1 %v5847_v39  ;;  %6069 = vmatpush1.msra.mxu0 %v5849_v5  ;;  %v5915_v39 = vld [vmem:[#allocation8 + $0xb40] sm:$0xff]  ;;  %v5917_v5 = vld [vmem:[#allocation8 + $0xb50] sm:$0xff] }
0x183b   :  { %5999 = vmatprep.subr.mxu1 %v5844_v63  ;;  %6070 = vmatprep.subr.mxu0 %v5846_v26  ;;  %v5912_v63 = vld [vmem:[#allocation8 + $0xac8] sm:$0xff]  ;;  %v5914_v26 = vld [vmem:[#allocation8 + $0xad8] sm:$0xff] }
0x183c   :  { %6000 = vmatpush1.msra.mxu1 %v5843_v15  ;;  %6071 = vmatpush1.msra.mxu0 %v5845_v8  ;;  %v5911_v15 = vld [vmem:[#allocation8 + $0xac0] sm:$0xff]  ;;  %v5913_v8 = vld [vmem:[#allocation8 + $0xad0] sm:$0xff] }
0x183d   :  { %6001 = vmatprep.subr.mxu1 %v5840_v25  ;;  %6072 = vmatprep.subr.mxu0 %v5842_v50  ;;  %v5908_v25 = vld [vmem:[#allocation8 + $0xa48] sm:$0xff]  ;;  %v5910_v50 = vld [vmem:[#allocation8 + $0xa58] sm:$0xff] }
0x183e   :  { %6002 = vmatpush1.msra.mxu1 %v5839_v6  ;;  %6073 = vmatpush1.msra.mxu0 %v5841_v36  ;;  %v5907_v6 = vld [vmem:[#allocation8 + $0xa40] sm:$0xff]  ;;  %v5909_v36 = vld [vmem:[#allocation8 + $0xa50] sm:$0xff] }
0x183f   :  { %6003 = vmatprep.subr.mxu1 %v5836_v62  ;;  %6074 = vmatprep.subr.mxu0 %v5838_v2  ;;  %v5904_v62 = vld [vmem:[#allocation8 + $0x9c8] sm:$0xff]  ;;  %v5906_v2 = vld [vmem:[#allocation8 + $0x9d8] sm:$0xff] }
0x1840   :  { %6004 = vmatpush1.msra.mxu1 %v5835_v57  ;;  %6075 = vmatpush1.msra.mxu0 %v5837_v16  ;;  %v5903_v57 = vld [vmem:[#allocation8 + $0x9c0] sm:$0xff]  ;;  %v5905_v16 = vld [vmem:[#allocation8 + $0x9d0] sm:$0xff] }
0x1841   :  { %6005 = vmatprep.subr.mxu1 %v5832_v20  ;;  %6076 = vmatprep.subr.mxu0 %v5834_v46  ;;  %v5900_v20 = vld [vmem:[#allocation8 + $0x948] sm:$0xff]  ;;  %v5902_v46 = vld [vmem:[#allocation8 + $0x958] sm:$0xff] }
0x1842   :  { %6006 = vmatpush1.msra.mxu1 %v5831_v32  ;;  %6077 = vmatpush1.msra.mxu0 %v5833_v60  ;;  %v5899_v32 = vld [vmem:[#allocation8 + $0x940] sm:$0xff]  ;;  %v5901_v60 = vld [vmem:[#allocation8 + $0x950] sm:$0xff] }
0x1843   :  { %6007 = vmatprep.subr.mxu1 %v5828_v13  ;;  %6078 = vmatprep.subr.mxu0 %v5830_v31  ;;  %v5896_v13 = vld [vmem:[#allocation8 + $0x8c8] sm:$0xff]  ;;  %v5898_v31 = vld [vmem:[#allocation8 + $0x8d8] sm:$0xff] }
0x1844   :  { %6008 = vmatpush1.msra.mxu1 %v5827_v19  ;;  %6079 = vmatpush1.msra.mxu0 %v5829_v42  ;;  %v5895_v19 = vld [vmem:[#allocation8 + $0x8c0] sm:$0xff]  ;;  %v5897_v42 = vld [vmem:[#allocation8 + $0x8d0] sm:$0xff] }
0x1845   :  { %6009 = vmatprep.subr.mxu1 %v5952_v21  ;;  %6080 = vmatprep.subr.mxu0 %v5954_v4  ;;  %v5892_v21 = vld [vmem:[#allocation8 + $0x848] sm:$0xff]  ;;  %v5894_v4 = vld [vmem:[#allocation8 + $0x858] sm:$0xff] }
0x1846   :  { %6010 = vmatpush2.msra.mxu1 %v5951_v7  ;;  %6081 = vmatpush2.msra.mxu0 %v5953_v55  ;;  %v5891_v7 = vld [vmem:[#allocation8 + $0x840] sm:$0xff]  ;;  %v5893_v55 = vld [vmem:[#allocation8 + $0x850] sm:$0xff] }
0x1847   :  { %6011 = vmatprep.subr.mxu1 %v5948_v18  ;;  %6082 = vmatprep.subr.mxu0 %v5950_v54  ;;  %v6184_v18 = vld [vmem:[#allocation8 + $0x7e8] sm:$0xff]  ;;  %v6186_v54 = vld [vmem:[#allocation8 + $0x7f8] sm:$0xff] }
0x1848   :  { %6012 = vmatpush2.msra.mxu1 %v5947_v58  ;;  %6083 = vmatpush2.msra.mxu0 %v5949_v22  ;;  %v6183_v58 = vld [vmem:[#allocation8 + $0x7e0] sm:$0xff]  ;;  %v6185_v22 = vld [vmem:[#allocation8 + $0x7f0] sm:$0xff] }
0x1849   :  { %6013 = vmatprep.subr.mxu1 %v5944_v3  ;;  %6084 = vmatprep.subr.mxu0 %v5946_v51  ;;  %v6180_v3 = vld [vmem:[#allocation8 + $0x768] sm:$0xff]  ;;  %v6182_v51 = vld [vmem:[#allocation8 + $0x778] sm:$0xff] }
0x184a   :  { %6014 = vmatpush2.msra.mxu1 %v5943_v28  ;;  %6085 = vmatpush2.msra.mxu0 %v5945_v40  ;;  %v6179_v28 = vld [vmem:[#allocation8 + $0x760] sm:$0xff]  ;;  %v6181_v40 = vld [vmem:[#allocation8 + $0x770] sm:$0xff] }
0x184b   :  { %6015 = vmatprep.subr.mxu1 %v5940_v9  ;;  %6086 = vmatprep.subr.mxu0 %v5942_v0  ;;  %v6176_v9 = vld [vmem:[#allocation8 + $0x6e8] sm:$0xff]  ;;  %v6178_v0 = vld [vmem:[#allocation8 + $0x6f8] sm:$0xff] }
0x184c   :  { %6016 = vmatpush2.msra.mxu1 %v5939_v41  ;;  %6087 = vmatpush2.msra.mxu0 %v5941_v59  ;;  %v6175_v41 = vld [vmem:[#allocation8 + $0x6e0] sm:$0xff]  ;;  %v6177_v59 = vld [vmem:[#allocation8 + $0x6f0] sm:$0xff] }
0x184d   :  { %6017 = vmatprep.subr.mxu1 %v5936_v29  ;;  %6088 = vmatprep.subr.mxu0 %v5938_v52  ;;  %v6172_v29 = vld [vmem:[#allocation8 + $0x668] sm:$0xff]  ;;  %v6174_v52 = vld [vmem:[#allocation8 + $0x678] sm:$0xff] }
0x184e   :  { %6018 = vmatpush2.msra.mxu1 %v5935_v27  ;;  %6089 = vmatpush2.msra.mxu0 %v5937_v35  ;;  %v6171_v27 = vld [vmem:[#allocation8 + $0x660] sm:$0xff]  ;;  %v6173_v35 = vld [vmem:[#allocation8 + $0x670] sm:$0xff] }
0x184f   :  { %6019 = vmatprep.subr.mxu1 %v5932_v45  ;;  %6090 = vmatprep.subr.mxu0 %v5934_v12  ;;  %v6168_v45 = vld [vmem:[#allocation8 + $0x5e8] sm:$0xff]  ;;  %v6170_v12 = vld [vmem:[#allocation8 + $0x5f8] sm:$0xff] }
0x1850   :  { %6020 = vmatpush2.msra.mxu1 %v5931_v48  ;;  %6091 = vmatpush2.msra.mxu0 %v5933_v44  ;;  %v6169_v48 = vld [vmem:[#allocation8 + $0x5f0] sm:$0xff]  ;;  %v6164_v44 = vld [vmem:[#allocation8 + $0x568] sm:$0xff] }
0x1851   :  { %6021 = vmatprep.subr.mxu1 %v5928_v43  ;;  %6092 = vmatprep.subr.mxu0 %v5930_v56  ;;  %v6166_v43 = vld [vmem:[#allocation8 + $0x578] sm:$0xff]  ;;  %v6163_v56 = vld [vmem:[#allocation8 + $0x560] sm:$0xff] }
0x1852   :  { %6022 = vmatpush2.msra.mxu1 %v5927_v10  ;;  %6093 = vmatpush2.msra.mxu0 %v5929_v1  ;;  %v6165_v10 = vld [vmem:[#allocation8 + $0x570] sm:$0xff]  ;;  %v6160_v1 = vld [vmem:[#allocation8 + $0x4e8] sm:$0xff] }
0x1853   :  { %6023 = vmatprep.subr.mxu1 %v5924_v47  ;;  %6094 = vmatprep.subr.mxu0 %v5926_v53  ;;  %v6162_v47 = vld [vmem:[#allocation8 + $0x4f8] sm:$0xff]  ;;  %v6159_v53 = vld [vmem:[#allocation8 + $0x4e0] sm:$0xff] }
0x1854   :  { %6024 = vmatpush2.msra.mxu1 %v5923_v38  ;;  %6095 = vmatpush2.msra.mxu0 %v5925_v11  ;;  %v6161_v38 = vld [vmem:[#allocation8 + $0x4f0] sm:$0xff]  ;;  %v6156_v11 = vld [vmem:[#allocation8 + $0x468] sm:$0xff] }
0x1855   :  { %6025 = vmatprep.subr.mxu1 %v5920_v49  ;;  %6096 = vmatprep.subr.mxu0 %v5922_v24  ;;  %v6158_v49 = vld [vmem:[#allocation8 + $0x478] sm:$0xff]  ;;  %v6155_v24 = vld [vmem:[#allocation8 + $0x460] sm:$0xff] }
0x1856   :  { %6026 = vmatpush2.msra.mxu1 %v5919_v33  ;;  %6097 = vmatpush2.msra.mxu0 %v5921_v30  ;;  %v6157_v33 = vld [vmem:[#allocation8 + $0x470] sm:$0xff]  ;;  %v6152_v30 = vld [vmem:[#allocation8 + $0x3e8] sm:$0xff] }
0x1857   :  { %6027 = vmatprep.subr.mxu1 %v5916_v37  ;;  %6098 = vmatprep.subr.mxu0 %v5918_v14  ;;  %v6154_v37 = vld [vmem:[#allocation8 + $0x3f8] sm:$0xff]  ;;  %v6151_v14 = vld [vmem:[#allocation8 + $0x3e0] sm:$0xff] }
0x1858   :  { %6028 = vmatpush2.msra.mxu1 %v5915_v39  ;;  %6099 = vmatpush2.msra.mxu0 %v5917_v5  ;;  %v6153_v39 = vld [vmem:[#allocation8 + $0x3f0] sm:$0xff]  ;;  %v6148_v5 = vld [vmem:[#allocation8 + $0x368] sm:$0xff] }
0x1859   :  { %6029 = vmatprep.subr.mxu1 %v5912_v63  ;;  %6100 = vmatprep.subr.mxu0 %v5914_v26  ;;  %v6150_v63 = vld [vmem:[#allocation8 + $0x378] sm:$0xff]  ;;  %v6147_v26 = vld [vmem:[#allocation8 + $0x360] sm:$0xff] }
0x185a   :  { %6030 = vmatpush2.msra.mxu1 %v5911_v15  ;;  %6101 = vmatpush2.msra.mxu0 %v5913_v8  ;;  %v6149_v15 = vld [vmem:[#allocation8 + $0x370] sm:$0xff]  ;;  %v6144_v8 = vld [vmem:[#allocation8 + $0x2e8] sm:$0xff] }
0x185b   :  { %6031 = vmatprep.subr.mxu1 %v5908_v25  ;;  %6102 = vmatprep.subr.mxu0 %v5910_v50  ;;  %v6146_v25 = vld [vmem:[#allocation8 + $0x2f8] sm:$0xff]  ;;  %v6143_v50 = vld [vmem:[#allocation8 + $0x2e0] sm:$0xff] }
0x185c   :  { %6032 = vmatpush2.msra.mxu1 %v5907_v6  ;;  %6103 = vmatpush2.msra.mxu0 %v5909_v36  ;;  %v6145_v6 = vld [vmem:[#allocation8 + $0x2f0] sm:$0xff]  ;;  %v6140_v36 = vld [vmem:[#allocation8 + $0x268] sm:$0xff] }
0x185d   :  { %6033 = vmatprep.subr.mxu1 %v5904_v62  ;;  %6104 = vmatprep.subr.mxu0 %v5906_v2  ;;  %v6142_v62 = vld [vmem:[#allocation8 + $0x278] sm:$0xff]  ;;  %v6139_v2 = vld [vmem:[#allocation8 + $0x260] sm:$0xff] }
0x185e   :  { %6034 = vmatpush2.msra.mxu1 %v5903_v57  ;;  %6105 = vmatpush2.msra.mxu0 %v5905_v16  ;;  %v6141_v57 = vld [vmem:[#allocation8 + $0x270] sm:$0xff]  ;;  %v6136_v16 = vld [vmem:[#allocation8 + $0x1e8] sm:$0xff] }
0x185f   :  { %6035 = vmatprep.subr.mxu1 %v5900_v20  ;;  %6106 = vmatprep.subr.mxu0 %v5902_v46  ;;  %v6138_v20 = vld [vmem:[#allocation8 + $0x1f8] sm:$0xff]  ;;  %v6135_v46 = vld [vmem:[#allocation8 + $0x1e0] sm:$0xff] }
0x1860   :  { %6036 = vmatpush2.msra.mxu1 %v5899_v32  ;;  %6107 = vmatpush2.msra.mxu0 %v5901_v60  ;;  %v6137_v32 = vld [vmem:[#allocation8 + $0x1f0] sm:$0xff]  ;;  %v6132_v60 = vld [vmem:[#allocation8 + $0x168] sm:$0xff] }
0x1861   :  { %6037 = vmatprep.subr.mxu1 %v5896_v13  ;;  %6108 = vmatprep.subr.mxu0 %v5898_v31  ;;  %v6134_v13 = vld [vmem:[#allocation8 + $0x178] sm:$0xff]  ;;  %v6131_v31 = vld [vmem:[#allocation8 + $0x160] sm:$0xff] }
0x1862   :  { %6038 = vmatpush2.msra.mxu1 %v5895_v19  ;;  %6109 = vmatpush2.msra.mxu0 %v5897_v42  ;;  %v6133_v19 = vld [vmem:[#allocation8 + $0x170] sm:$0xff]  ;;  %v6128_v42 = vld [vmem:[#allocation8 + $0xe8] sm:$0xff] }
0x1863   :  { %6039 = vmatprep.subr.mxu1 %v5892_v21  ;;  %6110 = vmatprep.subr.mxu0 %v5894_v4  ;;  %v6130_v21 = vld [vmem:[#allocation8 + $0xf8] sm:$0xff]  ;;  %v6127_v4 = vld [vmem:[#allocation8 + $0xe0] sm:$0xff] }
0x1864   :  { %6040 = vmatpush2.msra.mxu1 %v5891_v7  ;;  %6111 = vmatpush2.msra.mxu0 %v5893_v55  ;;  %v6129_v7 = vld [vmem:[#allocation8 + $0xf0] sm:$0xff]  ;;  %v6124_v55 = vld [vmem:[#allocation8 + $0x68] sm:$0xff] }
0x1865   :  { %6042 = vmatmul.mubr.f32.vlgmr.msra.gmra.mxu1 %v8148_v23  ;;  %6113 = vmatmul.mubr.f32.vlgmr.msra.gmra.mxu0 %v8148_v23 }
0x1866   :  { %6273 = vmatprep.subr.mxu1 %v6184_v18  ;;  %6344 = vmatprep.subr.mxu0 %v6186_v54  ;;  %v6126_v18 = vld [vmem:[#allocation8 + $0x78] sm:$0xff]  ;;  %v6123_v54 = vld [vmem:[#allocation8 + $0x60] sm:$0xff] }
0x1867   :  { %6274 = vmatpush1.msra.mxu1 %v6183_v58  ;;  %6337 = vmatprep.mubr.f32.mxu1 %v8146_v34  ;;  %v6125_v58 = vld [vmem:[#allocation8 + $0x70] sm:$0xff] }
0x1868   :  { %6345 = vmatpush1.msra.mxu0 %v6185_v22  ;;  %6408 = vmatprep.mubr.f32.mxu0 %v8146_v34  ;;  %v6167_v34 = vld [vmem:[#allocation8 + $0x5e0] sm:$0xff]  ;;  %v6248_v22 = vld [vmem:[#allocation8 + $0xfe8] sm:$0xff] }
0x1869   :  { %6275 = vmatprep.subr.mxu1 %v6180_v3  ;;  %6346 = vmatprep.subr.mxu0 %v6182_v51  ;;  %v6250_v3 = vld [vmem:[#allocation8 + $0xff8] sm:$0xff]  ;;  %v6247_v51 = vld [vmem:[#allocation8 + $0xfe0] sm:$0xff] }
0x186a   :  { %6276 = vmatpush1.msra.mxu1 %v6179_v28  ;;  %6347 = vmatpush1.msra.mxu0 %v6181_v40  ;;  %v6249_v28 = vld [vmem:[#allocation8 + $0xff0] sm:$0xff]  ;;  %v6244_v40 = vld [vmem:[#allocation8 + $0xf68] sm:$0xff] }
0x186b   :  { %6277 = vmatprep.subr.mxu1 %v6176_v9  ;;  %6348 = vmatprep.subr.mxu0 %v6178_v0  ;;  %v6246_v9 = vld [vmem:[#allocation8 + $0xf78] sm:$0xff]  ;;  %v6243_v0 = vld [vmem:[#allocation8 + $0xf60] sm:$0xff] }
0x186c   :  { %6278 = vmatpush1.msra.mxu1 %v6175_v41  ;;  %6349 = vmatpush1.msra.mxu0 %v6177_v59  ;;  %v6245_v41 = vld [vmem:[#allocation8 + $0xf70] sm:$0xff]  ;;  %v6240_v59 = vld [vmem:[#allocation8 + $0xee8] sm:$0xff] }
0x186d   :  { %6279 = vmatprep.subr.mxu1 %v6172_v29  ;;  %6350 = vmatprep.subr.mxu0 %v6174_v52  ;;  %v6242_v29 = vld [vmem:[#allocation8 + $0xef8] sm:$0xff]  ;;  %v6239_v52 = vld [vmem:[#allocation8 + $0xee0] sm:$0xff] }
0x186e   :  { %6280 = vmatpush1.msra.mxu1 %v6171_v27  ;;  %6351 = vmatpush1.msra.mxu0 %v6173_v35  ;;  %v6241_v27 = vld [vmem:[#allocation8 + $0xef0] sm:$0xff]  ;;  %v6236_v35 = vld [vmem:[#allocation8 + $0xe68] sm:$0xff] }
0x186f   :  { %6281 = vmatprep.subr.mxu1 %v6168_v45  ;;  %6352 = vmatprep.subr.mxu0 %v6170_v12  ;;  %v6238_v45 = vld [vmem:[#allocation8 + $0xe78] sm:$0xff]  ;;  %v6235_v12 = vld [vmem:[#allocation8 + $0xe60] sm:$0xff] }
0x1870   :  { %6282 = vmatpush1.msra.mxu1 %v6167_v34  ;;  %6353 = vmatpush1.msra.mxu0 %v6169_v48  ;;  %v6237_v34 = vld [vmem:[#allocation8 + $0xe70] sm:$0xff]  ;;  %v6232_v48 = vld [vmem:[#allocation8 + $0xde8] sm:$0xff] }
0x1871   :  { %6283 = vmatprep.subr.mxu1 %v6164_v44  ;;  %6354 = vmatprep.subr.mxu0 %v6166_v43  ;;  %v6234_v44 = vld [vmem:[#allocation8 + $0xdf8] sm:$0xff]  ;;  %v6231_v43 = vld [vmem:[#allocation8 + $0xde0] sm:$0xff] }
0x1872   :  { %6284 = vmatpush1.msra.mxu1 %v6163_v56  ;;  %6355 = vmatpush1.msra.mxu0 %v6165_v10  ;;  %v6233_v56 = vld [vmem:[#allocation8 + $0xdf0] sm:$0xff]  ;;  %v6228_v10 = vld [vmem:[#allocation8 + $0xd68] sm:$0xff] }
0x1873   :  { %6285 = vmatprep.subr.mxu1 %v6160_v1  ;;  %6356 = vmatprep.subr.mxu0 %v6162_v47  ;;  %v6230_v1 = vld [vmem:[#allocation8 + $0xd78] sm:$0xff]  ;;  %v6227_v47 = vld [vmem:[#allocation8 + $0xd60] sm:$0xff] }
0x1874   :  { %6286 = vmatpush1.msra.mxu1 %v6159_v53  ;;  %6357 = vmatpush1.msra.mxu0 %v6161_v38  ;;  %v6229_v53 = vld [vmem:[#allocation8 + $0xd70] sm:$0xff]  ;;  %v6224_v38 = vld [vmem:[#allocation8 + $0xce8] sm:$0xff] }
0x1875   :  { %6287 = vmatprep.subr.mxu1 %v6156_v11  ;;  %6358 = vmatprep.subr.mxu0 %v6158_v49  ;;  %v6226_v11 = vld [vmem:[#allocation8 + $0xcf8] sm:$0xff]  ;;  %v6223_v49 = vld [vmem:[#allocation8 + $0xce0] sm:$0xff] }
0x1876   :  { %6288 = vmatpush1.msra.mxu1 %v6155_v24  ;;  %6359 = vmatpush1.msra.mxu0 %v6157_v33  ;;  %v6225_v24 = vld [vmem:[#allocation8 + $0xcf0] sm:$0xff]  ;;  %v6220_v33 = vld [vmem:[#allocation8 + $0xc68] sm:$0xff] }
0x1877   :  { %6289 = vmatprep.subr.mxu1 %v6152_v30  ;;  %6360 = vmatprep.subr.mxu0 %v6154_v37  ;;  %v6222_v30 = vld [vmem:[#allocation8 + $0xc78] sm:$0xff]  ;;  %v6219_v37 = vld [vmem:[#allocation8 + $0xc60] sm:$0xff] }
0x1878   :  { %6290 = vmatpush1.msra.mxu1 %v6151_v14  ;;  %6361 = vmatpush1.msra.mxu0 %v6153_v39  ;;  %v6221_v14 = vld [vmem:[#allocation8 + $0xc70] sm:$0xff]  ;;  %v6216_v39 = vld [vmem:[#allocation8 + $0xbe8] sm:$0xff] }
0x1879   :  { %6291 = vmatprep.subr.mxu1 %v6148_v5  ;;  %6362 = vmatprep.subr.mxu0 %v6150_v63  ;;  %v6218_v5 = vld [vmem:[#allocation8 + $0xbf8] sm:$0xff]  ;;  %v6215_v63 = vld [vmem:[#allocation8 + $0xbe0] sm:$0xff] }
0x187a   :  { %6292 = vmatpush1.msra.mxu1 %v6147_v26  ;;  %6363 = vmatpush1.msra.mxu0 %v6149_v15  ;;  %v6217_v26 = vld [vmem:[#allocation8 + $0xbf0] sm:$0xff]  ;;  %v6212_v15 = vld [vmem:[#allocation8 + $0xb68] sm:$0xff] }
0x187b   :  { %6293 = vmatprep.subr.mxu1 %v6144_v8  ;;  %6364 = vmatprep.subr.mxu0 %v6146_v25  ;;  %v6214_v8 = vld [vmem:[#allocation8 + $0xb78] sm:$0xff]  ;;  %v6211_v25 = vld [vmem:[#allocation8 + $0xb60] sm:$0xff] }
0x187c   :  { %6294 = vmatpush1.msra.mxu1 %v6143_v50  ;;  %6365 = vmatpush1.msra.mxu0 %v6145_v6  ;;  %v6213_v50 = vld [vmem:[#allocation8 + $0xb70] sm:$0xff]  ;;  %v6208_v6 = vld [vmem:[#allocation8 + $0xae8] sm:$0xff] }
0x187d   :  { %6295 = vmatprep.subr.mxu1 %v6140_v36  ;;  %6366 = vmatprep.subr.mxu0 %v6142_v62  ;;  %v6210_v36 = vld [vmem:[#allocation8 + $0xaf8] sm:$0xff]  ;;  %v6207_v62 = vld [vmem:[#allocation8 + $0xae0] sm:$0xff] }
0x187e   :  { %6296 = vmatpush1.msra.mxu1 %v6139_v2  ;;  %6367 = vmatpush1.msra.mxu0 %v6141_v57  ;;  %v6209_v2 = vld [vmem:[#allocation8 + $0xaf0] sm:$0xff]  ;;  %v6204_v57 = vld [vmem:[#allocation8 + $0xa68] sm:$0xff] }
0x187f   :  { %6297 = vmatprep.subr.mxu1 %v6136_v16  ;;  %6368 = vmatprep.subr.mxu0 %v6138_v20  ;;  %v6206_v16 = vld [vmem:[#allocation8 + $0xa78] sm:$0xff]  ;;  %v6203_v20 = vld [vmem:[#allocation8 + $0xa60] sm:$0xff] }
0x1880   :  { %6298 = vmatpush1.msra.mxu1 %v6135_v46  ;;  %6369 = vmatpush1.msra.mxu0 %v6137_v32  ;;  %v6205_v46 = vld [vmem:[#allocation8 + $0xa70] sm:$0xff]  ;;  %v6200_v32 = vld [vmem:[#allocation8 + $0x9e8] sm:$0xff] }
0x1881   :  { %6299 = vmatprep.subr.mxu1 %v6132_v60  ;;  %6370 = vmatprep.subr.mxu0 %v6134_v13  ;;  %v6202_v60 = vld [vmem:[#allocation8 + $0x9f8] sm:$0xff]  ;;  %v5362_v13 = vld [vmem:[#allocation10] sm:$0xf] }
0x1882   :  { %6300 = vmatpush1.msra.mxu1 %v6131_v31  ;;  %6371 = vmatpush1.msra.mxu0 %v6133_v19  ;;  %v6199_v31 = vld [vmem:[#allocation8 + $0x9e0] sm:$0xff]  ;;  %v6201_v19 = vld [vmem:[#allocation8 + $0x9f0] sm:$0xff] }
0x1883   :  { %6301 = vmatprep.subr.mxu1 %v6128_v42  ;;  %6372 = vmatprep.subr.mxu0 %v6130_v21  ;;  %v6196_v42 = vld [vmem:[#allocation8 + $0x968] sm:$0xff]  ;;  %v6198_v21 = vld [vmem:[#allocation8 + $0x978] sm:$0xff] }
0x1884   :  { %6302 = vmatpush1.msra.mxu1 %v6127_v4  ;;  %6373 = vmatpush1.msra.mxu0 %v6129_v7  ;;  %v6195_v4 = vld [vmem:[#allocation8 + $0x960] sm:$0xff]  ;;  %v6197_v7 = vld [vmem:[#allocation8 + $0x970] sm:$0xff] }
0x1885   :  { %6303 = vmatprep.subr.mxu1 %v6124_v55  ;;  %6374 = vmatprep.subr.mxu0 %v6126_v18  ;;  %v5367_v55 = vrot.slane %v5362_v13, %v8226_v61  ;;  %v8228_v18 = vld [vmem:[#allocation16_spill] sm:$0xff] }
0x1886   :  { %6304 = vmatpush1.msra.mxu1 %v6123_v54  ;;  %6375 = vmatpush1.msra.mxu0 %v6125_v58  ;;  %v5375_v54 = vrot.slane %v5362_v13, %v8228_v18  ;;  %v6192_v58 = vld [vmem:[#allocation8 + $0x8e8] sm:$0xff] }
0x1887   :  { %6305 = vmatprep.subr.mxu1 %v6248_v22  ;;  %6376 = vmatprep.subr.mxu0 %v6250_v3  ;;  %v6194_v22 = vld [vmem:[#allocation8 + $0x8f8] sm:$0xff]  ;;  %v6191_v3 = vld [vmem:[#allocation8 + $0x8e0] sm:$0xff] }
0x1888   :  { %6306 = vmatpush2.msra.mxu1 %v6247_v51  ;;  %6377 = vmatpush2.msra.mxu0 %v6249_v28  ;;  %v6193_v51 = vld [vmem:[#allocation8 + $0x8f0] sm:$0xff]  ;;  %v5371_v28 = vrot.slane %v5362_v13, %v8227_v17 }
0x1889   :  { %6307 = vmatprep.subr.mxu1 %v6244_v40  ;;  %6378 = vmatprep.subr.mxu0 %v6246_v9  ;;  %v8229_v40 = vld [vmem:[#allocation19_spill] sm:$0xff] }
0x188a   :  { %6308 = vmatpush2.msra.mxu1 %v6243_v0  ;;  %6379 = vmatpush2.msra.mxu0 %v6245_v41  ;;  %v5379_v9 = vrot.slane %v5362_v13, %v8229_v40  ;;  %v6188_v0 = vld [vmem:[#allocation8 + $0x868] sm:$0xff]  ;;  %v6190_v41 = vld [vmem:[#allocation8 + $0x878] sm:$0xff] }
0x188b   :  { %6309 = vmatprep.subr.mxu1 %v6240_v59  ;;  %6380 = vmatprep.subr.mxu0 %v6242_v29 }
0x188c   :  { %6310 = vmatpush2.msra.mxu1 %v6239_v52  ;;  %6381 = vmatpush2.msra.mxu0 %v6241_v27  ;;  %v6187_v52 = vld [vmem:[#allocation8 + $0x860] sm:$0xff]  ;;  %v6189_v27 = vld [vmem:[#allocation8 + $0x870] sm:$0xff] }
0x188d   :  { %6311 = vmatprep.subr.mxu1 %v6236_v35  ;;  %6382 = vmatprep.subr.mxu0 %v6238_v45 }
0x188e   :  { %6312 = vmatpush2.msra.mxu1 %v6235_v12  ;;  %6383 = vmatpush2.msra.mxu0 %v6237_v34 }
0x188f   :  { %6313 = vmatprep.subr.mxu1 %v6232_v48  ;;  %6384 = vmatprep.subr.mxu0 %v6234_v44 }
0x1890   :  { %6314 = vmatpush2.msra.mxu1 %v6231_v43  ;;  %6385 = vmatpush2.msra.mxu0 %v6233_v56  ;;  %v5659_v43 = vld [vmem:[#allocation10 + $0x4] sm:$0xf] }
0x1891   :  { %6315 = vmatprep.subr.mxu1 %v6228_v10  ;;  %6386 = vmatprep.subr.mxu0 %v6230_v1  ;;  %v5664_v56 = vrot.slane %v5659_v43, %v8226_v61  ;;  %v5672_v10 = vrot.slane %v5659_v43, %v8228_v18  ;;  %v5668_v1 = vrot.slane %v5659_v43, %v8227_v17 }
0x1892   :  { %6316 = vmatpush2.msra.mxu1 %v6227_v47  ;;  %6387 = vmatpush2.msra.mxu0 %v6229_v53  ;;  %v5676_v47 = vrot.slane %v5659_v43, %v8229_v40 }
0x1893   :  { %6317 = vmatprep.subr.mxu1 %v6224_v38  ;;  %6388 = vmatprep.subr.mxu0 %v6226_v11 }
0x1894   :  { %6318 = vmatpush2.msra.mxu1 %v6223_v49  ;;  %6389 = vmatpush2.msra.mxu0 %v6225_v24 }
0x1895   :  { %6319 = vmatprep.subr.mxu1 %v6220_v33  ;;  %6390 = vmatprep.subr.mxu0 %v6222_v30 }
0x1896   :  { %6320 = vmatpush2.msra.mxu1 %v6219_v37  ;;  %6391 = vmatpush2.msra.mxu0 %v6221_v14  ;;  %v5955_v37 = vld [vmem:[#allocation10 + $0x8] sm:$0xf] }
0x1897   :  { %6321 = vmatprep.subr.mxu1 %v6216_v39  ;;  %6392 = vmatprep.subr.mxu0 %v6218_v5  ;;  %v5960_v14 = vrot.slane %v5955_v37, %v8226_v61  ;;  %v5968_v39 = vrot.slane %v5955_v37, %v8228_v18  ;;  %v5964_v5 = vrot.slane %v5955_v37, %v8227_v17 }
0x1898   :  { %6322 = vmatpush2.msra.mxu1 %v6215_v63  ;;  %6393 = vmatpush2.msra.mxu0 %v6217_v26  ;;  %v5972_v63 = vrot.slane %v5955_v37, %v8229_v40 }
0x1899   :  { %6323 = vmatprep.subr.mxu1 %v6212_v15  ;;  %6394 = vmatprep.subr.mxu0 %v6214_v8 }
0x189a   :  { %6324 = vmatpush2.msra.mxu1 %v6211_v25  ;;  %6395 = vmatpush2.msra.mxu0 %v6213_v50 }
0x189b   :  { %6325 = vmatprep.subr.mxu1 %v6208_v6  ;;  %6396 = vmatprep.subr.mxu0 %v6210_v36 }
0x189c   :  { %6326 = vmatpush2.msra.mxu1 %v6207_v62  ;;  %6397 = vmatpush2.msra.mxu0 %v6209_v2  ;;  %v6251_v2 = vld [vmem:[#allocation10 + $0xc] sm:$0xf] }
0x189d   :  { %6327 = vmatprep.subr.mxu1 %v6204_v57  ;;  %6398 = vmatprep.subr.mxu0 %v6206_v16  ;;  %v6256_v57 = vrot.slane %v6251_v2, %v8226_v61  ;;  %v6264_v16 = vrot.slane %v6251_v2, %v8228_v18 }
0x189e   :  { %6328 = vmatpush2.msra.mxu1 %v6203_v20  ;;  %6399 = vmatpush2.msra.mxu0 %v6205_v46  ;;  %v6260_v20 = vrot.slane %v6251_v2, %v8227_v17  ;;  %v6268_v46 = vrot.slane %v6251_v2, %v8229_v40 }
0x189f   :  { %6329 = vmatprep.subr.mxu1 %v6200_v32  ;;  %6400 = vmatprep.subr.mxu0 %v6202_v60 }
0x18a0   :  { %6330 = vmatpush2.msra.mxu1 %v6199_v31  ;;  %6401 = vmatpush2.msra.mxu0 %v6201_v19 }
0x18a1   :  { %6331 = vmatprep.subr.mxu1 %v6196_v42  ;;  %6402 = vmatprep.subr.mxu0 %v6198_v21 }
0x18a2   :  { %6332 = vmatpush2.msra.mxu1 %v6195_v4  ;;  %6403 = vmatpush2.msra.mxu0 %v6197_v7  ;;  %v5450_v59 = vpop.f32.mrf.mxu1  ;;  %v5521_v29 = vpop.f32.mrf.mxu0 }
0x18a3   :  { %6333 = vmatprep.subr.mxu1 %v6192_v58  ;;  %6404 = vmatprep.subr.mxu0 %v6194_v22  ;;  %v5451_v35 = vadd.f32 %v5450_v59, %v5367_v55  ;;  %v5522_v45 = vadd.f32 %v5521_v29, %v5375_v54 }
0x18a4   :  { %6334 = vmatpush2.msra.mxu1 %v6191_v3  ;;  %6405 = vmatpush2.msra.mxu0 %v6193_v51  ;;  %v5452_v12 = vpop.f32.mrf.mxu1  ;;  %v5523_v34 = vpop.f32.mrf.mxu0 }
0x18a5   :  { %6335 = vmatprep.subr.mxu1 %v6188_v0  ;;  %6406 = vmatprep.subr.mxu0 %v6190_v41  ;;  %5527 = vst [vmem:[#allocation11 + $0x80] sm:$0xff] %v5451_v35  ;;  %5529 = vst [vmem:[#allocation11 + $0x90] sm:$0xff] %v5522_v45  ;;  %v5453_v48 = vadd.f32 %v5452_v12, %v5371_v28  ;;  %v5524_v44 = vadd.f32 %v5523_v34, %v5379_v9 }
0x18a6   :  { %6336 = vmatpush2.msra.mxu1 %v6187_v52  ;;  %6407 = vmatpush2.msra.mxu0 %v6189_v27 }
0x18a7   :  { %6338 = vmatmul.mubr.f32.vlgmr.msra.gmra.mxu1 %v8148_v23  ;;  %6409 = vmatmul.mubr.f32.vlgmr.msra.gmra.mxu0 %v8148_v23  ;;  %5528 = vst [vmem:[#allocation11 + $0x88] sm:$0xff] %v5453_v48  ;;  %5530 = vst [vmem:[#allocation11 + $0x98] sm:$0xff] %v5524_v44 }
0x18e3   :  { %v5747_v53 = vpop.f32.mrf.mxu1  ;;  %v5818_v38 = vpop.f32.mrf.mxu0 }
0x18e4   :  { %v5748_v11 = vadd.f32 %v5747_v53, %v5664_v56  ;;  %v5819_v49 = vadd.f32 %v5818_v38, %v5672_v10 }
0x18e5   :  { %v5749_v24 = vpop.f32.mrf.mxu1  ;;  %v5820_v33 = vpop.f32.mrf.mxu0 }
0x18e6   :  { %5823 = vst [vmem:[#allocation11 + $0xa0] sm:$0xff] %v5748_v11  ;;  %5825 = vst [vmem:[#allocation11 + $0xb0] sm:$0xff] %v5819_v49  ;;  %v5750_v23 = vadd.f32 %v5749_v24, %v5668_v1  ;;  %v5821_v30 = vadd.f32 %v5820_v33, %v5676_v47 }
0x18e8   :  { %5824 = vst [vmem:[#allocation11 + $0xa8] sm:$0xff] %v5750_v23  ;;  %5826 = vst [vmem:[#allocation11 + $0xb8] sm:$0xff] %v5821_v30 }
0x1925   :  { %v6043_v26 = vpop.f32.mrf.mxu1  ;;  %v6114_v15 = vpop.f32.mrf.mxu0 }
0x1926   :  { %v6044_v8 = vadd.f32 %v6043_v26, %v5960_v14  ;;  %v6115_v25 = vadd.f32 %v6114_v15, %v5968_v39 }
0x1927   :  { %v6045_v50 = vpop.f32.mrf.mxu1  ;;  %v6116_v6 = vpop.f32.mrf.mxu0 }
0x1928   :  { %6119 = vst [vmem:[#allocation11 + $0xc0] sm:$0xff] %v6044_v8  ;;  %6121 = vst [vmem:[#allocation11 + $0xd0] sm:$0xff] %v6115_v25  ;;  %v6046_v36 = vadd.f32 %v6045_v50, %v5964_v5  ;;  %v6117_v62 = vadd.f32 %v6116_v6, %v5972_v63 }
0x192a   :  { %6120 = vst [vmem:[#allocation11 + $0xc8] sm:$0xff] %v6046_v36  ;;  %6122 = vst [vmem:[#allocation11 + $0xd8] sm:$0xff] %v6117_v62 }
0x1967   :  { %v6339_v32 = vpop.f32.mrf.mxu1  ;;  %v6410_v60 = vpop.f32.mrf.mxu0 }
0x1968   :  { %v6340_v13 = vadd.f32 %v6339_v32, %v6256_v57  ;;  %v6411_v31 = vadd.f32 %v6410_v60, %v6264_v16 }
0x1969   :  { %v6341_v19 = vpop.f32.mrf.mxu1  ;;  %v6412_v42 = vpop.f32.mrf.mxu0 }
0x196a   :  { %6415 = vst [vmem:[#allocation11 + $0xe0] sm:$0xff] %v6340_v13  ;;  %6417 = vst [vmem:[#allocation11 + $0xf0] sm:$0xff] %v6411_v31  ;;  %v6342_v21 = vadd.f32 %v6341_v19, %v6260_v20  ;;  %v6413_v4 = vadd.f32 %v6412_v42, %v6268_v46 }
0x196c   :  { %6416 = vst [vmem:[#allocation11 + $0xe8] sm:$0xff] %v6342_v21  ;;  %6418 = vst [vmem:[#allocation11 + $0xf8] sm:$0xff] %v6413_v4 }
0x196d   :  { %6791 = shalt.err (!%p6788_p1)
}
0x196e   :  { %6430 = dma.vmem_to_hbm [thread:$0]  %s6425_s10, 4096, %s8194_s6, [#allocation4], %s6812_s7, %s6812_s7, %s6813_s8  }
0x196f   :  { %6806 = dma.done.wait [#allocation4], 4096  }
0x1970   :  { %6807 = vsyncadd [#allocation4], 4294963200 }
0x1971   :  { %6434 = vsyncpa [#allocation3], 1 }
0x1972   :  { %6435 = vsyncpa [#allocation6], 1 }
0x1973   :  { %6436 = vsyncpa [#allocation9], 1 }
0x1974   :  { %6437 = vsyncpa [#allocation4], 1 }

</bundles_post_ra>
